<compile_context>
chip_gen: v5e
topology: v5e:2x2
jax: 0.10.0
libtpu: 0.0.40
codegen_flags: <defaults>
</compile_context>

<pallas_src>
import functools
import math

import numpy as np
import jax
import jax.numpy as jnp
from jax.experimental import pallas as pl
from jax.experimental.pallas import tpu as pltpu

HIGHEST = jax.lax.Precision.HIGHEST


def _mm(a, b):
    # TODO(synk): bf16 operands (f32 accum) would be 3-6x faster on v6e/v7x MXUs, but
    # dense-DFT rounding then risks exceeding the 1e-3 error budget; kept f32 HIGHEST.
    return jnp.dot(a, b, preferred_element_type=jnp.float32, precision=HIGHEST)


def _build_constants(H, W):
    """Trace-time (numpy) constants: Kronecker 2-D DFT matrices, 3x3 tap shifts and
    their validity masks (tiled x2 for the [Re | Im] lane concatenation)."""
    idx_h = np.arange(H)
    idx_w = np.arange(W)
    fh = np.exp(-2j * np.pi * np.outer(idx_h, idx_h) / H)
    fw = np.exp(-2j * np.pi * np.outer(idx_w, idx_w) / W)
    f2 = np.kron(fh, fw)                                  # (HW, HW), symmetric
    f2r = np.real(f2).astype(np.float32)
    f2i = np.imag(f2).astype(np.float32)
    f2_cat = np.concatenate([f2r, f2i], axis=1)           # (HW, 2HW): x @ [F2r | F2i]
    f2_stk = np.concatenate([f2r, f2i], axis=0)           # (2HW, HW): [cr|ci] @ [F2r; F2i]

    HW = H * W
    taps = []
    masks = np.zeros((9, HW), np.float32)
    t = 0
    for dh in (-1, 0, 1):
        for dw in (-1, 0, 1):
            taps.append(dh * W + dw)
            m = np.zeros((H, W), np.float32)
            m[max(0, -dh):min(H, H - dh), max(0, -dw):min(W, W - dw)] = 1.0
            masks[t] = m.reshape(-1)
            t += 1
    masks2 = np.concatenate([masks, masks], axis=1)       # (9, 2HW)
    return f2_cat, f2_stk, tuple(taps), masks2


# --------------------------- Pallas kernels ---------------------------

def _fused_kernel(x_ref, f2cat_ref, f2stk_ref, mask_ref, w_ref, b_ref,
                  y_ref, e_ref, *, taps, inv_hw):
    """Per batch element: fft2 -> 3x3 SAME conv (shared weights on Re/Im) ->
    partial energy sum -> ifft2 real part (unscaled).  HW = H*W.

      x_ref:     (1, Cin, HW)   real input, spatial dims flattened row-major
      f2cat_ref: (HW, 2*HW)     [Re(F2) | Im(F2)]
      f2stk_ref: (2*HW, HW)     [Re(F2) ; Im(F2)]  (conjugation folded into signs)
      mask_ref:  (9, 2*HW)      per-tap validity masks (tiled for [Re|Im])
      w_ref:     (9, Cout, Cin) conv taps, t = kh*3 + kw
      b_ref:     (Cout, 1)      conv bias
      y_ref:     (1, Cout, HW)  Re(ifft2(conv(fft2 x)))  (unscaled)
      e_ref:     (1, 1, 1)      sum of |conv(fft2 x)|^2 for this batch element
    """
    x = x_ref[0]                                   # (Cin, HW)
    yri = _mm(x, f2cat_ref[...])                   # (Cin, 2*HW) = [Re fft2 | Im fft2]
    masks = mask_ref[...]                          # (9, 2*HW)
    n2 = yri.shape[-1]

    # 3x3 SAME conv as 9 shifted accumulating matmuls, entirely in VMEM.
    # Tap (dh, dw): out(h, w) += w_t @ y(h+dh, w+dw).  In the flattened layout that is
    # a static circular lane shift by s = dh*W + dw followed by a zero mask; every
    # wrapped / cross-half read corresponds to an out-of-bounds position and is masked.
    acc = None
    for t, s in enumerate(taps):
        sm = s % n2
        if sm == 0:
            z = yri                                # center tap: mask is all ones
        else:
            z = jnp.concatenate([yri[:, sm:], yri[:, :sm]], axis=1)
            z = z * masks[t:t + 1, :]
        term = _mm(w_ref[t], z)                    # (Cout, 2*HW)
        acc = term if acc is None else acc + term
    c = acc + b_ref[...]                           # (Cout, 2*HW) = [conv Re | conv Im]

    # partial energy (sum of squared magnitudes = Re^2 + Im^2) for this batch element
    sq = c * c
    e_ref[0] = jnp.sum(jnp.sum(sq, axis=1, keepdims=True), axis=0, keepdims=True)

    # ifft2(.).real:  Re[(cr + i*ci) @ conj(F2)] / HW = (cr @ F2r + ci @ F2i) / HW
    y_ref[0] = _mm(c, f2stk_ref[...]) * inv_hw     # (Cout, HW)


def _scale_kernel(e_ref, y_ref, o_ref, *, inv_n):
    # e_ref: (B, 1, 1) per-batch partial energy sums; y/o: (1, Cout, HW)
    total = jnp.sum(e_ref[...])
    scale = jax.lax.rsqrt(total * inv_n + 1e-8)
    o_ref[...] = y_ref[...] * scale


# --------------------------- wrapper ---------------------------

def fourier_block_forward(x, weight, bias, enforce_conservation=True):
    B, Cin, H, W = x.shape
    Cout = weight.shape[0]
    HW = H * W
    # TODO(synk): for H*W not a multiple of 128 the DFT matmuls stay correct but the
    # lane layout is no longer dense; pad HW to 128 in that case.

    f2_cat_np, f2_stk_np, taps, masks_np = _build_constants(H, W)
    f2_cat = jnp.asarray(f2_cat_np)                # (HW, 2HW)
    f2_stk = jnp.asarray(f2_stk_np)                # (2HW, HW)
    masks = jnp.asarray(masks_np)                  # (9, 2HW)

    x_flat = x.reshape(B, Cin, HW).astype(jnp.float32)
    # w_taps[t, co, ci] = weight[co, ci, kh, kw], t = kh*3 + kw (matches `taps` order)
    w_taps = jnp.transpose(weight, (2, 3, 0, 1)).reshape(9, Cout, Cin).astype(jnp.float32)
    b_col = bias.reshape(Cout, 1).astype(jnp.float32)

    fused = functools.partial(_fused_kernel, taps=taps, inv_hw=1.0 / float(HW))
    y_unscaled, esum = pl.pallas_call(
        fused,
        out_shape=(jax.ShapeDtypeStruct((B, Cout, HW), jnp.float32),
                   jax.ShapeDtypeStruct((B, 1, 1), jnp.float32)),
        grid=(B,),
        in_specs=[
            pl.BlockSpec((1, Cin, HW), lambda b: (b, 0, 0)),
            pl.BlockSpec((HW, 2 * HW), lambda b: (0, 0)),
            pl.BlockSpec((2 * HW, HW), lambda b: (0, 0)),
            pl.BlockSpec((9, 2 * HW), lambda b: (0, 0)),
            pl.BlockSpec((9, Cout, Cin), lambda b: (0, 0, 0)),
            pl.BlockSpec((Cout, 1), lambda b: (0, 0)),
        ],
        out_specs=(
            pl.BlockSpec((1, Cout, HW), lambda b: (b, 0, 0)),
            pl.BlockSpec((1, 1, 1), lambda b: (b, 0, 0)),
        ),
        compiler_params=pltpu.CompilerParams(dimension_semantics=("parallel",)),
    )(x_flat, f2_cat, f2_stk, masks, w_taps, b_col)

    if not enforce_conservation:
        return y_unscaled.reshape(B, Cout, H, W)

    inv_n = 1.0 / float(B * Cout * HW)
    out = pl.pallas_call(
        functools.partial(_scale_kernel, inv_n=inv_n),
        out_shape=jax.ShapeDtypeStruct((B, Cout, HW), jnp.float32),
        grid=(B,),
        in_specs=[
            pl.BlockSpec((B, 1, 1), lambda b: (0, 0, 0)),
            pl.BlockSpec((1, Cout, HW), lambda b: (b, 0, 0)),
        ],
        out_specs=pl.BlockSpec((1, Cout, HW), lambda b: (b, 0, 0)),
        compiler_params=pltpu.CompilerParams(dimension_semantics=("parallel",)),
    )(esum, y_unscaled)

    return out.reshape(B, Cout, H, W)


# --------------------------- pure-JAX reference ---------------------------

def fourier_block_ref(x, weight, bias, enforce=True):
    x_fft = jnp.fft.fft2(x)

    def conv(z):
        return jax.lax.conv_general_dilated(
            z, weight, window_strides=(1, 1), padding="SAME",
            dimension_numbers=("NCHW", "OIHW", "NCHW"),
            precision=HIGHEST) + bias[None, :, None, None]

    y = conv(x_fft.real) + 1j * conv(x_fft.imag)
    if enforce:
        energy = jnp.mean(jnp.abs(y) ** 2)
        y = y / jnp.sqrt(energy + 1e-8)
    return jnp.fft.ifft2(y).real


if __name__ == "__main__":
    key = jax.random.PRNGKey(0)
    kx, kw_key, kb_key = jax.random.split(key, 3)

    B, Cin, Cout, H, W = 2, 4, 4, 16, 16
    x = jax.random.normal(kx, (B, Cin, H, W), jnp.float32)

    # deterministic Conv2d-like init (uniform in [-1/sqrt(fan_in), 1/sqrt(fan_in)])
    bound = 1.0 / math.sqrt(Cin * 3 * 3)
    weight = jax.random.uniform(kw_key, (Cout, Cin, 3, 3), jnp.float32, -bound, bound)
    bias = jax.random.uniform(kb_key, (Cout,), jnp.float32, -bound, bound)

    out = fourier_block_forward(x, weight, bias, enforce_conservation=True)
    out = jax.block_until_ready(out)

    ref = fourier_block_ref(x, weight, bias, True)
    err = float(jnp.max(jnp.abs(out - ref)))
    assert out.shape == (B, Cout, H, W), out.shape
    assert err < 1e-3, f"max abs err {err}"

    print("KERNEL_OK")
</pallas_src>

<mosaic_0001>
module attributes {stable_mosaic.version = 11 : i64} {
  func.func @_fused_kernel(%arg0: i32, %arg1: memref<1x4x256xf32, #tpu.memory_space<vmem>>, %arg2: memref<256x512xf32, #tpu.memory_space<vmem>>, %arg3: memref<512x256xf32, #tpu.memory_space<vmem>>, %arg4: memref<9x512xf32, #tpu.memory_space<vmem>>, %arg5: memref<9x4x4xf32, #tpu.memory_space<vmem>>, %arg6: memref<4x1xf32, #tpu.memory_space<vmem>>, %arg7: memref<1x4x256xf32, #tpu.memory_space<vmem>>, %arg8: memref<1x1x1xf32, #tpu.memory_space<vmem>>) attributes {dimension_semantics = [#tpu.dimension_semantics<parallel>], iteration_bounds = array<i64: 2>, scalar_prefetch = 0 : i64, scratch_operands = 0 : i64, tpu.core_type = #tpu.core_type<tc>, window_params = [{transform_indices = @transform_0, window_bounds = array<i64: 1, 4, 256>}, {pipeline_mode = #tpu.pipeline_mode<synchronous>, transform_indices = @transform_1, window_bounds = array<i64: 256, 512>}, {pipeline_mode = #tpu.pipeline_mode<synchronous>, transform_indices = @transform_2, window_bounds = array<i64: 512, 256>}, {pipeline_mode = #tpu.pipeline_mode<synchronous>, transform_indices = @transform_3, window_bounds = array<i64: 9, 512>}, {pipeline_mode = #tpu.pipeline_mode<synchronous>, transform_indices = @transform_4, window_bounds = array<i64: 9, 4, 4>}, {pipeline_mode = #tpu.pipeline_mode<synchronous>, transform_indices = @transform_5, window_bounds = array<i64: 4, 1>}, {transform_indices = @transform_6, window_bounds = array<i64: 1, 4, 256>}, {transform_indices = @transform_7, window_bounds = array<i64: 1, 1, 1>}]} {
    %c0 = arith.constant 0 : index
    %c0_0 = arith.constant 0 : index
    %c0_1 = arith.constant 0 : index
    %0 = vector.load %arg1[%c0, %c0_0, %c0_1] : memref<1x4x256xf32, #tpu.memory_space<vmem>>, vector<1x4x256xf32>
    %1 = vector.shape_cast %0 : vector<1x4x256xf32> to vector<4x256xf32>
    %c0_2 = arith.constant 0 : index
    %c0_3 = arith.constant 0 : index
    %2 = vector.load %arg2[%c0_2, %c0_3] : memref<256x512xf32, #tpu.memory_space<vmem>>, vector<256x512xf32>
    %cst = arith.constant dense<0.000000e+00> : vector<4x512xf32>
    %3 = tpu.matmul %1, %2, %cst {dimension_numbers = #tpu.dot_dimension_numbers<[1], [0], [0], [1], [0, 0, 1, 1], [], []>, precision = #tpu.contract_precision<fp32>} : vector<4x256xf32>, vector<256x512xf32>, vector<4x512xf32> -> vector<4x512xf32>
    %c0_4 = arith.constant 0 : index
    %c0_5 = arith.constant 0 : index
    %4 = vector.load %arg4[%c0_4, %c0_5] : memref<9x512xf32, #tpu.memory_space<vmem>>, vector<9x512xf32>
    %5 = vector.extract_strided_slice %3 {offsets = [0, 495], sizes = [4, 17], strides = [1, 1]} : vector<4x512xf32> to vector<4x17xf32>
    %6 = vector.extract_strided_slice %3 {offsets = [0, 0], sizes = [4, 495], strides = [1, 1]} : vector<4x512xf32> to vector<4x495xf32>
    %7 = tpu.concatenate %5, %6 in 1 : vector<4x17xf32>, vector<4x495xf32> -> vector<4x512xf32>
    %8 = vector.extract_strided_slice %4 {offsets = [0, 0], sizes = [1, 512], strides = [1, 1]} : vector<9x512xf32> to vector<1x512xf32>
    %9 = vector.broadcast %8 : vector<1x512xf32> to vector<4x512xf32>
    %10 = arith.mulf %7, %9 : vector<4x512xf32>
    %c0_6 = arith.constant 0 : index
    %c0_7 = arith.constant 0 : index
    %c0_8 = arith.constant 0 : index
    %11 = vector.load %arg5[%c0_6, %c0_7, %c0_8] : memref<9x4x4xf32, #tpu.memory_space<vmem>>, vector<1x4x4xf32>
    %12 = vector.shape_cast %11 : vector<1x4x4xf32> to vector<4x4xf32>
    %cst_9 = arith.constant dense<0.000000e+00> : vector<4x512xf32>
    %13 = tpu.matmul %12, %10, %cst_9 {dimension_numbers = #tpu.dot_dimension_numbers<[1], [0], [0], [1], [0, 0, 1, 1], [], []>, precision = #tpu.contract_precision<fp32>} : vector<4x4xf32>, vector<4x512xf32>, vector<4x512xf32> -> vector<4x512xf32>
    %14 = vector.extract_strided_slice %3 {offsets = [0, 496], sizes = [4, 16], strides = [1, 1]} : vector<4x512xf32> to vector<4x16xf32>
    %15 = vector.extract_strided_slice %3 {offsets = [0, 0], sizes = [4, 496], strides = [1, 1]} : vector<4x512xf32> to vector<4x496xf32>
    %16 = tpu.concatenate %14, %15 in 1 : vector<4x16xf32>, vector<4x496xf32> -> vector<4x512xf32>
    %17 = vector.extract_strided_slice %4 {offsets = [1, 0], sizes = [1, 512], strides = [1, 1]} : vector<9x512xf32> to vector<1x512xf32>
    %18 = vector.broadcast %17 : vector<1x512xf32> to vector<4x512xf32>
    %19 = arith.mulf %16, %18 : vector<4x512xf32>
    %c1 = arith.constant 1 : index
    %c0_10 = arith.constant 0 : index
    %c0_11 = arith.constant 0 : index
    %20 = vector.load %arg5[%c1, %c0_10, %c0_11] : memref<9x4x4xf32, #tpu.memory_space<vmem>>, vector<1x4x4xf32>
    %21 = vector.shape_cast %20 : vector<1x4x4xf32> to vector<4x4xf32>
    %cst_12 = arith.constant dense<0.000000e+00> : vector<4x512xf32>
    %22 = tpu.matmul %21, %19, %cst_12 {dimension_numbers = #tpu.dot_dimension_numbers<[1], [0], [0], [1], [0, 0, 1, 1], [], []>, precision = #tpu.contract_precision<fp32>} : vector<4x4xf32>, vector<4x512xf32>, vector<4x512xf32> -> vector<4x512xf32>
    %23 = arith.addf %13, %22 : vector<4x512xf32>
    %24 = vector.extract_strided_slice %3 {offsets = [0, 497], sizes = [4, 15], strides = [1, 1]} : vector<4x512xf32> to vector<4x15xf32>
    %25 = vector.extract_strided_slice %3 {offsets = [0, 0], sizes = [4, 497], strides = [1, 1]} : vector<4x512xf32> to vector<4x497xf32>
    %26 = tpu.concatenate %24, %25 in 1 : vector<4x15xf32>, vector<4x497xf32> -> vector<4x512xf32>
    %27 = vector.extract_strided_slice %4 {offsets = [2, 0], sizes = [1, 512], strides = [1, 1]} : vector<9x512xf32> to vector<1x512xf32>
    %28 = vector.broadcast %27 : vector<1x512xf32> to vector<4x512xf32>
    %29 = arith.mulf %26, %28 : vector<4x512xf32>
    %c2 = arith.constant 2 : index
    %c0_13 = arith.constant 0 : index
    %c0_14 = arith.constant 0 : index
    %30 = vector.load %arg5[%c2, %c0_13, %c0_14] : memref<9x4x4xf32, #tpu.memory_space<vmem>>, vector<1x4x4xf32>
    %31 = vector.shape_cast %30 : vector<1x4x4xf32> to vector<4x4xf32>
    %cst_15 = arith.constant dense<0.000000e+00> : vector<4x512xf32>
    %32 = tpu.matmul %31, %29, %cst_15 {dimension_numbers = #tpu.dot_dimension_numbers<[1], [0], [0], [1], [0, 0, 1, 1], [], []>, precision = #tpu.contract_precision<fp32>} : vector<4x4xf32>, vector<4x512xf32>, vector<4x512xf32> -> vector<4x512xf32>
    %33 = arith.addf %23, %32 : vector<4x512xf32>
    %34 = vector.extract_strided_slice %3 {offsets = [0, 511], sizes = [4, 1], strides = [1, 1]} : vector<4x512xf32> to vector<4x1xf32>
    %35 = vector.extract_strided_slice %3 {offsets = [0, 0], sizes = [4, 511], strides = [1, 1]} : vector<4x512xf32> to vector<4x511xf32>
    %36 = tpu.concatenate %34, %35 in 1 : vector<4x1xf32>, vector<4x511xf32> -> vector<4x512xf32>
    %37 = vector.extract_strided_slice %4 {offsets = [3, 0], sizes = [1, 512], strides = [1, 1]} : vector<9x512xf32> to vector<1x512xf32>
    %38 = vector.broadcast %37 : vector<1x512xf32> to vector<4x512xf32>
    %39 = arith.mulf %36, %38 : vector<4x512xf32>
    %c3 = arith.constant 3 : index
    %c0_16 = arith.constant 0 : index
    %c0_17 = arith.constant 0 : index
    %40 = vector.load %arg5[%c3, %c0_16, %c0_17] : memref<9x4x4xf32, #tpu.memory_space<vmem>>, vector<1x4x4xf32>
    %41 = vector.shape_cast %40 : vector<1x4x4xf32> to vector<4x4xf32>
    %cst_18 = arith.constant dense<0.000000e+00> : vector<4x512xf32>
    %42 = tpu.matmul %41, %39, %cst_18 {dimension_numbers = #tpu.dot_dimension_numbers<[1], [0], [0], [1], [0, 0, 1, 1], [], []>, precision = #tpu.contract_precision<fp32>} : vector<4x4xf32>, vector<4x512xf32>, vector<4x512xf32> -> vector<4x512xf32>
    %43 = arith.addf %33, %42 : vector<4x512xf32>
    %c4 = arith.constant 4 : index
    %c0_19 = arith.constant 0 : index
    %c0_20 = arith.constant 0 : index
    %44 = vector.load %arg5[%c4, %c0_19, %c0_20] : memref<9x4x4xf32, #tpu.memory_space<vmem>>, vector<1x4x4xf32>
    %45 = vector.shape_cast %44 : vector<1x4x4xf32> to vector<4x4xf32>
    %cst_21 = arith.constant dense<0.000000e+00> : vector<4x512xf32>
    %46 = tpu.matmul %45, %3, %cst_21 {dimension_numbers = #tpu.dot_dimension_numbers<[1], [0], [0], [1], [0, 0, 1, 1], [], []>, precision = #tpu.contract_precision<fp32>} : vector<4x4xf32>, vector<4x512xf32>, vector<4x512xf32> -> vector<4x512xf32>
    %47 = arith.addf %43, %46 : vector<4x512xf32>
    %48 = vector.extract_strided_slice %3 {offsets = [0, 1], sizes = [4, 511], strides = [1, 1]} : vector<4x512xf32> to vector<4x511xf32>
    %49 = vector.extract_strided_slice %3 {offsets = [0, 0], sizes = [4, 1], strides = [1, 1]} : vector<4x512xf32> to vector<4x1xf32>
    %50 = tpu.concatenate %48, %49 in 1 : vector<4x511xf32>, vector<4x1xf32> -> vector<4x512xf32>
    %51 = vector.extract_strided_slice %4 {offsets = [5, 0], sizes = [1, 512], strides = [1, 1]} : vector<9x512xf32> to vector<1x512xf32>
    %52 = vector.broadcast %51 : vector<1x512xf32> to vector<4x512xf32>
    %53 = arith.mulf %50, %52 : vector<4x512xf32>
    %c5 = arith.constant 5 : index
    %c0_22 = arith.constant 0 : index
    %c0_23 = arith.constant 0 : index
    %54 = vector.load %arg5[%c5, %c0_22, %c0_23] : memref<9x4x4xf32, #tpu.memory_space<vmem>>, vector<1x4x4xf32>
    %55 = vector.shape_cast %54 : vector<1x4x4xf32> to vector<4x4xf32>
    %cst_24 = arith.constant dense<0.000000e+00> : vector<4x512xf32>
    %56 = tpu.matmul %55, %53, %cst_24 {dimension_numbers = #tpu.dot_dimension_numbers<[1], [0], [0], [1], [0, 0, 1, 1], [], []>, precision = #tpu.contract_precision<fp32>} : vector<4x4xf32>, vector<4x512xf32>, vector<4x512xf32> -> vector<4x512xf32>
    %57 = arith.addf %47, %56 : vector<4x512xf32>
    %58 = vector.extract_strided_slice %3 {offsets = [0, 15], sizes = [4, 497], strides = [1, 1]} : vector<4x512xf32> to vector<4x497xf32>
    %59 = vector.extract_strided_slice %3 {offsets = [0, 0], sizes = [4, 15], strides = [1, 1]} : vector<4x512xf32> to vector<4x15xf32>
    %60 = tpu.concatenate %58, %59 in 1 : vector<4x497xf32>, vector<4x15xf32> -> vector<4x512xf32>
    %61 = vector.extract_strided_slice %4 {offsets = [6, 0], sizes = [1, 512], strides = [1, 1]} : vector<9x512xf32> to vector<1x512xf32>
    %62 = vector.broadcast %61 : vector<1x512xf32> to vector<4x512xf32>
    %63 = arith.mulf %60, %62 : vector<4x512xf32>
    %c6 = arith.constant 6 : index
    %c0_25 = arith.constant 0 : index
    %c0_26 = arith.constant 0 : index
    %64 = vector.load %arg5[%c6, %c0_25, %c0_26] : memref<9x4x4xf32, #tpu.memory_space<vmem>>, vector<1x4x4xf32>
    %65 = vector.shape_cast %64 : vector<1x4x4xf32> to vector<4x4xf32>
    %cst_27 = arith.constant dense<0.000000e+00> : vector<4x512xf32>
    %66 = tpu.matmul %65, %63, %cst_27 {dimension_numbers = #tpu.dot_dimension_numbers<[1], [0], [0], [1], [0, 0, 1, 1], [], []>, precision = #tpu.contract_precision<fp32>} : vector<4x4xf32>, vector<4x512xf32>, vector<4x512xf32> -> vector<4x512xf32>
    %67 = arith.addf %57, %66 : vector<4x512xf32>
    %68 = vector.extract_strided_slice %3 {offsets = [0, 16], sizes = [4, 496], strides = [1, 1]} : vector<4x512xf32> to vector<4x496xf32>
    %69 = vector.extract_strided_slice %3 {offsets = [0, 0], sizes = [4, 16], strides = [1, 1]} : vector<4x512xf32> to vector<4x16xf32>
    %70 = tpu.concatenate %68, %69 in 1 : vector<4x496xf32>, vector<4x16xf32> -> vector<4x512xf32>
    %71 = vector.extract_strided_slice %4 {offsets = [7, 0], sizes = [1, 512], strides = [1, 1]} : vector<9x512xf32> to vector<1x512xf32>
    %72 = vector.broadcast %71 : vector<1x512xf32> to vector<4x512xf32>
    %73 = arith.mulf %70, %72 : vector<4x512xf32>
    %c7 = arith.constant 7 : index
    %c0_28 = arith.constant 0 : index
    %c0_29 = arith.constant 0 : index
    %74 = vector.load %arg5[%c7, %c0_28, %c0_29] : memref<9x4x4xf32, #tpu.memory_space<vmem>>, vector<1x4x4xf32>
    %75 = vector.shape_cast %74 : vector<1x4x4xf32> to vector<4x4xf32>
    %cst_30 = arith.constant dense<0.000000e+00> : vector<4x512xf32>
    %76 = tpu.matmul %75, %73, %cst_30 {dimension_numbers = #tpu.dot_dimension_numbers<[1], [0], [0], [1], [0, 0, 1, 1], [], []>, precision = #tpu.contract_precision<fp32>} : vector<4x4xf32>, vector<4x512xf32>, vector<4x512xf32> -> vector<4x512xf32>
    %77 = arith.addf %67, %76 : vector<4x512xf32>
    %78 = vector.extract_strided_slice %3 {offsets = [0, 17], sizes = [4, 495], strides = [1, 1]} : vector<4x512xf32> to vector<4x495xf32>
    %79 = vector.extract_strided_slice %3 {offsets = [0, 0], sizes = [4, 17], strides = [1, 1]} : vector<4x512xf32> to vector<4x17xf32>
    %80 = tpu.concatenate %78, %79 in 1 : vector<4x495xf32>, vector<4x17xf32> -> vector<4x512xf32>
    %81 = vector.extract_strided_slice %4 {offsets = [8, 0], sizes = [1, 512], strides = [1, 1]} : vector<9x512xf32> to vector<1x512xf32>
    %82 = vector.broadcast %81 : vector<1x512xf32> to vector<4x512xf32>
    %83 = arith.mulf %80, %82 : vector<4x512xf32>
    %c8 = arith.constant 8 : index
    %c0_31 = arith.constant 0 : index
    %c0_32 = arith.constant 0 : index
    %84 = vector.load %arg5[%c8, %c0_31, %c0_32] : memref<9x4x4xf32, #tpu.memory_space<vmem>>, vector<1x4x4xf32>
    %85 = vector.shape_cast %84 : vector<1x4x4xf32> to vector<4x4xf32>
    %cst_33 = arith.constant dense<0.000000e+00> : vector<4x512xf32>
    %86 = tpu.matmul %85, %83, %cst_33 {dimension_numbers = #tpu.dot_dimension_numbers<[1], [0], [0], [1], [0, 0, 1, 1], [], []>, precision = #tpu.contract_precision<fp32>} : vector<4x4xf32>, vector<4x512xf32>, vector<4x512xf32> -> vector<4x512xf32>
    %87 = arith.addf %77, %86 : vector<4x512xf32>
    %c0_34 = arith.constant 0 : index
    %c0_35 = arith.constant 0 : index
    %88 = vector.load %arg6[%c0_34, %c0_35] : memref<4x1xf32, #tpu.memory_space<vmem>>, vector<4x1xf32>
    %89 = vector.broadcast %88 : vector<4x1xf32> to vector<4x512xf32>
    %90 = arith.addf %87, %89 : vector<4x512xf32>
    %91 = arith.mulf %90, %90 : vector<4x512xf32>
    %cst_36 = arith.constant dense<0.000000e+00> : vector<4xf32>
    %92 = vector.multi_reduction <add>, %91, %cst_36 [1] : vector<4x512xf32> to vector<4xf32>
    %93 = vector.shape_cast %92 : vector<4xf32> to vector<4x1xf32>
    %cst_37 = arith.constant dense<0.000000e+00> : vector<1xf32>
    %94 = vector.multi_reduction <add>, %93, %cst_37 [0] : vector<4x1xf32> to vector<1xf32>
    %95 = vector.shape_cast %94 : vector<1xf32> to vector<1x1xf32>
    %c0_38 = arith.constant 0 : index
    %c0_39 = arith.constant 0 : index
    %c0_40 = arith.constant 0 : index
    %96 = vector.load %arg8[%c0_38, %c0_39, %c0_40] : memref<1x1x1xf32, #tpu.memory_space<vmem>>, vector<1x1x1xf32>
    %97 = vector.shape_cast %96 : vector<1x1x1xf32> to vector<1x1xf32>
    %98 = vector.shape_cast %95 : vector<1x1xf32> to vector<1x1x1xf32>
    tpu.vector_store %arg8[%c0_38, %c0_39, %c0_40], %98 {strides = array<i32>} : memref<1x1x1xf32, #tpu.memory_space<vmem>>, vector<1x1x1xf32>,
    %c0_41 = arith.constant 0 : index
    %c0_42 = arith.constant 0 : index
    %99 = vector.load %arg3[%c0_41, %c0_42] : memref<512x256xf32, #tpu.memory_space<vmem>>, vector<512x256xf32>
    %cst_43 = arith.constant dense<0.000000e+00> : vector<4x256xf32>
    %100 = tpu.matmul %90, %99, %cst_43 {dimension_numbers = #tpu.dot_dimension_numbers<[1], [0], [0], [1], [0, 0, 1, 1], [], []>, precision = #tpu.contract_precision<fp32>} : vector<4x512xf32>, vector<512x256xf32>, vector<4x256xf32> -> vector<4x256xf32>
    %cst_44 = arith.constant 3.906250e-03 : f32
    %101 = vector.broadcast %cst_44 : f32 to vector<4x256xf32>
    %102 = arith.mulf %100, %101 : vector<4x256xf32>
    %c0_45 = arith.constant 0 : index
    %c0_46 = arith.constant 0 : index
    %c0_47 = arith.constant 0 : index
    %103 = vector.load %arg7[%c0_45, %c0_46, %c0_47] : memref<1x4x256xf32, #tpu.memory_space<vmem>>, vector<1x4x256xf32>
    %104 = vector.shape_cast %103 : vector<1x4x256xf32> to vector<4x256xf32>
    %105 = vector.shape_cast %102 : vector<4x256xf32> to vector<1x4x256xf32>
    tpu.vector_store %arg7[%c0_45, %c0_46, %c0_47], %105 {strides = array<i32>} : memref<1x4x256xf32, #tpu.memory_space<vmem>>, vector<1x4x256xf32>,
    return
  }
  func.func @transform_0(%arg0: i32) -> (i32, i32, i32) {
    %c0_i32 = arith.constant 0 : i32
    %c0_i32_0 = arith.constant 0 : i32
    %c0_i32_1 = arith.constant 0 : i32
    return %arg0, %c0_i32, %c0_i32_0 : i32, i32, i32
  }
  func.func @transform_1(%arg0: i32) -> (i32, i32) {
    %c0_i32 = arith.constant 0 : i32
    %c0_i32_0 = arith.constant 0 : i32
    %c0_i32_1 = arith.constant 0 : i32
    return %c0_i32, %c0_i32_0 : i32, i32
  }
  func.func @transform_2(%arg0: i32) -> (i32, i32) {
    %c0_i32 = arith.constant 0 : i32
    %c0_i32_0 = arith.constant 0 : i32
    %c0_i32_1 = arith.constant 0 : i32
    return %c0_i32, %c0_i32_0 : i32, i32
  }
  func.func @transform_3(%arg0: i32) -> (i32, i32) {
    %c0_i32 = arith.constant 0 : i32
    %c0_i32_0 = arith.constant 0 : i32
    %c0_i32_1 = arith.constant 0 : i32
    return %c0_i32, %c0_i32_0 : i32, i32
  }
  func.func @transform_4(%arg0: i32) -> (i32, i32, i32) {
    %c0_i32 = arith.constant 0 : i32
    %c0_i32_0 = arith.constant 0 : i32
    %c0_i32_1 = arith.constant 0 : i32
    %c0_i32_2 = arith.constant 0 : i32
    return %c0_i32, %c0_i32_0, %c0_i32_1 : i32, i32, i32
  }
  func.func @transform_5(%arg0: i32) -> (i32, i32) {
    %c0_i32 = arith.constant 0 : i32
    %c0_i32_0 = arith.constant 0 : i32
    %c0_i32_1 = arith.constant 0 : i32
    return %c0_i32, %c0_i32_0 : i32, i32
  }
  func.func @transform_6(%arg0: i32) -> (i32, i32, i32) {
    %c0_i32 = arith.constant 0 : i32
    %c0_i32_0 = arith.constant 0 : i32
    %c0_i32_1 = arith.constant 0 : i32
    return %arg0, %c0_i32, %c0_i32_0 : i32, i32, i32
  }
  func.func @transform_7(%arg0: i32) -> (i32, i32, i32) {
    %c0_i32 = arith.constant 0 : i32
    %c0_i32_0 = arith.constant 0 : i32
    %c0_i32_1 = arith.constant 0 : i32
    return %arg0, %c0_i32, %c0_i32_0 : i32, i32, i32
  }
}

</mosaic_0001>

<bundles_post_ra>
// kernel: tpu_custom_call.1
= control target key start
LH: loop header
LB: loop body
LE: loop exit
PB: predicated region body
PF: predicated region fallthrough
CT: control target
= control target key end

     0   :  { %s17469_s0 = inlined_call_operand.vmem [shape: f32[2,4,256], index: 0, kind: input, shape index: {}]   ;;  %s17470_s1 = inlined_call_operand.hbm [shape: f32[256,512], index: 1, kind: input, shape index: {}]   ;;  %s17471_s2 = inlined_call_operand.hbm [shape: f32[512,256], index: 2, kind: input, shape index: {}]   ;;  %s17472_s3 = inlined_call_operand.hbm [shape: f32[9,512], index: 3, kind: input, shape index: {}]   ;;  %s17473_s4 = inlined_call_operand.vmem [shape: f32[9,4,4], index: 4, kind: input, shape index: {}]   ;;  %s17474_s5 = inlined_call_operand.vmem [shape: f32[4,1], index: 5, kind: input, shape index: {}]   ;;  %s17475_s6 = inlined_call_operand.hbm [shape: f32[2,4,256], index: 6, kind: output, shape index: {0}]   ;;  %s17476_s7 = inlined_call_operand.vmem [shape: f32[2,1,1], index: 7, kind: output, shape index: {1}]  }
   0x1   :  { %17713 = sst [smem:[#allocation61_spill]] %s17470_s1 }
   0x2   :  { %17714 = sst [smem:[#allocation62_spill]] %s17471_s2 }
   0x3   :  { %13 = vsyncpa [#allocation3], 0 }
   0x4   :  { %14 = vsyncpa [#allocation6], 0 }
   0x5   :  { %15 = vsyncpa [#allocation4], 0 }
   0x6   :  { %17 = vsyncpa [#allocation4 + $0x1], 0  ;;  %s12220_s24 = smov 0   ;;  %s12222_s25 = smov 0  }
   0x7   :  { %s12224_s26 = smov 0   ;;  %s12226_s27 = smov 0  }
   0x8 LB: > { %s12241_s28 = sadd.s32 4294967295, %s12162_s27   ;;  %s11881_s29 = sadd.s32 4294967294, %s12162_s27   ;;  %s12162_s27 = sphi %s12226_s27, %s18180_s27   ;;  %s12158_s26 = sphi %s12224_s26, %s18179_s26   ;;  %s12154_s25 = sphi %s12222_s25, %s18178_s25   ;;  %s12150_s24 = sphi %s12220_s24, %s18177_s24  }
   0x9   : > { %s12245_s30 = sadd.s32 1, %s12162_s27   ;;  %s161_s8 = sadd.s32 1, %s12158_s26 }
   0xa   : > { %s158_s9 = ssub.s32 %s12162_s27, %s12245_s30  ;;  %p171_p0 = scmp.ne.s32.totalorder %s12158_s26, %s12154_s25 }
   0xb   : > { %p159_p1 = scmp.eq.s32.totalorder %s158_s9, 0  ;;  %p172_p2 = scmp.eq.s32.totalorder %s12241_s28, 1 }
   0xc   : > { %p177_p3 = scmp.ne.s32.totalorder %s12154_s25, %s12150_s24  ;;  %p178_p4 = scmp.eq.s32.totalorder %s11881_s29, 1 }
   0xd   : > { %s12256_s10 = scalar_select %p159_p1, %s12158_s26, %s161_s8  }
   0xe   : > { %p12258_p5 = por %p172_p2, %p171_p0  ;;  %p12262_p6 = por %p178_p4, %p177_p3 }
   0xf   : > { %p11882_p7 = scmp.ge.s32.totalorder %s12162_s27, 1  ;;  %p211_p8 = scmp.lt.s32.totalorder %s12162_s27, 3 }
  0x10   : > { %p11937_p9 = scmp.eq.s32.totalorder %s12241_s28, 0  ;;  %s17718_s2 = sld [smem:[#allocation62_spill]] }
  0x11   : > { %p12269_p10 = pnand %p11882_p7, %p211_p8  ;;  %s12164_s17 = smov [#allocation5]  }
  0x12   : > { %s238_s18 = sshll.u32 %s12164_s17, 4  ;;  %s17720_s1 = sld [smem:[#allocation61_spill]]  ;;  %s239_s18 = int_to_ptr.vmem [resolvable:$true] %s238_s18 }
  0x13   : > { %p11923_p11 = pneg %p12269_p10  ;;  %s12165_s23 = smov 256  }
  0x14   : > { %s12166_s29 = smov 16   ;;  %s12167_s8 = smov [#allocation2]  }
  0x15   : > { %p12280_p12 = pnand %p11937_p9, %p11923_p11  ;;  %s224_s9 = sshll.u32 %s12167_s8, 4  ;;  %s225_s9 = int_to_ptr.vmem [resolvable:$true] %s224_s9 }
  0x16   : > { %s236_s16 = sshll.u32 %s17718_s2, 4  ;;  %s12168_s14 = smov 512   ;;  %s237_s16 = int_to_ptr.hbm [resolvable:$true] %s236_s16 }
  0x17   : > { %11929 = dma.hbm_to_vmem [thread:$0]  (!%p12280_p12), %s237_s16, 16384, %s239_s18, [#allocation6], %s12165_s23, %s12165_s23, %s12166_s29  }
  0x18   : > { %s222_s22 = sshll.u32 %s17720_s1, 4  ;;  %s12169_s15 = smov 32   ;;  %s223_s22 = int_to_ptr.hbm [resolvable:$true] %s222_s22 }
  0x19   : > { %11926 = dma.hbm_to_vmem [thread:$0]  (!%p12280_p12), %s223_s22, 16384, %s225_s9, [#allocation3], %s12168_s14, %s12168_s14, %s12169_s15  }
  0x1a   : > { %s250_s20 = sshll.u32 %s17472_s3, 4  ;;  %s12170_s21 = smov [#allocation7]   ;;  %s251_s20 = int_to_ptr.hbm [resolvable:$true] %s250_s20 }
  0x1b   : > { %s252_s1 = sshll.u32 %s12170_s21, 4  ;;  %282 = sbr.rel (%p12269_p10) target bundleno = 1738 (0x6ca), region = 44  ;;  %s253_s1 = int_to_ptr.vmem [resolvable:$true] %s252_s1 }
  0x1c   : > { %11932 = dma.hbm_to_vmem [thread:$0]  (!%p12280_p12), %s251_s20, 1024, %s253_s1, [#allocation6], %s12168_s14, %s12168_s14, %s12169_s15  }
  0x20   : > { %12137 = dma.done.wait (%p11937_p9), [#allocation3], 16384  }
  0x21   : > { %12139 = vsyncadd (%p11937_p9), [#allocation3], 4294950912 }
  0x22   : > { %12141 = dma.done.wait (%p11937_p9), [#allocation6], 17408  }
  0x23   : > { %12143 = vsyncadd (%p11937_p9), [#allocation6], 4294949888  ;;  %p328_p13 = scmp.lt.s32.totalorder %s12241_s28, 1  ;;  %v397_v0 = vld [vmem:[#allocation2 + $0x1e0] sm:$0xff]  ;;  %s12171_s19 = smov 16   ;;  %vm3266_vm0 = vcmask 31744  }
  0x24   : > { %v393_v1 = vld [vmem:[#allocation2 + $0x1c0] sm:$0xff]  ;;  %v12307_v3 = vand.u32 4294901760, %v397_v0  ;;  %s12172_s22 = smov 17   ;;  %s12173_s23 = smov 15   ;;  %vm3247_vm1 = vcmask 130048   ;;  %vm3270_vm2 = vcmask 1043456  }
  0x25   : > { %v389_v2 = vld [vmem:[#allocation2 + $0x1a0] sm:$0xff]  ;;  %v12309_v4 = vand.u32 4294901760, %v393_v1  ;;  %s12335_s1 = scalar_select %p328_p13, %s12241_s28, 1  ;;  %vm3220_vm3 = vcmask 138240   ;;  %vm4475_vm4 = vcmask 121856   ;;  %vm5106_vm5 = vcmask 7168  }
  0x26   : > { %v12311_v5 = vand.u32 4294901760, %v389_v2  ;;  %v385_v6 = vld [vmem:[#allocation2 + $0x180] sm:$0xff]  ;;  %472 = vmatpush.msra.mxu0 %v12307_v3  ;;  %v12321_v14 = vsub.f32 %v397_v0, %v12307_v3  ;;  %668 = vmatpush.msra.mxu3 %v12307_v3  ;;  %s12174_s29 = smov 1   ;;  %s12175_s8 = smov 127   ;;  %vm6337_vm6 = vcmask 1039360   ;;  %vm6968_vm7 = vcmask 924672  }
  0x27   : > { %v381_v7 = vld [vmem:[#allocation2 + $0x160] sm:$0xff]  ;;  %v12313_v9 = vand.u32 4294901760, %v385_v6  ;;  %v12324_v15 = vsub.f32 %v393_v1, %v12309_v4  ;;  %s11907_s2 = sshll.u32 %s12335_s1, 3  ;;  %s12176_s9 = smov 113   ;;  %vm7599_vm8 = vcmask 916480   ;;  %vm8230_vm9 = vcmask 908288  }
  0x28   : > { %v377_v8 = vld [vmem:[#allocation2 + $0x140] sm:$0xff]  ;;  %v12315_v10 = vand.u32 4294901760, %v381_v7  ;;  %v12328_v16 = vsub.f32 %v389_v2, %v12311_v5  ;;  %474 = vmatpush.msra.mxu0 %v12309_v4  ;;  %615 = vmatpush.msra.mxu2 %v12321_v14  ;;  %v514_v22 = vand.u32 4294901760, %v12321_v14  ;;  %s332_s18 = scalar_lea.vmem %s17469_s0, %s11907_s2  ;;  %s12177_s14 = smov 112   ;;  %vm8883_vm10 = vcmask 0  }
  0x29   : > { %v12317_v11 = vand.u32 4294901760, %v377_v8  ;;  %v373_v12 = vld [vmem:[#allocation2 + $0x120] sm:$0xff]  ;;  %v12338_v19 = vsub.f32 %v385_v6, %v12313_v9  ;;  %v17492_v23 = vand.u32 4294901760, %v12324_v15  ;;  %670 = vmatpush.msra.mxu3 %v12309_v4  ;;  %v336_v55 = vld [vmem:[%s332_s18] sm:$0xff]  ;;  %s12178_s15 = smov 111   ;;  %s12112_s16 = scalar_lea.hbm %s17475_s6, 16 }
  0x2a   : > { %v369_v13 = vld [vmem:[#allocation2 + $0x100] sm:$0xff]  ;;  %v12330_v17 = vand.u32 4294901760, %v373_v12  ;;  %v12341_v20 = vsub.f32 %v381_v7, %v12315_v10  ;;  %v17490_v24 = vand.u32 4294901760, %v12328_v16  ;;  %476 = vmatpush.msra.mxu0 %v12311_v5  ;;  %618 = vmatpush.msra.mxu2 %v12324_v15  ;;  %v515_v30 = vsub.f32 %v12321_v14, %v514_v22  ;;  %466 = vst [vmem:[#allocation1] ss:$2 sm:$0xff] %v336_v55 }
  0x2b   : > { %v365_v18 = vld [vmem:[#allocation2 + $0xe0] sm:$0xff]  ;;  %v12344_v21 = vsub.f32 %v377_v8, %v12317_v11  ;;  %v12351_v25 = vand.u32 4294901760, %v369_v13  ;;  %v17488_v27 = vand.u32 4294901760, %v12338_v19  ;;  %v521_v31 = vsub.f32 %v12324_v15, %v17492_v23  ;;  %672 = vmatpush.msra.mxu3 %v12311_v5 }
  0x2c   : > { %v361_v26 = vld [vmem:[#allocation2 + $0xc0] sm:$0xff]  ;;  %v12355_v28 = vand.u32 4294901760, %v365_v18  ;;  %v12358_v29 = vsub.f32 %v373_v12, %v12330_v17  ;;  %v527_v32 = vsub.f32 %v12328_v16, %v17490_v24  ;;  %v17486_v33 = vand.u32 4294901760, %v12341_v20  ;;  %478 = vmatpush.msra.mxu0 %v12313_v9  ;;  %621 = vmatpush.msra.mxu2 %v12328_v16 }
  0x2d   : > { %v357_v34 = vld [vmem:[#allocation2 + $0xa0] sm:$0xff]  ;;  %v12374_v35 = vand.u32 4294901760, %v361_v26  ;;  %v17484_v36 = vand.u32 4294901760, %v12344_v21  ;;  %v516_v37 = vand.u32 4294901760, %v515_v30  ;;  %v522_v38 = vand.u32 4294901760, %v521_v31  ;;  %674 = vmatpush.msra.mxu3 %v12313_v9 }
  0x2e   : > { %v533_v39 = vsub.f32 %v12338_v19, %v17488_v27  ;;  %v12383_v40 = vsub.f32 %v369_v13, %v12351_v25  ;;  %v12386_v41 = vand.u32 4294901760, %v357_v34  ;;  %v353_v42 = vld [vmem:[#allocation2 + $0x80] sm:$0xff]  ;;  %480 = vmatpush.msra.mxu0 %v12315_v10  ;;  %v528_v43 = vand.u32 4294901760, %v527_v32  ;;  %624 = vmatpush.msra.mxu2 %v12338_v19 }
  0x2f   : > { %517 = vmatpush.msra.mxu1 %v516_v37  ;;  %v539_v44 = vsub.f32 %v12341_v20, %v17486_v33  ;;  %v17483_v45 = vand.u32 4294901760, %v12358_v29  ;;  %v12394_v46 = vsub.f32 %v365_v18, %v12355_v28  ;;  %676 = vmatpush.msra.mxu3 %v12315_v10  ;;  %v545_v47 = vsub.f32 %v12344_v21, %v17484_v36  ;;  %v349_v48 = vld [vmem:[#allocation2 + $0x60] sm:$0xff] }
  0x30   : > { %482 = vmatpush.msra.mxu0 %v12317_v11  ;;  %v534_v49 = vand.u32 4294901760, %v533_v39  ;;  %v12405_v50 = vand.u32 4294901760, %v353_v42  ;;  %v17482_v51 = vand.u32 4294901760, %v12383_v40  ;;  %v12409_v52 = vsub.f32 %v361_v26, %v12374_v35  ;;  %627 = vmatpush.msra.mxu2 %v12341_v20  ;;  %v345_v54 = vld [vmem:[#allocation2 + $0x40] sm:$0xff] }
  0x31   : > { %523 = vmatpush.msra.mxu1 %v522_v38  ;;  %678 = vmatpush.msra.mxu3 %v12317_v11  ;;  %v12414_v53 = vsub.f32 %v357_v34, %v12386_v41  ;;  %v540_v56 = vand.u32 4294901760, %v539_v44  ;;  %v551_v57 = vsub.f32 %v12358_v29, %v17483_v45  ;;  %v12420_v58 = vand.u32 4294901760, %v349_v48  ;;  %v461_v60 = vld [vmem:[#allocation2 + $0x3e0] sm:$0xff] }
  0x32   : > { %484 = vmatpush.msra.mxu0 %v12330_v17  ;;  %v17481_v59 = vand.u32 4294901760, %v12394_v46  ;;  %630 = vmatpush.msra.mxu2 %v12344_v21  ;;  %v546_v61 = vand.u32 4294901760, %v545_v47  ;;  %v341_v62 = vld [vmem:[#allocation2 + $0x20] sm:$0xff]  ;;  %v557_v63 = vsub.f32 %v12383_v40, %v17482_v51  ;;  %v12429_v0 = vand.u32 4294901760, %v345_v54 }
  0x33   : > { %529 = vmatpush.msra.mxu1 %v528_v43  ;;  %680 = vmatpush.msra.mxu3 %v12330_v17  ;;  %v17479_v1 = vand.u32 4294901760, %v12409_v52  ;;  %v12433_v2 = vsub.f32 %v353_v42, %v12405_v50  ;;  %v337_v6 = vld [vmem:[#allocation2] sm:$0xff]  ;;  %v17478_v8 = vand.u32 4294901760, %v12414_v53  ;;  %v12438_v12 = vand.u32 4294901760, %v461_v60 }
  0x34   : > { %486 = vmatpush.msra.mxu0 %v12351_v25  ;;  %v457_v7 = vld [vmem:[#allocation2 + $0x3c0] sm:$0xff]  ;;  %633 = vmatpush.msra.mxu2 %v12358_v29  ;;  %v552_v13 = vand.u32 4294901760, %v551_v57  ;;  %v563_v18 = vsub.f32 %v12394_v46, %v17481_v59  ;;  %v12444_v26 = vand.u32 4294901760, %v341_v62  ;;  %v12447_v30 = vsub.f32 %v349_v48, %v12420_v58 }
  0x35   : > { %535 = vmatpush.msra.mxu1 %v534_v49  ;;  %682 = vmatpush.msra.mxu3 %v12351_v25  ;;  %v12451_v31 = vand.u32 4294901760, %v337_v6  ;;  %v12453_v32 = vand.u32 4294901760, %v457_v7  ;;  %v453_v34 = vld [vmem:[#allocation2 + $0x3a0] sm:$0xff]  ;;  %v558_v37 = vand.u32 4294901760, %v557_v63  ;;  %v569_v38 = vsub.f32 %v12409_v52, %v17479_v1 }
  0x36   : > { %488 = vmatpush.msra.mxu0 %v12355_v28  ;;  %636 = vmatpush.msra.mxu2 %v12383_v40  ;;  %v17477_v39 = vand.u32 4294901760, %v12433_v2  ;;  %v12461_v42 = vsub.f32 %v345_v54, %v12429_v0  ;;  %v575_v43 = vsub.f32 %v12414_v53, %v17478_v8  ;;  %v12469_v44 = vsub.f32 %v461_v60, %v12438_v12  ;;  %v449_v47 = vld [vmem:[#allocation2 + $0x380] sm:$0xff] }
  0x37   : > { %541 = vmatpush.msra.mxu1 %v540_v56  ;;  %684 = vmatpush.msra.mxu3 %v12355_v28  ;;  %17721 = vst [vmem:[#allocation12_spill] sm:$0xff] %v12451_v31  ;;  %v564_v48 = vand.u32 4294901760, %v563_v18  ;;  %v17480_v49 = vand.u32 4294901760, %v12447_v30  ;;  %v12474_v54 = vsub.f32 %v341_v62, %v12444_v26  ;;  %v12476_v55 = vand.u32 4294901760, %v453_v34  ;;  %v445_v60 = vld [vmem:[#allocation2 + $0x360] sm:$0xff] }
  0x38   : > { %490 = vmatpush.msra.mxu0 %v12374_v35  ;;  %639 = vmatpush.msra.mxu2 %v12394_v46  ;;  %v12481_v56 = vsub.f32 %v337_v6, %v12451_v31  ;;  %v12484_v57 = vsub.f32 %v457_v7, %v12453_v32  ;;  %v581_v62 = vsub.f32 %v12433_v2, %v17477_v39  ;;  %v17485_v63 = vand.u32 4294901760, %v12461_v42  ;;  %v441_v18 = vld [vmem:[#allocation2 + $0x340] sm:$0xff] }
  0x39   : > { %547 = vmatpush.msra.mxu1 %v546_v61  ;;  %686 = vmatpush.msra.mxu3 %v12374_v35  ;;  %v570_v61 = vand.u32 4294901760, %v569_v38  ;;  %v576_v6 = vand.u32 4294901760, %v575_v43  ;;  %v17487_v7 = vand.u32 4294901760, %v12469_v44  ;;  %v17489_v38 = vand.u32 4294901760, %v12474_v54  ;;  %v437_v43 = vld [vmem:[#allocation2 + $0x320] sm:$0xff] }
  0x3a   : > { %492 = vmatpush.msra.mxu0 %v12386_v41  ;;  %642 = vmatpush.msra.mxu2 %v12409_v52  ;;  %v12502_v39 = vsub.f32 %v453_v34, %v12476_v55  ;;  %v12504_v8 = vand.u32 4294901760, %v445_v60  ;;  %v17493_v1 = vand.u32 4294901760, %v12481_v56  ;;  %v593_v34 = vsub.f32 %v12461_v42, %v17485_v63  ;;  %v433_v45 = vld [vmem:[#allocation2 + $0x300] sm:$0xff] }
  0x3b   : > { %553 = vmatpush.msra.mxu1 %v552_v13  ;;  %688 = vmatpush.msra.mxu3 %v12386_v41  ;;  %v12491_v13 = vand.u32 4294901760, %v449_v47  ;;  %v12517_v51 = vand.u32 4294901760, %v441_v18  ;;  %v856_v36 = vsub.f32 %v12469_v44, %v17487_v7  ;;  %v12539_v27 = vand.u32 4294901760, %v433_v45 }
  0x3c   : > { %494 = vmatpush.msra.mxu0 %v12405_v50  ;;  %645 = vmatpush.msra.mxu2 %v12414_v53  ;;  %v17494_v63 = vand.u32 4294901760, %v12502_v39  ;;  %v12532_v33 = vsub.f32 %v445_v60, %v12504_v8  ;;  %v605_v60 = vsub.f32 %v12481_v56, %v17493_v1  ;;  %v17722_v14 = vand.u32 4294901760, %v12324_v15 }
  0x3d   : > { %559 = vmatpush.msra.mxu1 %v558_v37  ;;  %690 = vmatpush.msra.mxu3 %v12405_v50  ;;  %v587_v37 = vsub.f32 %v12447_v30, %v17480_v49  ;;  %v582_v49 = vand.u32 4294901760, %v581_v62  ;;  %v12515_v59 = vsub.f32 %v449_v47, %v12491_v13  ;;  %v599_v47 = vsub.f32 %v12474_v54, %v17489_v38 }
  0x3e   : > { %496 = vmatpush.msra.mxu0 %v12420_v58  ;;  %648 = vmatpush.msra.mxu2 %v12433_v2  ;;  %v12547_v24 = vsub.f32 %v441_v18, %v12517_v51  ;;  %v868_v1 = vsub.f32 %v12502_v39, %v17494_v63  ;;  %v17724_v15 = vand.u32 4294901760, %v12328_v16  ;;  %v17726_v16 = vand.u32 4294901760, %v12338_v19 }
  0x3f   : > { %565 = vmatpush.msra.mxu1 %v564_v48  ;;  %692 = vmatpush.msra.mxu3 %v12420_v58  ;;  %v17491_v48 = vand.u32 4294901760, %v12484_v57  ;;  %v588_v62 = vand.u32 4294901760, %v587_v37  ;;  %v594_v37 = vand.u32 4294901760, %v593_v34  ;;  %v600_v34 = vand.u32 4294901760, %v599_v47 }
  0x40   : > { %498 = vmatpush.msra.mxu0 %v12429_v0  ;;  %651 = vmatpush.msra.mxu2 %v12447_v30  ;;  %v17723_v47 = vand.u32 4294901760, %v12515_v59  ;;  %v17728_v19 = vand.u32 4294901760, %v12341_v20  ;;  %v17730_v20 = vand.u32 4294901760, %v12344_v21  ;;  %v17733_v21 = vand.u32 4294901760, %v12358_v29 }
  0x41   : > { %571 = vmatpush.msra.mxu1 %v570_v61  ;;  %694 = vmatpush.msra.mxu3 %v12429_v0  ;;  %v12524_v61 = vand.u32 4294901760, %v437_v43  ;;  %v862_v7 = vsub.f32 %v12484_v57, %v17491_v48  ;;  %v857_v48 = vand.u32 4294901760, %v856_v36  ;;  %v12566_v36 = vsub.f32 %v433_v45, %v12539_v27 }
  0x42   : > { %500 = vmatpush.msra.mxu0 %v12444_v26  ;;  %654 = vmatpush.msra.mxu2 %v12461_v42  ;;  %v874_v63 = vsub.f32 %v12515_v59, %v17723_v47  ;;  %v17735_v29 = vand.u32 4294901760, %v12383_v40  ;;  %v17738_v40 = vand.u32 4294901760, %v12394_v46 }
  0x43   : > { %577 = vmatpush.msra.mxu1 %v576_v6  ;;  %696 = vmatpush.msra.mxu3 %v12444_v26  ;;  %v429_v6 = vld [vmem:[#allocation2 + $0x2e0] sm:$0xff]  ;;  %v12553_v23 = vsub.f32 %v437_v43, %v12524_v61 }
  0x44   : > { %502 = vmatpush.msra.mxu0 %v12451_v31  ;;  %657 = vmatpush.msra.mxu2 %v12474_v54  ;;  %v12560_v38 = vand.u32 4294901760, %v429_v6  ;;  %v421_v43 = vld [vmem:[#allocation2 + $0x2a0] sm:$0xff] }
  0x45   : > { %583 = vmatpush.msra.mxu1 %v582_v49  ;;  %v425_v49 = vld [vmem:[#allocation2 + $0x2c0] sm:$0xff]  ;;  %698 = vmatpush.msra.mxu3 %v12451_v31  ;;  %v12585_v18 = vand.u32 4294901760, %v421_v43 }
  0x46   : > { %709 = vmatpush.msrb.mxu0 %v514_v22  ;;  %660 = vmatpush.msra.mxu2 %v12481_v56  ;;  %v863_v22 = vand.u32 4294901760, %v862_v7  ;;  %v12573_v31 = vand.u32 4294901760, %v425_v49  ;;  %v417_v7 = vld [vmem:[#allocation2 + $0x280] sm:$0xff]  ;;  %v12583_v47 = vsub.f32 %v429_v6, %v12560_v38 }
  0x47   : > { %589 = vmatpush.msra.mxu1 %v588_v62  ;;  %v606_v62 = vand.u32 4294901760, %v605_v60  ;;  %858 = vmatpush.msrb.mxu3 %v857_v48  ;;  %v17725_v60 = vand.u32 4294901760, %v12532_v33  ;;  %v12597_v45 = vand.u32 4294901760, %v417_v7 }
  0x48   : > { %713 = vmatpush.msrb.mxu0 %v17722_v14  ;;  %813 = vmatpush.msrb.mxu2 %v12438_v12  ;;  %v12595_v6 = vsub.f32 %v425_v49, %v12573_v31  ;;  %v12608_v49 = vsub.f32 %v421_v43, %v12585_v18 }
  0x49   : > { %595 = vmatpush.msra.mxu1 %v594_v37  ;;  %v869_v37 = vand.u32 4294901760, %v868_v1  ;;  %v880_v14 = vsub.f32 %v12532_v33, %v17725_v60  ;;  %864 = vmatpush.msrb.mxu3 %v863_v22  ;;  %v875_v1 = vand.u32 4294901760, %v874_v63  ;;  %v17729_v22 = vand.u32 4294901760, %v12553_v23 }
  0x4a   : > { %717 = vmatpush.msrb.mxu0 %v17724_v15  ;;  %815 = vmatpush.msrb.mxu2 %v12453_v32  ;;  %v413_v15 = vld [vmem:[#allocation2 + $0x260] sm:$0xff]  ;;  %v12621_v43 = vsub.f32 %v417_v7, %v12597_v45 }
  0x4b   : > { %601 = vmatpush.msra.mxu1 %v600_v34  ;;  %v17727_v34 = vand.u32 4294901760, %v12547_v24  ;;  %870 = vmatpush.msrb.mxu3 %v869_v37  ;;  %v881_v63 = vand.u32 4294901760, %v880_v14  ;;  %v12610_v48 = vand.u32 4294901760, %v413_v15 }
  0x4c   : > { %721 = vmatpush.msrb.mxu0 %v17726_v16  ;;  %817 = vmatpush.msrb.mxu2 %v12476_v55  ;;  %v467_v16 = vld.sshfl [vmem:[#allocation1] sm:$0xff pattern:$0x75316420] }
  0x4d   : > { %607 = vmatpush.msra.mxu1 %v606_v62  ;;  %v886_v60 = vsub.f32 %v12547_v24, %v17727_v34  ;;  %v892_v62 = vsub.f32 %v12553_v23, %v17729_v22  ;;  %v409_v22 = vld [vmem:[#allocation2 + $0x240] sm:$0xff]  ;;  %876 = vmatpush.msrb.mxu3 %v875_v1  ;;  %v12623_v34 = vand.u32 4294901760, %v467_v16  ;;  %v17734_v1 = vand.u32 4294901760, %v12583_v47 }
  0x4e   : > { %725 = vmatpush.msrb.mxu0 %v17728_v19  ;;  %819 = vmatpush.msrb.mxu2 %v12491_v13  ;;  %v12633_v7 = vand.u32 4294901760, %v409_v22  ;;  %v12636_v14 = vsub.f32 %v413_v15, %v12610_v48 }
  0x4f   : > { %776 = vmatpush.msrb.mxu1 %v12307_v3  ;;  %v17731_v3 = vand.u32 4294901760, %v12566_v36  ;;  %v887_v37 = vand.u32 4294901760, %v886_v60  ;;  %17732 = vst [vmem:[#allocation13_spill] sm:$0xff] %v12623_v34  ;;  %882 = vmatpush.msrb.mxu3 %v881_v63  ;;  %v904_v60 = vsub.f32 %v12583_v47, %v17734_v1  ;;  %v12647_v1 = vsub.f32 %v467_v16, %v12623_v34 }
  0x50   : > { %729 = vmatpush.msrb.mxu0 %v17730_v20  ;;  %821 = vmatpush.msrb.mxu2 %v12504_v8  ;;  %v405_v20 = vld [vmem:[#allocation2 + $0x220] sm:$0xff]  ;;  %v12660_v16 = vsub.f32 %v409_v22, %v12633_v7 }
  0x51   : > { %778 = vmatpush.msrb.mxu1 %v12309_v4  ;;  %v898_v19 = vsub.f32 %v12566_v36, %v17731_v3  ;;  %v893_v4 = vand.u32 4294901760, %v892_v62  ;;  %888 = vmatpush.msrb.mxu3 %v887_v37  ;;  %v17736_v62 = vand.u32 4294901760, %v12595_v6  ;;  %17737 = vst [vmem:[#allocation14_spill] sm:$0xff] %v12647_v1  ;;  %v12649_v15 = vand.u32 4294901760, %v405_v20  ;;  %v401_v3 = vld [vmem:[#allocation2 + $0x200] sm:$0xff] }
  0x52   : > { %733 = vmatpush.msrb.mxu0 %v17733_v21  ;;  %823 = vmatpush.msrb.mxu2 %v12517_v51  ;;  %v921_v21 = vand.u32 4294901760, %v12621_v43  ;;  %v12665_v46 = vand.u32 4294901760, %v401_v3 }
  0x53   : > { %780 = vmatpush.msrb.mxu1 %v12311_v5  ;;  %v899_v5 = vand.u32 4294901760, %v898_v19  ;;  %v910_v63 = vsub.f32 %v12595_v6, %v17736_v62  ;;  %894 = vmatpush.msrb.mxu3 %v893_v4  ;;  %v17739_v19 = vand.u32 4294901760, %v12608_v49  ;;  %v17740_v62 = vand.u32 4294901760, %v12409_v52 }
  0x54   : > { %737 = vmatpush.msrb.mxu0 %v17735_v29  ;;  %825 = vmatpush.msrb.mxu2 %v12524_v61  ;;  %v927_v29 = vand.u32 4294901760, %v12636_v14  ;;  %v922_v4 = vsub.f32 %v12621_v43, %v921_v21  ;;  %v12675_v22 = vsub.f32 %v405_v20, %v12649_v15  ;;  %v17742_v52 = vand.u32 4294901760, %v12414_v53 }
  0x55   : > { %782 = vmatpush.msrb.mxu1 %v12313_v9  ;;  %v905_v9 = vand.u32 4294901760, %v904_v60  ;;  %v916_v37 = vsub.f32 %v12608_v49, %v17739_v19  ;;  %900 = vmatpush.msrb.mxu3 %v899_v5  ;;  %v12672_v60 = vand.u32 4294901760, %v12647_v1  ;;  %v17743_v19 = vand.u32 4294901760, %v12433_v2 }
  0x56   : > { %741 = vmatpush.msrb.mxu0 %v17738_v40  ;;  %827 = vmatpush.msrb.mxu2 %v12539_v27  ;;  %v933_v40 = vand.u32 4294901760, %v12660_v16  ;;  %v12689_v53 = vsub.f32 %v401_v3, %v12665_v46  ;;  %v17746_v3 = vand.u32 4294901760, %v12461_v42  ;;  %v17749_v42 = vand.u32 4294901760, %v12481_v56 }
  0x57   : > { %784 = vmatpush.msrb.mxu1 %v12315_v10  ;;  %v911_v10 = vand.u32 4294901760, %v910_v63  ;;  %17741 = vst [vmem:[#allocation15_spill] sm:$0xff] %v12672_v60  ;;  %906 = vmatpush.msrb.mxu3 %v905_v9  ;;  %v917_v5 = vand.u32 4294901760, %v916_v37  ;;  %v928_v63 = vsub.f32 %v12636_v14, %v927_v29  ;;  %v506_v20 = vsub.f32 %v12647_v1, %v12672_v60 }
  0x58   : > { %745 = vmatpush.msrb.mxu0 %v17740_v62  ;;  %829 = vmatpush.msrb.mxu2 %v12560_v38  ;;  %v939_v9 = vand.u32 4294901760, %v12675_v22  ;;  %v17745_v62 = vand.u32 4294901760, %v12447_v30  ;;  %v934_v2 = vsub.f32 %v12660_v16, %v933_v40 }
  0x59   : > { %786 = vmatpush.msrb.mxu1 %v12317_v11  ;;  %v468_v11 = vld.sshfl [vmem:[#allocation1 + $0x8] sm:$0xff pattern:$0x75316420]  ;;  %912 = vmatpush.msrb.mxu3 %v911_v10  ;;  %v945_v10 = vand.u32 4294901760, %v12689_v53  ;;  %v12709_v30 = vand.u32 4294901760, %v506_v20 }
  0x5a   : > { %749 = vmatpush.msrb.mxu0 %v17742_v52  ;;  %831 = vmatpush.msrb.mxu2 %v12573_v31  ;;  %v12695_v37 = vand.u32 4294901760, %v468_v11  ;;  %v17748_v52 = vand.u32 4294901760, %v12474_v54 }
  0x5b   : > { %788 = vmatpush.msrb.mxu1 %v12330_v17  ;;  %v923_v17 = vand.u32 4294901760, %v922_v4  ;;  %918 = vmatpush.msrb.mxu3 %v917_v5  ;;  %v946_v5 = vsub.f32 %v12689_v53, %v945_v10 }
  0x5c   : > { %753 = vmatpush.msrb.mxu0 %v17743_v19  ;;  %833 = vmatpush.msrb.mxu2 %v12585_v18  ;;  %17744 = vst [vmem:[#allocation16_spill] sm:$0xff] %v12695_v37  ;;  %v12715_v4 = vsub.f32 %v468_v11, %v12695_v37 }
  0x5d   : > { %790 = vmatpush.msrb.mxu1 %v12351_v25  ;;  %v929_v25 = vand.u32 4294901760, %v928_v63  ;;  %924 = vmatpush.msrb.mxu3 %v923_v17  ;;  %v17754_v63 = vld [vmem:[#allocation12_spill] sm:$0xff]  ;;  %v366_v17 = vld [vmem:[#allocation2 + $0xe8] sm:$0xff] }
  0x5e   : > { %757 = vmatpush.msrb.mxu0 %v17745_v62  ;;  %835 = vmatpush.msrb.mxu2 %v12597_v45  ;;  %17747 = vst [vmem:[#allocation17_spill] sm:$0xff] %v12715_v4  ;;  %v362_v62 = vld [vmem:[#allocation2 + $0xc8] sm:$0xff] }
  0x5f   : > { %792 = vmatpush.msrb.mxu1 %v12355_v28  ;;  %v940_v28 = vsub.f32 %v12675_v22, %v939_v9  ;;  %930 = vmatpush.msrb.mxu3 %v929_v25  ;;  %v12877_v25 = vand.u32 4294901760, %v366_v17 }
  0x60   : > { %761 = vmatpush.msrb.mxu0 %v17746_v3  ;;  %837 = vmatpush.msrb.mxu2 %v12610_v48 }
  0x61   : > { %794 = vmatpush.msrb.mxu1 %v12374_v35  ;;  %v935_v35 = vand.u32 4294901760, %v934_v2  ;;  %508 = vmatmul.f32.vlgmr.msra.gmra.mxu0 %v12709_v30  ;;  %v941_v54 = vand.u32 4294901760, %v940_v28 }
  0x62   : > { %765 = vmatpush.msrb.mxu0 %v17748_v52  ;;  %839 = vmatpush.msrb.mxu2 %v12633_v7  ;;  %v358_v52 = vld [vmem:[#allocation2 + $0xa8] sm:$0xff] }
  0x63   : > { %796 = vmatpush.msrb.mxu1 %v12386_v41  ;;  %v12730_v41 = vand.u32 4294901760, %v12715_v4  ;;  %936 = vmatpush.msrb.mxu3 %v935_v35 }
  0x64   : > { %769 = vmatpush.msrb.mxu0 %v17749_v42  ;;  %841 = vmatpush.msrb.mxu2 %v12649_v15 }
  0x65   : > { %798 = vmatpush.msrb.mxu1 %v12405_v50  ;;  %17750 = vst [vmem:[#allocation18_spill] sm:$0xff] %v12730_v41  ;;  %663 = vmatmul.f32.vlgmr.msra.gmra.mxu2 %v12647_v1  ;;  %v947_v50 = vand.u32 4294901760, %v946_v5  ;;  %v847_v56 = vsub.f32 %v12715_v4, %v12730_v41 }
  0x66   : > { %956 = vmatpush.msra.mxu0 %v12469_v44  ;;  %843 = vmatpush.msrb.mxu2 %v12665_v46 }
  0x67   : > { %800 = vmatpush.msrb.mxu1 %v12420_v58  ;;  %942 = vmatpush.msrb.mxu3 %v941_v54  ;;  %v17751_v58 = vand.u32 4294901760, %v12469_v44  ;;  %v12749_v11 = vand.u32 4294901760, %v847_v56  ;;  %v17756_v44 = vand.u32 4294901760, %v12515_v59 }
  0x68   : > { %959 = vmatpush.msra.mxu0 %v12484_v57  ;;  %702 = vmatmul.f32.vlgmr.msra.gmra.mxu3 %v12672_v60 }
  0x69   : > { %802 = vmatpush.msrb.mxu1 %v12429_v0  ;;  %1050 = vmatpush.msra.mxu2 %v17751_v58  ;;  %v17752_v0 = vand.u32 4294901760, %v12484_v57  ;;  %17753 = vst [vmem:[#allocation19_spill] sm:$0xff] %v12749_v11  ;;  %v17763_v57 = vand.u32 4294901760, %v12608_v49 }
  0x6a   : > { %962 = vmatpush.msra.mxu0 %v12502_v39  ;;  %948 = vmatpush.msrb.mxu3 %v947_v50  ;;  %v12904_v50 = vsub.f32 %v366_v17, %v12877_v25  ;;  %v462_v17 = vld [vmem:[#allocation2 + $0x3e8] sm:$0xff] }
  0x6b   : > { %804 = vmatpush.msrb.mxu1 %v12444_v26  ;;  %1054 = vmatpush.msra.mxu2 %v17752_v0  ;;  %v17755_v26 = vand.u32 4294901760, %v12502_v39  ;;  %v12910_v0 = vand.u32 4294901760, %v358_v52 }
  0x6c   : > { %609 = vmatmul.f32.vlgmr.msra.gmra.mxu1 %v12623_v34  ;;  %965 = vmatpush.msra.mxu0 %v12515_v59  ;;  %v17758_v59 = vand.u32 4294901760, %v12547_v24 }
  0x6d   : > { %1117 = vmatpush.msra.mxu3 %v12438_v12  ;;  %806 = vmatpush.msrb.mxu1 %v17754_v63 }
  0x6e   : > { %968 = vmatpush.msra.mxu0 %v12532_v33  ;;  %1058 = vmatpush.msra.mxu2 %v17755_v26 }
  0x6f   : > { %1009 = vmatpush.msra.mxu1 %v12438_v12  ;;  %1119 = vmatpush.msra.mxu3 %v12453_v32  ;;  %v17757_v12 = vand.u32 4294901760, %v12532_v33  ;;  %v17759_v33 = vand.u32 4294901760, %v12553_v23 }
  0x70   : > { %849 = vmatmul.f32.vlgmr.msrb.gmra.mxu2 %v12749_v11  ;;  %971 = vmatpush.msra.mxu0 %v12547_v24  ;;  %v398_v24 = vld [vmem:[#allocation2 + $0x1e8] sm:$0xff] }
  0x71   : > { %1011 = vmatpush.msra.mxu1 %v12453_v32  ;;  %1062 = vmatpush.msra.mxu2 %v17756_v44  ;;  %v17760_v32 = vand.u32 4294901760, %v12566_v36  ;;  %v12797_v39 = vand.u32 4294901760, %v398_v24  ;;  %v350_v44 = vld [vmem:[#allocation2 + $0x68] sm:$0xff] }
  0x72   : > { %1121 = vmatpush.msra.mxu3 %v12476_v55  ;;  %771 = vmatmul.f32.vlgmr.msrb.gmra.mxu0 %v12623_v34 }
  0x73   : > { %950 = vmatmul.f32.vlgmr.msrb.gmra.mxu3 %v12695_v37  ;;  %974 = vmatpush.msra.mxu0 %v12553_v23  ;;  %v394_v23 = vld [vmem:[#allocation2 + $0x1c8] sm:$0xff] }
  0x74   : > { %1013 = vmatpush.msra.mxu1 %v12476_v55  ;;  %1066 = vmatpush.msra.mxu2 %v17757_v12  ;;  %v390_v55 = vld [vmem:[#allocation2 + $0x1a8] sm:$0xff] }
  0x75   : > { %1123 = vmatpush.msra.mxu3 %v12491_v13  ;;  %808 = vmatmul.f32.vlgmr.msrb.gmra.mxu1 %v12623_v34 }
  0x76   : > { %977 = vmatpush.msra.mxu0 %v12566_v36  ;;  %1015 = vmatpush.msra.mxu1 %v12491_v13  ;;  %v12804_v13 = vand.u32 4294901760, %v394_v23  ;;  %v382_v36 = vld [vmem:[#allocation2 + $0x168] sm:$0xff] }
  0x77   : > { %1070 = vmatpush.msra.mxu2 %v17758_v59  ;;  %1125 = vmatpush.msra.mxu3 %v12504_v8 }
  0x78   : > { %980 = vmatpush.msra.mxu0 %v12583_v47  ;;  %1017 = vmatpush.msra.mxu1 %v12504_v8  ;;  %v17761_v8 = vand.u32 4294901760, %v12583_v47  ;;  %v12824_v47 = vsub.f32 %v394_v23, %v12804_v13 }
  0x79   : > { %1074 = vmatpush.msra.mxu2 %v17759_v33  ;;  %1127 = vmatpush.msra.mxu3 %v12517_v51 }
  0x7a   : > { %983 = vmatpush.msra.mxu0 %v12595_v6  ;;  %1019 = vmatpush.msra.mxu1 %v12517_v51  ;;  %v17762_v51 = vand.u32 4294901760, %v12595_v6  ;;  %v378_v6 = vld [vmem:[#allocation2 + $0x148] sm:$0xff] }
  0x7b   : > { %1078 = vmatpush.msra.mxu2 %v17760_v32  ;;  %1129 = vmatpush.msra.mxu3 %v12524_v61 }
  0x7c   : > { %986 = vmatpush.msra.mxu0 %v12608_v49  ;;  %1021 = vmatpush.msra.mxu1 %v12524_v61  ;;  %v12811_v61 = vand.u32 4294901760, %v390_v55 }
  0x7d   : > { %1082 = vmatpush.msra.mxu2 %v17761_v8  ;;  %1131 = vmatpush.msra.mxu3 %v12539_v27  ;;  %v346_v8 = vld [vmem:[#allocation2 + $0x48] sm:$0xff] }
  0x7e   : > { %989 = vmatpush.msra.mxu0 %v12621_v43  ;;  %1023 = vmatpush.msra.mxu1 %v12539_v27  ;;  %v386_v27 = vld [vmem:[#allocation2 + $0x188] sm:$0xff] }
  0x7f   : > { %1086 = vmatpush.msra.mxu2 %v17762_v51  ;;  %1133 = vmatpush.msra.mxu3 %v12560_v38  ;;  %v374_v43 = vld [vmem:[#allocation2 + $0x128] sm:$0xff] }
  0x80   : > { %992 = vmatpush.msra.mxu0 %v12636_v14  ;;  %1025 = vmatpush.msra.mxu1 %v12560_v38  ;;  %v12814_v38 = vsub.f32 %v398_v24, %v12797_v39  ;;  %v12835_v14 = vsub.f32 %v390_v55, %v12811_v61  ;;  %v17497_v24 = vand.u32 4294901760, %v12904_v50  ;;  %v12932_v55 = vand.u32 4294901760, %v350_v44 }
  0x81   : > { %1090 = vmatpush.msra.mxu2 %v17763_v57  ;;  %1135 = vmatpush.msra.mxu3 %v12573_v31  ;;  %v12935_v57 = vsub.f32 %v358_v52, %v12910_v0 }
  0x82   : > { %995 = vmatpush.msra.mxu0 %v12660_v16  ;;  %1027 = vmatpush.msra.mxu1 %v12573_v31  ;;  %v12821_v31 = vand.u32 4294901760, %v386_v27  ;;  %v17509_v49 = vand.u32 4294901760, %v12814_v38  ;;  %v370_v16 = vld [vmem:[#allocation2 + $0x108] sm:$0xff] }
  0x83   : > { %1094 = vmatpush.msra.mxu2 %v921_v21  ;;  %1137 = vmatpush.msra.mxu3 %v12585_v18  ;;  %v17507_v21 = vand.u32 4294901760, %v12824_v47  ;;  %v17498_v52 = vand.u32 4294901760, %v12935_v57 }
  0x84   : > { %998 = vmatpush.msra.mxu0 %v12675_v22  ;;  %1029 = vmatpush.msra.mxu1 %v12585_v18  ;;  %v12831_v18 = vand.u32 4294901760, %v382_v36  ;;  %v12856_v22 = vand.u32 4294901760, %v374_v43 }
  0x85   : > { %1098 = vmatpush.msra.mxu2 %v927_v29  ;;  %1139 = vmatpush.msra.mxu3 %v12597_v45  ;;  %v12846_v29 = vsub.f32 %v386_v27, %v12821_v31 }
  0x86   : > { %1001 = vmatpush.msra.mxu0 %v12689_v53  ;;  %1031 = vmatpush.msra.mxu1 %v12597_v45  ;;  %v12842_v45 = vand.u32 4294901760, %v378_v6  ;;  %v12860_v19 = vsub.f32 %v382_v36, %v12831_v18  ;;  %v12869_v53 = vand.u32 4294901760, %v370_v16  ;;  %v12886_v28 = vsub.f32 %v374_v43, %v12856_v22  ;;  %v342_v36 = vld [vmem:[#allocation2 + $0x28] sm:$0xff] }
  0x87   : > { %1102 = vmatpush.msra.mxu2 %v933_v40  ;;  %1141 = vmatpush.msra.mxu3 %v12610_v48  ;;  %v17506_v40 = vand.u32 4294901760, %v12835_v14  ;;  %v17504_v20 = vand.u32 4294901760, %v12846_v29 }
  0x88   : > { %1004 = vmatmul.f32.vlgmr.msra.gmra.mxu0 %v12715_v4  ;;  %1033 = vmatpush.msra.mxu1 %v12610_v48  ;;  %v1197_v48 = vsub.f32 %v12814_v38, %v17509_v49  ;;  %v12899_v54 = vsub.f32 %v370_v16, %v12869_v53  ;;  %v17500_v63 = vand.u32 4294901760, %v12886_v28  ;;  %v12944_v16 = vand.u32 4294901760, %v346_v8 }
  0x89   : > { %1154 = vmatpush.msrb.mxu0 %v12797_v39  ;;  %1106 = vmatpush.msra.mxu2 %v939_v9  ;;  %v12873_v9 = vsub.f32 %v378_v6, %v12842_v45  ;;  %v1209_v3 = vsub.f32 %v12835_v14, %v17506_v40  ;;  %v1215_v42 = vsub.f32 %v12846_v29, %v17504_v20 }
  0x8a   : > { %1143 = vmatpush.msra.mxu3 %v12633_v7  ;;  %1035 = vmatpush.msra.mxu1 %v12633_v7  ;;  %v1203_v7 = vsub.f32 %v12824_v47, %v17507_v21  ;;  %v1198_v2 = vand.u32 4294901760, %v1197_v48  ;;  %v17499_v32 = vand.u32 4294901760, %v12899_v54  ;;  %v1233_v51 = vsub.f32 %v12886_v28, %v17500_v63 }
  0x8b   : > { %1156 = vmatpush.msrb.mxu0 %v12804_v13  ;;  %1110 = vmatpush.msra.mxu2 %v945_v10  ;;  %v17503_v10 = vand.u32 4294901760, %v12860_v19  ;;  %v17501_v5 = vand.u32 4294901760, %v12873_v9  ;;  %v1210_v56 = vand.u32 4294901760, %v1209_v3  ;;  %v1216_v12 = vand.u32 4294901760, %v1215_v42 }
  0x8c   : > { %1145 = vmatpush.msra.mxu3 %v12649_v15  ;;  %1112 = vmatmul.f32.vlgmr.msra.gmra.mxu2 %v12695_v37  ;;  %v1204_v35 = vand.u32 4294901760, %v1203_v7  ;;  %v1239_v43 = vsub.f32 %v12899_v54, %v17499_v32  ;;  %v1245_v7 = vsub.f32 %v12904_v50, %v17497_v24  ;;  %v12955_v3 = vand.u32 4294901760, %v342_v36  ;;  %v450_v24 = vld [vmem:[#allocation2 + $0x388] sm:$0xff] }
  0x8d   : > { %1158 = vmatpush.msrb.mxu0 %v12811_v61  ;;  %1297 = vmatpush.msrb.mxu2 %v12814_v38  ;;  %v1221_v58 = vsub.f32 %v12860_v19, %v17503_v10  ;;  %v1227_v59 = vsub.f32 %v12873_v9, %v17501_v5  ;;  %v446_v5 = vld [vmem:[#allocation2 + $0x368] sm:$0xff] }
  0x8e   : > { %1037 = vmatpush.msra.mxu1 %v12649_v15  ;;  %1147 = vmatpush.msra.mxu3 %v12665_v46  ;;  %v12890_v15 = vand.u32 4294901760, %v362_v62  ;;  %v13017_v20 = vand.u32 4294901760, %v446_v5 }
  0x8f   : > { %1149 = vmatmul.f32.vlgmr.msra.gmra.mxu3 %v12695_v37  ;;  %1160 = vmatpush.msrb.mxu0 %v12821_v31  ;;  %v1222_v23 = vand.u32 4294901760, %v1221_v58  ;;  %v1228_v6 = vand.u32 4294901760, %v1227_v59  ;;  %v1240_v58 = vand.u32 4294901760, %v1239_v43  ;;  %v12973_v59 = vsub.f32 %v346_v8, %v12944_v16 }
  0x90   : > { %1300 = vmatpush.msrb.mxu2 %v12824_v47  ;;  %1350 = vmatpush.msrb.mxu3 %v12797_v39  ;;  %v12916_v26 = vsub.f32 %v362_v62, %v12890_v15  ;;  %v338_v62 = vld [vmem:[#allocation2 + $0x8] sm:$0xff]  ;;  %v17766_v37 = vand.u32 4294901760, %v12814_v38 }
  0x91   : > { %1039 = vmatpush.msra.mxu1 %v12665_v46  ;;  %1162 = vmatpush.msrb.mxu0 %v12831_v18  ;;  %v354_v46 = vld [vmem:[#allocation2 + $0x88] sm:$0xff] }
  0x92   : > { %1043 = vmatmul.f32.vlgmr.msra.gmra.mxu1 %v12730_v41  ;;  %1303 = vmatpush.msrb.mxu2 %v12835_v14  ;;  %v12922_v33 = vand.u32 4294901760, %v354_v46  ;;  %v17496_v27 = vand.u32 4294901760, %v12916_v26 }
  0x93   : > { %1199 = vmatpush.msrb.mxu1 %v1198_v2  ;;  %1352 = vmatpush.msrb.mxu3 %v12804_v13  ;;  %v1234_v2 = vand.u32 4294901760, %v1233_v51  ;;  %v454_v51 = vld [vmem:[#allocation2 + $0x3a8] sm:$0xff] }
  0x94   : > { %1164 = vmatpush.msrb.mxu0 %v12842_v45  ;;  %1306 = vmatpush.msrb.mxu2 %v12846_v29  ;;  %v12947_v48 = vsub.f32 %v354_v46, %v12922_v33  ;;  %v1251_v42 = vsub.f32 %v12916_v26, %v17496_v27  ;;  %v12966_v46 = vand.u32 4294901760, %v462_v17  ;;  %v12983_v27 = vsub.f32 %v342_v36, %v12955_v3 }
  0x95   : > { %1205 = vmatpush.msrb.mxu1 %v1204_v35  ;;  %1354 = vmatpush.msrb.mxu3 %v12811_v61  ;;  %v12959_v35 = vsub.f32 %v350_v44, %v12932_v55  ;;  %v17508_v36 = vand.u32 4294901760, %v12973_v59  ;;  %v13000_v63 = vand.u32 4294901760, %v454_v51 }
  0x96   : > { %1166 = vmatpush.msrb.mxu0 %v12856_v22  ;;  %1309 = vmatpush.msrb.mxu2 %v12860_v19  ;;  %v17502_v44 = vand.u32 4294901760, %v12947_v48 }
  0x97   : > { %1211 = vmatpush.msrb.mxu1 %v1210_v56  ;;  %1356 = vmatpush.msrb.mxu3 %v12821_v31  ;;  %v458_v56 = vld [vmem:[#allocation2 + $0x3c8] sm:$0xff]  ;;  %v17505_v43 = vand.u32 4294901760, %v12959_v35  ;;  %v13025_v40 = vsub.f32 %v454_v51, %v13000_v63 }
  0x98   : > { %1168 = vmatpush.msrb.mxu0 %v12869_v53  ;;  %1312 = vmatpush.msrb.mxu2 %v12873_v9  ;;  %v12985_v8 = vand.u32 4294901760, %v458_v56 }
  0x99   : > { %1217 = vmatpush.msrb.mxu1 %v1216_v12  ;;  %1358 = vmatpush.msrb.mxu3 %v12831_v18  ;;  %v12969_v12 = vand.u32 4294901760, %v338_v62 }
  0x9a   : > { %1170 = vmatpush.msrb.mxu0 %v12877_v25  ;;  %1315 = vmatpush.msrb.mxu2 %v12886_v28  ;;  %17765 = vst [vmem:[#allocation20_spill] sm:$0xff] %v12985_v8 }
  0x9b   : > { %1223 = vmatpush.msrb.mxu1 %v1222_v23  ;;  %1360 = vmatpush.msrb.mxu3 %v12842_v45  ;;  %17764 = vst [vmem:[#allocation12_spill] sm:$0xff] %v12969_v12  ;;  %v1246_v23 = vand.u32 4294901760, %v1245_v7  ;;  %v1252_v7 = vand.u32 4294901760, %v1251_v42  ;;  %v12998_v32 = vsub.f32 %v338_v62, %v12969_v12  ;;  %v17510_v62 = vand.u32 4294901760, %v12983_v27 }
  0x9c   : > { %1172 = vmatpush.msrb.mxu0 %v12890_v15  ;;  %1318 = vmatpush.msrb.mxu2 %v12899_v54 }
  0x9d   : > { %1229 = vmatpush.msrb.mxu1 %v1228_v6  ;;  %1362 = vmatpush.msrb.mxu3 %v12856_v22  ;;  %v1257_v6 = vsub.f32 %v12935_v57, %v17498_v52  ;;  %v1263_v52 = vsub.f32 %v12947_v48, %v17502_v44  ;;  %v13012_v44 = vsub.f32 %v458_v56, %v12985_v8  ;;  %v17518_v56 = vand.u32 4294901760, %v12998_v32 }
  0x9e   : > { %1174 = vmatpush.msrb.mxu0 %v12910_v0  ;;  %1321 = vmatpush.msrb.mxu2 %v12904_v50 }
  0x9f   : > { %1235 = vmatpush.msrb.mxu1 %v1234_v2  ;;  %1364 = vmatpush.msrb.mxu3 %v12869_v53  ;;  %v12990_v2 = vsub.f32 %v462_v17, %v12966_v46  ;;  %v13004_v17 = vand.u32 4294901760, %v450_v24  ;;  %v1258_v42 = vand.u32 4294901760, %v1257_v6  ;;  %v1264_v6 = vand.u32 4294901760, %v1263_v52 }
  0xa0   : > { %1176 = vmatpush.msrb.mxu0 %v12922_v33  ;;  %1324 = vmatpush.msrb.mxu2 %v12916_v26  ;;  %v1287_v49 = vsub.f32 %v12998_v32, %v17518_v56 }
  0xa1   : > { %1241 = vmatpush.msrb.mxu1 %v1240_v58  ;;  %1366 = vmatpush.msrb.mxu3 %v12877_v25  ;;  %v1269_v58 = vsub.f32 %v12959_v35, %v17505_v43  ;;  %v17517_v10 = vand.u32 4294901760, %v12990_v2  ;;  %v1275_v43 = vsub.f32 %v12973_v59, %v17508_v36  ;;  %v13030_v21 = vsub.f32 %v450_v24, %v13004_v17 }
  0xa2   : > { %1178 = vmatpush.msrb.mxu0 %v12932_v55  ;;  %1327 = vmatpush.msrb.mxu2 %v12935_v57  ;;  %v1281_v36 = vsub.f32 %v12983_v27, %v17510_v62 }
  0xa3   : > { %1247 = vmatpush.msrb.mxu1 %v1246_v23  ;;  %1368 = vmatpush.msrb.mxu3 %v12890_v15  ;;  %v442_v23 = vld [vmem:[#allocation2 + $0x348] sm:$0xff]  ;;  %v1270_v52 = vand.u32 4294901760, %v1269_v58  ;;  %v1538_v24 = vsub.f32 %v12990_v2, %v17517_v10  ;;  %v1276_v62 = vand.u32 4294901760, %v1275_v43 }
  0xa4   : > { %1180 = vmatpush.msrb.mxu0 %v12944_v16  ;;  %1330 = vmatpush.msrb.mxu2 %v12947_v48  ;;  %v13037_v51 = vand.u32 4294901760, %v442_v23  ;;  %v434_v58 = vld [vmem:[#allocation2 + $0x308] sm:$0xff]  ;;  %v1282_v43 = vand.u32 4294901760, %v1281_v36  ;;  %v1288_v36 = vand.u32 4294901760, %v1287_v49 }
  0xa5   : > { %1253 = vmatpush.msrb.mxu1 %v1252_v7  ;;  %1370 = vmatpush.msrb.mxu3 %v12910_v0  ;;  %v438_v7 = vld [vmem:[#allocation2 + $0x328] sm:$0xff]  ;;  %v13065_v11 = vand.u32 4294901760, %v434_v58  ;;  %v1539_v38 = vand.u32 4294901760, %v1538_v24  ;;  %v17771_v24 = vand.u32 4294901760, %v13030_v21 }
  0xa6   : > { %1182 = vmatpush.msrb.mxu0 %v12955_v3  ;;  %1333 = vmatpush.msrb.mxu2 %v12959_v35  ;;  %v13052_v4 = vand.u32 4294901760, %v438_v7  ;;  %v430_v10 = vld [vmem:[#allocation2 + $0x2e8] sm:$0xff]  ;;  %v13063_v41 = vsub.f32 %v442_v23, %v13037_v51 }
  0xa7   : > { %1259 = vmatpush.msrb.mxu1 %v1258_v42  ;;  %1372 = vmatpush.msrb.mxu3 %v12922_v33  ;;  %v13045_v42 = vsub.f32 %v446_v5, %v13017_v20  ;;  %v426_v5 = vld [vmem:[#allocation2 + $0x2c8] sm:$0xff]  ;;  %v13078_v60 = vand.u32 4294901760, %v430_v10 }
  0xa8   : > { %1184 = vmatpush.msrb.mxu0 %v12969_v12  ;;  %1336 = vmatpush.msrb.mxu2 %v12973_v59  ;;  %v13076_v34 = vsub.f32 %v438_v7, %v13052_v4  ;;  %v13089_v7 = vsub.f32 %v434_v58, %v13065_v11 }
  0xa9   : > { %1265 = vmatpush.msrb.mxu1 %v1264_v6  ;;  %1374 = vmatpush.msrb.mxu3 %v12932_v55  ;;  %v17767_v6 = vand.u32 4294901760, %v13012_v44  ;;  %v13101_v58 = vsub.f32 %v430_v10, %v13078_v60 }
  0xaa   : > { %1391 = vmatpush.msra.mxu0 %v17766_v37  ;;  %1339 = vmatpush.msrb.mxu2 %v12983_v27  ;;  %v17768_v37 = vand.u32 4294901760, %v12824_v47  ;;  %v17770_v47 = vand.u32 4294901760, %v12835_v14  ;;  %v17772_v14 = vand.u32 4294901760, %v12846_v29  ;;  %v17774_v29 = vand.u32 4294901760, %v12860_v19 }
  0xab   : > { %1271 = vmatpush.msrb.mxu1 %v1270_v52  ;;  %1376 = vmatpush.msrb.mxu3 %v12944_v16  ;;  %v1544_v56 = vsub.f32 %v13012_v44, %v17767_v6  ;;  %v17769_v6 = vand.u32 4294901760, %v13025_v40  ;;  %v13091_v52 = vand.u32 4294901760, %v426_v5  ;;  %v17776_v19 = vand.u32 4294901760, %v12873_v9 }
  0xac   : > { %1395 = vmatpush.msra.mxu0 %v17768_v37  ;;  %1342 = vmatpush.msrb.mxu2 %v12998_v32  ;;  %v422_v37 = vld [vmem:[#allocation2 + $0x2a8] sm:$0xff]  ;;  %v17777_v9 = vand.u32 4294901760, %v12886_v28 }
  0xad   : > { %1277 = vmatpush.msrb.mxu1 %v1276_v62  ;;  %1378 = vmatpush.msrb.mxu3 %v12955_v3  ;;  %v1550_v23 = vsub.f32 %v13025_v40, %v17769_v6  ;;  %v1556_v62 = vsub.f32 %v13030_v21, %v17771_v24  ;;  %v1545_v49 = vand.u32 4294901760, %v1544_v56  ;;  %v17528_v6 = vand.u32 4294901760, %v13076_v34 }
  0xae   : > { %1399 = vmatpush.msra.mxu0 %v17770_v47  ;;  %1495 = vmatpush.msra.mxu2 %v12966_v46  ;;  %v17773_v47 = vand.u32 4294901760, %v13045_v42  ;;  %v13114_v10 = vsub.f32 %v426_v5, %v13091_v52 }
  0xaf   : > { %1283 = vmatpush.msrb.mxu1 %v1282_v43  ;;  %1380 = vmatpush.msrb.mxu3 %v12969_v12  ;;  %v418_v43 = vld [vmem:[#allocation2 + $0x288] sm:$0xff]  ;;  %v1551_v56 = vand.u32 4294901760, %v1550_v23  ;;  %v13103_v12 = vand.u32 4294901760, %v422_v37  ;;  %v1579_v23 = vand.u32 4294901760, %v13089_v7 }
  0xb0   : > { %1403 = vmatpush.msra.mxu0 %v17772_v14  ;;  %1497 = vmatpush.msra.mxu2 %v12985_v8  ;;  %v1562_v24 = vsub.f32 %v13045_v42, %v17773_v47  ;;  %v1557_v14 = vand.u32 4294901760, %v1556_v62  ;;  %v414_v8 = vld [vmem:[#allocation2 + $0x268] sm:$0xff]  ;;  %v13116_v47 = vand.u32 4294901760, %v418_v43  ;;  %v1574_v62 = vsub.f32 %v13076_v34, %v17528_v6 }
  0xb1   : > { %1540 = vmatpush.msra.mxu3 %v1539_v38  ;;  %1289 = vmatpush.msrb.mxu1 %v1288_v36  ;;  %v17775_v38 = vand.u32 4294901760, %v13063_v41  ;;  %v13127_v5 = vsub.f32 %v422_v37, %v13103_v12  ;;  %v17778_v6 = vand.u32 4294901760, %v12899_v54  ;;  %v17779_v54 = vand.u32 4294901760, %v12904_v50 }
  0xb2   : > { %1407 = vmatpush.msra.mxu0 %v17774_v29  ;;  %1499 = vmatpush.msra.mxu2 %v13000_v63  ;;  %v13129_v29 = vand.u32 4294901760, %v414_v8  ;;  %v13140_v37 = vsub.f32 %v418_v43, %v13116_v47  ;;  %v1575_v28 = vand.u32 4294901760, %v1574_v62 }
  0xb3   : > { %1458 = vmatpush.msra.mxu1 %v12797_v39  ;;  %1546 = vmatpush.msra.mxu3 %v1545_v49  ;;  %v1568_v36 = vsub.f32 %v13063_v41, %v17775_v38  ;;  %v1563_v39 = vand.u32 4294901760, %v1562_v24  ;;  %v1585_v49 = vand.u32 4294901760, %v13101_v58  ;;  %v410_v38 = vld [vmem:[#allocation2 + $0x248] sm:$0xff]  ;;  %v1580_v24 = vsub.f32 %v13089_v7, %v1579_v23 }
  0xb4   : > { %1411 = vmatpush.msra.mxu0 %v17776_v19  ;;  %1501 = vmatpush.msra.mxu2 %v13004_v17  ;;  %v406_v19 = vld [vmem:[#allocation2 + $0x228] sm:$0xff]  ;;  %v13153_v43 = vsub.f32 %v414_v8, %v13129_v29  ;;  %v17780_v8 = vand.u32 4294901760, %v12916_v26  ;;  %v17781_v26 = vand.u32 4294901760, %v12935_v57 }
  0xb5   : > { %1460 = vmatpush.msra.mxu1 %v12804_v13  ;;  %1552 = vmatpush.msra.mxu3 %v1551_v56  ;;  %v1569_v13 = vand.u32 4294901760, %v1568_v36  ;;  %v1591_v56 = vand.u32 4294901760, %v13114_v10  ;;  %v1597_v36 = vand.u32 4294901760, %v13127_v5 }
  0xb6   : > { %1415 = vmatpush.msra.mxu0 %v17777_v9  ;;  %1503 = vmatpush.msra.mxu2 %v13017_v20  ;;  %v1603_v9 = vand.u32 4294901760, %v13140_v37 }
  0xb7   : > { %1462 = vmatpush.msra.mxu1 %v12811_v61  ;;  %1558 = vmatpush.msra.mxu3 %v1557_v14  ;;  %v13145_v61 = vand.u32 4294901760, %v410_v38  ;;  %v1586_v14 = vsub.f32 %v13101_v58, %v1585_v49  ;;  %v1592_v62 = vsub.f32 %v13114_v10, %v1591_v56 }
  0xb8   : > { %1419 = vmatpush.msra.mxu0 %v17778_v6  ;;  %1505 = vmatpush.msra.mxu2 %v13037_v51  ;;  %v402_v6 = vld [vmem:[#allocation2 + $0x208] sm:$0xff] }
  0xb9   : > { %1464 = vmatpush.msra.mxu1 %v12821_v31  ;;  %1564 = vmatpush.msra.mxu3 %v1563_v39  ;;  %v13158_v31 = vand.u32 4294901760, %v406_v19  ;;  %v1581_v39 = vand.u32 4294901760, %v1580_v24  ;;  %v1587_v50 = vand.u32 4294901760, %v1586_v14  ;;  %v1609_v24 = vand.u32 4294901760, %v13153_v43 }
  0xba   : > { %1423 = vmatpush.msra.mxu0 %v17779_v54  ;;  %1507 = vmatpush.msra.mxu2 %v13052_v4  ;;  %v13176_v54 = vand.u32 4294901760, %v402_v6  ;;  %v17782_v14 = vand.u32 4294901760, %v12947_v48 }
  0xbb   : > { %1466 = vmatpush.msra.mxu1 %v12831_v18  ;;  %1570 = vmatpush.msra.mxu3 %v1569_v13  ;;  %v13169_v18 = vsub.f32 %v410_v38, %v13145_v61  ;;  %v1598_v13 = vsub.f32 %v13127_v5, %v1597_v36  ;;  %v1593_v38 = vand.u32 4294901760, %v1592_v62  ;;  %v17783_v62 = vand.u32 4294901760, %v12959_v35 }
  0xbc   : > { %1427 = vmatpush.msra.mxu0 %v17780_v8  ;;  %1509 = vmatpush.msra.mxu2 %v13065_v11  ;;  %v17784_v8 = vand.u32 4294901760, %v12973_v59 }
  0xbd   : > { %1468 = vmatpush.msra.mxu1 %v12842_v45  ;;  %1576 = vmatpush.msra.mxu3 %v1575_v28  ;;  %v13182_v45 = vsub.f32 %v406_v19, %v13158_v31  ;;  %v1604_v28 = vsub.f32 %v13140_v37, %v1603_v9  ;;  %v1615_v57 = vand.u32 4294901760, %v13169_v18  ;;  %v1610_v19 = vsub.f32 %v13153_v43, %v1609_v24 }
  0xbe   : > { %1431 = vmatpush.msra.mxu0 %v17781_v26  ;;  %1511 = vmatpush.msra.mxu2 %v13078_v60  ;;  %v17789_v26 = vld [vmem:[#allocation13_spill] sm:$0xff] }
  0xbf   : > { %1470 = vmatpush.msra.mxu1 %v12856_v22  ;;  %1582 = vmatpush.msra.mxu3 %v1581_v39  ;;  %v1599_v22 = vand.u32 4294901760, %v1598_v13  ;;  %v13197_v39 = vsub.f32 %v402_v6, %v13176_v54  ;;  %v1605_v48 = vand.u32 4294901760, %v1604_v28  ;;  %v1616_v6 = vsub.f32 %v13169_v18, %v1615_v57  ;;  %v17794_v28 = vld [vmem:[#allocation19_spill] sm:$0xff] }
  0xc0   : > { %1435 = vmatpush.msra.mxu0 %v17782_v14  ;;  %1513 = vmatpush.msra.mxu2 %v13091_v52  ;;  %v1611_v35 = vand.u32 4294901760, %v1610_v19  ;;  %v17796_v14 = vld [vmem:[#allocation16_spill] sm:$0xff] }
  0xc1   : > { %1472 = vmatpush.msra.mxu1 %v12869_v53  ;;  %1588 = vmatpush.msra.mxu3 %v1587_v50  ;;  %v1621_v53 = vand.u32 4294901760, %v13182_v45  ;;  %v17785_v50 = vand.u32 4294901760, %v12983_v27  ;;  %v1617_v13 = vand.u32 4294901760, %v1616_v6 }
  0xc2   : > { %1439 = vmatpush.msra.mxu0 %v17783_v62  ;;  %1515 = vmatpush.msra.mxu2 %v13103_v12 }
  0xc3   : > { %1474 = vmatpush.msra.mxu1 %v12877_v25  ;;  %1594 = vmatpush.msra.mxu3 %v1593_v38  ;;  %v1627_v25 = vand.u32 4294901760, %v13197_v39  ;;  %v1622_v59 = vsub.f32 %v13182_v45, %v1621_v53  ;;  %v17791_v38 = vld [vmem:[#allocation12_spill] sm:$0xff] }
  0xc4   : > { %1443 = vmatpush.msra.mxu0 %v17784_v8  ;;  %1517 = vmatpush.msra.mxu2 %v13116_v47  ;;  %v359_v8 = vld [vmem:[#allocation2 + $0xb0] sm:$0xff] }
  0xc5   : > { %1476 = vmatpush.msra.mxu1 %v12890_v15  ;;  %1600 = vmatpush.msra.mxu3 %v1599_v22  ;;  %v17786_v15 = vand.u32 4294901760, %v12998_v32  ;;  %v1623_v27 = vand.u32 4294901760, %v1622_v59  ;;  %v17787_v32 = vld [vmem:[#allocation15_spill] sm:$0xff]  ;;  %v363_v22 = vld [vmem:[#allocation2 + $0xd0] sm:$0xff]  ;;  %v17801_v59 = vld [vmem:[#allocation18_spill] sm:$0xff] }
  0xc6   : > { %1447 = vmatpush.msra.mxu0 %v17785_v50  ;;  %1519 = vmatpush.msra.mxu2 %v13129_v29 }
  0xc7   : > { %1478 = vmatpush.msra.mxu1 %v12910_v0  ;;  %1606 = vmatpush.msra.mxu3 %v1605_v48  ;;  %v1628_v0 = vsub.f32 %v13197_v39, %v1627_v25 }
  0xc8   : > { %1451 = vmatpush.msra.mxu0 %v17786_v15  ;;  %1521 = vmatpush.msra.mxu2 %v13145_v61 }
  0xc9   : > { %1480 = vmatpush.msra.mxu1 %v12922_v33  ;;  %1612 = vmatpush.msra.mxu3 %v1611_v35  ;;  %v1629_v33 = vand.u32 4294901760, %v1628_v0 }
  0xca   : > { %1190 = vmatmul.f32.vlgmr.msrb.gmra.mxu0 %v12709_v30  ;;  %1523 = vmatpush.msra.mxu2 %v13158_v31 }
  0xcb   : > { %1482 = vmatpush.msra.mxu1 %v12932_v55  ;;  %1638 = vmatpush.msrb.mxu0 %v12990_v2  ;;  %v17788_v55 = vand.u32 4294901760, %v12990_v2  ;;  %v17792_v2 = vand.u32 4294901760, %v13025_v40 }
  0xcc   : > { %1618 = vmatpush.msra.mxu3 %v1617_v13  ;;  %1345 = vmatmul.f32.vlgmr.msrb.gmra.mxu2 %v12647_v1 }
  0xcd   : > { %1641 = vmatpush.msrb.mxu0 %v13012_v44  ;;  %1484 = vmatpush.msra.mxu1 %v12944_v16  ;;  %v17790_v16 = vand.u32 4294901760, %v13012_v44  ;;  %v17795_v44 = vand.u32 4294901760, %v13030_v21 }
  0xce   : > { %1525 = vmatpush.msra.mxu2 %v13176_v54  ;;  %1624 = vmatpush.msra.mxu3 %v1623_v27  ;;  %v13402_v27 = vand.u32 4294901760, %v359_v8 }
  0xcf   : > { %1384 = vmatmul.f32.vlgmr.msrb.gmra.mxu3 %v17787_v32  ;;  %1644 = vmatpush.msrb.mxu0 %v13025_v40  ;;  %v17797_v40 = vand.u32 4294901760, %v13045_v42 }
  0xd0   : > { %1732 = vmatpush.msrb.mxu2 %v17788_v55  ;;  %1486 = vmatpush.msra.mxu1 %v12955_v3  ;;  %v17793_v3 = vld [vmem:[#allocation20_spill] sm:$0xff] }
  0xd1   : > { %1630 = vmatpush.msra.mxu3 %v1629_v33  ;;  %1291 = vmatmul.f32.vlgmr.msrb.gmra.mxu1 %v17789_v26 }
  0xd2   : > { %1647 = vmatpush.msrb.mxu0 %v13030_v21  ;;  %1736 = vmatpush.msrb.mxu2 %v17790_v16  ;;  %v17798_v21 = vand.u32 4294901760, %v13063_v41  ;;  %v351_v16 = vld [vmem:[#allocation2 + $0x70] sm:$0xff] }
  0xd3   : > { %1799 = vmatpush.msrb.mxu3 %v12966_v46  ;;  %1488 = vmatpush.msra.mxu1 %v17791_v38 }
  0xd4   : > { %1650 = vmatpush.msrb.mxu0 %v13045_v42  ;;  %1740 = vmatpush.msrb.mxu2 %v17792_v2 }
  0xd5   : > { %1691 = vmatpush.msrb.mxu1 %v12966_v46  ;;  %1801 = vmatpush.msrb.mxu3 %v17793_v3 }
  0xd6   : > { %1531 = vmatmul.f32.vlgmr.msra.gmra.mxu2 %v17794_v28  ;;  %1653 = vmatpush.msrb.mxu0 %v13063_v41  ;;  %v399_v41 = vld [vmem:[#allocation2 + $0x1f0] sm:$0xff] }
  0xd7   : > { %1693 = vmatpush.msrb.mxu1 %v17793_v3  ;;  %1744 = vmatpush.msrb.mxu2 %v17795_v44 }
  0xd8   : > { %1803 = vmatpush.msrb.mxu3 %v13000_v63  ;;  %1453 = vmatmul.f32.vlgmr.msra.gmra.mxu0 %v17789_v26 }
  0xd9   : > { %1632 = vmatmul.f32.vlgmr.msra.gmra.mxu3 %v17796_v14  ;;  %1656 = vmatpush.msrb.mxu0 %v13076_v34 }
  0xda   : > { %1695 = vmatpush.msrb.mxu1 %v13000_v63  ;;  %1748 = vmatpush.msrb.mxu2 %v17797_v40  ;;  %v17799_v63 = vand.u32 4294901760, %v13076_v34  ;;  %v395_v34 = vld [vmem:[#allocation2 + $0x1d0] sm:$0xff] }
  0xdb   : > { %1805 = vmatpush.msrb.mxu3 %v13004_v17  ;;  %1490 = vmatmul.f32.vlgmr.msra.gmra.mxu1 %v17789_v26  ;;  %v13296_v46 = vand.u32 4294901760, %v395_v34 }
  0xdc   : > { %1659 = vmatpush.msrb.mxu0 %v13089_v7  ;;  %1697 = vmatpush.msrb.mxu1 %v13004_v17  ;;  %v379_v7 = vld [vmem:[#allocation2 + $0x150] sm:$0xff] }
  0xdd   : > { %1752 = vmatpush.msrb.mxu2 %v17798_v21  ;;  %1807 = vmatpush.msrb.mxu3 %v13017_v20  ;;  %v347_v21 = vld [vmem:[#allocation2 + $0x50] sm:$0xff] }
  0xde   : > { %1662 = vmatpush.msrb.mxu0 %v13101_v58  ;;  %1699 = vmatpush.msrb.mxu1 %v13017_v20  ;;  %v13289_v20 = vand.u32 4294901760, %v399_v41 }
  0xdf   : > { %1756 = vmatpush.msrb.mxu2 %v17799_v63  ;;  %1809 = vmatpush.msrb.mxu3 %v13037_v51 }
  0xe0   : > { %1665 = vmatpush.msrb.mxu0 %v13114_v10  ;;  %1701 = vmatpush.msrb.mxu1 %v13037_v51  ;;  %v383_v51 = vld [vmem:[#allocation2 + $0x170] sm:$0xff]  ;;  %v17800_v10 = vld [vmem:[#allocation17_spill] sm:$0xff] }
  0xe1   : > { %1760 = vmatpush.msrb.mxu2 %v1579_v23  ;;  %1811 = vmatpush.msrb.mxu3 %v13052_v4 }
  0xe2   : > { %1668 = vmatpush.msrb.mxu0 %v13127_v5  ;;  %1703 = vmatpush.msrb.mxu1 %v13052_v4  ;;  %v391_v4 = vld [vmem:[#allocation2 + $0x1b0] sm:$0xff] }
  0xe3   : > { %1764 = vmatpush.msrb.mxu2 %v1585_v49  ;;  %1813 = vmatpush.msrb.mxu3 %v13065_v11  ;;  %v13303_v17 = vand.u32 4294901760, %v391_v4  ;;  %v375_v49 = vld [vmem:[#allocation2 + $0x130] sm:$0xff] }
  0xe4   : > { %1671 = vmatpush.msrb.mxu0 %v13140_v37  ;;  %1705 = vmatpush.msrb.mxu1 %v13065_v11  ;;  %v387_v11 = vld [vmem:[#allocation2 + $0x190] sm:$0xff] }
  0xe5   : > { %1768 = vmatpush.msrb.mxu2 %v1591_v56  ;;  %1815 = vmatpush.msrb.mxu3 %v13078_v60  ;;  %v13313_v42 = vand.u32 4294901760, %v387_v11  ;;  %v13327_v23 = vsub.f32 %v391_v4, %v13303_v17  ;;  %v371_v37 = vld [vmem:[#allocation2 + $0x110] sm:$0xff]  ;;  %v13427_v4 = vsub.f32 %v359_v8, %v13402_v27 }
  0xe6   : > { %1674 = vmatpush.msrb.mxu0 %v13153_v43  ;;  %1707 = vmatpush.msrb.mxu1 %v13078_v60  ;;  %v13306_v60 = vsub.f32 %v399_v41, %v13289_v20 }
  0xe7   : > { %1772 = vmatpush.msrb.mxu2 %v1597_v36  ;;  %1817 = vmatpush.msrb.mxu3 %v13091_v52  ;;  %v13338_v56 = vsub.f32 %v387_v11, %v13313_v42  ;;  %v13348_v36 = vand.u32 4294901760, %v375_v49  ;;  %v17539_v43 = vand.u32 4294901760, %v13327_v23  ;;  %v17531_v8 = vand.u32 4294901760, %v13427_v4 }
  0xe8   : > { %1677 = vmatpush.msrb.mxu0 %v13169_v18  ;;  %1709 = vmatpush.msrb.mxu1 %v13091_v52  ;;  %v13316_v52 = vsub.f32 %v395_v34, %v13296_v46  ;;  %v17542_v58 = vand.u32 4294901760, %v13306_v60  ;;  %v367_v18 = vld [vmem:[#allocation2 + $0xf0] sm:$0xff]  ;;  %v13424_v34 = vand.u32 4294901760, %v351_v16 }
  0xe9   : > { %1776 = vmatpush.msrb.mxu2 %v1603_v9  ;;  %1819 = vmatpush.msrb.mxu3 %v13103_v12  ;;  %v13369_v19 = vand.u32 4294901760, %v367_v18  ;;  %v1891_v62 = vsub.f32 %v13327_v23, %v17539_v43  ;;  %v13378_v48 = vsub.f32 %v375_v49, %v13348_v36 }
  0xea   : > { %1680 = vmatpush.msrb.mxu0 %v13182_v45  ;;  %1711 = vmatpush.msrb.mxu1 %v13103_v12  ;;  %v13323_v12 = vand.u32 4294901760, %v383_v51  ;;  %v17540_v5 = vand.u32 4294901760, %v13316_v52  ;;  %v17537_v45 = vand.u32 4294901760, %v13338_v56 }
  0xeb   : > { %1780 = vmatpush.msrb.mxu2 %v1609_v24  ;;  %1821 = vmatpush.msrb.mxu3 %v13116_v47  ;;  %v13361_v24 = vand.u32 4294901760, %v371_v37  ;;  %v13396_v15 = vsub.f32 %v367_v18, %v13369_v19  ;;  %v1892_v13 = vand.u32 4294901760, %v1891_v62  ;;  %v17533_v33 = vand.u32 4294901760, %v13378_v48  ;;  %v463_v18 = vld [vmem:[#allocation2 + $0x3f0] sm:$0xff] }
  0xec   : > { %1683 = vmatpush.msrb.mxu0 %v13197_v39  ;;  %1713 = vmatpush.msrb.mxu1 %v13116_v47  ;;  %v13334_v47 = vand.u32 4294901760, %v379_v7  ;;  %v13352_v9 = vsub.f32 %v383_v51, %v13323_v12  ;;  %v1897_v35 = vsub.f32 %v13338_v56, %v17537_v45  ;;  %v343_v51 = vld [vmem:[#allocation2 + $0x30] sm:$0xff] }
  0xed   : > { %1784 = vmatpush.msrb.mxu2 %v1615_v57  ;;  %1823 = vmatpush.msrb.mxu3 %v13129_v29  ;;  %v13391_v50 = vsub.f32 %v371_v37, %v13361_v24  ;;  %v17530_v40 = vand.u32 4294901760, %v13396_v15  ;;  %v1915_v41 = vsub.f32 %v13378_v48, %v17533_v33  ;;  %v13436_v37 = vand.u32 4294901760, %v347_v21 }
  0xee   : > { %1686 = vmatmul.f32.vlgmr.msrb.gmra.mxu0 %v17800_v10  ;;  %1715 = vmatpush.msrb.mxu1 %v13129_v29  ;;  %v1879_v29 = vsub.f32 %v13306_v60, %v17542_v58  ;;  %v13365_v57 = vsub.f32 %v379_v7, %v13334_v47  ;;  %v1898_v38 = vand.u32 4294901760, %v1897_v35  ;;  %v13447_v62 = vand.u32 4294901760, %v343_v51 }
  0xef   : > { %1836 = vmatpush.msra.mxu0 %v13289_v20  ;;  %1788 = vmatpush.msrb.mxu2 %v1621_v53  ;;  %v17536_v53 = vand.u32 4294901760, %v13352_v9  ;;  %v17532_v44 = vand.u32 4294901760, %v13391_v50 }
  0xf0   : > { %1825 = vmatpush.msrb.mxu3 %v13145_v61  ;;  %1717 = vmatpush.msrb.mxu1 %v13145_v61  ;;  %v1885_v61 = vsub.f32 %v13316_v52, %v17540_v5  ;;  %v1880_v39 = vand.u32 4294901760, %v1879_v29 }
  0xf1   : > { %1838 = vmatpush.msra.mxu0 %v13296_v46  ;;  %1792 = vmatpush.msrb.mxu2 %v1627_v25  ;;  %v17534_v25 = vand.u32 4294901760, %v13365_v57  ;;  %v1903_v0 = vsub.f32 %v13352_v9, %v17536_v53  ;;  %v1921_v49 = vsub.f32 %v13391_v50, %v17532_v44 }
  0xf2   : > { %1827 = vmatpush.msrb.mxu3 %v13158_v31  ;;  %1794 = vmatmul.f32.vlgmr.msrb.gmra.mxu2 %v17796_v14  ;;  %v1886_v6 = vand.u32 4294901760, %v1885_v61  ;;  %v1927_v61 = vsub.f32 %v13396_v15, %v17530_v40  ;;  %v451_v40 = vld [vmem:[#allocation2 + $0x390] sm:$0xff] }
  0xf3   : > { %1840 = vmatpush.msra.mxu0 %v13303_v17  ;;  %1979 = vmatpush.msra.mxu2 %v13306_v60  ;;  %v1909_v2 = vsub.f32 %v13365_v57, %v17534_v25  ;;  %v1904_v63 = vand.u32 4294901760, %v1903_v0  ;;  %v1922_v0 = vand.u32 4294901760, %v1921_v49  ;;  %v447_v25 = vld [vmem:[#allocation2 + $0x370] sm:$0xff] }
  0xf4   : > { %1719 = vmatpush.msrb.mxu1 %v13158_v31  ;;  %1829 = vmatpush.msrb.mxu3 %v13176_v54  ;;  %v13382_v31 = vand.u32 4294901760, %v363_v22  ;;  %v13509_v45 = vand.u32 4294901760, %v447_v25 }
  0xf5   : > { %1831 = vmatmul.f32.vlgmr.msrb.gmra.mxu3 %v17796_v14  ;;  %1842 = vmatpush.msra.mxu0 %v13313_v42  ;;  %v1910_v7 = vand.u32 4294901760, %v1909_v2  ;;  %v13465_v2 = vsub.f32 %v347_v21, %v13436_v37  ;;  %v17804_v14 = vand.u32 4294901760, %v13306_v60 }
  0xf6   : > { %1982 = vmatpush.msra.mxu2 %v13316_v52  ;;  %2032 = vmatpush.msra.mxu3 %v13289_v20  ;;  %v13408_v55 = vsub.f32 %v363_v22, %v13382_v31  ;;  %v339_v22 = vld [vmem:[#allocation2 + $0x10] sm:$0xff] }
  0xf7   : > { %1721 = vmatpush.msrb.mxu1 %v13176_v54  ;;  %1844 = vmatpush.msra.mxu0 %v13323_v12  ;;  %v355_v54 = vld [vmem:[#allocation2 + $0x90] sm:$0xff] }
  0xf8   : > { %1725 = vmatmul.f32.vlgmr.msrb.gmra.mxu1 %v17801_v59  ;;  %1985 = vmatpush.msra.mxu2 %v13327_v23  ;;  %v13414_v3 = vand.u32 4294901760, %v355_v54  ;;  %v17529_v11 = vand.u32 4294901760, %v13408_v55 }
  0xf9   : > { %1881 = vmatpush.msra.mxu1 %v1880_v39  ;;  %2034 = vmatpush.msra.mxu3 %v13296_v46  ;;  %v1916_v39 = vand.u32 4294901760, %v1915_v41  ;;  %v455_v41 = vld [vmem:[#allocation2 + $0x3b0] sm:$0xff] }
  0xfa   : > { %1846 = vmatpush.msra.mxu0 %v13334_v47  ;;  %1988 = vmatpush.msra.mxu2 %v13338_v56  ;;  %v13439_v29 = vsub.f32 %v355_v54, %v13414_v3  ;;  %v1933_v35 = vsub.f32 %v13408_v55, %v17529_v11  ;;  %v13458_v54 = vand.u32 4294901760, %v463_v18  ;;  %v13475_v11 = vsub.f32 %v343_v51, %v13447_v62 }
  0xfb   : > { %1887 = vmatpush.msra.mxu1 %v1886_v6  ;;  %2036 = vmatpush.msra.mxu3 %v13303_v17  ;;  %v13451_v6 = vsub.f32 %v351_v16, %v13424_v34  ;;  %v17541_v51 = vand.u32 4294901760, %v13465_v2  ;;  %v13492_v33 = vand.u32 4294901760, %v455_v41 }
  0xfc   : > { %1848 = vmatpush.msra.mxu0 %v13348_v36  ;;  %1991 = vmatpush.msra.mxu2 %v13352_v9  ;;  %v17535_v16 = vand.u32 4294901760, %v13439_v29 }
  0xfd   : > { %1893 = vmatpush.msra.mxu1 %v1892_v13  ;;  %2038 = vmatpush.msra.mxu3 %v13313_v42  ;;  %v459_v13 = vld [vmem:[#allocation2 + $0x3d0] sm:$0xff]  ;;  %v17538_v49 = vand.u32 4294901760, %v13451_v6  ;;  %v13517_v43 = vsub.f32 %v455_v41, %v13492_v33 }
  0xfe   : > { %1850 = vmatpush.msra.mxu0 %v13361_v24  ;;  %1994 = vmatpush.msra.mxu2 %v13365_v57  ;;  %v13477_v21 = vand.u32 4294901760, %v459_v13 }
  0xff   : > { %1899 = vmatpush.msra.mxu1 %v1898_v38  ;;  %2040 = vmatpush.msra.mxu3 %v13323_v12  ;;  %v13461_v38 = vand.u32 4294901760, %v339_v22 }
 0x100   : > { %1852 = vmatpush.msra.mxu0 %v13369_v19  ;;  %1997 = vmatpush.msra.mxu2 %v13378_v48  ;;  %17803 = vst [vmem:[#allocation20_spill] sm:$0xff] %v13477_v21 }
 0x101   : > { %1905 = vmatpush.msra.mxu1 %v1904_v63  ;;  %2042 = vmatpush.msra.mxu3 %v13334_v47  ;;  %17802 = vst [vmem:[#allocation12_spill] sm:$0xff] %v13461_v38  ;;  %v1928_v63 = vand.u32 4294901760, %v1927_v61  ;;  %v1934_v61 = vand.u32 4294901760, %v1933_v35  ;;  %v13490_v44 = vsub.f32 %v339_v22, %v13461_v38  ;;  %v17543_v22 = vand.u32 4294901760, %v13475_v11 }
 0x102   : > { %1854 = vmatpush.msra.mxu0 %v13382_v31  ;;  %2000 = vmatpush.msra.mxu2 %v13391_v50 }
 0x103   : > { %1911 = vmatpush.msra.mxu1 %v1910_v7  ;;  %2044 = vmatpush.msra.mxu3 %v13348_v36  ;;  %v1939_v7 = vsub.f32 %v13427_v4, %v17531_v8  ;;  %v1945_v8 = vsub.f32 %v13439_v29, %v17535_v16  ;;  %v13504_v16 = vsub.f32 %v459_v13, %v13477_v21  ;;  %v17546_v13 = vand.u32 4294901760, %v13490_v44 }
 0x104   : > { %1856 = vmatpush.msra.mxu0 %v13402_v27  ;;  %2003 = vmatpush.msra.mxu2 %v13396_v15 }
 0x105   : > { %1917 = vmatpush.msra.mxu1 %v1916_v39  ;;  %2046 = vmatpush.msra.mxu3 %v13361_v24  ;;  %v13482_v39 = vsub.f32 %v463_v18, %v13458_v54  ;;  %v13496_v18 = vand.u32 4294901760, %v451_v40  ;;  %v1940_v35 = vand.u32 4294901760, %v1939_v7  ;;  %v1946_v7 = vand.u32 4294901760, %v1945_v8 }
 0x106   : > { %1858 = vmatpush.msra.mxu0 %v13414_v3  ;;  %2006 = vmatpush.msra.mxu2 %v13408_v55  ;;  %v1969_v58 = vsub.f32 %v13490_v44, %v17546_v13 }
 0x107   : > { %1923 = vmatpush.msra.mxu1 %v1922_v0  ;;  %2048 = vmatpush.msra.mxu3 %v13369_v19  ;;  %v1951_v0 = vsub.f32 %v13451_v6, %v17538_v49  ;;  %v17545_v53 = vand.u32 4294901760, %v13482_v39  ;;  %v1957_v49 = vsub.f32 %v13465_v2, %v17541_v51  ;;  %v13522_v5 = vsub.f32 %v451_v40, %v13496_v18 }
 0x108   : > { %1860 = vmatpush.msra.mxu0 %v13424_v34  ;;  %2009 = vmatpush.msra.mxu2 %v13427_v4  ;;  %v1963_v51 = vsub.f32 %v13475_v11, %v17543_v22 }
 0x109   : > { %1929 = vmatpush.msra.mxu1 %v1928_v63  ;;  %2050 = vmatpush.msra.mxu3 %v13382_v31  ;;  %v443_v63 = vld [vmem:[#allocation2 + $0x350] sm:$0xff]  ;;  %v1952_v8 = vand.u32 4294901760, %v1951_v0  ;;  %v2220_v40 = vsub.f32 %v13482_v39, %v17545_v53  ;;  %v1958_v22 = vand.u32 4294901760, %v1957_v49 }
 0x10a   : > { %1862 = vmatpush.msra.mxu0 %v13436_v37  ;;  %2012 = vmatpush.msra.mxu2 %v13439_v29  ;;  %v13529_v41 = vand.u32 4294901760, %v443_v63  ;;  %v435_v0 = vld [vmem:[#allocation2 + $0x310] sm:$0xff]  ;;  %v1964_v49 = vand.u32 4294901760, %v1963_v51  ;;  %v1970_v51 = vand.u32 4294901760, %v1969_v58 }
 0x10b   : > { %1935 = vmatpush.msra.mxu1 %v1934_v61  ;;  %2052 = vmatpush.msra.mxu3 %v13402_v27  ;;  %v439_v61 = vld [vmem:[#allocation2 + $0x330] sm:$0xff]  ;;  %v13557_v28 = vand.u32 4294901760, %v435_v0  ;;  %v2221_v60 = vand.u32 4294901760, %v2220_v40  ;;  %v17809_v40 = vand.u32 4294901760, %v13522_v5 }
 0x10c   : > { %1864 = vmatpush.msra.mxu0 %v13447_v62  ;;  %2015 = vmatpush.msra.mxu2 %v13451_v6  ;;  %v13544_v10 = vand.u32 4294901760, %v439_v61  ;;  %v431_v53 = vld [vmem:[#allocation2 + $0x2f0] sm:$0xff]  ;;  %v13555_v59 = vsub.f32 %v443_v63, %v13529_v41 }
 0x10d   : > { %1941 = vmatpush.msra.mxu1 %v1940_v35  ;;  %2054 = vmatpush.msra.mxu3 %v13414_v3  ;;  %v13537_v35 = vsub.f32 %v447_v25, %v13509_v45  ;;  %v427_v25 = vld [vmem:[#allocation2 + $0x2d0] sm:$0xff]  ;;  %v13570_v32 = vand.u32 4294901760, %v431_v53 }
 0x10e   : > { %1866 = vmatpush.msra.mxu0 %v13461_v38  ;;  %2018 = vmatpush.msra.mxu2 %v13465_v2  ;;  %v13568_v26 = vsub.f32 %v439_v61, %v13544_v10  ;;  %v13581_v61 = vsub.f32 %v435_v0, %v13557_v28 }
 0x10f   : > { %1947 = vmatpush.msra.mxu1 %v1946_v7  ;;  %2056 = vmatpush.msra.mxu3 %v13424_v34  ;;  %v17805_v7 = vand.u32 4294901760, %v13504_v16  ;;  %v13593_v0 = vsub.f32 %v431_v53, %v13570_v32 }
 0x110   : > { %2073 = vmatpush.msrb.mxu0 %v17804_v14  ;;  %2021 = vmatpush.msra.mxu2 %v13475_v11  ;;  %v17806_v14 = vand.u32 4294901760, %v13316_v52  ;;  %v17808_v52 = vand.u32 4294901760, %v13327_v23  ;;  %v17810_v23 = vand.u32 4294901760, %v13338_v56  ;;  %v17812_v56 = vand.u32 4294901760, %v13352_v9 }
 0x111   : > { %1953 = vmatpush.msra.mxu1 %v1952_v8  ;;  %2058 = vmatpush.msra.mxu3 %v13436_v37  ;;  %v2226_v13 = vsub.f32 %v13504_v16, %v17805_v7  ;;  %v17807_v7 = vand.u32 4294901760, %v13517_v43  ;;  %v13583_v8 = vand.u32 4294901760, %v427_v25  ;;  %v17814_v9 = vand.u32 4294901760, %v13365_v57 }
 0x112   : > { %2077 = vmatpush.msrb.mxu0 %v17806_v14  ;;  %2024 = vmatpush.msra.mxu2 %v13490_v44  ;;  %v423_v14 = vld [vmem:[#allocation2 + $0x2b0] sm:$0xff]  ;;  %v17815_v57 = vand.u32 4294901760, %v13378_v48 }
 0x113   : > { %1959 = vmatpush.msra.mxu1 %v1958_v22  ;;  %2060 = vmatpush.msra.mxu3 %v13447_v62  ;;  %v2232_v63 = vsub.f32 %v13517_v43, %v17807_v7  ;;  %v2238_v22 = vsub.f32 %v13522_v5, %v17809_v40  ;;  %v2227_v58 = vand.u32 4294901760, %v2226_v13  ;;  %v17551_v7 = vand.u32 4294901760, %v13568_v26 }
 0x114   : > { %2081 = vmatpush.msrb.mxu0 %v17808_v52  ;;  %2177 = vmatpush.msrb.mxu2 %v13458_v54  ;;  %v17811_v52 = vand.u32 4294901760, %v13537_v35  ;;  %v13606_v53 = vsub.f32 %v427_v25, %v13583_v8 }
 0x115   : > { %1965 = vmatpush.msra.mxu1 %v1964_v49  ;;  %2062 = vmatpush.msra.mxu3 %v13461_v38  ;;  %v419_v49 = vld [vmem:[#allocation2 + $0x290] sm:$0xff]  ;;  %v2233_v13 = vand.u32 4294901760, %v2232_v63  ;;  %v13595_v38 = vand.u32 4294901760, %v423_v14  ;;  %v2261_v63 = vand.u32 4294901760, %v13581_v61 }
 0x116   : > { %2085 = vmatpush.msrb.mxu0 %v17810_v23  ;;  %2179 = vmatpush.msrb.mxu2 %v13477_v21  ;;  %v2244_v40 = vsub.f32 %v13537_v35, %v17811_v52  ;;  %v2239_v23 = vand.u32 4294901760, %v2238_v22  ;;  %v415_v21 = vld [vmem:[#allocation2 + $0x270] sm:$0xff]  ;;  %v13608_v52 = vand.u32 4294901760, %v419_v49  ;;  %v2256_v22 = vsub.f32 %v13568_v26, %v17551_v7 }
 0x117   : > { %2222 = vmatpush.msrb.mxu3 %v2221_v60  ;;  %1971 = vmatpush.msra.mxu1 %v1970_v51  ;;  %v17813_v60 = vand.u32 4294901760, %v13555_v59  ;;  %v13619_v25 = vsub.f32 %v423_v14, %v13595_v38  ;;  %v17816_v7 = vand.u32 4294901760, %v13391_v50  ;;  %v17817_v50 = vand.u32 4294901760, %v13396_v15 }
 0x118   : > { %2089 = vmatpush.msrb.mxu0 %v17812_v56  ;;  %2181 = vmatpush.msrb.mxu2 %v13492_v33  ;;  %v13621_v56 = vand.u32 4294901760, %v415_v21  ;;  %v13632_v14 = vsub.f32 %v419_v49, %v13608_v52  ;;  %v2257_v48 = vand.u32 4294901760, %v2256_v22 }
 0x119   : > { %2140 = vmatpush.msrb.mxu1 %v13289_v20  ;;  %2228 = vmatpush.msrb.mxu3 %v2227_v58  ;;  %v2250_v51 = vsub.f32 %v13555_v59, %v17813_v60  ;;  %v2245_v20 = vand.u32 4294901760, %v2244_v40  ;;  %v2267_v58 = vand.u32 4294901760, %v13593_v0  ;;  %v411_v60 = vld [vmem:[#allocation2 + $0x250] sm:$0xff]  ;;  %v2262_v40 = vsub.f32 %v13581_v61, %v2261_v63 }
 0x11a   : > { %2093 = vmatpush.msrb.mxu0 %v17814_v9  ;;  %2183 = vmatpush.msrb.mxu2 %v13496_v18  ;;  %v407_v9 = vld [vmem:[#allocation2 + $0x230] sm:$0xff]  ;;  %v13645_v49 = vsub.f32 %v415_v21, %v13621_v56  ;;  %v17818_v21 = vand.u32 4294901760, %v13408_v55  ;;  %v17819_v55 = vand.u32 4294901760, %v13427_v4 }
 0x11b   : > { %2142 = vmatpush.msrb.mxu1 %v13296_v46  ;;  %2234 = vmatpush.msrb.mxu3 %v2233_v13  ;;  %v2251_v46 = vand.u32 4294901760, %v2250_v51  ;;  %v2273_v13 = vand.u32 4294901760, %v13606_v53  ;;  %v2279_v51 = vand.u32 4294901760, %v13619_v25 }
 0x11c   : > { %2097 = vmatpush.msrb.mxu0 %v17815_v57  ;;  %2185 = vmatpush.msrb.mxu2 %v13509_v45  ;;  %v2285_v57 = vand.u32 4294901760, %v13632_v14 }
 0x11d   : > { %2144 = vmatpush.msrb.mxu1 %v13303_v17  ;;  %2240 = vmatpush.msrb.mxu3 %v2239_v23  ;;  %v13637_v17 = vand.u32 4294901760, %v411_v60  ;;  %v2268_v23 = vsub.f32 %v13593_v0, %v2267_v58  ;;  %v2274_v22 = vsub.f32 %v13606_v53, %v2273_v13 }
 0x11e   : > { %2101 = vmatpush.msrb.mxu0 %v17816_v7  ;;  %2187 = vmatpush.msrb.mxu2 %v13529_v41  ;;  %v403_v7 = vld [vmem:[#allocation2 + $0x210] sm:$0xff] }
 0x11f   : > { %2146 = vmatpush.msrb.mxu1 %v13313_v42  ;;  %2246 = vmatpush.msrb.mxu3 %v2245_v20  ;;  %v13650_v42 = vand.u32 4294901760, %v407_v9  ;;  %v2263_v20 = vand.u32 4294901760, %v2262_v40  ;;  %v2269_v15 = vand.u32 4294901760, %v2268_v23  ;;  %v2291_v40 = vand.u32 4294901760, %v13645_v49 }
 0x120   : > { %2105 = vmatpush.msrb.mxu0 %v17817_v50  ;;  %2189 = vmatpush.msrb.mxu2 %v13544_v10  ;;  %v13668_v50 = vand.u32 4294901760, %v403_v7  ;;  %v17820_v23 = vand.u32 4294901760, %v13439_v29 }
 0x121   : > { %2148 = vmatpush.msrb.mxu1 %v13323_v12  ;;  %2252 = vmatpush.msrb.mxu3 %v2251_v46  ;;  %v13661_v12 = vsub.f32 %v411_v60, %v13637_v17  ;;  %v2280_v46 = vsub.f32 %v13619_v25, %v2279_v51  ;;  %v2275_v60 = vand.u32 4294901760, %v2274_v22  ;;  %v17821_v22 = vand.u32 4294901760, %v13451_v6 }
 0x122   : > { %2109 = vmatpush.msrb.mxu0 %v17818_v21  ;;  %2191 = vmatpush.msrb.mxu2 %v13557_v28  ;;  %v17822_v21 = vand.u32 4294901760, %v13465_v2 }
 0x123   : > { %2150 = vmatpush.msrb.mxu1 %v13334_v47  ;;  %2258 = vmatpush.msrb.mxu3 %v2257_v48  ;;  %v13674_v47 = vsub.f32 %v407_v9, %v13650_v42  ;;  %v2286_v48 = vsub.f32 %v13632_v14, %v2285_v57  ;;  %v2297_v4 = vand.u32 4294901760, %v13661_v12  ;;  %v2292_v9 = vsub.f32 %v13645_v49, %v2291_v40 }
 0x124   : > { %2113 = vmatpush.msrb.mxu0 %v17819_v55  ;;  %2193 = vmatpush.msrb.mxu2 %v13570_v32  ;;  %v17827_v55 = vld [vmem:[#allocation13_spill] sm:$0xff] }
 0x125   : > { %2152 = vmatpush.msrb.mxu1 %v13348_v36  ;;  %2264 = vmatpush.msrb.mxu3 %v2263_v20  ;;  %v2281_v36 = vand.u32 4294901760, %v2280_v46  ;;  %v13689_v20 = vsub.f32 %v403_v7, %v13668_v50  ;;  %v2287_v29 = vand.u32 4294901760, %v2286_v48  ;;  %v2298_v7 = vsub.f32 %v13661_v12, %v2297_v4  ;;  %v17832_v48 = vld [vmem:[#allocation19_spill] sm:$0xff] }
 0x126   : > { %2117 = vmatpush.msrb.mxu0 %v17820_v23  ;;  %2195 = vmatpush.msrb.mxu2 %v13583_v8  ;;  %v2293_v6 = vand.u32 4294901760, %v2292_v9  ;;  %v17834_v23 = vld [vmem:[#allocation16_spill] sm:$0xff] }
 0x127   : > { %2154 = vmatpush.msrb.mxu1 %v13361_v24  ;;  %2270 = vmatpush.msrb.mxu3 %v2269_v15  ;;  %v2303_v24 = vand.u32 4294901760, %v13674_v47  ;;  %v17823_v15 = vand.u32 4294901760, %v13475_v11  ;;  %v2299_v46 = vand.u32 4294901760, %v2298_v7  ;;  %v368_v7 = vld [vmem:[#allocation2 + $0xf8] sm:$0xff] }
 0x128   : > { %2121 = vmatpush.msrb.mxu0 %v17821_v22  ;;  %2197 = vmatpush.msrb.mxu2 %v13595_v38  ;;  %v372_v22 = vld [vmem:[#allocation2 + $0x118] sm:$0xff] }
 0x129   : > { %2156 = vmatpush.msrb.mxu1 %v13369_v19  ;;  %2276 = vmatpush.msrb.mxu3 %v2275_v60  ;;  %v2309_v19 = vand.u32 4294901760, %v13689_v20  ;;  %v2304_v2 = vsub.f32 %v13674_v47, %v2303_v24  ;;  %v17829_v60 = vld [vmem:[#allocation12_spill] sm:$0xff] }
 0x12a   : > { %2125 = vmatpush.msrb.mxu0 %v17822_v21  ;;  %2199 = vmatpush.msrb.mxu2 %v13608_v52 }
 0x12b   : > { %2158 = vmatpush.msrb.mxu1 %v13382_v31  ;;  %2282 = vmatpush.msrb.mxu3 %v2281_v36  ;;  %v17824_v31 = vand.u32 4294901760, %v13490_v44  ;;  %v2305_v11 = vand.u32 4294901760, %v2304_v2  ;;  %v17825_v44 = vld [vmem:[#allocation15_spill] sm:$0xff] }
 0x12c   : > { %2129 = vmatpush.msrb.mxu0 %v17823_v15  ;;  %2201 = vmatpush.msrb.mxu2 %v13621_v56 }
 0x12d   : > { %2160 = vmatpush.msrb.mxu1 %v13402_v27  ;;  %2288 = vmatpush.msrb.mxu3 %v2287_v29  ;;  %v2310_v27 = vsub.f32 %v13689_v20, %v2309_v19 }
 0x12e   : > { %2133 = vmatpush.msrb.mxu0 %v17824_v31  ;;  %2203 = vmatpush.msrb.mxu2 %v13637_v17  ;;  %v364_v31 = vld [vmem:[#allocation2 + $0xd8] sm:$0xff] }
 0x12f   : > { %2162 = vmatpush.msrb.mxu1 %v13414_v3  ;;  %2294 = vmatpush.msrb.mxu3 %v2293_v6  ;;  %v2311_v3 = vand.u32 4294901760, %v2310_v27 }
 0x130   : > { %1872 = vmatmul.f32.vlgmr.msra.gmra.mxu0 %v12709_v30  ;;  %2205 = vmatpush.msrb.mxu2 %v13650_v42 }
 0x131   : > { %2164 = vmatpush.msrb.mxu1 %v13424_v34  ;;  %2320 = vmatpush.msra.mxu0 %v13482_v39  ;;  %v17826_v34 = vand.u32 4294901760, %v13482_v39  ;;  %v17830_v39 = vand.u32 4294901760, %v13517_v43 }
 0x132   : > { %2300 = vmatpush.msrb.mxu3 %v2299_v46  ;;  %2027 = vmatmul.f32.vlgmr.msra.gmra.mxu2 %v12647_v1  ;;  %v428_v1 = vld [vmem:[#allocation2 + $0x2d8] sm:$0xff] }
 0x133   : > { %2323 = vmatpush.msra.mxu0 %v13504_v16  ;;  %2166 = vmatpush.msrb.mxu1 %v13436_v37  ;;  %v17828_v37 = vand.u32 4294901760, %v13504_v16  ;;  %v17833_v16 = vand.u32 4294901760, %v13522_v5 }
 0x134   : > { %2207 = vmatpush.msrb.mxu2 %v13668_v50  ;;  %2306 = vmatpush.msrb.mxu3 %v2305_v11  ;;  %v13889_v11 = vand.u32 4294901760, %v368_v7 }
 0x135   : > { %2066 = vmatmul.f32.vlgmr.msra.gmra.mxu3 %v17825_v44  ;;  %2326 = vmatpush.msra.mxu0 %v13517_v43  ;;  %v17835_v43 = vand.u32 4294901760, %v13537_v35 }
 0x136   : > { %2414 = vmatpush.msra.mxu2 %v17826_v34  ;;  %2168 = vmatpush.msrb.mxu1 %v13447_v62  ;;  %v17831_v62 = vld [vmem:[#allocation20_spill] sm:$0xff]  ;;  %v360_v34 = vld [vmem:[#allocation2 + $0xb8] sm:$0xff] }
 0x137   : > { %2312 = vmatpush.msrb.mxu3 %v2311_v3  ;;  %1973 = vmatmul.f32.vlgmr.msra.gmra.mxu1 %v17827_v55 }
 0x138   : > { %2329 = vmatpush.msra.mxu0 %v13522_v5  ;;  %2418 = vmatpush.msra.mxu2 %v17828_v37  ;;  %v13758_v5 = vpop.f32.mrf.mxu1 }
 0x139   : > { %2481 = vmatpush.msra.mxu3 %v13458_v54  ;;  %2170 = vmatpush.msrb.mxu1 %v17829_v60  ;;  %17836 = vst [vmem:[#allocation12_spill] sm:$0xff] %v13758_v5 }
 0x13a   : > { %2332 = vmatpush.msra.mxu0 %v13537_v35  ;;  %2422 = vmatpush.msra.mxu2 %v17830_v39  ;;  %v17839_v35 = vand.u32 4294901760, %v13568_v26 }
 0x13b   : > { %2373 = vmatpush.msra.mxu1 %v13458_v54  ;;  %2483 = vmatpush.msra.mxu3 %v17831_v62  ;;  %v17837_v54 = vand.u32 4294901760, %v13555_v59 }
 0x13c   : > { %2213 = vmatmul.f32.vlgmr.msrb.gmra.mxu2 %v17832_v48  ;;  %2335 = vmatpush.msra.mxu0 %v13555_v59  ;;  %v13784_v59 = vpop.f32.mrf.mxu3 }
 0x13d   : > { %2375 = vmatpush.msra.mxu1 %v17831_v62  ;;  %2426 = vmatpush.msra.mxu2 %v17833_v16  ;;  %17841 = vst [vmem:[#allocation22_spill] sm:$0xff] %v13784_v59  ;;  %v13903_v62 = vand.u32 4294901760, %v364_v31 }
 0x13e   : > { %2485 = vmatpush.msra.mxu3 %v13492_v33  ;;  %2135 = vmatmul.f32.vlgmr.msrb.gmra.mxu0 %v17827_v55 }
 0x13f   : > { %2314 = vmatmul.f32.vlgmr.msrb.gmra.mxu3 %v17834_v23  ;;  %2338 = vmatpush.msra.mxu0 %v13568_v26  ;;  %v396_v26 = vld [vmem:[#allocation2 + $0x1d8] sm:$0xff] }
 0x140   : > { %2377 = vmatpush.msra.mxu1 %v13492_v33  ;;  %2430 = vmatpush.msra.mxu2 %v17835_v43  ;;  %v13765_v33 = vpop.f32.mrf.mxu0 }
 0x141   : > { %2487 = vmatpush.msra.mxu3 %v13496_v18  ;;  %2172 = vmatmul.f32.vlgmr.msrb.gmra.mxu1 %v17827_v55  ;;  %17838 = vst [vmem:[#allocation20_spill] sm:$0xff] %v13765_v33  ;;  %v440_v33 = vld [vmem:[#allocation2 + $0x338] sm:$0xff] }
 0x142   : > { %2341 = vmatpush.msra.mxu0 %v13581_v61  ;;  %2379 = vmatpush.msra.mxu1 %v13496_v18  ;;  %v13772_v18 = vpop.f32.mrf.mxu2  ;;  %v392_v61 = vld [vmem:[#allocation2 + $0x1b8] sm:$0xff]  ;;  %v14063_v48 = vand.u32 4294901760, %v440_v33 }
 0x143   : > { %2434 = vmatpush.msra.mxu2 %v17837_v54  ;;  %2489 = vmatpush.msra.mxu3 %v13509_v45  ;;  %17840 = vst [vmem:[#allocation21_spill] sm:$0xff] %v13772_v18  ;;  %v356_v54 = vld [vmem:[#allocation2 + $0x98] sm:$0xff] }
 0x144   : > { %2344 = vmatpush.msra.mxu0 %v13593_v0  ;;  %2381 = vmatpush.msra.mxu1 %v13509_v45  ;;  %v400_v45 = vld [vmem:[#allocation2 + $0x1f8] sm:$0xff]  ;;  %v13795_v0 = vpop.f32.mrf.mxu1  ;;  %v13838_v36 = vpop.f32.mrf.mxu3 }
 0x145   : > { %2438 = vmatpush.msra.mxu2 %v17839_v35  ;;  %2491 = vmatpush.msra.mxu3 %v13529_v41  ;;  %17842 = vst [vmem:[#allocation23_spill] sm:$0xff] %v13795_v0  ;;  %v17851_v35 = vld [vmem:[#allocation18_spill] sm:$0xff] }
 0x146   : > { %2347 = vmatpush.msra.mxu0 %v13606_v53  ;;  %2383 = vmatpush.msra.mxu1 %v13529_v41  ;;  %v13789_v41 = vand.u32 4294901760, %v400_v45  ;;  %17846 = vst [vmem:[#allocation26_spill] sm:$0xff] %v13838_v36 }
 0x147   : > { %2442 = vmatpush.msra.mxu2 %v2261_v63  ;;  %2493 = vmatpush.msra.mxu3 %v13544_v10 }
 0x148   : > { %2350 = vmatpush.msra.mxu0 %v13619_v25  ;;  %2385 = vmatpush.msra.mxu1 %v13544_v10  ;;  %v13793_v10 = vand.u32 4294901760, %v396_v26  ;;  %v13802_v63 = vpop.f32.mrf.mxu0  ;;  %v13810_v53 = vsub.f32 %v400_v45, %v13789_v41 }
 0x149   : > { %2446 = vmatpush.msra.mxu2 %v2267_v58  ;;  %2495 = vmatpush.msra.mxu3 %v13557_v28  ;;  %17843 = vst [vmem:[#allocation24_spill] sm:$0xff] %v13802_v63  ;;  %v384_v58 = vld [vmem:[#allocation2 + $0x178] sm:$0xff] }
 0x14a   : > { %2353 = vmatpush.msra.mxu0 %v13632_v14  ;;  %2387 = vmatpush.msra.mxu1 %v13557_v28  ;;  %v388_v28 = vld [vmem:[#allocation2 + $0x198] sm:$0xff]  ;;  %v13817_v25 = vpop.f32.mrf.mxu2  ;;  %v13826_v14 = vand.u32 4294901760, %v384_v58 }
 0x14b   : > { %2450 = vmatpush.msra.mxu2 %v2273_v13  ;;  %2497 = vmatpush.msra.mxu3 %v13570_v32  ;;  %17844 = vst [vmem:[#allocation25_spill] sm:$0xff] %v13817_v25  ;;  %v13822_v13 = vand.u32 4294901760, %v388_v28  ;;  %v448_v25 = vld [vmem:[#allocation2 + $0x378] sm:$0xff] }
 0x14c   : > { %2356 = vmatpush.msra.mxu0 %v13645_v49  ;;  %2389 = vmatpush.msra.mxu1 %v13570_v32  ;;  %v13807_v32 = vand.u32 4294901760, %v392_v61  ;;  %v13840_v9 = vpop.f32.mrf.mxu1  ;;  %v13896_v37 = vpop.f32.mrf.mxu3 }
 0x14d   : > { %2454 = vmatpush.msra.mxu2 %v2279_v51  ;;  %2499 = vmatpush.msra.mxu3 %v13583_v8  ;;  %v380_v51 = vld [vmem:[#allocation2 + $0x158] sm:$0xff]  ;;  %17847 = vst [vmem:[#allocation27_spill] sm:$0xff] %v13840_v9 }
 0x14e   : > { %2359 = vmatpush.msra.mxu0 %v13661_v12  ;;  %2391 = vmatpush.msra.mxu1 %v13583_v8  ;;  %v13815_v8 = vsub.f32 %v396_v26, %v13793_v10  ;;  %v13833_v49 = vsub.f32 %v392_v61, %v13807_v32  ;;  %v13845_v12 = vand.u32 4294901760, %v380_v51  ;;  %17850 = vst [vmem:[#allocation30_spill] sm:$0xff] %v13896_v37  ;;  %v13915_v61 = vand.u32 4294901760, %v360_v34  ;;  %v456_v37 = vld [vmem:[#allocation2 + $0x3b8] sm:$0xff] }
 0x14f   : > { %2458 = vmatpush.msra.mxu2 %v2285_v57  ;;  %2501 = vmatpush.msra.mxu3 %v13595_v38  ;;  %v17845_v57 = vld [vmem:[#allocation17_spill] sm:$0xff] }
 0x150   : > { %2362 = vmatpush.msra.mxu0 %v13674_v47  ;;  %2393 = vmatpush.msra.mxu1 %v13595_v38  ;;  %v17559_v38 = vand.u32 4294901760, %v13810_v53  ;;  %v13855_v29 = vpop.f32.mrf.mxu0  ;;  %v17555_v21 = vand.u32 4294901760, %v13833_v49  ;;  %v13879_v15 = vsub.f32 %v380_v51, %v13845_v12 }
 0x151   : > { %2462 = vmatpush.msra.mxu2 %v2291_v40  ;;  %2503 = vmatpush.msra.mxu3 %v13608_v52  ;;  %v17557_v40 = vand.u32 4294901760, %v13815_v8  ;;  %17848 = vst [vmem:[#allocation28_spill] sm:$0xff] %v13855_v29 }
 0x152   : > { %2365 = vmatpush.msra.mxu0 %v13689_v20  ;;  %2395 = vmatpush.msra.mxu1 %v13608_v52  ;;  %v376_v52 = vld [vmem:[#allocation2 + $0x138] sm:$0xff]  ;;  %v2561_v47 = vsub.f32 %v13810_v53, %v17559_v38  ;;  %v13871_v6 = vpop.f32.mrf.mxu2  ;;  %v13875_v20 = vand.u32 4294901760, %v372_v22  ;;  %v2573_v27 = vsub.f32 %v13833_v49, %v17555_v21  ;;  %v17552_v16 = vand.u32 4294901760, %v13879_v15 }
 0x153   : > { %2466 = vmatpush.msra.mxu2 %v2297_v4  ;;  %2505 = vmatpush.msra.mxu3 %v13621_v56  ;;  %v13848_v4 = vsub.f32 %v388_v28, %v13822_v13  ;;  %17849 = vst [vmem:[#allocation29_spill] sm:$0xff] %v13871_v6 }
 0x154   : > { %2368 = vmatmul.f32.vlgmr.msra.gmra.mxu0 %v17845_v57  ;;  %2397 = vmatpush.msra.mxu1 %v13621_v56  ;;  %v13853_v56 = vsub.f32 %v384_v58, %v13826_v14  ;;  %v2562_v46 = vand.u32 4294901760, %v2561_v47  ;;  %v1292_v60 = vpop.f32.mrf.mxu1  ;;  %v13907_v43 = vsub.f32 %v372_v22, %v13875_v20  ;;  %v2574_v26 = vand.u32 4294901760, %v2573_v27  ;;  %v352_v22 = vld [vmem:[#allocation2 + $0x78] sm:$0xff]  ;;  %v1385_v21 = vpop.f32.mrf.mxu3 }
 0x155   : > { %2518 = vmatpush.msrb.mxu0 %v13789_v41  ;;  %2470 = vmatpush.msra.mxu2 %v2303_v24  ;;  %v13863_v24 = vand.u32 4294901760, %v376_v52  ;;  %v13919_v58 = vsub.f32 %v368_v7, %v13889_v11  ;;  %v13931_v27 = vsub.f32 %v364_v31, %v13903_v62  ;;  %v13943_v31 = vsub.f32 %v360_v34, %v13915_v61 }
 0x156   : > { %2507 = vmatpush.msra.mxu3 %v13637_v17  ;;  %2399 = vmatpush.msra.mxu1 %v13637_v17  ;;  %v2567_v17 = vsub.f32 %v13815_v8, %v17557_v40  ;;  %v17553_v2 = vand.u32 4294901760, %v13853_v56  ;;  %v17558_v7 = vand.u32 4294901760, %v13907_v43  ;;  %v340_v40 = vld [vmem:[#allocation2 + $0x18] sm:$0xff] }
 0x157   : > { %2520 = vmatpush.msrb.mxu0 %v13793_v10  ;;  %2474 = vmatpush.msra.mxu2 %v2309_v19  ;;  %v17554_v19 = vand.u32 4294901760, %v13848_v4  ;;  %v13892_v3 = vsub.f32 %v376_v52, %v13863_v24  ;;  %v13923_v52 = vand.u32 4294901760, %v356_v54 }
 0x158   : > { %2509 = vmatpush.msra.mxu3 %v13650_v42  ;;  %2476 = vmatmul.f32.vlgmr.msra.gmra.mxu2 %v17834_v23  ;;  %v1191_v45 = vpop.f32.mrf.mxu0  ;;  %v2603_v34 = vsub.f32 %v13907_v43, %v17558_v7  ;;  %v17854_v7 = vand.u32 4294901760, %v13931_v27 }
 0x159   : > { %2522 = vmatpush.msrb.mxu0 %v13807_v32  ;;  %2661 = vmatpush.msrb.mxu2 %v13810_v53  ;;  %v2579_v39 = vsub.f32 %v13848_v4, %v17554_v19  ;;  %v17556_v28 = vand.u32 4294901760, %v13892_v3  ;;  %v1293_v51 = vadd.f32 %v1292_v60, %v1191_v45  ;;  %v348_v60 = vld [vmem:[#allocation2 + $0x58] sm:$0xff] }
 0x15a   : > { %2401 = vmatpush.msra.mxu1 %v13650_v42  ;;  %2511 = vmatpush.msra.mxu3 %v13668_v50  ;;  %v2568_v42 = vand.u32 4294901760, %v2567_v17  ;;  %v1346_v47 = vpop.f32.mrf.mxu2 }
 0x15b   : > { %2513 = vmatmul.f32.vlgmr.msra.gmra.mxu3 %v17834_v23  ;;  %2524 = vmatpush.msrb.mxu0 %v13822_v13  ;;  %v2580_v17 = vand.u32 4294901760, %v2579_v39  ;;  %v13939_v39 = vand.u32 4294901760, %v352_v22  ;;  %v1347_v19 = vadd.f32 %v1346_v47, %v1293_v51  ;;  %v436_v23 = vld [vmem:[#allocation2 + $0x318] sm:$0xff] }
 0x15c   : > { %2664 = vmatpush.msrb.mxu2 %v13815_v8  ;;  %2714 = vmatpush.msrb.mxu3 %v13789_v41  ;;  %v1491_v0 = vpop.f32.mrf.mxu1 }
 0x15d   : > { %2403 = vmatpush.msra.mxu1 %v13668_v50  ;;  %2526 = vmatpush.msrb.mxu0 %v13826_v14  ;;  %v2585_v50 = vsub.f32 %v13853_v56, %v17553_v2  ;;  %17852 = vst [vmem:[#allocation31_spill] sm:$0xff] %v13939_v39  ;;  %v344_v2 = vld [vmem:[#allocation2 + $0x38] sm:$0xff]  ;;  %v13967_v38 = vsub.f32 %v352_v22, %v13939_v39 }
 0x15e   : > { %2407 = vmatmul.f32.vlgmr.msra.gmra.mxu1 %v17851_v35  ;;  %2667 = vmatpush.msrb.mxu2 %v13833_v49  ;;  %v13959_v47 = vand.u32 4294901760, %v344_v2  ;;  %v1386_v51 = vadd.f32 %v1385_v21, %v1347_v19  ;;  %v2615_v22 = vsub.f32 %v13931_v27, %v17854_v7  ;;  %v13979_v21 = vand.u32 4294901760, %v340_v40 }
 0x15f   : > { %2563 = vmatpush.msrb.mxu1 %v2562_v46  ;;  %2716 = vmatpush.msrb.mxu3 %v13793_v10  ;;  %v2591_v46 = vsub.f32 %v13879_v15, %v17552_v16  ;;  %v2586_v45 = vand.u32 4294901760, %v2585_v50  ;;  %v17560_v16 = vand.u32 4294901760, %v13919_v58  ;;  %v13947_v50 = vand.u32 4294901760, %v348_v60 }
 0x160   : > { %2528 = vmatpush.msrb.mxu0 %v13845_v12  ;;  %2670 = vmatpush.msrb.mxu2 %v13848_v4  ;;  %v1454_v6 = vpop.f32.mrf.mxu0  ;;  %v14003_v9 = vsub.f32 %v340_v40, %v13979_v21 }
 0x161   : > { %2569 = vmatpush.msrb.mxu1 %v2568_v42  ;;  %2718 = vmatpush.msrb.mxu3 %v13807_v32  ;;  %v2597_v42 = vsub.f32 %v13892_v3, %v17556_v28  ;;  %17853 = vst [vmem:[#allocation32_spill] sm:$0xff] %v13947_v50  ;;  %v2592_v28 = vand.u32 4294901760, %v2591_v46  ;;  %v2609_v46 = vsub.f32 %v13919_v58, %v17560_v16  ;;  %v2604_v16 = vand.u32 4294901760, %v2603_v34 }
 0x162   : > { %2530 = vmatpush.msrb.mxu0 %v13863_v24  ;;  %2673 = vmatpush.msrb.mxu2 %v13853_v56  ;;  %v17855_v34 = vand.u32 4294901760, %v13943_v31  ;;  %v1455_v36 = vadd.f32 %v1454_v6, %v1386_v51  ;;  %v14008_v51 = vand.u32 4294901760, %v456_v37  ;;  %v1532_v5 = vpop.f32.mrf.mxu2 }
 0x163   : > { %2575 = vmatpush.msrb.mxu1 %v2574_v26  ;;  %2720 = vmatpush.msrb.mxu3 %v13822_v13  ;;  %v13950_v26 = vsub.f32 %v356_v54, %v13923_v52  ;;  %v464_v54 = vld [vmem:[#allocation2 + $0x3f8] sm:$0xff] }
 0x164   : > { %2532 = vmatpush.msrb.mxu0 %v13875_v20  ;;  %2676 = vmatpush.msrb.mxu2 %v13879_v15  ;;  %v13981_v19 = vand.u32 4294901760, %v464_v54  ;;  %v2621_v7 = vsub.f32 %v13943_v31, %v17855_v34  ;;  %v2616_v34 = vand.u32 4294901760, %v2615_v22  ;;  %v17857_v22 = vand.u32 4294901760, %v13967_v38 }
 0x165   : > { %2581 = vmatpush.msrb.mxu1 %v2580_v17  ;;  %2722 = vmatpush.msrb.mxu3 %v13826_v14  ;;  %v2598_v17 = vand.u32 4294901760, %v2597_v42  ;;  %v460_v42 = vld [vmem:[#allocation2 + $0x3d8] sm:$0xff]  ;;  %v1492_v59 = vadd.f32 %v1491_v0, %v1455_v36  ;;  %v14031_v0 = vsub.f32 %v456_v37, %v14008_v51  ;;  %v14033_v36 = vand.u32 4294901760, %v448_v25 }
 0x166   : > { %2534 = vmatpush.msrb.mxu0 %v13889_v11  ;;  %2679 = vmatpush.msrb.mxu2 %v13892_v3  ;;  %v13993_v29 = vand.u32 4294901760, %v460_v42  ;;  %v14006_v6 = vsub.f32 %v464_v54, %v13981_v19  ;;  %v2633_v40 = vsub.f32 %v13967_v38, %v17857_v22 }
 0x167   : > { %2587 = vmatpush.msrb.mxu1 %v2586_v45  ;;  %2724 = vmatpush.msrb.mxu3 %v13845_v12  ;;  %v13973_v45 = vsub.f32 %v348_v60, %v13947_v50  ;;  %v13986_v60 = vsub.f32 %v344_v2, %v13959_v47  ;;  %v17856_v2 = vand.u32 4294901760, %v13950_v26  ;;  %v1533_v35 = vadd.f32 %v1532_v5, %v1492_v59 }
 0x168   : > { %2536 = vmatpush.msrb.mxu0 %v13903_v62  ;;  %2682 = vmatpush.msrb.mxu2 %v13907_v43  ;;  %v14018_v54 = vsub.f32 %v460_v42, %v13993_v29  ;;  %v14058_v59 = vsub.f32 %v448_v25, %v14033_v36  ;;  %v17866_v5 = vand.u32 4294901760, %v14031_v0 }
 0x169   : > { %2593 = vmatpush.msrb.mxu1 %v2592_v28  ;;  %2726 = vmatpush.msrb.mxu3 %v13863_v24  ;;  %v2610_v28 = vand.u32 4294901760, %v2609_v46  ;;  %v452_v46 = vld [vmem:[#allocation2 + $0x398] sm:$0xff] }
 0x16a   : > { %2538 = vmatpush.msrb.mxu0 %v13915_v61  ;;  %2685 = vmatpush.msrb.mxu2 %v13919_v58  ;;  %17858 = vst [vmem:[#allocation33_spill] sm:$0xff] %v14018_v54  ;;  %v14020_v63 = vand.u32 4294901760, %v452_v46 }
 0x16b   : > { %2599 = vmatpush.msrb.mxu1 %v2598_v17  ;;  %2728 = vmatpush.msrb.mxu3 %v13875_v20  ;;  %v2627_v17 = vsub.f32 %v13950_v26, %v17856_v2  ;;  %v1687_v55 = vpop.f32.mrf.mxu0 }
 0x16c   : > { %2540 = vmatpush.msrb.mxu0 %v13923_v52  ;;  %2688 = vmatpush.msrb.mxu2 %v13931_v27  ;;  %v14043_v22 = vsub.f32 %v452_v46, %v14020_v63  ;;  %v17862_v46 = vand.u32 4294901760, %v14003_v9 }
 0x16d   : > { %2605 = vmatpush.msrb.mxu1 %v2604_v16  ;;  %2730 = vmatpush.msrb.mxu3 %v13889_v11  ;;  %v2622_v16 = vand.u32 4294901760, %v2621_v7  ;;  %v2628_v2 = vand.u32 4294901760, %v2627_v17  ;;  %v444_v7 = vld [vmem:[#allocation2 + $0x358] sm:$0xff]  ;;  %v17860_v17 = vand.u32 4294901760, %v13986_v60 }
 0x16e   : > { %2542 = vmatpush.msrb.mxu0 %v13939_v39  ;;  %2691 = vmatpush.msrb.mxu2 %v13943_v31  ;;  %v14045_v37 = vand.u32 4294901760, %v444_v7  ;;  %v2651_v42 = vsub.f32 %v14003_v9, %v17862_v46 }
 0x16f   : > { %2611 = vmatpush.msrb.mxu1 %v2610_v28  ;;  %2732 = vmatpush.msrb.mxu3 %v13903_v62  ;;  %v17859_v28 = vand.u32 4294901760, %v13973_v45 }
 0x170   : > { %2544 = vmatpush.msrb.mxu0 %v13947_v50  ;;  %2694 = vmatpush.msrb.mxu2 %v13950_v26  ;;  %v14071_v25 = vsub.f32 %v444_v7, %v14045_v37  ;;  %v2914_v7 = vsub.f32 %v14031_v0, %v17866_v5  ;;  %v17869_v5 = vand.u32 4294901760, %v13848_v4 }
 0x171   : > { %v2639_v18 = vsub.f32 %v13973_v45, %v17859_v28  ;;  %2617 = vmatpush.msrb.mxu1 %v2616_v34  ;;  %2734 = vmatpush.msrb.mxu3 %v13915_v61  ;;  %v2645_v28 = vsub.f32 %v13986_v60, %v17860_v17  ;;  %v2634_v34 = vand.u32 4294901760, %v2633_v40  ;;  %v1633_v17 = vpop.f32.mrf.mxu3 }
 0x172   : > { %2546 = vmatpush.msrb.mxu0 %v13959_v47  ;;  %2697 = vmatpush.msrb.mxu2 %v13967_v38  ;;  %v1634_v44 = vadd.f32 %v1633_v17, %v1533_v35  ;;  %v17867_v35 = vand.u32 4294901760, %v13833_v49  ;;  %v17868_v17 = vand.u32 4294901760, %v14043_v22  ;;  %v424_v49 = vld [vmem:[#allocation2 + $0x2b8] sm:$0xff] }
 0x173   : > { %2623 = vmatpush.msrb.mxu1 %v2622_v16  ;;  %2736 = vmatpush.msrb.mxu3 %v13923_v52  ;;  %v2640_v57 = vand.u32 4294901760, %v2639_v18  ;;  %v17861_v16 = vand.u32 4294901760, %v14006_v6  ;;  %v17863_v18 = vand.u32 4294901760, %v13810_v53  ;;  %v14073_v53 = vand.u32 4294901760, %v436_v23 }
 0x174   : > { %2548 = vmatpush.msrb.mxu0 %v13979_v21  ;;  %2700 = vmatpush.msrb.mxu2 %v13973_v45 }
 0x175   : > { %2629 = vmatpush.msrb.mxu1 %v2628_v2  ;;  %2738 = vmatpush.msrb.mxu3 %v13939_v39  ;;  %v2902_v40 = vsub.f32 %v14006_v6, %v17861_v16  ;;  %v2646_v2 = vand.u32 4294901760, %v2645_v28  ;;  %v17864_v16 = vand.u32 4294901760, %v14018_v54  ;;  %v17865_v28 = vand.u32 4294901760, %v13815_v8 }
 0x176   : > { %2755 = vmatpush.msra.mxu0 %v17863_v18  ;;  %2703 = vmatpush.msrb.mxu2 %v13986_v60  ;;  %v432_v18 = vld [vmem:[#allocation2 + $0x2f8] sm:$0xff]  ;;  %v1688_v39 = vadd.f32 %v1687_v55, %v1634_v44  ;;  %v14087_v8 = vsub.f32 %v440_v33, %v14063_v48  ;;  %v17568_v44 = vand.u32 4294901760, %v14071_v25  ;;  %v14097_v55 = vsub.f32 %v436_v23, %v14073_v53 }
 0x177   : > { %2635 = vmatpush.msrb.mxu1 %v2634_v34  ;;  %2740 = vmatpush.msrb.mxu3 %v13947_v50  ;;  %v2908_v46 = vsub.f32 %v14018_v54, %v17864_v16  ;;  %v2903_v34 = vand.u32 4294901760, %v2902_v40  ;;  %v2652_v50 = vand.u32 4294901760, %v2651_v42  ;;  %v1726_v16 = vpop.f32.mrf.mxu1  ;;  %v17569_v54 = vand.u32 4294901760, %v14058_v59 }
 0x178   : > { %2759 = vmatpush.msra.mxu0 %v17865_v28  ;;  %2706 = vmatpush.msrb.mxu2 %v14003_v9  ;;  %v2920_v40 = vsub.f32 %v14043_v22, %v17868_v17  ;;  %v1727_v33 = vadd.f32 %v1726_v16, %v1688_v39  ;;  %v1795_v28 = vpop.f32.mrf.mxu2  ;;  %v420_v17 = vld [vmem:[#allocation2 + $0x298] sm:$0xff]  ;;  %v17870_v23 = vand.u32 4294901760, %v13853_v56  ;;  %v2937_v4 = vand.u32 4294901760, %v14087_v8 }
 0x179   : > { %2641 = vmatpush.msrb.mxu1 %v2640_v57  ;;  %2742 = vmatpush.msrb.mxu3 %v13959_v47  ;;  %v14089_v57 = vand.u32 4294901760, %v432_v18  ;;  %v2909_v42 = vand.u32 4294901760, %v2908_v46  ;;  %v2915_v46 = vand.u32 4294901760, %v2914_v7  ;;  %v14114_v16 = vand.u32 4294901760, %v424_v49  ;;  %v416_v7 = vld [vmem:[#allocation2 + $0x278] sm:$0xff] }
 0x17a   : > { %2763 = vmatpush.msra.mxu0 %v17867_v35  ;;  %2859 = vmatpush.msra.mxu2 %v13981_v19  ;;  %v2926_v35 = vsub.f32 %v14058_v59, %v17569_v54  ;;  %v2943_v56 = vand.u32 4294901760, %v14097_v55  ;;  %v17872_v54 = vand.u32 4294901760, %v13892_v3 }
 0x17b   : > { %2647 = vmatpush.msrb.mxu1 %v2646_v2  ;;  %2744 = vmatpush.msrb.mxu3 %v13979_v21  ;;  %v14102_v2 = vand.u32 4294901760, %v428_v1  ;;  %v14112_v39 = vsub.f32 %v432_v18, %v14089_v57  ;;  %v1796_v18 = vadd.f32 %v1795_v28, %v1727_v33  ;;  %v14140_v33 = vand.u32 4294901760, %v416_v7 }
 0x17c   : > { %2767 = vmatpush.msra.mxu0 %v17869_v5  ;;  %2861 = vmatpush.msra.mxu2 %v13993_v29  ;;  %v2944_v3 = vsub.f32 %v14097_v55, %v2943_v56 }
 0x17d   : > { %2904 = vmatpush.msra.mxu3 %v2903_v34  ;;  %2653 = vmatpush.msrb.mxu1 %v2652_v50  ;;  %v2921_v50 = vand.u32 4294901760, %v2920_v40  ;;  %v2932_v34 = vsub.f32 %v14071_v25, %v17568_v44  ;;  %v14125_v5 = vsub.f32 %v428_v1, %v14102_v2  ;;  %v2927_v40 = vand.u32 4294901760, %v2926_v35  ;;  %v412_v44 = vld [vmem:[#allocation2 + $0x258] sm:$0xff] }
 0x17e   : > { %2771 = vmatpush.msra.mxu0 %v17870_v23  ;;  %2863 = vmatpush.msra.mxu2 %v14008_v51  ;;  %v14127_v23 = vand.u32 4294901760, %v420_v17  ;;  %v2949_v1 = vand.u32 4294901760, %v14112_v39  ;;  %v14155_v35 = vand.u32 4294901760, %v412_v44 }
 0x17f   : > { %2822 = vmatpush.msra.mxu1 %v13789_v41  ;;  %2910 = vmatpush.msra.mxu3 %v2909_v42  ;;  %v17871_v41 = vand.u32 4294901760, %v13879_v15  ;;  %v1832_v42 = vpop.f32.mrf.mxu3  ;;  %v14138_v15 = vsub.f32 %v424_v49, %v14114_v16  ;;  %v2955_v49 = vand.u32 4294901760, %v14125_v5 }
 0x180   : > { %2865 = vmatpush.msra.mxu2 %v14020_v63  ;;  %v14153_v28 = vsub.f32 %v420_v17, %v14127_v23  ;;  %v14166_v17 = vsub.f32 %v416_v7, %v14140_v33  ;;  %2554 = vmatmul.f32.vlgmr.msrb.gmra.mxu0 %v12709_v30  ;;  %v17886_v30 = vld [vmem:[#allocation15_spill] sm:$0xff] }
 0x181   : > { %2775 = vmatpush.msra.mxu0 %v17871_v41  ;;  %2824 = vmatpush.msra.mxu1 %v13793_v10  ;;  %v2938_v10 = vsub.f32 %v14087_v8, %v2937_v4  ;;  %v2961_v41 = vand.u32 4294901760, %v14138_v15 }
 0x182   : > { %2916 = vmatpush.msra.mxu3 %v2915_v46  ;;  %2867 = vmatpush.msra.mxu2 %v14033_v36  ;;  %v2933_v46 = vand.u32 4294901760, %v2932_v34  ;;  %v17874_v34 = vand.u32 4294901760, %v13919_v58  ;;  %v2945_v58 = vand.u32 4294901760, %v2944_v3  ;;  %v2967_v7 = vand.u32 4294901760, %v14153_v28 }
 0x183   : > { %2779 = vmatpush.msra.mxu0 %v17872_v54  ;;  %2826 = vmatpush.msra.mxu1 %v13807_v32  ;;  %v14146_v32 = vadd.f32 %v1832_v42, %v1796_v18  ;;  %v17873_v54 = vand.u32 4294901760, %v13907_v43  ;;  %v2939_v43 = vand.u32 4294901760, %v2938_v10  ;;  %v404_v18 = vld [vmem:[#allocation2 + $0x218] sm:$0xff]  ;;  %v14180_v10 = vsub.f32 %v412_v44, %v14155_v35 }
 0x184   : > { %2922 = vmatpush.msra.mxu3 %v2921_v50  ;;  %v408_v50 = vld [vmem:[#allocation2 + $0x238] sm:$0xff]  ;;  %2869 = vmatpush.msra.mxu2 %v14045_v37  ;;  %v17877_v44 = vand.u32 4294901760, %v13950_v26 }
 0x185   : > { %2783 = vmatpush.msra.mxu0 %v17873_v54  ;;  %2828 = vmatpush.msra.mxu1 %v13822_v13  ;;  %v2950_v13 = vsub.f32 %v14112_v39, %v2949_v1  ;;  %v14169_v42 = vand.u32 4294901760, %v408_v50  ;;  %v2962_v54 = vsub.f32 %v14138_v15, %v2961_v41 }
 0x186   : > { %2928 = vmatpush.msra.mxu3 %v2927_v40  ;;  %2871 = vmatpush.msra.mxu2 %v14063_v48  ;;  %v2956_v40 = vsub.f32 %v14125_v5, %v2955_v49 }
 0x187   : > { %2787 = vmatpush.msra.mxu0 %v17874_v34  ;;  %2830 = vmatpush.msra.mxu1 %v13826_v14  ;;  %v17875_v14 = vand.u32 4294901760, %v13931_v27  ;;  %v17876_v27 = vand.u32 4294901760, %v13943_v31  ;;  %v2951_v3 = vand.u32 4294901760, %v2950_v13  ;;  %v2973_v34 = vand.u32 4294901760, %v14166_v17 }
 0x188   : > { %2934 = vmatpush.msra.mxu3 %v2933_v46  ;;  %3243 = vrot.lane.b32.xlu1 %v14146_v32, %s12171_s19  ;;  %v14184_v46 = vand.u32 4294901760, %v404_v18  ;;  %v2957_v31 = vand.u32 4294901760, %v2956_v40  ;;  %v2979_v13 = vand.u32 4294901760, %v14180_v10  ;;  %v2963_v26 = vand.u32 4294901760, %v2962_v54 }
 0x189   : > { %2791 = vmatpush.msra.mxu0 %v17875_v14  ;;  %2832 = vmatpush.msra.mxu1 %v13845_v12  ;;  %v14195_v12 = vsub.f32 %v408_v50, %v14169_v42  ;;  %v17878_v50 = vand.u32 4294901760, %v13967_v38  ;;  %v2974_v14 = vsub.f32 %v14166_v17, %v2973_v34 }
 0x18a   : > { %2873 = vmatpush.msra.mxu2 %v14073_v53  ;;  %2940 = vmatpush.msra.mxu3 %v2939_v43  ;;  %v2968_v43 = vsub.f32 %v14153_v28, %v2967_v7  ;;  %v2980_v38 = vsub.f32 %v14180_v10, %v2979_v13 }
 0x18b   : > { %2795 = vmatpush.msra.mxu0 %v17876_v27  ;;  %2834 = vmatpush.msra.mxu1 %v13863_v24  ;;  %v14206_v24 = vsub.f32 %v404_v18, %v14184_v46  ;;  %v2975_v27 = vand.u32 4294901760, %v2974_v14  ;;  %v17892_v14 = vand.u32 4294901760, %v14043_v22 }
 0x18c   : > { %2875 = vmatpush.msra.mxu2 %v14089_v57  ;;  %2946 = vmatpush.msra.mxu3 %v2945_v58  ;;  %v17879_v58 = vand.u32 4294901760, %v13973_v45  ;;  %v2969_v18 = vand.u32 4294901760, %v2968_v43  ;;  %v17887_v43 = vand.u32 4294901760, %v14006_v6 }
 0x18d   : > { %2799 = vmatpush.msra.mxu0 %v17877_v44  ;;  %2836 = vmatpush.msra.mxu1 %v13875_v20  ;;  %v2985_v20 = vand.u32 4294901760, %v14195_v12  ;;  %v2991_v40 = vand.u32 4294901760, %v14206_v24 }
 0x18e   : > { %2877 = vmatpush.msra.mxu2 %v14102_v2  ;;  %2952 = vmatpush.msra.mxu3 %v2951_v3  ;;  %v2981_v3 = vand.u32 4294901760, %v2980_v38 }
 0x18f   : > { %2803 = vmatpush.msra.mxu0 %v17878_v50  ;;  %2838 = vmatpush.msra.mxu1 %v13889_v11  ;;  %v17880_v11 = vand.u32 4294901760, %v13986_v60  ;;  %v2986_v45 = vsub.f32 %v14195_v12, %v2985_v20  ;;  %v2992_v60 = vsub.f32 %v14206_v24, %v2991_v40  ;;  %v17888_v50 = vld [vmem:[#allocation13_spill] sm:$0xff] }
 0x190   : > { %2879 = vmatpush.msra.mxu2 %v14114_v16  ;;  %2958 = vmatpush.msra.mxu3 %v2957_v31  ;;  %v17885_v31 = vld [vmem:[#allocation32_spill] sm:$0xff] }
 0x191   : > { %2807 = vmatpush.msra.mxu0 %v17879_v58  ;;  %2840 = vmatpush.msra.mxu1 %v13903_v62  ;;  %v17881_v62 = vand.u32 4294901760, %v14003_v9  ;;  %v2987_v54 = vand.u32 4294901760, %v2986_v45  ;;  %v17883_v9 = vld [vmem:[#allocation14_spill] sm:$0xff]  ;;  %v2993_v44 = vand.u32 4294901760, %v2992_v60 }
 0x192   : > { %2881 = vmatpush.msra.mxu2 %v14127_v23  ;;  %2964 = vmatpush.msra.mxu3 %v2963_v26  ;;  %v17909_v60 = vld [vmem:[#allocation30_spill] sm:$0xff] }
 0x193   : > { %2811 = vmatpush.msra.mxu0 %v17880_v11  ;;  %2842 = vmatpush.msra.mxu1 %v13915_v61  ;;  %v17882_v61 = vld [vmem:[#allocation31_spill] sm:$0xff] }
 0x194   : > { %2883 = vmatpush.msra.mxu2 %v14140_v33  ;;  %2970 = vmatpush.msra.mxu3 %v2969_v18  ;;  %v17905_v18 = vld [vmem:[#allocation26_spill] sm:$0xff] }
 0x195   : > { %2815 = vmatpush.msra.mxu0 %v17881_v62  ;;  %2844 = vmatpush.msra.mxu1 %v13923_v52  ;;  %v17884_v52 = vld [vmem:[#allocation33_spill] sm:$0xff] }
 0x196   : > { %2885 = vmatpush.msra.mxu2 %v14155_v35  ;;  %2976 = vmatpush.msra.mxu3 %v2975_v27  ;;  %v17889_v26 = vand.u32 4294901760, %v17884_v52  ;;  %v17907_v27 = vld [vmem:[#allocation27_spill] sm:$0xff]  ;;  %v17908_v62 = vld [vmem:[#allocation29_spill] sm:$0xff] }
 0x197   : > { %3002 = vmatpush.msrb.mxu0 %v14006_v6  ;;  %2846 = vmatpush.msra.mxu1 %v17882_v61  ;;  %v17890_v6 = vand.u32 4294901760, %v14031_v0 }
 0x198   : > { %2887 = vmatpush.msra.mxu2 %v14169_v42  ;;  %2982 = vmatpush.msra.mxu3 %v2981_v3 }
 0x199   : > { %2709 = vmatmul.f32.vlgmr.msrb.gmra.mxu2 %v17883_v9  ;;  %3005 = vmatpush.msrb.mxu0 %v17884_v52 }
 0x19a   : > { %2848 = vmatpush.msra.mxu1 %v17885_v31  ;;  %2889 = vmatpush.msra.mxu2 %v14184_v46 }
 0x19b   : > { %2988 = vmatpush.msra.mxu3 %v2987_v54  ;;  %3008 = vmatpush.msrb.mxu0 %v14031_v0 }
 0x19c   : > { %2748 = vmatmul.f32.vlgmr.msrb.gmra.mxu3 %v17886_v30  ;;  %3096 = vmatpush.msrb.mxu2 %v17887_v43 }
 0x19d   : > { %2850 = vmatpush.msra.mxu1 %v13959_v47  ;;  %2994 = vmatpush.msra.mxu3 %v2993_v44  ;;  %v17891_v47 = vld [vmem:[#allocation19_spill] sm:$0xff] }
 0x19e   : > { %2655 = vmatmul.f32.vlgmr.msrb.gmra.mxu1 %v17888_v50  ;;  %3011 = vmatpush.msrb.mxu0 %v14043_v22 }
 0x19f   : > { %3100 = vmatpush.msrb.mxu2 %v17889_v26  ;;  %3163 = vmatpush.msrb.mxu3 %v13981_v19 }
 0x1a0   : > { %2852 = vmatpush.msra.mxu1 %v13979_v21  ;;  %3014 = vmatpush.msrb.mxu0 %v14058_v59  ;;  %v17893_v21 = vld [vmem:[#allocation16_spill] sm:$0xff] }
 0x1a1   : > { %3104 = vmatpush.msrb.mxu2 %v17890_v6  ;;  %3165 = vmatpush.msrb.mxu3 %v13993_v29 }
 0x1a2   : > { %3055 = vmatpush.msrb.mxu1 %v13981_v19  ;;  %2895 = vmatmul.f32.vlgmr.msra.gmra.mxu2 %v17891_v47  ;;  %v17894_v19 = vand.u32 4294901760, %v14058_v59 }
 0x1a3   : > { %3017 = vmatpush.msrb.mxu0 %v14071_v25  ;;  %3108 = vmatpush.msrb.mxu2 %v17892_v14 }
 0x1a4   : > { %3057 = vmatpush.msrb.mxu1 %v13993_v29  ;;  %3167 = vmatpush.msrb.mxu3 %v14008_v51  ;;  %v17895_v29 = vand.u32 4294901760, %v14071_v25 }
 0x1a5   : > { %2817 = vmatmul.f32.vlgmr.msra.gmra.mxu0 %v17888_v50  ;;  %2996 = vmatmul.f32.vlgmr.msra.gmra.mxu3 %v17893_v21 }
 0x1a6   : > { %3020 = vmatpush.msrb.mxu0 %v14087_v8  ;;  %3059 = vmatpush.msrb.mxu1 %v14008_v51 }
 0x1a7   : > { %3112 = vmatpush.msrb.mxu2 %v17894_v19  ;;  %3169 = vmatpush.msrb.mxu3 %v14020_v63 }
 0x1a8   : > { %2854 = vmatmul.f32.vlgmr.msra.gmra.mxu1 %v17888_v50  ;;  %3023 = vmatpush.msrb.mxu0 %v14097_v55 }
 0x1a9   : > { %3061 = vmatpush.msrb.mxu1 %v14020_v63  ;;  %3116 = vmatpush.msrb.mxu2 %v17895_v29 }
 0x1aa   : > { %3171 = vmatpush.msrb.mxu3 %v14033_v36  ;;  %3026 = vmatpush.msrb.mxu0 %v14112_v39  ;;  %v17899_v39 = vld [vmem:[#allocation12_spill] sm:$0xff] }
 0x1ab   : > { %3063 = vmatpush.msrb.mxu1 %v14033_v36  ;;  %3120 = vmatpush.msrb.mxu2 %v2937_v4  ;;  %v17897_v36 = vld [vmem:[#allocation18_spill] sm:$0xff]  ;;  %v17898_v4 = vld [vmem:[#allocation20_spill] sm:$0xff] }
 0x1ac   : > { %3173 = vmatpush.msrb.mxu3 %v14045_v37  ;;  %3029 = vmatpush.msrb.mxu0 %v14125_v5 }
 0x1ad   : > { %3065 = vmatpush.msrb.mxu1 %v14045_v37  ;;  %3124 = vmatpush.msrb.mxu2 %v2943_v56  ;;  %v1873_v51 = vpop.f32.mrf.mxu0 }
 0x1ae   : > { %3175 = vmatpush.msrb.mxu3 %v14063_v48  ;;  %3032 = vmatpush.msrb.mxu0 %v14138_v15 }
 0x1af   : > { %3067 = vmatpush.msrb.mxu1 %v14063_v48  ;;  %3128 = vmatpush.msrb.mxu2 %v2949_v1  ;;  %v17896_v48 = vld [vmem:[#allocation17_spill] sm:$0xff] }
 0x1b0   : > { %3177 = vmatpush.msrb.mxu3 %v14073_v53  ;;  %3035 = vmatpush.msrb.mxu0 %v14153_v28  ;;  %v17900_v1 = vld [vmem:[#allocation21_spill] sm:$0xff] }
 0x1b1   : > { %3069 = vmatpush.msrb.mxu1 %v14073_v53  ;;  %3132 = vmatpush.msrb.mxu2 %v2955_v49 }
 0x1b2   : > { %3179 = vmatpush.msrb.mxu3 %v14089_v57  ;;  %3038 = vmatpush.msrb.mxu0 %v14166_v17 }
 0x1b3   : > { %3071 = vmatpush.msrb.mxu1 %v14089_v57  ;;  %3136 = vmatpush.msrb.mxu2 %v2961_v41  ;;  %v17901_v41 = vld [vmem:[#allocation22_spill] sm:$0xff] }
 0x1b4   : > { %3181 = vmatpush.msrb.mxu3 %v14102_v2  ;;  %3041 = vmatpush.msrb.mxu0 %v14180_v10  ;;  %v1974_v63 = vpop.f32.mrf.mxu1 }
 0x1b5   : > { %3073 = vmatpush.msrb.mxu1 %v14102_v2  ;;  %3140 = vmatpush.msrb.mxu2 %v2967_v7  ;;  %v1975_v22 = vadd.f32 %v1974_v63, %v1873_v51  ;;  %v2028_v0 = vpop.f32.mrf.mxu2 }
 0x1b6   : > { %3183 = vmatpush.msrb.mxu3 %v14114_v16  ;;  %3044 = vmatpush.msrb.mxu0 %v14195_v12 }
 0x1b7   : > { %3075 = vmatpush.msrb.mxu1 %v14114_v16  ;;  %3144 = vmatpush.msrb.mxu2 %v2973_v34  ;;  %v2029_v37 = vadd.f32 %v2028_v0, %v1975_v22  ;;  %v611_v16 = vadd.f32 %v17899_v39, %v17898_v4  ;;  %v14413_v4 = vld [vmem:[#allocation7 + $0x10] sm:$0xff] }
 0x1b8   : > { %3185 = vmatpush.msrb.mxu3 %v14127_v23  ;;  %3047 = vmatpush.msrb.mxu0 %v14206_v24  ;;  %v2067_v59 = vpop.f32.mrf.mxu3 }
 0x1b9   : > { %3077 = vmatpush.msrb.mxu1 %v14127_v23  ;;  %3148 = vmatpush.msrb.mxu2 %v2979_v13  ;;  %v2068_v25 = vadd.f32 %v2067_v59, %v2029_v37  ;;  %v665_v15 = vadd.f32 %v17900_v1, %v611_v16  ;;  %v17903_v13 = vld [vmem:[#allocation23_spill] sm:$0xff]  ;;  %v14422_v1 = vld [vmem:[#allocation7 + $0x18] sm:$0xff] }
 0x1ba   : > { %3187 = vmatpush.msrb.mxu3 %v14140_v33  ;;  %3050 = vmatmul.f32.vlgmr.msrb.gmra.mxu0 %v17896_v48  ;;  %v14415_v16 = vld [vmem:[#allocation7 + $0x8] sm:$0xff] }
 0x1bb   : > { %3079 = vmatpush.msrb.mxu1 %v14140_v33  ;;  %3152 = vmatpush.msrb.mxu2 %v2985_v20  ;;  %v2136_v53 = vpop.f32.mrf.mxu0  ;;  %v704_v17 = vadd.f32 %v17901_v41, %v665_v15  ;;  %v17904_v20 = vld [vmem:[#allocation25_spill] sm:$0xff]  ;;  %v14424_v15 = vld [vmem:[#allocation7] sm:$0xff] }
 0x1bc   : > { %3189 = vmatpush.msrb.mxu3 %v14155_v35  ;;  %v2137_v8 = vadd.f32 %v2136_v53, %v2068_v25  ;;  %v11894_v25 = vld [vmem:[%s17473_s4 + $0x4] sm:$0xf] }
 0x1bd   : > { %3081 = vmatpush.msrb.mxu1 %v14155_v35  ;;  %3156 = vmatpush.msrb.mxu2 %v2991_v40  ;;  %v17906_v40 = vld [vmem:[#allocation28_spill] sm:$0xff]  ;;  %v3268_v53 = vsel %vm3266_vm0, %v11894_v25, 0 }
 0x1be   : > { %3191 = vmatpush.msrb.mxu3 %v14169_v42  ;;  %3158 = vmatmul.f32.vlgmr.msrb.gmra.mxu2 %v17893_v21  ;;  %v2173_v57 = vpop.f32.mrf.mxu1 }
 0x1bf   : > { %3083 = vmatpush.msrb.mxu1 %v14169_v42  ;;  %v2174_v55 = vadd.f32 %v2173_v57, %v2137_v8  ;;  %v2214_v2 = vpop.f32.mrf.mxu2  ;;  %v14408_v57 = vand.u32 4294901760, %v3268_v53 }
 0x1c0   : > { %3193 = vmatpush.msrb.mxu3 %v14184_v46 }
 0x1c1   : > { %3195 = vmatmul.f32.vlgmr.msrb.gmra.mxu3 %v17893_v21  ;;  %3085 = vmatpush.msrb.mxu1 %v14184_v46  ;;  %v2215_v56 = vadd.f32 %v2214_v2, %v2174_v55  ;;  %v17902_v46 = vld [vmem:[#allocation24_spill] sm:$0xff]  ;;  %v14411_v2 = vsub.f32 %v3268_v53, %v14408_v57 }
 0x1c2   : > { %3089 = vmatmul.f32.vlgmr.msrb.gmra.mxu1 %v17897_v36  ;;  %v2315_v5 = vpop.f32.mrf.mxu3  ;;  %v773_v34 = vadd.f32 %v17902_v46, %v704_v17 }
 0x1c3   : > { %v2316_v33 = vadd.f32 %v2315_v5, %v2215_v56  ;;  %v3258_v56 = vperm.slane %v14413_v4, 1  ;;  %v14419_v5 = vand.u32 4294901760, %v14411_v2 }
 0x1c4   : > { %v810_v24 = vadd.f32 %v17903_v13, %v773_v34 }
 0x1c6   : > { %v851_v58 = vadd.f32 %v17904_v20, %v810_v24 }
 0x1c8   : > { %v952_v38 = vadd.f32 %v17905_v18, %v851_v58 }
 0x1ca   : > { %v1006_v11 = vadd.f32 %v17906_v40, %v952_v38 }
 0x1cc   : > { %v1045_v45 = vadd.f32 %v17907_v27, %v1006_v11 }
 0x1ce   : > { %v1114_v3 = vadd.f32 %v17908_v62, %v1045_v45 }
 0x1d0   : > { %v14356_v61 = vadd.f32 %v17909_v60, %v1114_v3 }
 0x1d1   : > { %v2369_v23 = vpop.f32.mrf.mxu0 }
 0x1d2   : > { %v2370_v49 = vadd.f32 %v2369_v23, %v2316_v33  ;;  %v3259_v33 = vperm.slane %v14422_v1, 1 }
 0x1db   : > { %v2408_v28 = vpop.f32.mrf.mxu1  ;;  %v2477_v35 = vpop.f32.mrf.mxu2 }
 0x1dc   : > { %v2409_v42 = vadd.f32 %v2408_v28, %v2370_v49  ;;  %v3256_v49 = vperm.slane %v14424_v15, 1  ;;  %v3257_v28 = vperm.slane %v14415_v16, 1 }
 0x1de   : > { %v2478_v7 = vadd.f32 %v2477_v35, %v2409_v42  ;;  %v2514_v10 = vpop.f32.mrf.mxu3  ;;  %v3303_v42 = vsub.f32 %v14411_v2, %v14419_v5 }
 0x1e0   : > { %v14341_v12 = vadd.f32 %v2514_v10, %v2478_v7  ;;  %v14437_v18 = vand.u32 4294901760, %v3303_v42 }
 0x1e2   : > { %3245 = vrot.lane.b32.xlu1 %v14341_v12, %s12171_s19 }
 0x1ea   : > { %3218 = vrot.lane.b32.xlu1 %v14341_v12, %s12172_s22 }
 0x1f2   : > { %4471 = vrot.lane.b32.xlu1 %v14146_v32, %s12173_s23 }
 0x1fa   : > { %5100 = vrot.lane.b32.xlu1 %v14356_v61, %s12174_s29  ;;  %v3244_v8 = vpop.permute.xlu1 %3243 }
 0x1fd   : > { %v2555_v9 = vpop.f32.mrf.mxu0 }
 0x202   : > { %6329 = vrot.lane.b32.xlu1 %v14356_v61, %s12175_s8 }
 0x21b   : > { %v2656_v54 = vpop.f32.mrf.mxu1 }
 0x21c   : > { %v2657_v52 = vadd.f32 %v2656_v54, %v2555_v9  ;;  %v2710_v44 = vpop.f32.mrf.mxu2 }
 0x21e   : > { %v2711_v31 = vadd.f32 %v2710_v44, %v2657_v52 }
 0x21f   : > { %v2749_v30 = vpop.f32.mrf.mxu3 }
 0x220   : > { %v2750_v43 = vadd.f32 %v2749_v30, %v2711_v31 }
 0x222   : > { %v2818_v50 = vpop.f32.mrf.mxu0 }
 0x223   : > { %v2819_v26 = vadd.f32 %v2818_v50, %v2750_v43 }
 0x225   : > { %v2855_v6 = vpop.f32.mrf.mxu1  ;;  %v2896_v14 = vpop.f32.mrf.mxu2 }
 0x226   : > { %v2856_v47 = vadd.f32 %v2855_v6, %v2819_v26 }
 0x228   : > { %v2897_v21 = vadd.f32 %v2896_v14, %v2856_v47  ;;  %v2997_v19 = vpop.f32.mrf.mxu3 }
 0x22a   : > { %v2998_v48 = vadd.f32 %v2997_v19, %v2897_v21  ;;  %v3229_v21 = vperm.slane %v14424_v15, 0 }
 0x237   : > { %v3051_v29 = vpop.f32.mrf.mxu0 }
 0x238   : > { %v3052_v63 = vadd.f32 %v3051_v29, %v2998_v48 }
 0x23f   : > { %v3090_v51 = vpop.f32.mrf.mxu1 }
 0x240   : > { %v3091_v22 = vadd.f32 %v3090_v51, %v3052_v63  ;;  %v3230_v63 = vperm.slane %v14415_v16, 0 }
 0x241   : > { %v3159_v0 = vpop.f32.mrf.mxu2 }
 0x242   : > { %v3160_v36 = vadd.f32 %v3159_v0, %v3091_v22 }
 0x244   : > { %v3196_v37 = vpop.f32.mrf.mxu3 }
 0x245   : > { %v14362_v59 = vadd.f32 %v3196_v37, %v3160_v36 }
 0x247   : > { %3208 = vrot.lane.b32.xlu2 %v14362_v59, %s12172_s22  ;;  %3238 = vrot.lane.b32.xlu0 %v14362_v59, %s12171_s19 }
 0x248   : > { %6335 = vrot.lane.b32.xlu1 %v14362_v59, %s12175_s8 }
 0x24f   : > { %3214 = vrot.lane.b32.xlu2 %v14356_v61, %s12172_s22  ;;  %3241 = vrot.lane.b32.xlu0 %v14356_v61, %s12171_s19  ;;  %s335_s19 = scalar_lea.vmem %s17476_s7, %s12335_s1  ;;  %s320_s1 = sand.u32 1, %s12154_s25  }
 0x250   : > { %6964 = vrot.lane.b32.xlu1 %v14341_v12, %s12176_s9 }
 0x254   : > { %v3246_v39 = vpop.permute.xlu1 %3245 }
 0x255   : > { %v3249_v23 = vsel %vm3247_vm1, %v3244_v8, %v3246_v39 }
 0x256   : > { %v3262_v41 = vmul.f32 %v3258_v56, %v3249_v23 }
 0x257   : > { %4466 = vrot.lane.b32.xlu2 %v14362_v59, %s12173_s23  ;;  %3216 = vrot.lane.b32.xlu0 %v14146_v32, %s12172_s22  ;;  %s11891_s22 = sshll.u32 %s320_s1, 3 }
 0x258   : > { %7593 = vrot.lane.b32.xlu1 %v14146_v32, %s12177_s14  ;;  %v3278_v24 = vsel %vm3270_vm2, %v3262_v41, 0 }
 0x259   : > { %v14440_v27 = vand.u32 4294901760, %v3278_v24 }
 0x25b   : > { %v3617_v52 = vsub.f32 %v3278_v24, %v14440_v27 }
 0x25c   : > { %v3219_v42 = vpop.permute.xlu1 %3218 }
 0x25d   : > { %v3618_v26 = vand.u32 4294901760, %v3617_v52 }
 0x25f   : > { %4473 = vrot.lane.b32.xlu2 %v14341_v12, %s12173_s23  ;;  %4469 = vrot.lane.b32.xlu0 %v14356_v61, %s12173_s23  ;;  %v3619_v14 = vsub.f32 %v3617_v52, %v3618_v26  ;;  %s11908_s23 = sshll.u32 %s12241_s28, 3  ;;  %s11750_s28 = scalar_lea.sflag [#allocation4], %s320_s1 }
 0x260   : > { %8222 = vrot.lane.b32.xlu1 %v14356_v61, %s12178_s15 }
 0x261   : > { %v3620_v22 = vand.u32 4294901760, %v3619_v14 }
 0x267   : > { %5102 = vrot.lane.b32.xlu2 %v14146_v32, %s12174_s29  ;;  %5097 = vrot.lane.b32.xlu0 %v14362_v59, %s12174_s29 }
 0x268   : > { %8228 = vrot.lane.b32.xlu1 %v14362_v59, %s12178_s15 }
 0x26f   : > { %6331 = vrot.lane.b32.xlu2 %v14146_v32, %s12175_s8  ;;  %5104 = vrot.lane.b32.xlu0 %v14341_v12, %s12174_s29 }
 0x277   : > { %6960 = vrot.lane.b32.xlu2 %v14356_v61, %s12176_s9  ;;  %6333 = vrot.lane.b32.xlu0 %v14341_v12, %s12175_s8 }
 0x27f   : > { %6966 = vrot.lane.b32.xlu2 %v14362_v59, %s12176_s9  ;;  %6962 = vrot.lane.b32.xlu0 %v14146_v32, %s12176_s9  ;;  %s11764_s9 = scalar_lea.hbm %s17475_s6, %s11908_s23 }
 0x280   : > { %s11768_s17 = sshll.u32 %s11764_s9, 4  ;;  %s11769_s17 = int_to_ptr.hbm [resolvable:$true] %s11768_s17 }
 0x281   : > { %s12106_s20 = sshra.s32 %s11769_s17, 4  ;;  %s12107_s20 = int_to_ptr.hbm [resolvable:$true] %s12106_s20 }
 0x282   : > { %s12108_s21 = scalar_lea.hbm %s12107_s20, 8  ;;  %p12113_p3 = scmp.lt.s32.totalorder %s12107_s20, %s17475_s6 }
 0x283   : > { %p12109_p0 = scmp.ne.s32.totalorder %s12107_s20, %s12108_s21  ;;  %p12114_p4 = scmp.lt.s32.totalorder %s12112_s16, %s12108_s21 }
 0x285   : > { %p12110_p1 = pnand %p12109_p0, %p12258_p5  ;;  %p12115_p7 = por %p12114_p4, %p12113_p3 }
 0x287   : > { %7595 = vrot.lane.b32.xlu2 %v14341_v12, %s12177_s14  ;;  %7591 = vrot.lane.b32.xlu0 %v14356_v61, %s12177_s14  ;;  %p12111_p2 = pneg %p12110_p1 }
 0x289   : > { %p12116_p8 = pnand %p12115_p7, %p12111_p2 }
 0x28f   : > { %8224 = vrot.lane.b32.xlu2 %v14146_v32, %s12178_s15  ;;  %7597 = vrot.lane.b32.xlu0 %v14362_v59, %s12177_s14  ;;  %s322_s14 = scalar_lea.vmem [#allocation8], %s11891_s22 }
 0x297   : > { %8226 = vrot.lane.b32.xlu0 %v14341_v12, %s12178_s15  ;;  %s11766_s15 = sshll.u32 %s322_s14, 4  ;;  %s11767_s15 = int_to_ptr.vmem [resolvable:$true] %s11766_s15 }
 0x2a1   : > { %v14442_v3 = vpop.permute.xlu2 %3208 }
 0x2a2   : > { %v3223_v24 = vsel %vm3220_vm3, %v3219_v42, %v14442_v3 }
 0x2a9   : > { %v3215_v47 = vpop.permute.xlu2 %3214 }
 0x2aa   : > { %v3228_v29 = vsel %vm3220_vm3, %v14442_v3, %v3215_v47 }
 0x2ab   : > { %v3233_v0 = vmul.f32 %v3229_v21, %v3228_v29 }
 0x2ad   : > { %v3871_v25 = vsel %vm3270_vm2, %v3233_v0, 0 }
 0x2b9   : > { %v3239_v55 = vpop.permute.xlu0 %3238 }
 0x2ba   : > { %v3250_v35 = vsel %vm3247_vm1, %v3246_v39, %v3239_v55 }
 0x2bb   : > { %v3263_v46 = vmul.f32 %v3259_v33, %v3250_v35 }
 0x2bd   : > { %v3281_v11 = vsel %vm3270_vm2, %v3263_v46, 0 }
 0x2be   : > { %v14446_v60 = vand.u32 4294901760, %v3281_v11 }
 0x2c0   : > { %v3763_v30 = vsub.f32 %v3281_v11, %v14446_v60 }
 0x2c1   : > { %v3242_v17 = vpop.permute.xlu0 %3241 }
 0x2c2   : > { %v3248_v7 = vsel %vm3247_vm1, %v3242_v17, %v3244_v8  ;;  %v3255_v10 = vsel %vm3247_vm1, %v3239_v55, %v3242_v17  ;;  %v3764_v6 = vand.u32 4294901760, %v3763_v30  ;;  %v3897_v8 = vand.u32 4294901760, %v3871_v25  ;;  %v3237_v55 = vld [vmem:[%s17473_s4] sm:$0xf] }
 0x2c3   : > { %v3260_v34 = vmul.f32 %v3256_v49, %v3255_v10  ;;  %v3261_v13 = vmul.f32 %v3257_v28, %v3248_v7  ;;  %v3868_v56 = vsel %vm3266_vm0, %v3237_v55, 0  ;;  %v3231_v7 = vperm.slane %v14413_v4, 0 }
 0x2c4   : > { %v3765_v48 = vsub.f32 %v3763_v30, %v3764_v6  ;;  %v3924_v23 = vsub.f32 %v3871_v25, %v3897_v8  ;;  %v14479_v49 = vand.u32 4294901760, %v3868_v56 }
 0x2c5   : > { %v3272_v20 = vsel %vm3270_vm2, %v3260_v34, 0  ;;  %v3275_v58 = vsel %vm3270_vm2, %v3261_v13, 0  ;;  %v3232_v13 = vperm.slane %v14422_v1, 0 }
 0x2c6   : > { %v3298_v38 = vand.u32 4294901760, %v3272_v20  ;;  %v3444_v40 = vand.u32 4294901760, %v3275_v58  ;;  %v3766_v36 = vand.u32 4294901760, %v3765_v48  ;;  %v3925_v28 = vand.u32 4294901760, %v3924_v23 }
 0x2c7   : > { %v14485_v41 = vsub.f32 %v3868_v56, %v14479_v49  ;;  %v4486_v56 = vperm.slane %v14413_v4, 2 }
 0x2c8   : > { %v3325_v45 = vsub.f32 %v3272_v20, %v3298_v38  ;;  %v3471_v62 = vsub.f32 %v3275_v58, %v3444_v40  ;;  %3299 = vmatpush.msra.mxu0 %v3298_v38  ;;  %3375 = vmatpush.msra.mxu3 %v3298_v38  ;;  %v3926_v17 = vsub.f32 %v3924_v23, %v3925_v28 }
 0x2c9   : > { %3305 = vmatmul.f32.vlgmr.msra.gmra.mxu0 %v14437_v18  ;;  %3379 = vmatmul.f32.vlgmr.msra.gmra.mxu3 %v14419_v5  ;;  %v3217_v19 = vpop.permute.xlu0 %3216  ;;  %v14492_v34 = vand.u32 4294901760, %v14485_v41 }
 0x2ca   : > { %3352 = vmatpush.msra.mxu2 %v3325_v45  ;;  %v3326_v54 = vand.u32 4294901760, %v3325_v45  ;;  %v3472_v9 = vand.u32 4294901760, %v3471_v62  ;;  %v3221_v51 = vsel %vm3220_vm3, %v3215_v47, %v3217_v19  ;;  %v3222_v10 = vsel %vm3220_vm3, %v3217_v19, %v3219_v42 }
 0x2cb   : > { %3355 = vmatmul.f32.vlgmr.msra.gmra.mxu2 %v14411_v2  ;;  %v3234_v37 = vmul.f32 %v3230_v63, %v3221_v51  ;;  %v3927_v20 = vand.u32 4294901760, %v3926_v17  ;;  %v3235_v58 = vmul.f32 %v3231_v7, %v3222_v10  ;;  %v11895_v63 = vld [vmem:[%s17473_s4 + $0x8] sm:$0xf] }
 0x2cc   : > { %3445 = vmatpush.msrb.mxu2 %v3444_v40  ;;  %3401 = vmatpush.msrb.mxu0 %v3326_v54  ;;  %v3327_v44 = vsub.f32 %v3325_v45, %v3326_v54  ;;  %v3473_v31 = vsub.f32 %v3471_v62, %v3472_v9 }
 0x2cd   : > { %v3874_v53 = vsel %vm3270_vm2, %v3234_v37, 0  ;;  %v3877_v11 = vsel %vm3270_vm2, %v3235_v58, 0 }
 0x2ce   : > { %3547 = vmatpush.msra.mxu2 %v3472_v9  ;;  %3498 = vmatpush.msra.mxu0 %v3471_v62  ;;  %v3328_v43 = vand.u32 4294901760, %v3327_v44  ;;  %v3474_v50 = vand.u32 4294901760, %v3473_v31  ;;  %v4043_v39 = vand.u32 4294901760, %v3874_v53  ;;  %v4484_v44 = vperm.slane %v14424_v15, 2 }
 0x2d0   : > { %3329 = vmatpush.msra.mxu1 %v3328_v43  ;;  %3475 = vmatpush.msrb.mxu3 %v3474_v50  ;;  %v4070_v33 = vsub.f32 %v3874_v53, %v4043_v39  ;;  %v4472_v43 = vpop.permute.xlu1 %4471  ;;  %v4485_v50 = vperm.slane %v14415_v16, 2 }
 0x2d1   : > { %3331 = vmatmul.f32.vlgmr.msra.gmra.mxu1 %v14408_v57  ;;  %3403 = vmatmul.f32.vlgmr.msrb.gmra.mxu0 %v14408_v57  ;;  %v4470_v54 = vpop.permute.xlu0 %4469 }
 0x2d2   : > { %3423 = vmatpush.msrb.mxu1 %v3298_v38  ;;  %3477 = vmatmul.f32.vlgmr.msrb.gmra.mxu3 %v14408_v57  ;;  %v4071_v35 = vand.u32 4294901760, %v4070_v33  ;;  %v3902_v38 = vsub.f32 %v14485_v41, %v14492_v34 }
 0x2d3   : > { %3591 = vmatpush.msrb.mxu0 %v14440_v27  ;;  %3569 = vmatpush.msra.mxu3 %v3444_v40 }
 0x2d4   : > { %3521 = vmatpush.msra.mxu1 %v3444_v40  ;;  %3451 = vmatmul.f32.vlgmr.msrb.gmra.mxu2 %v14437_v18  ;;  %v4072_v46 = vsub.f32 %v4070_v33, %v4071_v35  ;;  %v3236_v40 = vmul.f32 %v3232_v13, %v3223_v24 }
 0x2d5   : > { %3667 = vmatpush.msrb.mxu3 %v14440_v27  ;;  %3644 = vmatpush.msrb.mxu2 %v3617_v52  ;;  %v4467_v52 = vpop.permute.xlu2 %4466 }
 0x2d6   : > { %v3880_v45 = vsel %vm3270_vm2, %v3236_v40, 0  ;;  %v4483_v31 = vsel %vm4475_vm4, %v4467_v52, %v4470_v54 }
 0x2d7   : > { %v4335_v62 = vand.u32 4294901760, %v3880_v45  ;;  %v4488_v47 = vmul.f32 %v4484_v44, %v4483_v31 }
 0x2d9   : > { %3425 = vmatmul.f32.vlgmr.msrb.gmra.mxu1 %v14408_v57  ;;  %3501 = vmatmul.f32.vlgmr.msra.gmra.mxu0 %v14411_v2  ;;  %v4498_v19 = vsel %vm3270_vm2, %v4488_v47, 0 }
 0x2da   : > { %3621 = vmatpush.msrb.mxu1 %v3620_v22  ;;  %3571 = vmatmul.f32.vlgmr.msra.gmra.mxu3 %v14408_v57  ;;  %v4524_v48 = vand.u32 4294901760, %v4498_v19  ;;  %v4495_v22 = vsel %vm3266_vm0, %v11895_v63, 0 }
 0x2db   : > { %3693 = vmatpush.msra.mxu0 %v3618_v26  ;;  %3767 = vmatpush.msra.mxu3 %v3766_v36  ;;  %v4476_v26 = vsel %vm4475_vm4, %v4470_v54, %v4472_v43  ;;  %v14533_v37 = vand.u32 4294901760, %v4495_v22 }
 0x2dc   : > { %3549 = vmatmul.f32.vlgmr.msra.gmra.mxu2 %v14408_v57  ;;  %v4489_v21 = vmul.f32 %v4485_v50, %v4476_v26  ;;  %v4551_v0 = vsub.f32 %v4498_v19, %v4524_v48  ;;  %v11896_v50 = vld [vmem:[%s17473_s4 + $0xc] sm:$0xf] }
 0x2dd   : > { %3737 = vmatpush.msra.mxu2 %v14446_v60  ;;  %v4474_v55 = vpop.permute.xlu2 %4473 }
 0x2de   : > { %v4501_v29 = vsel %vm3270_vm2, %v4489_v21, 0  ;;  %v4552_v25 = vand.u32 4294901760, %v4551_v0  ;;  %v4478_v17 = vsel %vm4475_vm4, %v4474_v55, %v4467_v52 }
 0x2df   : > { %v4670_v51 = vand.u32 4294901760, %v4501_v29 }
 0x2e1   : > { %3525 = vmatmul.f32.vlgmr.msra.gmra.mxu1 %v14419_v5  ;;  %3597 = vmatmul.f32.vlgmr.msrb.gmra.mxu0 %v14437_v18  ;;  %v4697_v36 = vsub.f32 %v4501_v29, %v4670_v51 }
 0x2e2   : > { %3715 = vmatpush.msra.mxu1 %v14440_v27  ;;  %3671 = vmatmul.f32.vlgmr.msrb.gmra.mxu3 %v14419_v5  ;;  %v14504_v27 = vand.u32 4294901760, %v3902_v38 }
 0x2e3   : > { %3790 = vmatpush.msrb.mxu0 %v3763_v30  ;;  %3861 = vmatpush.msrb.mxu3 %v14446_v60  ;;  %v4698_v53 = vand.u32 4294901760, %v4697_v36 }
 0x2e4   : > { %3647 = vmatmul.f32.vlgmr.msrb.gmra.mxu2 %v14411_v2 }
 0x2e5   : > { %3839 = vmatpush.msrb.mxu2 %v3764_v6 }
 0x2e9   : > { %3623 = vmatmul.f32.vlgmr.msrb.gmra.mxu1 %v14408_v57  ;;  %3695 = vmatmul.f32.vlgmr.msra.gmra.mxu0 %v14408_v57 }
 0x2ea   : > { %3813 = vmatpush.msrb.mxu1 %v14446_v60  ;;  %3769 = vmatmul.f32.vlgmr.msra.gmra.mxu3 %v14408_v57 }
 0x2eb   : > { %3898 = vmatpush.msra.mxu0 %v3897_v8  ;;  %3974 = vmatpush.msra.mxu3 %v3897_v8 }
 0x2ec   : > { %3743 = vmatmul.f32.vlgmr.msra.gmra.mxu2 %v14437_v18  ;;  %v4073_v18 = vand.u32 4294901760, %v4072_v46 }
 0x2ed   : > { %3951 = vmatpush.msra.mxu2 %v3924_v23  ;;  %v4477_v23 = vsel %vm4475_vm4, %v4472_v43, %v4474_v55 }
 0x2ee   : > { %v4490_v7 = vmul.f32 %v4486_v56, %v4477_v23  ;;  %v5118_v23 = vperm.slane %v14422_v1, 3 }
 0x2f0   : > { %v4504_v24 = vsel %vm3270_vm2, %v4490_v7, 0 }
 0x2f1   : > { %3717 = vmatmul.f32.vlgmr.msra.gmra.mxu1 %v14408_v57  ;;  %3793 = vmatmul.f32.vlgmr.msrb.gmra.mxu0 %v14411_v2  ;;  %v4189_v2 = vand.u32 4294901760, %v3877_v11 }
 0x2f2   : > { %3928 = vmatpush.msra.mxu1 %v3927_v20  ;;  %3863 = vmatmul.f32.vlgmr.msrb.gmra.mxu3 %v14408_v57 }
 0x2f3   : > { %4000 = vmatpush.msrb.mxu0 %v3925_v28  ;;  %4074 = vmatpush.msrb.mxu3 %v4073_v18  ;;  %v4216_v3 = vsub.f32 %v3877_v11, %v4189_v2  ;;  %v14565_v11 = vpop.permute.xlu0 %5097 }
 0x2f4   : > { %3841 = vmatmul.f32.vlgmr.msrb.gmra.mxu2 %v14408_v57  ;;  %v4362_v57 = vsub.f32 %v3880_v45, %v4335_v62  ;;  %v5101_v45 = vpop.permute.xlu1 %5100 }
 0x2f5   : > { %4044 = vmatpush.msrb.mxu2 %v4043_v39  ;;  %v4217_v60 = vand.u32 4294901760, %v4216_v3 }
 0x2f7   : > { %v4218_v9 = vsub.f32 %v4216_v3, %v4217_v60 }
 0x2f9   : > { %3817 = vmatmul.f32.vlgmr.msrb.gmra.mxu1 %v14419_v5  ;;  %3904 = vmatmul.f32.vlgmr.msra.gmra.mxu0 %v14504_v27  ;;  %v4363_v5 = vand.u32 4294901760, %v4362_v57  ;;  %v4219_v6 = vand.u32 4294901760, %v4218_v9 }
 0x2fa   : > { %4022 = vmatpush.msrb.mxu1 %v3897_v8  ;;  %3978 = vmatmul.f32.vlgmr.msra.gmra.mxu3 %v14492_v34  ;;  %v14538_v8 = vsub.f32 %v4495_v22, %v14533_v37 }
 0x2fb   : > { %4097 = vmatpush.msra.mxu0 %v4070_v33  ;;  %4168 = vmatpush.msra.mxu3 %v4043_v39  ;;  %v4364_v30 = vsub.f32 %v4362_v57, %v4363_v5  ;;  %v4699_v33 = vsub.f32 %v4697_v36, %v4698_v53 }
 0x2fc   : > { %3954 = vmatmul.f32.vlgmr.msra.gmra.mxu2 %v14485_v41  ;;  %v14545_v28 = vand.u32 4294901760, %v14538_v8 }
 0x2fd   : > { %4146 = vmatpush.msra.mxu2 %v4071_v35  ;;  %v4365_v14 = vand.u32 4294901760, %v4364_v30  ;;  %v4487_v35 = vperm.slane %v14422_v1, 2  ;;  %v4700_v10 = vand.u32 4294901760, %v4699_v33 }
 0x2fe   : > { %v4529_v46 = vsub.f32 %v14538_v8, %v14545_v28 }
 0x2ff   : > { %v4491_v13 = vmul.f32 %v4487_v35, %v4478_v17 }
 0x300   : > { %v14556_v20 = vand.u32 4294901760, %v4529_v46 }
 0x301   : > { %3930 = vmatmul.f32.vlgmr.msra.gmra.mxu1 %v14479_v49  ;;  %4002 = vmatmul.f32.vlgmr.msrb.gmra.mxu0 %v14479_v49  ;;  %v4507_v58 = vsel %vm3270_vm2, %v4491_v13, 0 }
 0x302   : > { %4120 = vmatpush.msra.mxu1 %v4043_v39  ;;  %4076 = vmatmul.f32.vlgmr.msrb.gmra.mxu3 %v14479_v49  ;;  %v4553_v39 = vsub.f32 %v4551_v0, %v4552_v25  ;;  %v4962_v18 = vand.u32 4294901760, %v4507_v58 }
 0x303   : > { %4190 = vmatpush.msrb.mxu0 %v4189_v2  ;;  %4266 = vmatpush.msrb.mxu3 %v4189_v2 }
 0x304   : > { %4050 = vmatmul.f32.vlgmr.msrb.gmra.mxu2 %v14504_v27  ;;  %v4554_v42 = vand.u32 4294901760, %v4553_v39 }
 0x305   : > { %4243 = vmatpush.msrb.mxu2 %v4216_v3  ;;  %v5114_v3 = vsel %vm5106_vm5, %v14565_v11, %v5101_v45 }
 0x309   : > { %4024 = vmatmul.f32.vlgmr.msrb.gmra.mxu1 %v14479_v49  ;;  %4100 = vmatmul.f32.vlgmr.msra.gmra.mxu0 %v14485_v41 }
 0x30a   : > { %4220 = vmatpush.msrb.mxu1 %v4219_v6  ;;  %4170 = vmatmul.f32.vlgmr.msra.gmra.mxu3 %v14479_v49  ;;  %v5126_v6 = vsel %vm3266_vm0, %v11896_v50, 0 }
 0x30b   : > { %4292 = vmatpush.msra.mxu0 %v4217_v60  ;;  %4366 = vmatpush.msra.mxu3 %v4365_v14  ;;  %v5116_v60 = vperm.slane %v14415_v16, 3  ;;  %v14596_v19 = vand.u32 4294901760, %v5126_v6 }
 0x30c   : > { %4148 = vmatmul.f32.vlgmr.msra.gmra.mxu2 %v14479_v49 }
 0x30d   : > { %4336 = vmatpush.msra.mxu2 %v4335_v62  ;;  %v14602_v63 = vsub.f32 %v5126_v6, %v14596_v19 }
 0x30f   : > { %v14612_v56 = vand.u32 4294901760, %v14602_v63 }
 0x311   : > { %4124 = vmatmul.f32.vlgmr.msra.gmra.mxu1 %v14492_v34  ;;  %4196 = vmatmul.f32.vlgmr.msrb.gmra.mxu0 %v14504_v27  ;;  %v5160_v46 = vsub.f32 %v14602_v63, %v14612_v56 }
 0x312   : > { %4314 = vmatpush.msra.mxu1 %v4189_v2  ;;  %4270 = vmatmul.f32.vlgmr.msrb.gmra.mxu3 %v14492_v34  ;;  %v5103_v2 = vpop.permute.xlu2 %5102 }
 0x313   : > { %4389 = vmatpush.msrb.mxu0 %v4362_v57  ;;  %4460 = vmatpush.msrb.mxu3 %v4335_v62 }
 0x314   : > { %4246 = vmatmul.f32.vlgmr.msrb.gmra.mxu2 %v14485_v41 }
 0x315   : > { %4438 = vmatpush.msrb.mxu2 %v4363_v5  ;;  %v5107_v5 = vsel %vm5106_vm5, %v5101_v45, %v5103_v2 }
 0x316   : > { %v5120_v44 = vmul.f32 %v5116_v60, %v5107_v5 }
 0x318   : > { %v5132_v30 = vsel %vm3270_vm2, %v5120_v44, 0 }
 0x319   : > { %4222 = vmatmul.f32.vlgmr.msrb.gmra.mxu1 %v14479_v49  ;;  %4294 = vmatmul.f32.vlgmr.msra.gmra.mxu0 %v14479_v49  ;;  %v14586_v26 = vand.u32 4294901760, %v5132_v30 }
 0x31a   : > { %4412 = vmatpush.msrb.mxu1 %v4335_v62  ;;  %4368 = vmatmul.f32.vlgmr.msra.gmra.mxu3 %v14479_v49  ;;  %v5115_v62 = vperm.slane %v14424_v15, 3 }
 0x31b   : > { %4525 = vmatpush.msra.mxu0 %v4524_v48  ;;  %4601 = vmatpush.msra.mxu3 %v4524_v48  ;;  %v14594_v14 = vsub.f32 %v5132_v30, %v14586_v26 }
 0x31c   : > { %4342 = vmatmul.f32.vlgmr.msra.gmra.mxu2 %v14504_v27  ;;  %v5119_v9 = vmul.f32 %v5115_v62, %v5114_v3 }
 0x31d   : > { %4578 = vmatpush.msra.mxu2 %v4551_v0 }
 0x31e   : > { %v5129_v31 = vsel %vm3270_vm2, %v5119_v9, 0 }
 0x31f   : > { %v14580_v43 = vand.u32 4294901760, %v5129_v31 }
 0x321   : > { %4316 = vmatmul.f32.vlgmr.msra.gmra.mxu1 %v14479_v49  ;;  %4392 = vmatmul.f32.vlgmr.msrb.gmra.mxu0 %v14485_v41  ;;  %v4816_v41 = vand.u32 4294901760, %v4504_v24  ;;  %v5182_v47 = vsub.f32 %v5129_v31, %v14580_v43 }
 0x322   : > { %4555 = vmatpush.msra.mxu1 %v4554_v42  ;;  %4462 = vmatmul.f32.vlgmr.msrb.gmra.mxu3 %v14479_v49 }
 0x323   : > { %4627 = vmatpush.msrb.mxu0 %v4552_v25  ;;  %4701 = vmatpush.msrb.mxu3 %v4700_v10  ;;  %v4843_v38 = vsub.f32 %v4504_v24, %v4816_v41  ;;  %v5183_v29 = vand.u32 4294901760, %v5182_v47 }
 0x324   : > { %4440 = vmatmul.f32.vlgmr.msrb.gmra.mxu2 %v14479_v49  ;;  %v4989_v49 = vsub.f32 %v4507_v58, %v4962_v18 }
 0x325   : > { %4671 = vmatpush.msrb.mxu2 %v4670_v51  ;;  %v4844_v40 = vand.u32 4294901760, %v4843_v38  ;;  %v5184_v0 = vsub.f32 %v5182_v47, %v5183_v29 }
 0x327   : > { %v4845_v27 = vsub.f32 %v4843_v38, %v4844_v40 }
 0x329   : > { %4416 = vmatmul.f32.vlgmr.msrb.gmra.mxu1 %v14492_v34  ;;  %4531 = vmatmul.f32.vlgmr.msra.gmra.mxu0 %v14556_v20  ;;  %v4990_v34 = vand.u32 4294901760, %v4989_v49  ;;  %v4846_v54 = vand.u32 4294901760, %v4845_v27 }
 0x32a   : > { %4649 = vmatpush.msrb.mxu1 %v4524_v48  ;;  %4605 = vmatmul.f32.vlgmr.msra.gmra.mxu3 %v14545_v28  ;;  %v5329_v48 = vand.u32 4294901760, %v14594_v14 }
 0x32b   : > { %4724 = vmatpush.msra.mxu0 %v4697_v36  ;;  %4795 = vmatpush.msra.mxu3 %v4670_v51  ;;  %v4991_v57 = vsub.f32 %v4989_v49, %v4990_v34  ;;  %v5117_v36 = vperm.slane %v14413_v4, 3  ;;  %v5185_v4 = vand.u32 4294901760, %v5184_v0 }
 0x32c   : > { %4581 = vmatmul.f32.vlgmr.msra.gmra.mxu2 %v14538_v8  ;;  %v5330_v39 = vsub.f32 %v14594_v14, %v5329_v48 }
 0x32d   : > { %4773 = vmatpush.msra.mxu2 %v4698_v53  ;;  %v4992_v52 = vand.u32 4294901760, %v4991_v57 }
 0x32e   : > { %v5331_v10 = vand.u32 4294901760, %v5330_v39 }
 0x331   : > { %4557 = vmatmul.f32.vlgmr.msra.gmra.mxu1 %v14533_v37  ;;  %4629 = vmatmul.f32.vlgmr.msrb.gmra.mxu0 %v14533_v37 }
 0x332   : > { %4747 = vmatpush.msra.mxu1 %v4670_v51  ;;  %4703 = vmatmul.f32.vlgmr.msrb.gmra.mxu3 %v14533_v37  ;;  %v5105_v51 = vpop.permute.xlu0 %5104 }
 0x333   : > { %4817 = vmatpush.msrb.mxu0 %v4816_v41  ;;  %4893 = vmatpush.msrb.mxu3 %v4816_v41  ;;  %v5108_v25 = vsel %vm5106_vm5, %v5103_v2, %v5105_v51  ;;  %v5109_v17 = vsel %vm5106_vm5, %v5105_v51, %v14565_v11 }
 0x334   : > { %4677 = vmatmul.f32.vlgmr.msrb.gmra.mxu2 %v14556_v20  ;;  %v5121_v42 = vmul.f32 %v5117_v36, %v5108_v25  ;;  %v5122_v13 = vmul.f32 %v5118_v23, %v5109_v17  ;;  %v5735_v36 = vsel %vm3270_vm2, %v14146_v32, 0 }
 0x335   : > { %4870 = vmatpush.msrb.mxu2 %v4843_v38 }
 0x336   : > { %v5135_v1 = vsel %vm3270_vm2, %v5121_v42, 0 }
 0x339   : > { %4651 = vmatmul.f32.vlgmr.msrb.gmra.mxu1 %v14533_v37  ;;  %4727 = vmatmul.f32.vlgmr.msra.gmra.mxu0 %v14538_v8 }
 0x33a   : > { %4847 = vmatpush.msrb.mxu1 %v4846_v54  ;;  %4797 = vmatmul.f32.vlgmr.msra.gmra.mxu3 %v14533_v37 }
 0x33b   : > { %4919 = vmatpush.msra.mxu0 %v4844_v40  ;;  %4993 = vmatpush.msra.mxu3 %v4992_v52 }
 0x33c   : > { %4775 = vmatmul.f32.vlgmr.msra.gmra.mxu2 %v14533_v37 }
 0x33d   : > { %4963 = vmatpush.msra.mxu2 %v4962_v18 }
 0x341   : > { %4751 = vmatmul.f32.vlgmr.msra.gmra.mxu1 %v14545_v28  ;;  %4823 = vmatmul.f32.vlgmr.msrb.gmra.mxu0 %v14556_v20 }
 0x342   : > { %4941 = vmatpush.msra.mxu1 %v4816_v41  ;;  %4897 = vmatmul.f32.vlgmr.msrb.gmra.mxu3 %v14545_v28  ;;  %v14629_v41 = vand.u32 4294901760, %v5160_v46 }
 0x343   : > { %5016 = vmatpush.msrb.mxu0 %v4989_v49  ;;  %5087 = vmatpush.msrb.mxu3 %v4962_v18  ;;  %v5447_v49 = vand.u32 4294901760, %v5135_v1 }
 0x344   : > { %4873 = vmatmul.f32.vlgmr.msrb.gmra.mxu2 %v14538_v8 }
 0x345   : > { %5065 = vmatpush.msrb.mxu2 %v4990_v34  ;;  %v5474_v27 = vsub.f32 %v5135_v1, %v5447_v49 }
 0x346   : > { %v3306_v21 = vpop.f32.mrf.mxu0 }
 0x347   : > { %v5475_v60 = vand.u32 4294901760, %v5474_v27 }
 0x349   : > { %4849 = vmatmul.f32.vlgmr.msrb.gmra.mxu1 %v14533_v37  ;;  %4921 = vmatmul.f32.vlgmr.msra.gmra.mxu0 %v14533_v37  ;;  %v5476_v52 = vsub.f32 %v5474_v27, %v5475_v60 }
 0x34a   : > { %5039 = vmatpush.msrb.mxu1 %v4962_v18  ;;  %4995 = vmatmul.f32.vlgmr.msra.gmra.mxu3 %v14533_v37  ;;  %v5138_v18 = vsel %vm3270_vm2, %v5122_v13, 0 }
 0x34b   : > { %5156 = vmatpush.msra.mxu0 %v14580_v43  ;;  %5232 = vmatpush.msra.mxu3 %v14580_v43  ;;  %v14633_v11 = vand.u32 4294901760, %v5138_v18 }
 0x34c   : > { %v3380_v22 = vpop.f32.mrf.mxu3  ;;  %4969 = vmatmul.f32.vlgmr.msra.gmra.mxu2 %v14556_v20 }
 0x34d   : > { %5209 = vmatpush.msra.mxu2 %v5182_v47  ;;  %v5620_v45 = vsub.f32 %v5138_v18, %v14633_v11  ;;  %v5477_v47 = vand.u32 4294901760, %v5476_v52 }
 0x34e   : > { %v3332_v53 = vpop.f32.mrf.mxu1  ;;  %v3356_v55 = vpop.f32.mrf.mxu2 }
 0x34f   : > { %v3333_v33 = vadd.f32 %v3332_v53, %v3306_v21  ;;  %v3404_v35 = vpop.f32.mrf.mxu0  ;;  %v5621_v54 = vand.u32 4294901760, %v5620_v45 }
 0x351   : > { %v3357_v7 = vadd.f32 %v3356_v55, %v3333_v33  ;;  %4943 = vmatmul.f32.vlgmr.msra.gmra.mxu1 %v14533_v37  ;;  %5019 = vmatmul.f32.vlgmr.msrb.gmra.mxu0 %v14538_v8  ;;  %v5622_v30 = vsub.f32 %v5620_v45, %v5621_v54  ;;  %v11897_v55 = vld [vmem:[%s17473_s4 + $0x10] sm:$0xf] }
 0x352   : > { %5186 = vmatpush.msra.mxu1 %v5185_v4  ;;  %5089 = vmatmul.f32.vlgmr.msrb.gmra.mxu3 %v14533_v37  ;;  %v5731_v32 = vsel %vm3266_vm0, %v11897_v55, 0  ;;  %v14739_v55 = vpop.permute.xlu1 %6329 }
 0x353   : > { %v3381_v24 = vadd.f32 %v3380_v22, %v3357_v7  ;;  %5258 = vmatpush.msrb.mxu0 %v5183_v29  ;;  %5332 = vmatpush.msrb.mxu3 %v5331_v10  ;;  %v14677_v42 = vand.u32 4294901760, %v5731_v32 }
 0x354   : > { %5067 = vmatmul.f32.vlgmr.msrb.gmra.mxu2 %v14533_v37 }
 0x355   : > { %v14624_v20 = vadd.f32 %v3404_v35, %v3381_v24  ;;  %5302 = vmatpush.msrb.mxu2 %v14586_v26  ;;  %v3478_v58 = vpop.f32.mrf.mxu3 }
 0x356   : > { %v14627_v8 = vpop.f32.mrf.mxu1 }
 0x357   : > { %v3502_v38 = vpop.f32.mrf.mxu0  ;;  %v3452_v40 = vpop.f32.mrf.mxu2  ;;  %v3427_v18 = vadd.f32 %v14627_v8, %v14624_v20 }
 0x358   : > { %v3479_v34 = vadd.f32 %v3478_v58, %v3452_v40  ;;  %v14683_v58 = vsub.f32 %v5731_v32, %v14677_v42 }
 0x359   : > { %5043 = vmatmul.f32.vlgmr.msrb.gmra.mxu1 %v14545_v28  ;;  %5162 = vmatmul.f32.vlgmr.msra.gmra.mxu0 %v14629_v41 }
 0x35a   : > { %5280 = vmatpush.msrb.mxu1 %v14580_v43  ;;  %5236 = vmatmul.f32.vlgmr.msra.gmra.mxu3 %v14612_v56  ;;  %v3503_v37 = vadd.f32 %v3502_v38, %v3479_v34 }
 0x35b   : > { %5355 = vmatpush.msra.mxu0 %v14594_v14  ;;  %5426 = vmatpush.msra.mxu3 %v14586_v26 }
 0x35c   : > { %5212 = vmatmul.f32.vlgmr.msra.gmra.mxu2 %v14602_v63 }
 0x35d   : > { %5404 = vmatpush.msra.mxu2 %v5329_v48  ;;  %v3572_v2 = vpop.f32.mrf.mxu3  ;;  %v5733_v48 = vsel %vm3270_vm2, %v14356_v61, 0  ;;  %v14669_v61 = vand.u32 4294901760, %v5735_v36 }
 0x35e   : > { %v3526_v28 = vpop.f32.mrf.mxu1  ;;  %v14662_v53 = vand.u32 4294901760, %v5733_v48 }
 0x35f   : > { %v3527_v62 = vadd.f32 %v3526_v28, %v3503_v37  ;;  %v3598_v3 = vpop.f32.mrf.mxu0  ;;  %v3550_v57 = vpop.f32.mrf.mxu2  ;;  %v5929_v4 = vsub.f32 %v5735_v36, %v14669_v61 }
 0x360   : > { %v5783_v33 = vsub.f32 %v5733_v48, %v14662_v53 }
 0x361   : > { %v3551_v5 = vadd.f32 %v3550_v57, %v3527_v62  ;;  %5188 = vmatmul.f32.vlgmr.msra.gmra.mxu1 %v14596_v19  ;;  %5260 = vmatmul.f32.vlgmr.msrb.gmra.mxu0 %v14596_v19  ;;  %v5930_v1 = vand.u32 4294901760, %v5929_v4 }
 0x362   : > { %5378 = vmatpush.msra.mxu1 %v14586_v26  ;;  %5334 = vmatmul.f32.vlgmr.msrb.gmra.mxu3 %v14596_v19  ;;  %v5623_v26 = vand.u32 4294901760, %v5622_v30  ;;  %v5784_v13 = vand.u32 4294901760, %v5783_v33 }
 0x363   : > { %v14645_v9 = vadd.f32 %v3572_v2, %v3551_v5  ;;  %5448 = vmatpush.msrb.mxu0 %v5447_v49  ;;  %5524 = vmatpush.msrb.mxu3 %v5447_v49  ;;  %v5931_v37 = vsub.f32 %v5929_v4, %v5930_v1 }
 0x364   : > { %5308 = vmatmul.f32.vlgmr.msrb.gmra.mxu2 %v14629_v41 }
 0x365   : > { %5501 = vmatpush.msrb.mxu2 %v5474_v27  ;;  %v3672_v31 = vpop.f32.mrf.mxu3  ;;  %v14694_v27 = vand.u32 4294901760, %v14683_v58  ;;  %v5932_v62 = vand.u32 4294901760, %v5931_v37 }
 0x366   : > { %v3624_v44 = vpop.f32.mrf.mxu1 }
 0x367   : > { %v3625_v43 = vadd.f32 %v3624_v44, %v3598_v3  ;;  %v3696_v50 = vpop.f32.mrf.mxu0  ;;  %v3648_v6 = vpop.f32.mrf.mxu2  ;;  %v5739_v44 = vsel %vm3270_vm2, %v14362_v59, 0 }
 0x369   : > { %v3649_v14 = vadd.f32 %v3648_v6, %v3625_v43  ;;  %5282 = vmatmul.f32.vlgmr.msrb.gmra.mxu1 %v14596_v19  ;;  %5358 = vmatmul.f32.vlgmr.msra.gmra.mxu0 %v14602_v63 }
 0x36a   : > { %5478 = vmatpush.msrb.mxu1 %v5477_v47  ;;  %5428 = vmatmul.f32.vlgmr.msra.gmra.mxu3 %v14596_v19 }
 0x36b   : > { %v3673_v21 = vadd.f32 %v3672_v31, %v3649_v14  ;;  %5550 = vmatpush.msra.mxu0 %v5475_v60  ;;  %5624 = vmatpush.msra.mxu3 %v5623_v26  ;;  %v5737_v60 = vsel %vm3270_vm2, %v14341_v12, 0  ;;  %v14719_v12 = vand.u32 4294901760, %v5739_v44 }
 0x36c   : > { %5406 = vmatmul.f32.vlgmr.msra.gmra.mxu2 %v14596_v19  ;;  %v14713_v30 = vand.u32 4294901760, %v5737_v60 }
 0x36d   : > { %v14653_v29 = vadd.f32 %v3696_v50, %v3673_v21  ;;  %5594 = vmatpush.msra.mxu2 %v14633_v11  ;;  %v3770_v22 = vpop.f32.mrf.mxu3  ;;  %v14726_v6 = vsub.f32 %v5739_v44, %v14719_v12 }
 0x36e   : > { %v14658_v51 = vpop.f32.mrf.mxu1  ;;  %v6075_v59 = vsub.f32 %v5737_v60, %v14713_v30 }
 0x36f   : > { %v3794_v0 = vpop.f32.mrf.mxu0  ;;  %v3744_v25 = vpop.f32.mrf.mxu2  ;;  %v3719_v36 = vadd.f32 %v14658_v51, %v14653_v29 }
 0x370   : > { %v3771_v39 = vadd.f32 %v3770_v22, %v3744_v25  ;;  %v6076_v21 = vand.u32 4294901760, %v6075_v59  ;;  %v6222_v22 = vand.u32 4294901760, %v14726_v6 }
 0x371   : > { %5382 = vmatmul.f32.vlgmr.msra.gmra.mxu1 %v14612_v56  ;;  %5454 = vmatmul.f32.vlgmr.msrb.gmra.mxu0 %v14629_v41 }
 0x372   : > { %5572 = vmatpush.msra.mxu1 %v5447_v49  ;;  %5528 = vmatmul.f32.vlgmr.msrb.gmra.mxu3 %v14612_v56  ;;  %v3795_v23 = vadd.f32 %v3794_v0, %v3771_v39  ;;  %v5785_v49 = vsub.f32 %v5783_v33, %v5784_v13  ;;  %v6332_v0 = vpop.permute.xlu2 %6331  ;;  %v6347_v39 = vperm.slane %v14424_v15, 5 }
 0x373   : > { %5647 = vmatpush.msrb.mxu0 %v5620_v45  ;;  %5718 = vmatpush.msrb.mxu3 %v14633_v11  ;;  %v6338_v29 = vsel %vm6337_vm6, %v14739_v55, %v6332_v0 }
 0x374   : > { %5504 = vmatmul.f32.vlgmr.msrb.gmra.mxu2 %v14602_v63  ;;  %v5786_v28 = vand.u32 4294901760, %v5785_v49 }
 0x375   : > { %5696 = vmatpush.msrb.mxu2 %v5621_v54  ;;  %v3864_v17 = vpop.f32.mrf.mxu3 }
 0x376   : > { %v3818_v35 = vpop.f32.mrf.mxu1 }
 0x377   : > { %v3819_v7 = vadd.f32 %v3818_v35, %v3795_v23  ;;  %v3905_v10 = vpop.f32.mrf.mxu0  ;;  %v3842_v46 = vpop.f32.mrf.mxu2  ;;  %v6348_v35 = vperm.slane %v14415_v16, 5 }
 0x378   : > { %v3906_v40 = vadd.f32 %v3905_v10, %v3427_v18 }
 0x379   : > { %v3843_v24 = vadd.f32 %v3842_v46, %v3819_v7  ;;  %5480 = vmatmul.f32.vlgmr.msrb.gmra.mxu1 %v14596_v19  ;;  %5552 = vmatmul.f32.vlgmr.msra.gmra.mxu0 %v14596_v19  ;;  %v6351_v46 = vmul.f32 %v6347_v39, %v6338_v29 }
 0x37a   : > { %5670 = vmatpush.msrb.mxu1 %v14633_v11  ;;  %5626 = vmatmul.f32.vlgmr.msra.gmra.mxu3 %v14596_v19 }
 0x37b   : > { %v14687_v38 = vadd.f32 %v3864_v17, %v3843_v24  ;;  %5757 = vmatpush.msra.mxu0 %v14662_v53  ;;  %5833 = vmatpush.msra.mxu3 %v14662_v53  ;;  %v6361_v16 = vsel %vm3270_vm2, %v6351_v46, 0 }
 0x37c   : > { %5600 = vmatmul.f32.vlgmr.msra.gmra.mxu2 %v14629_v41  ;;  %v5761_v41 = vsub.f32 %v14683_v58, %v14694_v27 }
 0x37d   : > { %5810 = vmatpush.msra.mxu2 %v5783_v33  ;;  %v3979_v11 = vpop.f32.mrf.mxu3  ;;  %v6223_v33 = vsub.f32 %v14726_v6, %v6222_v22 }
 0x37e   : > { %v3931_v34 = vpop.f32.mrf.mxu1  ;;  %v14709_v54 = vand.u32 4294901760, %v5761_v41 }
 0x37f   : > { %v3932_v20 = vadd.f32 %v3931_v34, %v3906_v40  ;;  %v4003_v8 = vpop.f32.mrf.mxu0  ;;  %v3955_v45 = vpop.f32.mrf.mxu2  ;;  %v6224_v24 = vand.u32 4294901760, %v6223_v33 }
 0x381   : > { %v3956_v2 = vadd.f32 %v3955_v45, %v3932_v20  ;;  %5574 = vmatmul.f32.vlgmr.msra.gmra.mxu1 %v14596_v19  ;;  %5650 = vmatmul.f32.vlgmr.msrb.gmra.mxu0 %v14602_v63  ;;  %v14762_v20 = vand.u32 4294901760, %v6361_v16  ;;  %v11898_v45 = vld [vmem:[%s17473_s4 + $0x14] sm:$0xf] }
 0x382   : > { %5787 = vmatpush.msra.mxu1 %v5786_v28  ;;  %5720 = vmatmul.f32.vlgmr.msrb.gmra.mxu3 %v14596_v19  ;;  %v6358_v41 = vsel %vm3266_vm0, %v11898_v45, 0 }
 0x383   : > { %v3980_v3 = vadd.f32 %v3979_v11, %v3956_v2  ;;  %5859 = vmatpush.msrb.mxu0 %v5784_v13  ;;  %5933 = vmatpush.msrb.mxu3 %v5932_v62  ;;  %v14782_v44 = vand.u32 4294901760, %v6358_v41 }
 0x384   : > { %5698 = vmatmul.f32.vlgmr.msrb.gmra.mxu2 %v14596_v19 }
 0x385   : > { %v14702_v57 = vadd.f32 %v4003_v8, %v3980_v3  ;;  %5903 = vmatpush.msrb.mxu2 %v14669_v61  ;;  %v4077_v5 = vpop.f32.mrf.mxu3  ;;  %v6414_v3 = vsub.f32 %v6361_v16, %v14762_v20 }
 0x386   : > { %v14707_v63 = vpop.f32.mrf.mxu1 }
 0x387   : > { %v4101_v52 = vpop.f32.mrf.mxu0  ;;  %v4051_v31 = vpop.f32.mrf.mxu2 }
 0x388   : > { %v4052_v19 = vadd.f32 %v4051_v31, %v14645_v9 }
 0x389   : > { %5674 = vmatmul.f32.vlgmr.msrb.gmra.mxu1 %v14612_v56  ;;  %5763 = vmatmul.f32.vlgmr.msra.gmra.mxu0 %v14709_v54 }
 0x38a   : > { %5881 = vmatpush.msrb.mxu1 %v14662_v53  ;;  %v4078_v43 = vadd.f32 %v4077_v5, %v4052_v19  ;;  %5837 = vmatmul.f32.vlgmr.msra.gmra.mxu3 %v14694_v27  ;;  %v6077_v53 = vsub.f32 %v6075_v59, %v6076_v21 }
 0x38b   : > { %5956 = vmatpush.msra.mxu0 %v5929_v4  ;;  %6027 = vmatpush.msra.mxu3 %v14669_v61 }
 0x38c   : > { %5813 = vmatmul.f32.vlgmr.msra.gmra.mxu2 %v14683_v58  ;;  %v4102_v50 = vadd.f32 %v4101_v52, %v4078_v43  ;;  %v6078_v10 = vand.u32 4294901760, %v6077_v53  ;;  %v6415_v43 = vand.u32 4294901760, %v6414_v3 }
 0x38d   : > { %6005 = vmatpush.msra.mxu2 %v5930_v1  ;;  %v4171_v56 = vpop.f32.mrf.mxu3 }
 0x38e   : > { %v4125_v9 = vpop.f32.mrf.mxu1 }
 0x38f   : > { %v4126_v47 = vadd.f32 %v4125_v9, %v4102_v50  ;;  %v4197_v14 = vpop.f32.mrf.mxu0  ;;  %v4149_v26 = vpop.f32.mrf.mxu2  ;;  %v14789_v9 = vsub.f32 %v6358_v41, %v14782_v44 }
 0x390   : > { %v4198_v23 = vadd.f32 %v4197_v14, %v3719_v36  ;;  %v14796_v14 = vld [vmem:[#allocation7 + $0x10] sm:$0xff]  ;;  %v14806_v36 = vld [vmem:[#allocation7 + $0x18] sm:$0xff] }
 0x391   : > { %v4150_v48 = vadd.f32 %v4149_v26, %v4126_v47  ;;  %5789 = vmatmul.f32.vlgmr.msra.gmra.mxu1 %v14677_v42  ;;  %5861 = vmatmul.f32.vlgmr.msrb.gmra.mxu0 %v14677_v42  ;;  %v6336_v47 = vpop.permute.xlu1 %6335  ;;  %v6349_v26 = vperm.slane %v14796_v14, 5  ;;  %v6350_v53 = vperm.slane %v14806_v36, 5 }
 0x392   : > { %5979 = vmatpush.msra.mxu1 %v14669_v61  ;;  %5935 = vmatmul.f32.vlgmr.msrb.gmra.mxu3 %v14677_v42  ;;  %v14742_v61 = vpop.permute.xlu0 %6333 }
 0x393   : > { %v14734_v25 = vadd.f32 %v4171_v56, %v4150_v48  ;;  %6049 = vmatpush.msrb.mxu0 %v14713_v30  ;;  %6125 = vmatpush.msrb.mxu3 %v14713_v30  ;;  %v6339_v15 = vsel %vm6337_vm6, %v6332_v0, %v14742_v61  ;;  %v14804_v0 = vand.u32 4294901760, %v14789_v9 }
 0x394   : > { %5909 = vmatmul.f32.vlgmr.msrb.gmra.mxu2 %v14709_v54  ;;  %v6352_v1 = vmul.f32 %v6348_v35, %v6339_v15 }
 0x395   : > { %6102 = vmatpush.msrb.mxu2 %v6075_v59  ;;  %v4271_v32 = vpop.f32.mrf.mxu3  ;;  %v6392_v35 = vsub.f32 %v14789_v9, %v14804_v0 }
 0x396   : > { %v4223_v51 = vpop.f32.mrf.mxu1  ;;  %v6364_v11 = vsel %vm3270_vm2, %v6352_v1, 0 }
 0x397   : > { %v4224_v17 = vadd.f32 %v4223_v51, %v4198_v23  ;;  %v4295_v4 = vpop.f32.mrf.mxu0  ;;  %v4247_v7 = vpop.f32.mrf.mxu2  ;;  %v14769_v2 = vand.u32 4294901760, %v6364_v11 }
 0x399   : > { %v4248_v13 = vadd.f32 %v4247_v7, %v4224_v17  ;;  %5883 = vmatmul.f32.vlgmr.msrb.gmra.mxu1 %v14677_v42  ;;  %5959 = vmatmul.f32.vlgmr.msra.gmra.mxu0 %v14683_v58  ;;  %v14780_v60 = vsub.f32 %v6364_v11, %v14769_v2 }
 0x39a   : > { %6079 = vmatpush.msrb.mxu1 %v6078_v10  ;;  %6029 = vmatmul.f32.vlgmr.msra.gmra.mxu3 %v14677_v42  ;;  %v14819_v10 = vand.u32 4294901760, %v6392_v35 }
 0x39b   : > { %v4272_v18 = vadd.f32 %v4271_v32, %v4248_v13  ;;  %6151 = vmatpush.msra.mxu0 %v6076_v21  ;;  %6225 = vmatpush.msra.mxu3 %v6224_v24  ;;  %v6561_v50 = vand.u32 4294901760, %v14780_v60  ;;  %v4026_v13 = vadd.f32 %v14707_v63, %v14702_v57 }
 0x39c   : > { %6007 = vmatmul.f32.vlgmr.msra.gmra.mxu2 %v14677_v42 }
 0x39d   : > { %v14755_v49 = vadd.f32 %v4295_v4, %v4272_v18  ;;  %6195 = vmatpush.msra.mxu2 %v14719_v12  ;;  %v4369_v34 = vpop.f32.mrf.mxu3 }
 0x39e   : > { %v14759_v40 = vpop.f32.mrf.mxu1 }
 0x39f   : > { %v4393_v37 = vpop.f32.mrf.mxu0  ;;  %v4343_v8 = vpop.f32.mrf.mxu2 }
 0x3a0   : > { %v4344_v28 = vadd.f32 %v4343_v8, %v14687_v38 }
 0x3a1   : > { %5983 = vmatmul.f32.vlgmr.msra.gmra.mxu1 %v14694_v27  ;;  %6055 = vmatmul.f32.vlgmr.msrb.gmra.mxu0 %v14709_v54 }
 0x3a2   : > { %6173 = vmatpush.msra.mxu1 %v14713_v30  ;;  %v4370_v62 = vadd.f32 %v4369_v34, %v4344_v28  ;;  %6129 = vmatmul.f32.vlgmr.msrb.gmra.mxu3 %v14694_v27 }
 0x3a3   : > { %6248 = vmatpush.msrb.mxu0 %v14726_v6  ;;  %6319 = vmatpush.msrb.mxu3 %v14719_v12  ;;  %v6416_v6 = vsub.f32 %v6414_v3, %v6415_v43 }
 0x3a4   : > { %v4394_v38 = vadd.f32 %v4393_v37, %v4370_v62  ;;  %6105 = vmatmul.f32.vlgmr.msrb.gmra.mxu2 %v14683_v58 }
 0x3a5   : > { %6297 = vmatpush.msrb.mxu2 %v6222_v22  ;;  %v4463_v52 = vpop.f32.mrf.mxu3  ;;  %v6562_v22 = vsub.f32 %v14780_v60, %v6561_v50  ;;  %v6417_v51 = vand.u32 4294901760, %v6416_v6  ;;  %v14862_v6 = vpop.permute.xlu1 %6964 }
 0x3a6   : > { %v4417_v5 = vpop.f32.mrf.mxu1 }
 0x3a7   : > { %v4418_v31 = vadd.f32 %v4417_v5, %v4394_v38  ;;  %v4532_v30 = vpop.f32.mrf.mxu0  ;;  %v4441_v19 = vpop.f32.mrf.mxu2  ;;  %v6563_v33 = vand.u32 4294901760, %v6562_v22 }
 0x3a8   : > { %v6963_v38 = vpop.permute.xlu0 %6962 }
 0x3a9   : > { %v4442_v59 = vadd.f32 %v4441_v19, %v4418_v31  ;;  %6081 = vmatmul.f32.vlgmr.msrb.gmra.mxu1 %v14677_v42  ;;  %6153 = vmatmul.f32.vlgmr.msra.gmra.mxu0 %v14677_v42  ;;  %v14850_v31 = vld [vmem:[#allocation7] sm:$0xff] }
 0x3aa   : > { %6271 = vmatpush.msrb.mxu1 %v14719_v12  ;;  %6227 = vmatmul.f32.vlgmr.msra.gmra.mxu3 %v14677_v42  ;;  %v6340_v12 = vsel %vm6337_vm6, %v14742_v61, %v6336_v47 }
 0x3ab   : > { %v14791_v56 = vadd.f32 %v4463_v52, %v4442_v59  ;;  %6388 = vmatpush.msra.mxu0 %v14762_v20  ;;  %6464 = vmatpush.msra.mxu3 %v14762_v20  ;;  %v6353_v61 = vmul.f32 %v6349_v26, %v6340_v12  ;;  %v14848_v52 = vpop.permute.xlu2 %6960 }
 0x3ac   : > { %6201 = vmatmul.f32.vlgmr.msra.gmra.mxu2 %v14709_v54  ;;  %v6346_v54 = vsel %vm6337_vm6, %v6336_v47, %v14739_v55  ;;  %v6969_v19 = vsel %vm6968_vm7, %v14848_v52, %v6963_v38  ;;  %v14864_v47 = vld [vmem:[#allocation7 + $0x8] sm:$0xff] }
 0x3ad   : > { %6441 = vmatpush.msra.mxu2 %v6414_v3  ;;  %v4606_v48 = vpop.f32.mrf.mxu3  ;;  %v6354_v17 = vmul.f32 %v6350_v53, %v6346_v54  ;;  %v6367_v55 = vsel %vm3270_vm2, %v6353_v61, 0  ;;  %v6979_v26 = vperm.slane %v14864_v47, 6 }
 0x3ae   : > { %v4558_v21 = vpop.f32.mrf.mxu1  ;;  %v14824_v18 = vand.u32 4294901760, %v6367_v55 }
 0x3af   : > { %v4559_v39 = vadd.f32 %v4558_v21, %v4532_v30  ;;  %v4630_v23 = vpop.f32.mrf.mxu0  ;;  %v4582_v29 = vpop.f32.mrf.mxu2  ;;  %v6370_v46 = vsel %vm3270_vm2, %v6354_v17, 0  ;;  %v6978_v30 = vperm.slane %v14850_v31, 6  ;;  %v6970_v21 = vsel %vm6968_vm7, %v6963_v38, %v14862_v6 }
 0x3b0   : > { %v6706_v63 = vsub.f32 %v6367_v55, %v14824_v18  ;;  %v6983_v54 = vmul.f32 %v6979_v26, %v6970_v21  ;;  %v4318_v17 = vadd.f32 %v14759_v40, %v14755_v49  ;;  %v6980_v38 = vperm.slane %v14796_v14, 6 }
 0x3b1   : > { %v4583_v32 = vadd.f32 %v4582_v29, %v4559_v39  ;;  %6175 = vmatmul.f32.vlgmr.msra.gmra.mxu1 %v14677_v42  ;;  %6251 = vmatmul.f32.vlgmr.msrb.gmra.mxu0 %v14683_v58  ;;  %v6982_v53 = vmul.f32 %v6978_v30, %v6969_v19 }
 0x3b2   : > { %6418 = vmatpush.msra.mxu1 %v6417_v51  ;;  %6321 = vmatmul.f32.vlgmr.msrb.gmra.mxu3 %v14677_v42  ;;  %v6707_v62 = vand.u32 4294901760, %v6706_v63  ;;  %v6995_v35 = vsel %vm3270_vm2, %v6983_v54, 0 }
 0x3b3   : > { %v4607_v4 = vadd.f32 %v4606_v48, %v4583_v32  ;;  %6490 = vmatpush.msrb.mxu0 %v6415_v43  ;;  %6564 = vmatpush.msrb.mxu3 %v6563_v33  ;;  %v6992_v51 = vsel %vm3270_vm2, %v6982_v53, 0 }
 0x3b4   : > { %6299 = vmatmul.f32.vlgmr.msrb.gmra.mxu2 %v14677_v42  ;;  %v14829_v42 = vand.u32 4294901760, %v6370_v46  ;;  %v6708_v5 = vsub.f32 %v6706_v63, %v6707_v62 }
 0x3b5   : > { %v4631_v15 = vadd.f32 %v4630_v23, %v4607_v4  ;;  %6534 = vmatpush.msrb.mxu2 %v14769_v2  ;;  %v4704_v58 = vpop.f32.mrf.mxu3 }
 0x3b6   : > { %v4652_v7 = vpop.f32.mrf.mxu1  ;;  %v14839_v37 = vsub.f32 %v6370_v46, %v14829_v42  ;;  %v6709_v22 = vand.u32 4294901760, %v6708_v5 }
 0x3b7   : > { %v4653_v24 = vadd.f32 %v4652_v7, %v4631_v15  ;;  %v4728_v1 = vpop.f32.mrf.mxu0  ;;  %v4678_v16 = vpop.f32.mrf.mxu2  ;;  %v14878_v15 = vand.u32 4294901760, %v6992_v51 }
 0x3b8   : > { %v4705_v11 = vadd.f32 %v4704_v58, %v4678_v16  ;;  %v6853_v3 = vand.u32 4294901760, %v14839_v37  ;;  %v11899_v58 = vld [vmem:[%s17473_s4 + $0x18] sm:$0xf] }
 0x3b9   : > { %v14826_v34 = vadd.f32 %v4653_v24, %v4026_v13  ;;  %6275 = vmatmul.f32.vlgmr.msrb.gmra.mxu1 %v14694_v27  ;;  %6394 = vmatmul.f32.vlgmr.msra.gmra.mxu0 %v14819_v10  ;;  %v14886_v24 = vand.u32 4294901760, %v6995_v35  ;;  %v6989_v40 = vsel %vm3266_vm0, %v11899_v58, 0 }
 0x3ba   : > { %6512 = vmatpush.msrb.mxu1 %v14762_v20  ;;  %6468 = vmatmul.f32.vlgmr.msra.gmra.mxu3 %v14804_v0  ;;  %v4729_v57 = vadd.f32 %v4728_v1, %v4705_v11  ;;  %v7045_v1 = vsub.f32 %v6992_v51, %v14878_v15 }
 0x3bb   : > { %6587 = vmatpush.msra.mxu0 %v14780_v60  ;;  %6658 = vmatpush.msra.mxu3 %v14769_v2  ;;  %v14897_v16 = vsub.f32 %v6995_v35, %v14886_v24 }
 0x3bc   : > { %6444 = vmatmul.f32.vlgmr.msra.gmra.mxu2 %v14789_v9 }
 0x3bd   : > { %6636 = vmatpush.msra.mxu2 %v6561_v50  ;;  %v4798_v8 = vpop.f32.mrf.mxu3  ;;  %v6854_v50 = vsub.f32 %v14839_v37, %v6853_v3 }
 0x3be   : > { %v4752_v27 = vpop.f32.mrf.mxu1 }
 0x3bf   : > { %v4753_v45 = vadd.f32 %v4752_v27, %v4729_v57  ;;  %v4824_v28 = vpop.f32.mrf.mxu0  ;;  %v4776_v20 = vpop.f32.mrf.mxu2  ;;  %v6855_v23 = vand.u32 4294901760, %v6854_v50  ;;  %v14901_v57 = vand.u32 4294901760, %v6989_v40 }
 0x3c1   : > { %v4777_v41 = vadd.f32 %v4776_v20, %v4753_v45  ;;  %6420 = vmatmul.f32.vlgmr.msra.gmra.mxu1 %v14782_v44  ;;  %6492 = vmatmul.f32.vlgmr.msrb.gmra.mxu0 %v14782_v44  ;;  %v7046_v45 = vand.u32 4294901760, %v7045_v1  ;;  %v7192_v20 = vand.u32 4294901760, %v14897_v16 }
 0x3c2   : > { %6610 = vmatpush.msra.mxu1 %v14769_v2  ;;  %6566 = vmatmul.f32.vlgmr.msrb.gmra.mxu3 %v14782_v44 }
 0x3c3   : > { %v4799_v60 = vadd.f32 %v4798_v8, %v4777_v41  ;;  %6680 = vmatpush.msrb.mxu0 %v14824_v18  ;;  %6756 = vmatpush.msrb.mxu3 %v14824_v18  ;;  %v7193_v19 = vsub.f32 %v14897_v16, %v7192_v20 }
 0x3c4   : > { %6540 = vmatmul.f32.vlgmr.msrb.gmra.mxu2 %v14819_v10 }
 0x3c5   : > { %v14854_v2 = vadd.f32 %v4799_v60, %v14734_v25  ;;  %6733 = vmatpush.msrb.mxu2 %v6706_v63  ;;  %v4898_v59 = vpop.f32.mrf.mxu3 }
 0x3c6   : > { %v4850_v43 = vpop.f32.mrf.mxu1 }
 0x3c7   : > { %v4851_v25 = vadd.f32 %v4850_v43, %v4824_v28  ;;  %v4922_v12 = vpop.f32.mrf.mxu0  ;;  %v4874_v48 = vpop.f32.mrf.mxu2 }
 0x3c9   : > { %v4875_v39 = vadd.f32 %v4874_v48, %v4851_v25  ;;  %6514 = vmatmul.f32.vlgmr.msrb.gmra.mxu1 %v14782_v44  ;;  %6590 = vmatmul.f32.vlgmr.msra.gmra.mxu0 %v14789_v9 }
 0x3ca   : > { %6710 = vmatpush.msrb.mxu1 %v6709_v22  ;;  %6660 = vmatmul.f32.vlgmr.msra.gmra.mxu3 %v14782_v44 }
 0x3cb   : > { %v4899_v29 = vadd.f32 %v4898_v59, %v4875_v39  ;;  %6782 = vmatpush.msra.mxu0 %v6707_v62  ;;  %6856 = vmatpush.msra.mxu3 %v6855_v23  ;;  %v6967_v62 = vpop.permute.xlu2 %6966  ;;  %v6981_v59 = vperm.slane %v14806_v36, 6 }
 0x3cc   : > { %6638 = vmatmul.f32.vlgmr.msra.gmra.mxu2 %v14782_v44 }
 0x3cd   : > { %v4923_v61 = vadd.f32 %v4922_v12, %v4899_v29  ;;  %6826 = vmatpush.msra.mxu2 %v14829_v42  ;;  %v4996_v33 = vpop.f32.mrf.mxu3 }
 0x3ce   : > { %v4944_v32 = vpop.f32.mrf.mxu1 }
 0x3cf   : > { %v4945_v4 = vadd.f32 %v4944_v32, %v4923_v61  ;;  %v5020_v55 = vpop.f32.mrf.mxu0  ;;  %v4970_v7 = vpop.f32.mrf.mxu2 }
 0x3d0   : > { %v4997_v13 = vadd.f32 %v4996_v33, %v4970_v7 }
 0x3d1   : > { %v14883_v46 = vadd.f32 %v4945_v4, %v4318_v17  ;;  %6614 = vmatmul.f32.vlgmr.msra.gmra.mxu1 %v14804_v0  ;;  %6686 = vmatmul.f32.vlgmr.msrb.gmra.mxu0 %v14819_v10 }
 0x3d2   : > { %6804 = vmatpush.msra.mxu1 %v14824_v18  ;;  %6760 = vmatmul.f32.vlgmr.msrb.gmra.mxu3 %v14804_v0  ;;  %v5021_v49 = vadd.f32 %v5020_v55, %v4997_v13 }
 0x3d3   : > { %6879 = vmatpush.msrb.mxu0 %v14839_v37  ;;  %6950 = vmatpush.msrb.mxu3 %v14829_v42  ;;  %v14908_v37 = vsub.f32 %v6989_v40, %v14901_v57 }
 0x3d4   : > { %6736 = vmatmul.f32.vlgmr.msrb.gmra.mxu2 %v14789_v9 }
 0x3d5   : > { %6928 = vmatpush.msrb.mxu2 %v6853_v3  ;;  %v5090_v11 = vpop.f32.mrf.mxu3  ;;  %v7047_v3 = vsub.f32 %v7045_v1, %v7046_v45  ;;  %v14922_v43 = vand.u32 4294901760, %v14908_v37 }
 0x3d6   : > { %v5044_v18 = vpop.f32.mrf.mxu1 }
 0x3d7   : > { %v5045_v63 = vadd.f32 %v5044_v18, %v5021_v49  ;;  %v5163_v27 = vpop.f32.mrf.mxu0  ;;  %v5068_v8 = vpop.f32.mrf.mxu2  ;;  %v7023_v48 = vsub.f32 %v14908_v37, %v14922_v43 }
 0x3d9   : > { %v5069_v28 = vadd.f32 %v5068_v8, %v5045_v63  ;;  %6712 = vmatmul.f32.vlgmr.msrb.gmra.mxu1 %v14782_v44  ;;  %6784 = vmatmul.f32.vlgmr.msra.gmra.mxu0 %v14782_v44  ;;  %v14935_v54 = vand.u32 4294901760, %v7023_v48  ;;  %v7594_v63 = vpop.permute.xlu1 %7593  ;;  %v7609_v8 = vperm.slane %v14850_v31, 7 }
 0x3da   : > { %6902 = vmatpush.msrb.mxu1 %v14829_v42  ;;  %6858 = vmatmul.f32.vlgmr.msra.gmra.mxu3 %v14782_v44  ;;  %v6971_v42 = vsel %vm6968_vm7, %v14862_v6, %v6967_v62  ;;  %v7194_v6 = vand.u32 4294901760, %v7193_v19 }
 0x3db   : > { %v5091_v41 = vadd.f32 %v5090_v11, %v5069_v28  ;;  %7019 = vmatpush.msra.mxu0 %v14878_v15  ;;  %7095 = vmatpush.msra.mxu3 %v14878_v15  ;;  %v6984_v12 = vmul.f32 %v6980_v38, %v6971_v42 }
 0x3dc   : > { %6832 = vmatmul.f32.vlgmr.msra.gmra.mxu2 %v14819_v10  ;;  %v7048_v10 = vand.u32 4294901760, %v7047_v3 }
 0x3dd   : > { %v14915_v60 = vadd.f32 %v5091_v41, %v14791_v56  ;;  %7072 = vmatpush.msra.mxu2 %v7045_v1  ;;  %v5237_v30 = vpop.f32.mrf.mxu3  ;;  %v6977_v56 = vsel %vm6968_vm7, %v6967_v62, %v14848_v52  ;;  %v6998_v52 = vsel %vm3270_vm2, %v6984_v12, 0  ;;  %v7610_v41 = vperm.slane %v14864_v47, 7 }
 0x3de   : > { %v5189_v5 = vpop.f32.mrf.mxu1  ;;  %v6985_v22 = vmul.f32 %v6981_v59, %v6977_v56  ;;  %v14938_v32 = vand.u32 4294901760, %v6998_v52 }
 0x3df   : > { %v5190_v50 = vadd.f32 %v5189_v5, %v5163_v27  ;;  %v5261_v26 = vpop.f32.mrf.mxu0  ;;  %v5213_v25 = vpop.f32.mrf.mxu2 }
 0x3e0   : > { %v7001_v29 = vsel %vm3270_vm2, %v6985_v22, 0  ;;  %v7337_v55 = vsub.f32 %v6998_v52, %v14938_v32  ;;  %v14965_v27 = vpop.permute.xlu2 %7595  ;;  %v11900_v22 = vld [vmem:[%s17473_s4 + $0x1c] sm:$0xf] }
 0x3e1   : > { %v5214_v21 = vadd.f32 %v5213_v25, %v5190_v50  ;;  %6806 = vmatmul.f32.vlgmr.msra.gmra.mxu1 %v14782_v44  ;;  %6882 = vmatmul.f32.vlgmr.msrb.gmra.mxu0 %v14789_v9  ;;  %v7601_v31 = vsel %vm7599_vm8, %v7594_v63, %v14965_v27 }
 0x3e2   : > { %7049 = vmatpush.msra.mxu1 %v7048_v10  ;;  %6952 = vmatmul.f32.vlgmr.msrb.gmra.mxu3 %v14782_v44  ;;  %v7338_v49 = vand.u32 4294901760, %v7337_v55  ;;  %v7614_v59 = vmul.f32 %v7610_v41, %v7601_v31 }
 0x3e3   : > { %v5238_v53 = vadd.f32 %v5237_v30, %v5214_v21  ;;  %7121 = vmatpush.msrb.mxu0 %v7046_v45  ;;  %7195 = vmatpush.msrb.mxu3 %v7194_v6 }
 0x3e4   : > { %6930 = vmatmul.f32.vlgmr.msrb.gmra.mxu2 %v14782_v44  ;;  %v14944_v44 = vand.u32 4294901760, %v7001_v29  ;;  %v7339_v11 = vsub.f32 %v7337_v55, %v7338_v49  ;;  %v7626_v10 = vsel %vm3270_vm2, %v7614_v59, 0 }
 0x3e5   : > { %v5262_v39 = vadd.f32 %v5261_v26, %v5238_v53  ;;  %7165 = vmatpush.msrb.mxu2 %v14886_v24  ;;  %v5335_v9 = vpop.f32.mrf.mxu3 }
 0x3e6   : > { %v5283_v23 = vpop.f32.mrf.mxu1 }
 0x3e7   : > { %v5284_v51 = vadd.f32 %v5283_v23, %v5262_v39  ;;  %v5359_v61 = vpop.f32.mrf.mxu0  ;;  %v5309_v33 = vpop.f32.mrf.mxu2  ;;  %v14994_v39 = vand.u32 4294901760, %v7626_v10 }
 0x3e8   : > { %v5336_v17 = vadd.f32 %v5335_v9, %v5309_v33  ;;  %v7620_v9 = vsel %vm3266_vm0, %v11900_v22, 0 }
 0x3e9   : > { %v14941_v35 = vadd.f32 %v5284_v51, %v14826_v34  ;;  %6906 = vmatmul.f32.vlgmr.msrb.gmra.mxu1 %v14804_v0  ;;  %7025 = vmatmul.f32.vlgmr.msra.gmra.mxu0 %v14935_v54  ;;  %v14954_v34 = vsub.f32 %v7001_v29, %v14944_v44 }
 0x3ea   : > { %7143 = vmatpush.msrb.mxu1 %v14878_v15  ;;  %7099 = vmatmul.f32.vlgmr.msra.gmra.mxu3 %v14922_v43  ;;  %v5360_v4 = vadd.f32 %v5359_v61, %v5336_v17 }
 0x3eb   : > { %7218 = vmatpush.msra.mxu0 %v14897_v16  ;;  %7289 = vmatpush.msra.mxu3 %v14886_v24  ;;  %v7484_v1 = vand.u32 4294901760, %v14954_v34  ;;  %v14960_v16 = vpop.permute.xlu0 %7591 }
 0x3ec   : > { %7075 = vmatmul.f32.vlgmr.msra.gmra.mxu2 %v14908_v37  ;;  %v7600_v45 = vsel %vm7599_vm8, %v14960_v16, %v7594_v63 }
 0x3ed   : > { %7267 = vmatpush.msra.mxu2 %v7192_v20  ;;  %v5429_v7 = vpop.f32.mrf.mxu3  ;;  %v7485_v62 = vsub.f32 %v14954_v34, %v7484_v1  ;;  %v7613_v5 = vmul.f32 %v7609_v8, %v7600_v45  ;;  %v7612_v8 = vperm.slane %v14806_v36, 7 }
 0x3ee   : > { %v5383_v0 = vpop.f32.mrf.mxu1 }
 0x3ef   : > { %v5384_v58 = vadd.f32 %v5383_v0, %v5360_v4  ;;  %v5455_v13 = vpop.f32.mrf.mxu0  ;;  %v5407_v15 = vpop.f32.mrf.mxu2  ;;  %v7486_v19 = vand.u32 4294901760, %v7485_v62  ;;  %v7623_v47 = vsel %vm3270_vm2, %v7613_v5, 0 }
 0x3f0   : > { %v14985_v6 = vand.u32 4294901760, %v7623_v47 }
 0x3f1   : > { %v5408_v40 = vadd.f32 %v5407_v15, %v5384_v58  ;;  %7051 = vmatmul.f32.vlgmr.msra.gmra.mxu1 %v14901_v57  ;;  %7123 = vmatmul.f32.vlgmr.msrb.gmra.mxu0 %v14901_v57 }
 0x3f2   : > { %7241 = vmatpush.msra.mxu1 %v14886_v24  ;;  %7197 = vmatmul.f32.vlgmr.msrb.gmra.mxu3 %v14901_v57  ;;  %v7676_v29 = vsub.f32 %v7623_v47, %v14985_v6 }
 0x3f3   : > { %v5430_v18 = vadd.f32 %v5429_v7, %v5408_v40  ;;  %7311 = vmatpush.msrb.mxu0 %v14938_v32  ;;  %7387 = vmatpush.msrb.mxu3 %v14938_v32  ;;  %v7598_v58 = vpop.permute.xlu0 %7597 }
 0x3f4   : > { %7171 = vmatmul.f32.vlgmr.msrb.gmra.mxu2 %v14935_v54 }
 0x3f5   : > { %v14969_v24 = vadd.f32 %v5430_v18, %v14854_v2  ;;  %7364 = vmatpush.msrb.mxu2 %v7337_v55  ;;  %v5529_v20 = vpop.f32.mrf.mxu3  ;;  %v7340_v2 = vand.u32 4294901760, %v7339_v11  ;;  %v7677_v55 = vand.u32 4294901760, %v7676_v29 }
 0x3f6   : > { %v5481_v28 = vpop.f32.mrf.mxu1 }
 0x3f7   : > { %v5482_v3 = vadd.f32 %v5481_v28, %v5455_v13  ;;  %v5553_v38 = vpop.f32.mrf.mxu0  ;;  %v5505_v42 = vpop.f32.mrf.mxu2  ;;  %v7678_v15 = vsub.f32 %v7676_v29, %v7677_v55 }
 0x3f9   : > { %v5506_v30 = vadd.f32 %v5505_v42, %v5482_v3  ;;  %7145 = vmatmul.f32.vlgmr.msrb.gmra.mxu1 %v14901_v57  ;;  %7221 = vmatmul.f32.vlgmr.msra.gmra.mxu0 %v14908_v37 }
 0x3fa   : > { %7341 = vmatpush.msrb.mxu1 %v7340_v2  ;;  %7291 = vmatmul.f32.vlgmr.msra.gmra.mxu3 %v14901_v57 }
 0x3fb   : > { %v5530_v50 = vadd.f32 %v5529_v20, %v5506_v30  ;;  %7413 = vmatpush.msra.mxu0 %v7338_v49  ;;  %7487 = vmatpush.msra.mxu3 %v7486_v19  ;;  %v7611_v49 = vperm.slane %v14796_v14, 7 }
 0x3fc   : > { %7269 = vmatmul.f32.vlgmr.msra.gmra.mxu2 %v14901_v57 }
 0x3fd   : > { %v5554_v26 = vadd.f32 %v5553_v38, %v5530_v50  ;;  %7457 = vmatpush.msra.mxu2 %v14944_v44  ;;  %v5627_v25 = vpop.f32.mrf.mxu3 }
 0x3fe   : > { %v5575_v56 = vpop.f32.mrf.mxu1 }
 0x3ff   : > { %v5576_v12 = vadd.f32 %v5575_v56, %v5554_v26  ;;  %v5651_v21 = vpop.f32.mrf.mxu0  ;;  %v5601_v48 = vpop.f32.mrf.mxu2 }
 0x400   : > { %v5628_v52 = vadd.f32 %v5627_v25, %v5601_v48 }
 0x401   : > { %v14991_v53 = vadd.f32 %v5576_v12, %v14883_v46  ;;  %7245 = vmatmul.f32.vlgmr.msra.gmra.mxu1 %v14922_v43  ;;  %7317 = vmatmul.f32.vlgmr.msrb.gmra.mxu0 %v14935_v54  ;;  %v15005_v46 = vsub.f32 %v7626_v10, %v14994_v39 }
 0x402   : > { %7435 = vmatpush.msra.mxu1 %v14938_v32  ;;  %7391 = vmatmul.f32.vlgmr.msrb.gmra.mxu3 %v14922_v43  ;;  %v5652_v23 = vadd.f32 %v5651_v21, %v5628_v52  ;;  %v15007_v32 = vand.u32 4294901760, %v7620_v9  ;;  %v8225_v52 = vpop.permute.xlu2 %8224 }
 0x403   : > { %7510 = vmatpush.msrb.mxu0 %v14954_v34  ;;  %7581 = vmatpush.msrb.mxu3 %v14944_v44  ;;  %v7823_v0 = vand.u32 4294901760, %v15005_v46 }
 0x404   : > { %7367 = vmatmul.f32.vlgmr.msrb.gmra.mxu2 %v14908_v37  ;;  %v15014_v7 = vsub.f32 %v7620_v9, %v15007_v32 }
 0x405   : > { %7559 = vmatpush.msrb.mxu2 %v7484_v1  ;;  %v5721_v61 = vpop.f32.mrf.mxu3  ;;  %v7824_v11 = vsub.f32 %v15005_v46, %v7823_v0 }
 0x406   : > { %v5675_v51 = vpop.f32.mrf.mxu1  ;;  %v15028_v63 = vand.u32 4294901760, %v15014_v7 }
 0x407   : > { %v5676_v33 = vadd.f32 %v5675_v51, %v5652_v23  ;;  %v5764_v17 = vpop.f32.mrf.mxu0  ;;  %v5699_v4 = vpop.f32.mrf.mxu2 }
 0x408   : > { %v7654_v41 = vsub.f32 %v15014_v7, %v15028_v63  ;;  %v15071_v51 = vpop.permute.xlu0 %8226 }
 0x409   : > { %v5700_v34 = vadd.f32 %v5699_v4, %v5676_v33  ;;  %7343 = vmatmul.f32.vlgmr.msrb.gmra.mxu1 %v14901_v57  ;;  %7415 = vmatmul.f32.vlgmr.msra.gmra.mxu0 %v14901_v57 }
 0x40a   : > { %7533 = vmatpush.msrb.mxu1 %v14944_v44  ;;  %7489 = vmatmul.f32.vlgmr.msra.gmra.mxu3 %v14901_v57  ;;  %v7602_v44 = vsel %vm7599_vm8, %v14965_v27, %v7598_v58  ;;  %v7825_v27 = vand.u32 4294901760, %v7824_v11  ;;  %v15041_v42 = vand.u32 4294901760, %v7654_v41 }
 0x40b   : > { %v5722_v13 = vadd.f32 %v5721_v61, %v5700_v34  ;;  %7650 = vmatpush.msra.mxu0 %v14985_v6  ;;  %7726 = vmatpush.msra.mxu3 %v14985_v6  ;;  %v7615_v20 = vmul.f32 %v7611_v49, %v7602_v44 }
 0x40c   : > { %7463 = vmatmul.f32.vlgmr.msra.gmra.mxu2 %v14935_v54  ;;  %v7679_v54 = vand.u32 4294901760, %v7678_v15 }
 0x40d   : > { %v15021_v40 = vadd.f32 %v5722_v13, %v14915_v60  ;;  %7703 = vmatpush.msra.mxu2 %v7676_v29  ;;  %v5838_v18 = vpop.f32.mrf.mxu3  ;;  %v7608_v60 = vsel %vm7599_vm8, %v7598_v58, %v14960_v16  ;;  %v7629_v16 = vsel %vm3270_vm2, %v7615_v20, 0  ;;  %v15069_v29 = vpop.permute.xlu1 %8222  ;;  %v8232_v58 = vsel %vm8230_vm9, %v8225_v52, %v15071_v51 }
 0x40e   : > { %v5790_v1 = vpop.f32.mrf.mxu1  ;;  %v7616_v3 = vmul.f32 %v7612_v8, %v7608_v60  ;;  %v15044_v19 = vand.u32 4294901760, %v7629_v16 }
 0x40f   : > { %v5791_v45 = vadd.f32 %v5790_v1, %v5764_v17  ;;  %v5862_v14 = vpop.f32.mrf.mxu0  ;;  %v5814_v28 = vpop.f32.mrf.mxu2 }
 0x410   : > { %v7632_v2 = vsel %vm3270_vm2, %v7616_v3, 0  ;;  %v7968_v56 = vsub.f32 %v7629_v16, %v15044_v19 }
 0x411   : > { %v5815_v62 = vadd.f32 %v5814_v28, %v5791_v45  ;;  %7437 = vmatmul.f32.vlgmr.msra.gmra.mxu1 %v14901_v57  ;;  %7513 = vmatmul.f32.vlgmr.msrb.gmra.mxu0 %v14908_v37 }
 0x412   : > { %7680 = vmatpush.msra.mxu1 %v7679_v54  ;;  %7583 = vmatmul.f32.vlgmr.msrb.gmra.mxu3 %v14901_v57 }
 0x413   : > { %v5839_v36 = vadd.f32 %v5838_v18, %v5815_v62  ;;  %7752 = vmatpush.msrb.mxu0 %v7677_v55  ;;  %7826 = vmatpush.msrb.mxu3 %v7825_v27  ;;  %v11996_v55 = vld [vmem:[#allocation7 + $0x28] ss:$0 sm:$0xff]  ;;  %v11901_v27 = vld [vmem:[%s17473_s4 + $0x20] sm:$0xf] }
 0x414   : > { %7561 = vmatmul.f32.vlgmr.msrb.gmra.mxu2 %v14901_v57  ;;  %v15050_v57 = vand.u32 4294901760, %v7632_v2  ;;  %v8245_v1 = vmul.f32 %v11996_v55, %v8232_v58 }
 0x415   : > { %v5863_v38 = vadd.f32 %v5862_v14, %v5839_v36  ;;  %7796 = vmatpush.msrb.mxu2 %v14994_v39  ;;  %v5936_v37 = vpop.f32.mrf.mxu3 }
 0x416   : > { %v5884_v31 = vpop.f32.mrf.mxu1  ;;  %v8257_v60 = vsel %vm3270_vm2, %v8245_v1, 0 }
 0x417   : > { %v5885_v5 = vadd.f32 %v5884_v31, %v5863_v38  ;;  %v5960_v30 = vpop.f32.mrf.mxu0  ;;  %v5910_v59 = vpop.f32.mrf.mxu2  ;;  %v15098_v36 = vand.u32 4294901760, %v8257_v60  ;;  %v8251_v38 = vsel %vm3266_vm0, %v11901_v27, 0 }
 0x418   : > { %v5937_v47 = vadd.f32 %v5936_v37, %v5910_v59 }
 0x419   : > { %v15047_v50 = vadd.f32 %v5885_v5, %v14941_v35  ;;  %7537 = vmatmul.f32.vlgmr.msrb.gmra.mxu1 %v14922_v43  ;;  %7656 = vmatmul.f32.vlgmr.msra.gmra.mxu0 %v15041_v42  ;;  %v15060_v35 = vsub.f32 %v7632_v2, %v15050_v57  ;;  %v15111_v5 = vand.u32 4294901760, %v8251_v38 }
 0x41a   : > { %7774 = vmatpush.msrb.mxu1 %v14985_v6  ;;  %7730 = vmatmul.f32.vlgmr.msra.gmra.mxu3 %v15028_v63  ;;  %v5961_v26 = vadd.f32 %v5960_v30, %v5937_v47  ;;  %v7969_v6 = vand.u32 4294901760, %v7968_v56 }
 0x41b   : > { %17910 = vst [vmem:[#allocation31_spill] sm:$0xff] %v15047_v50  ;;  %7849 = vmatpush.msra.mxu0 %v15005_v46  ;;  %7920 = vmatpush.msra.mxu3 %v14994_v39  ;;  %v8115_v22 = vand.u32 4294901760, %v15060_v35  ;;  %v11995_v46 = vld [vmem:[#allocation7 + $0x20] ss:$0 sm:$0xff] }
 0x41c   : > { %7706 = vmatmul.f32.vlgmr.msra.gmra.mxu2 %v15014_v7  ;;  %v7970_v9 = vsub.f32 %v7968_v56, %v7969_v6 }
 0x41d   : > { %7898 = vmatpush.msra.mxu2 %v7823_v0  ;;  %v6030_v25 = vpop.f32.mrf.mxu3  ;;  %v8116_v4 = vsub.f32 %v15060_v35, %v8115_v22 }
 0x41e   : > { %v5984_v43 = vpop.f32.mrf.mxu1  ;;  %v7971_v15 = vand.u32 4294901760, %v7970_v9 }
 0x41f   : > { %v5985_v10 = vadd.f32 %v5984_v43, %v5961_v26  ;;  %v6056_v12 = vpop.f32.mrf.mxu0  ;;  %v6008_v21 = vpop.f32.mrf.mxu2  ;;  %v8117_v44 = vand.u32 4294901760, %v8116_v4 }
 0x421   : > { %v6009_v48 = vadd.f32 %v6008_v21, %v5985_v10  ;;  %7682 = vmatmul.f32.vlgmr.msra.gmra.mxu1 %v15007_v32  ;;  %7754 = vmatmul.f32.vlgmr.msrb.gmra.mxu0 %v15007_v32  ;;  %v8229_v10 = vpop.permute.xlu1 %8228 }
 0x422   : > { %7872 = vmatpush.msra.mxu1 %v14994_v39  ;;  %7828 = vmatmul.f32.vlgmr.msrb.gmra.mxu3 %v15007_v32  ;;  %v8231_v39 = vsel %vm8230_vm9, %v15069_v29, %v8225_v52 }
 0x423   : > { %v6031_v23 = vadd.f32 %v6030_v25, %v6009_v48  ;;  %7942 = vmatpush.msrb.mxu0 %v15044_v19  ;;  %8018 = vmatpush.msrb.mxu3 %v15044_v19 }
 0x424   : > { %7802 = vmatmul.f32.vlgmr.msrb.gmra.mxu2 %v15041_v42 }
 0x425   : > { %v15074_v61 = vadd.f32 %v6031_v23, %v14969_v24  ;;  %7995 = vmatpush.msrb.mxu2 %v7968_v56  ;;  %v6130_v17 = vpop.f32.mrf.mxu3  ;;  %v8244_v24 = vmul.f32 %v11995_v46, %v8231_v39  ;;  %v11994_v23 = vld [vmem:[#allocation7 + $0x38] ss:$0 sm:$0xff] }
 0x426   : > { %v6082_v33 = vpop.f32.mrf.mxu1 }
 0x427   : > { %17911 = vst [vmem:[#allocation14_spill] sm:$0xff] %v15074_v61  ;;  %v6083_v34 = vadd.f32 %v6082_v33, %v6056_v12  ;;  %v6154_v0 = vpop.f32.mrf.mxu0  ;;  %v6106_v13 = vpop.f32.mrf.mxu2  ;;  %v8254_v11 = vsel %vm3270_vm2, %v8244_v24, 0  ;;  %v11997_v12 = vld [vmem:[#allocation7 + $0x30] ss:$0 sm:$0xff] }
 0x428   : > { %v15089_v20 = vand.u32 4294901760, %v8254_v11 }
 0x429   : > { %v6107_v49 = vadd.f32 %v6106_v13, %v6083_v34  ;;  %7776 = vmatmul.f32.vlgmr.msrb.gmra.mxu1 %v15007_v32  ;;  %7852 = vmatmul.f32.vlgmr.msra.gmra.mxu0 %v15014_v7 }
 0x42a   : > { %7972 = vmatpush.msrb.mxu1 %v7971_v15  ;;  %7922 = vmatmul.f32.vlgmr.msra.gmra.mxu3 %v15007_v32  ;;  %v8307_v31 = vsub.f32 %v8254_v11, %v15089_v20 }
 0x42b   : > { %v6131_v18 = vadd.f32 %v6130_v17, %v6107_v49  ;;  %8044 = vmatpush.msra.mxu0 %v7969_v6  ;;  %8118 = vmatpush.msra.mxu3 %v8117_v44 }
 0x42c   : > { %7900 = vmatmul.f32.vlgmr.msra.gmra.mxu2 %v15007_v32  ;;  %v8308_v47 = vand.u32 4294901760, %v8307_v31 }
 0x42d   : > { %v6155_v8 = vadd.f32 %v6154_v0, %v6131_v18  ;;  %8088 = vmatpush.msra.mxu2 %v15050_v57  ;;  %v6228_v14 = vpop.f32.mrf.mxu3 }
 0x42e   : > { %v6176_v45 = vpop.f32.mrf.mxu1  ;;  %v8309_v25 = vsub.f32 %v8307_v31, %v8308_v47 }
 0x42f   : > { %v6177_v28 = vadd.f32 %v6176_v45, %v6155_v8  ;;  %v6252_v54 = vpop.f32.mrf.mxu0  ;;  %v6202_v62 = vpop.f32.mrf.mxu2 }
 0x430   : > { %v6229_v3 = vadd.f32 %v6228_v14, %v6202_v62  ;;  %v8310_v46 = vand.u32 4294901760, %v8309_v25 }
 0x431   : > { %v15095_v41 = vadd.f32 %v6177_v28, %v14991_v53  ;;  %7876 = vmatmul.f32.vlgmr.msra.gmra.mxu1 %v15028_v63  ;;  %7948 = vmatmul.f32.vlgmr.msrb.gmra.mxu0 %v15041_v42  ;;  %v15109_v53 = vsub.f32 %v8257_v60, %v15098_v36 }
 0x432   : > { %8066 = vmatpush.msra.mxu1 %v15044_v19  ;;  %8022 = vmatmul.f32.vlgmr.msrb.gmra.mxu3 %v15028_v63  ;;  %v6253_v16 = vadd.f32 %v6252_v54, %v6229_v3 }
 0x433   : > { %8141 = vmatpush.msrb.mxu0 %v15060_v35  ;;  %8212 = vmatpush.msrb.mxu3 %v15050_v57  ;;  %v8454_v56 = vand.u32 4294901760, %v15109_v53  ;;  %v15120_v35 = vsub.f32 %v8251_v38, %v15111_v5 }
 0x434   : > { %7998 = vmatmul.f32.vlgmr.msrb.gmra.mxu2 %v15014_v7 }
 0x435   : > { %8190 = vmatpush.msrb.mxu2 %v8115_v22  ;;  %v6322_v2 = vpop.f32.mrf.mxu3  ;;  %v8455_v22 = vsub.f32 %v15109_v53, %v8454_v56  ;;  %v15137_v52 = vand.u32 4294901760, %v15120_v35 }
 0x436   : > { %v6276_v37 = vpop.f32.mrf.mxu1 }
 0x437   : > { %v6277_v30 = vadd.f32 %v6276_v37, %v6253_v16  ;;  %v15113_v19 = vpop.f32.mrf.mxu0  ;;  %v6300_v59 = vpop.f32.mrf.mxu2  ;;  %v8456_v39 = vand.u32 4294901760, %v8455_v22  ;;  %v8285_v33 = vsub.f32 %v15120_v35, %v15137_v52  ;;  %v8853_v16 = vld [vmem:[%s17474_s5] sm:$0xf] }
 0x439   : > { %v6301_v26 = vadd.f32 %v6300_v59, %v6277_v30  ;;  %7974 = vmatmul.f32.vlgmr.msrb.gmra.mxu1 %v15007_v32  ;;  %8046 = vmatmul.f32.vlgmr.msra.gmra.mxu0 %v15007_v32 }
 0x43a   : > { %8164 = vmatpush.msrb.mxu1 %v15050_v57  ;;  %8120 = vmatmul.f32.vlgmr.msra.gmra.mxu3 %v15007_v32  ;;  %v8233_v57 = vsel %vm8230_vm9, %v15071_v51, %v8229_v10 }
 0x43b   : > { %v6323_v43 = vadd.f32 %v6322_v2, %v6301_v26  ;;  %8281 = vmatpush.msra.mxu0 %v15089_v20  ;;  %8357 = vmatpush.msra.mxu3 %v15089_v20  ;;  %v8246_v51 = vmul.f32 %v11997_v12, %v8233_v57 }
 0x43c   : > { %8094 = vmatmul.f32.vlgmr.msra.gmra.mxu2 %v15041_v42 }
 0x43d   : > { %v15126_v21 = vadd.f32 %v6323_v43, %v15021_v40  ;;  %8334 = vmatpush.msra.mxu2 %v8307_v31  ;;  %v15133_v48 = vpop.f32.mrf.mxu3  ;;  %v8239_v40 = vsel %vm8230_vm9, %v8229_v10, %v15069_v29  ;;  %v8260_v29 = vsel %vm3270_vm2, %v8246_v51, 0  ;;  %v12179_v31 = vmov 0  }
 0x43e   : > { %v15131_v6 = vpop.f32.mrf.mxu1  ;;  %17913 = vst [vmem:[#allocation32_spill] sm:$0xff] %v15133_v48  ;;  %v8247_v17 = vmul.f32 %v11994_v23, %v8239_v40  ;;  %v8572_v58 = vand.u32 4294901760, %v8260_v29  ;;  %11992 = vset.pattern.permute.xlu2 %v12179_v31  ;;  %11993 = vset.pattern.permute.xlu0 %v12179_v31 }
 0x43f   : > { %17912 = vst [vmem:[#allocation33_spill] sm:$0xff] %v15126_v21  ;;  %v15139_v9 = vpop.f32.mrf.mxu0  ;;  %v15143_v42 = vpop.f32.mrf.mxu2  ;;  %8856 = vperm.xlu2 %11992, %v8853_v16   ;;  %v8903_v21 = vld [vmem:[#allocation5 + $0x90] sm:$0xff] }
 0x440   : > { %17914 = vst [vmem:[#allocation15_spill] sm:$0xff] %v15139_v9  ;;  %v8263_v34 = vsel %vm3270_vm2, %v8247_v17, 0 }
 0x441   : > { %8068 = vmatmul.f32.vlgmr.msra.gmra.mxu1 %v15007_v32  ;;  %8144 = vmatmul.f32.vlgmr.msrb.gmra.mxu0 %v15014_v7  ;;  %v15157_v7 = vand.u32 4294901760, %v8285_v33  ;;  %v8718_v15 = vand.u32 4294901760, %v8263_v34 }
 0x442   : > { %8311 = vmatpush.msra.mxu1 %v8310_v46  ;;  %8214 = vmatmul.f32.vlgmr.msrb.gmra.mxu3 %v15007_v32  ;;  %v8913_v46 = vld [vmem:[#allocation5 + $0xe0] sm:$0xff] }
 0x443   : > { %8383 = vmatpush.msrb.mxu0 %v8308_v47  ;;  %8457 = vmatpush.msrb.mxu3 %v8456_v39  ;;  %v8745_v24 = vsub.f32 %v8263_v34, %v8718_v15  ;;  %v15257_v39 = vand.u32 4294901760, %v8913_v46 }
 0x444   : > { %8192 = vmatmul.f32.vlgmr.msrb.gmra.mxu2 %v15007_v32  ;;  %v8599_v32 = vsub.f32 %v8260_v29, %v8572_v58 }
 0x445   : > { %8427 = vmatpush.msrb.mxu2 %v15098_v36  ;;  %v15155_v55 = vpop.f32.mrf.mxu3  ;;  %v8746_v11 = vand.u32 4294901760, %v8745_v24  ;;  %v15263_v17 = vsub.f32 %v8913_v46, %v15257_v39  ;;  %v8905_v46 = vld [vmem:[#allocation5 + $0xa0] sm:$0xff] }
 0x446   : > { %v15153_v4 = vpop.f32.mrf.mxu1  ;;  %17916 = vst [vmem:[#allocation19_spill] sm:$0xff] %v15155_v55  ;;  %v8600_v18 = vand.u32 4294901760, %v8599_v32 }
 0x447   : > { %17915 = vst [vmem:[#allocation13_spill] sm:$0xff] %v15153_v4  ;;  %v15160_v0 = vpop.f32.mrf.mxu0  ;;  %v15162_v13 = vpop.f32.mrf.mxu2  ;;  %v8747_v60 = vsub.f32 %v8745_v24, %v8746_v11 }
 0x448   : > { %17917 = vst [vmem:[#allocation16_spill] sm:$0xff] %v15160_v0  ;;  %v8601_v8 = vsub.f32 %v8599_v32, %v8600_v18 }
 0x449   : > { %17918 = vst [vmem:[#allocation17_spill] sm:$0xff] %v15162_v13  ;;  %8168 = vmatmul.f32.vlgmr.msrb.gmra.mxu1 %v15028_v63  ;;  %8287 = vmatmul.f32.vlgmr.msra.gmra.mxu0 %v15157_v7  ;;  %v8748_v62 = vand.u32 4294901760, %v8747_v60 }
 0x44a   : > { %8405 = vmatpush.msrb.mxu1 %v15089_v20  ;;  %8361 = vmatmul.f32.vlgmr.msra.gmra.mxu3 %v15137_v52  ;;  %v8602_v20 = vand.u32 4294901760, %v8601_v8  ;;  %v8907_v8 = vld [vmem:[#allocation5 + $0xb0] sm:$0xff] }
 0x44b   : > { %8480 = vmatpush.msra.mxu0 %v15109_v53  ;;  %8551 = vmatpush.msra.mxu3 %v15098_v36 }
 0x44c   : > { %8337 = vmatmul.f32.vlgmr.msra.gmra.mxu2 %v15120_v35 }
 0x44d   : > { %8529 = vmatpush.msra.mxu2 %v8454_v56  ;;  %v15173_v44 = vpop.f32.mrf.mxu3 }
 0x44e   : > { %v15171_v49 = vpop.f32.mrf.mxu1  ;;  %17920 = vst [vmem:[#allocation20_spill] sm:$0xff] %v15173_v44  ;;  %v8895_v44 = vld [vmem:[#allocation5 + $0x50] sm:$0xff] }
 0x44f   : > { %17919 = vst [vmem:[#allocation18_spill] sm:$0xff] %v15171_v49  ;;  %v15175_v63 = vpop.f32.mrf.mxu0  ;;  %v15177_v1 = vpop.f32.mrf.mxu2 }
 0x450   : > { %17921 = vst [vmem:[#allocation12_spill] sm:$0xff] %v15177_v1  ;;  %v15372_v1 = vand.u32 4294901760, %v8895_v44 }
 0x451   : > { %8313 = vmatmul.f32.vlgmr.msra.gmra.mxu1 %v15111_v5  ;;  %8385 = vmatmul.f32.vlgmr.msrb.gmra.mxu0 %v15111_v5 }
 0x452   : > { %8503 = vmatpush.msra.mxu1 %v15098_v36  ;;  %8459 = vmatmul.f32.vlgmr.msrb.gmra.mxu3 %v15111_v5  ;;  %v15388_v49 = vsub.f32 %v8895_v44, %v15372_v1 }
 0x453   : > { %8573 = vmatpush.msrb.mxu0 %v8572_v58  ;;  %8649 = vmatpush.msrb.mxu3 %v8572_v58 }
 0x454   : > { %8433 = vmatmul.f32.vlgmr.msrb.gmra.mxu2 %v15157_v7  ;;  %v17579_v44 = vand.u32 4294901760, %v15388_v49 }
 0x455   : > { %8626 = vmatpush.msrb.mxu2 %v8599_v32  ;;  %v15186_v14 = vpop.f32.mrf.mxu3  ;;  %v17570_v32 = vand.u32 4294901760, %v15263_v17 }
 0x456   : > { %v15184_v45 = vpop.f32.mrf.mxu1 }
 0x457   : > { %v15188_v28 = vpop.f32.mrf.mxu0  ;;  %v15190_v54 = vpop.f32.mrf.mxu2 }
 0x459   : > { %8407 = vmatmul.f32.vlgmr.msrb.gmra.mxu1 %v15111_v5  ;;  %8483 = vmatmul.f32.vlgmr.msra.gmra.mxu0 %v15120_v35 }
 0x45a   : > { %8603 = vmatpush.msrb.mxu1 %v8602_v20  ;;  %8553 = vmatmul.f32.vlgmr.msra.gmra.mxu3 %v15111_v5 }
 0x45b   : > { %8675 = vmatpush.msra.mxu0 %v8600_v18  ;;  %8749 = vmatpush.msra.mxu3 %v8748_v62  ;;  %v9063_v62 = vsub.f32 %v15263_v17, %v17570_v32 }
 0x45c   : > { %8531 = vmatmul.f32.vlgmr.msra.gmra.mxu2 %v15111_v5 }
 0x45d   : > { %8719 = vmatpush.msra.mxu2 %v8718_v15  ;;  %v15198_v3 = vpop.f32.mrf.mxu3 }
 0x45e   : > { %v15196_v27 = vpop.f32.mrf.mxu1  ;;  %17922 = vst [vmem:[#allocation21_spill] sm:$0xff] %v15198_v3 }
 0x45f   : > { %v15200_v36 = vpop.f32.mrf.mxu0  ;;  %v15205_v38 = vpop.f32.mrf.mxu2 }
 0x460   : > { %17923 = vst [vmem:[#allocation22_spill] sm:$0xff] %v15200_v36 }
 0x461   : > { %17924 = vst [vmem:[#allocation24_spill] sm:$0xff] %v15205_v38  ;;  %8507 = vmatmul.f32.vlgmr.msra.gmra.mxu1 %v15137_v52  ;;  %8579 = vmatmul.f32.vlgmr.msrb.gmra.mxu0 %v15157_v7 }
 0x462   : > { %8697 = vmatpush.msra.mxu1 %v8572_v58  ;;  %8653 = vmatmul.f32.vlgmr.msrb.gmra.mxu3 %v15137_v52 }
 0x463   : > { %8772 = vmatpush.msrb.mxu0 %v8745_v24  ;;  %8843 = vmatpush.msrb.mxu3 %v8718_v15 }
 0x464   : > { %8629 = vmatmul.f32.vlgmr.msrb.gmra.mxu2 %v15120_v35 }
 0x465   : > { %8821 = vmatpush.msrb.mxu2 %v8746_v11  ;;  %v15213_v37 = vpop.f32.mrf.mxu3 }
 0x466   : > { %v15211_v53 = vpop.f32.mrf.mxu1  ;;  %17926 = vst [vmem:[#allocation25_spill] sm:$0xff] %v15213_v37  ;;  %v15320_v37 = vand.u32 4294901760, %v8903_v21 }
 0x467   : > { %17925 = vst [vmem:[#allocation23_spill] sm:$0xff] %v15211_v53  ;;  %v15215_v2 = vpop.f32.mrf.mxu0  ;;  %v15217_v30 = vpop.f32.mrf.mxu2 }
 0x468   : > { %17927 = vst [vmem:[#allocation26_spill] sm:$0xff] %v15217_v30 }
 0x469   : > { %8605 = vmatmul.f32.vlgmr.msrb.gmra.mxu1 %v15111_v5  ;;  %8677 = vmatmul.f32.vlgmr.msra.gmra.mxu0 %v15111_v5 }
 0x46a   : > { %8795 = vmatpush.msrb.mxu1 %v8718_v15  ;;  %8751 = vmatmul.f32.vlgmr.msra.gmra.mxu3 %v15111_v5 }
 0x46c   : > { %8725 = vmatmul.f32.vlgmr.msra.gmra.mxu2 %v15157_v7  ;;  %v8909_v7 = vld [vmem:[#allocation5 + $0xc0] sm:$0xff] }
 0x46d   : > { %v15225_v47 = vpop.f32.mrf.mxu3  ;;  %v15282_v18 = vand.u32 4294901760, %v8909_v7 }
 0x46e   : > { %v15223_v59 = vpop.f32.mrf.mxu1  ;;  %17928 = vst [vmem:[#allocation28_spill] sm:$0xff] %v15225_v47 }
 0x46f   : > { %v15227_v26 = vpop.f32.mrf.mxu0  ;;  %v15229_v56 = vpop.f32.mrf.mxu2  ;;  %v15295_v31 = vsub.f32 %v8909_v7, %v15282_v18  ;;  %v15307_v7 = vand.u32 4294901760, %v8905_v46 }
 0x470   : > { %17929 = vst [vmem:[#allocation27_spill] sm:$0xff] %v15227_v26 }
 0x471   : > { %17930 = vst [vmem:[#allocation29_spill] sm:$0xff] %v15229_v56  ;;  %8699 = vmatmul.f32.vlgmr.msra.gmra.mxu1 %v15111_v5  ;;  %8775 = vmatmul.f32.vlgmr.msrb.gmra.mxu0 %v15120_v35  ;;  %v8915_v35 = vld [vmem:[#allocation5 + $0xf0] sm:$0xff]  ;;  %v17573_v32 = vand.u32 4294901760, %v15295_v31 }
 0x472   : > { %8845 = vmatmul.f32.vlgmr.msrb.gmra.mxu3 %v15111_v5 }
 0x474   : > { %8823 = vmatmul.f32.vlgmr.msrb.gmra.mxu2 %v15111_v5  ;;  %v15252_v5 = vand.u32 4294901760, %v8915_v35 }
 0x475   : > { %v15237_v25 = vpop.f32.mrf.mxu3 }
 0x476   : > { %v15235_v43 = vpop.f32.mrf.mxu1  ;;  %17932 = vst [vmem:[#allocation34_spill] sm:$0xff] %v15237_v25  ;;  %v15255_v51 = vsub.f32 %v8915_v35, %v15252_v5  ;;  %9210 = vmatpush.msra.mxu3 %v15252_v5  ;;  %9014 = vmatpush.msra.mxu0 %v15252_v5  ;;  %v15299_v35 = vand.u32 4294901760, %v8907_v8 }
 0x477   : > { %17931 = vst [vmem:[#allocation30_spill] sm:$0xff] %v15235_v43  ;;  %v15239_v10 = vpop.f32.mrf.mxu0  ;;  %v15241_v12 = vpop.f32.mrf.mxu2 }
 0x478   : > { %17933 = vst [vmem:[#allocation35_spill] sm:$0xff] %v15239_v10  ;;  %v17571_v33 = vand.u32 4294901760, %v15255_v51  ;;  %9157 = vmatpush.msra.mxu2 %v15255_v51  ;;  %9212 = vmatpush.msra.mxu3 %v15257_v39 }
 0x479   : > { %17934 = vst [vmem:[#allocation36_spill] sm:$0xff] %v15241_v12  ;;  %8799 = vmatmul.f32.vlgmr.msrb.gmra.mxu1 %v15137_v52  ;;  %v8911_v52 = vld [vmem:[#allocation5 + $0xd0] sm:$0xff]  ;;  %9016 = vmatpush.msra.mxu0 %v15257_v39 }
 0x47a   : > { %v15266_v29 = vand.u32 4294901760, %v8911_v52  ;;  %v9057_v15 = vsub.f32 %v15255_v51, %v17571_v33  ;;  %9160 = vmatpush.msra.mxu2 %v15263_v17  ;;  %v15310_v33 = vsub.f32 %v8907_v8, %v15299_v35  ;;  %v8901_v8 = vld [vmem:[#allocation5 + $0x80] sm:$0xff] }
 0x47b   : > { %v15333_v36 = vand.u32 4294901760, %v8901_v8 }
 0x47c   : > { %v15279_v24 = vsub.f32 %v8911_v52, %v15266_v29  ;;  %9214 = vmatpush.msra.mxu3 %v15266_v29  ;;  %9018 = vmatpush.msra.mxu0 %v15266_v29  ;;  %v9058_v20 = vand.u32 4294901760, %v9057_v15  ;;  %v9064_v52 = vand.u32 4294901760, %v9063_v62  ;;  %v9075_v62 = vsub.f32 %v15295_v31, %v17573_v32 }
 0x47d   : > { %v15246_v22 = vpop.f32.mrf.mxu3  ;;  %v17940_v3 = vand.u32 4294901760, %v15310_v33 }
 0x47e   : > { %v15244_v57 = vpop.f32.mrf.mxu1  ;;  %17936 = vst [vmem:[#allocation38_spill] sm:$0xff] %v15246_v22  ;;  %v17572_v16 = vand.u32 4294901760, %v15279_v24  ;;  %9163 = vmatpush.msra.mxu2 %v15279_v24  ;;  %9216 = vmatpush.msra.mxu3 %v15282_v18  ;;  %v8897_v22 = vld [vmem:[#allocation5 + $0x60] sm:$0xff] }
 0x47f   : > { %17935 = vst [vmem:[#allocation37_spill] sm:$0xff] %v15244_v57  ;;  %v15248_v23 = vpop.f32.mrf.mxu0  ;;  %v15250_v40 = vpop.f32.mrf.mxu2  ;;  %9020 = vmatpush.msra.mxu0 %v15282_v18  ;;  %9059 = vmatpush.msra.mxu1 %v9058_v20  ;;  %v9081_v38 = vsub.f32 %v15310_v33, %v17940_v3 }
 0x480   : > { %17937 = vst [vmem:[#allocation39_spill] sm:$0xff] %v15250_v40  ;;  %v9069_v15 = vsub.f32 %v15279_v24, %v17572_v16  ;;  %9166 = vmatpush.msra.mxu2 %v15295_v31  ;;  %9218 = vmatpush.msra.mxu3 %v15299_v35  ;;  %v15318_v16 = vsub.f32 %v8905_v46, %v15307_v7 }
 0x481   : > { %9022 = vmatpush.msra.mxu0 %v15299_v35  ;;  %9065 = vmatpush.msra.mxu1 %v9064_v52  ;;  %v15331_v46 = vsub.f32 %v8903_v21, %v15320_v37  ;;  %v9082_v3 = vand.u32 4294901760, %v9081_v38  ;;  %v15366_v38 = vand.u32 4294901760, %v8897_v22 }
 0x482   : > { %v9070_v20 = vand.u32 4294901760, %v9069_v15  ;;  %9169 = vmatpush.msra.mxu2 %v15310_v33  ;;  %9220 = vmatpush.msra.mxu3 %v15307_v7  ;;  %v9076_v15 = vand.u32 4294901760, %v9075_v62  ;;  %v17574_v32 = vand.u32 4294901760, %v15318_v16 }
 0x483   : > { %9024 = vmatpush.msra.mxu0 %v15307_v7  ;;  %v17575_v62 = vand.u32 4294901760, %v15331_v46 }
 0x484   : > { %9071 = vmatpush.msra.mxu1 %v9070_v20  ;;  %9172 = vmatpush.msra.mxu2 %v15318_v16  ;;  %v9087_v21 = vsub.f32 %v15318_v16, %v17574_v32 }
 0x485   : > { %v15272_v58 = vpop.f32.mrf.mxu3  ;;  %9222 = vmatpush.msra.mxu3 %v15320_v37  ;;  %9026 = vmatpush.msra.mxu0 %v15320_v37  ;;  %v9093_v32 = vsub.f32 %v15331_v46, %v17575_v62 }
 0x486   : > { %v15270_v34 = vpop.f32.mrf.mxu1  ;;  %9077 = vmatpush.msra.mxu1 %v9076_v15  ;;  %9175 = vmatpush.msra.mxu2 %v15331_v46  ;;  %v9088_v15 = vand.u32 4294901760, %v9087_v21 }
 0x487   : > { %v15285_v11 = vpop.f32.mrf.mxu0  ;;  %v15288_v60 = vpop.f32.mrf.mxu2  ;;  %9224 = vmatpush.msra.mxu3 %v15333_v36  ;;  %9028 = vmatpush.msra.mxu0 %v15333_v36  ;;  %v9094_v40 = vand.u32 4294901760, %v9093_v32 }
 0x488   : > { %9083 = vmatpush.msra.mxu1 %v9082_v3  ;;  %v8893_v3 = vld [vmem:[#allocation5 + $0x40] sm:$0xff] }
 0x489   : > { %v15390_v50 = vand.u32 4294901760, %v8893_v3 }
 0x48a   : > { %9089 = vmatpush.msra.mxu1 %v9088_v15 }
 0x48c   : > { %9095 = vmatpush.msra.mxu1 %v9094_v40 }
 0x48d   : > { %v15327_v52 = vpop.f32.mrf.mxu3 }
 0x48e   : > { %v15325_v53 = vpop.f32.mrf.mxu1  ;;  %17938 = vst [vmem:[#allocation40_spill] sm:$0xff] %v15327_v52  ;;  %v8899_v52 = vld [vmem:[#allocation5 + $0x70] sm:$0xff] }
 0x48f   : > { %v15336_v30 = vpop.f32.mrf.mxu0  ;;  %v15343_v20 = vpop.f32.mrf.mxu2  ;;  %v15352_v61 = vand.u32 4294901760, %v8899_v52 }
 0x490   : > { %17939 = vst [vmem:[#allocation41_spill] sm:$0xff] %v15336_v30  ;;  %v15350_v30 = vsub.f32 %v8901_v8, %v15333_v36 }
 0x491   : > { %17941 = vst [vmem:[#allocation42_spill] sm:$0xff] %v15343_v20  ;;  %v15362_v8 = vsub.f32 %v8899_v52, %v15352_v61  ;;  %9226 = vmatpush.msra.mxu3 %v15352_v61  ;;  %9030 = vmatpush.msra.mxu0 %v15352_v61  ;;  %v15377_v52 = vsub.f32 %v8897_v22, %v15366_v38 }
 0x492   : > { %v17576_v20 = vand.u32 4294901760, %v15350_v30  ;;  %9178 = vmatpush.msra.mxu2 %v15350_v30 }
 0x493   : > { %v17577_v62 = vand.u32 4294901760, %v15362_v8  ;;  %9228 = vmatpush.msra.mxu3 %v15366_v38  ;;  %9032 = vmatpush.msra.mxu0 %v15366_v38  ;;  %v17578_v15 = vand.u32 4294901760, %v15377_v52 }
 0x494   : > { %v9099_v21 = vsub.f32 %v15350_v30, %v17576_v20  ;;  %9181 = vmatpush.msra.mxu2 %v15362_v8 }
 0x495   : > { %v15382_v57 = vpop.f32.mrf.mxu3  ;;  %v9105_v10 = vsub.f32 %v15362_v8, %v17577_v62  ;;  %9230 = vmatpush.msra.mxu3 %v15372_v1  ;;  %9034 = vmatpush.msra.mxu0 %v15372_v1  ;;  %v9111_v40 = vsub.f32 %v15377_v52, %v17578_v15  ;;  %v8887_v15 = vld [vmem:[#allocation5 + $0x10] sm:$0xff] }
 0x496   : > { %v15380_v32 = vpop.f32.mrf.mxu1  ;;  %17943 = vst [vmem:[#allocation44_spill] sm:$0xff] %v15382_v57  ;;  %v9100_v20 = vand.u32 4294901760, %v9099_v21  ;;  %9184 = vmatpush.msra.mxu2 %v15377_v52  ;;  %v8891_v21 = vld [vmem:[#allocation5 + $0x30] sm:$0xff] }
 0x497   : > { %17942 = vst [vmem:[#allocation43_spill] sm:$0xff] %v15380_v32  ;;  %v15394_v22 = vpop.f32.mrf.mxu0  ;;  %v15398_v57 = vpop.f32.mrf.mxu2  ;;  %v9106_v62 = vand.u32 4294901760, %v9105_v10  ;;  %v15402_v32 = vsub.f32 %v8893_v3, %v15390_v50  ;;  %v15404_v43 = vand.u32 4294901760, %v8891_v21  ;;  %v9117_v10 = vsub.f32 %v15388_v49, %v17579_v44  ;;  %9232 = vmatpush.msra.mxu3 %v15390_v50  ;;  %9036 = vmatpush.msra.mxu0 %v15390_v50 }
 0x498   : > { %17944 = vst [vmem:[#allocation45_spill] sm:$0xff] %v15398_v57  ;;  %9101 = vmatpush.msra.mxu1 %v9100_v20  ;;  %9187 = vmatpush.msra.mxu2 %v15388_v49  ;;  %v8889_v57 = vld [vmem:[#allocation5 + $0x20] sm:$0xff]  ;;  %v9112_v20 = vand.u32 4294901760, %v9111_v40 }
 0x499   : > { %v17580_v3 = vand.u32 4294901760, %v15402_v32  ;;  %v15417_v0 = vsub.f32 %v8891_v21, %v15404_v43  ;;  %v15419_v25 = vand.u32 4294901760, %v8889_v57  ;;  %v9118_v12 = vand.u32 4294901760, %v9117_v10  ;;  %9234 = vmatpush.msra.mxu3 %v15404_v43  ;;  %9038 = vmatpush.msra.mxu0 %v15404_v43  ;;  %v8885_v40 = vld [vmem:[#allocation5] sm:$0xff] }
 0x49a   : > { %9107 = vmatpush.msra.mxu1 %v9106_v62  ;;  %9190 = vmatpush.msra.mxu2 %v15402_v32  ;;  %v15434_v62 = vand.u32 4294901760, %v8887_v15  ;;  %v15444_v13 = vand.u32 4294901760, %v8885_v40 }
 0x49b   : > { %17945 = vst [vmem:[#allocation46_spill] sm:$0xff] %v15419_v25  ;;  %v9123_v44 = vsub.f32 %v15402_v32, %v17580_v3  ;;  %v17581_v4 = vand.u32 4294901760, %v15417_v0  ;;  %v15429_v21 = vsub.f32 %v8889_v57, %v15419_v25  ;;  %9236 = vmatpush.msra.mxu3 %v15419_v25  ;;  %9040 = vmatpush.msra.mxu0 %v15419_v25  ;;  %v8943_v25 = vld [vmem:[#allocation5 + $0x1d0] sm:$0xff] }
 0x49c   : > { %9113 = vmatpush.msra.mxu1 %v9112_v20  ;;  %9193 = vmatpush.msra.mxu2 %v15417_v0  ;;  %17946 = vst [vmem:[#allocation47_spill] sm:$0xff] %v15434_v62  ;;  %v15451_v9 = vsub.f32 %v8887_v15, %v15434_v62  ;;  %v15460_v47 = vsub.f32 %v8885_v40, %v15444_v13 }
 0x49d   : > { %v15438_v26 = vpop.f32.mrf.mxu3  ;;  %v9124_v3 = vand.u32 4294901760, %v9123_v44  ;;  %v9129_v57 = vsub.f32 %v15417_v0, %v17581_v4  ;;  %v17582_v55 = vand.u32 4294901760, %v15429_v21  ;;  %17948 = vst [vmem:[#allocation49_spill] sm:$0xff] %v15444_v13  ;;  %9238 = vmatpush.msra.mxu3 %v15434_v62  ;;  %9042 = vmatpush.msra.mxu0 %v15434_v62  ;;  %v17952_v62 = vand.u32 4294901760, %v15255_v51 }
 0x49e   : > { %v15436_v10 = vpop.f32.mrf.mxu1  ;;  %17947 = vst [vmem:[#allocation48_spill] sm:$0xff] %v15438_v26  ;;  %9119 = vmatpush.msra.mxu1 %v9118_v12  ;;  %9196 = vmatpush.msra.mxu2 %v15429_v21  ;;  %v17584_v12 = vand.u32 4294901760, %v15451_v9 }
 0x49f   : > { %v15448_v20 = vpop.f32.mrf.mxu0  ;;  %v15454_v44 = vpop.f32.mrf.mxu2  ;;  %v9130_v26 = vand.u32 4294901760, %v9129_v57  ;;  %v9135_v4 = vsub.f32 %v15429_v21, %v17582_v55  ;;  %17951 = vst [vmem:[#allocation52_spill] sm:$0xff] %v15460_v47  ;;  %v8947_v57 = vld [vmem:[#allocation5 + $0x1f0] sm:$0xff]  ;;  %9240 = vmatpush.msra.mxu3 %v15444_v13  ;;  %9044 = vmatpush.msra.mxu0 %v15444_v13  ;;  %v8945_v55 = vld [vmem:[#allocation5 + $0x1e0] sm:$0xff] }
 0x4a0   : > { %17949 = vst [vmem:[#allocation50_spill] sm:$0xff] %v15448_v20  ;;  %9125 = vmatpush.msra.mxu1 %v9124_v3  ;;  %9199 = vmatpush.msra.mxu2 %v15451_v9  ;;  %v17587_v20 = vand.u32 4294901760, %v15460_v47  ;;  %v9141_v40 = vsub.f32 %v15451_v9, %v17584_v12  ;;  %v15473_v3 = vand.u32 4294901760, %v8947_v57 }
 0x4a1   : > { %17950 = vst [vmem:[#allocation51_spill] sm:$0xff] %v15454_v44  ;;  %v9136_v15 = vand.u32 4294901760, %v9135_v4  ;;  %v15478_v44 = vand.u32 4294901760, %v8945_v55  ;;  %9251 = vmatpush.msrb.mxu0 %v17952_v62  ;;  %v15496_v62 = vand.u32 4294901760, %v8943_v25 }
 0x4a2   : > { %9131 = vmatpush.msra.mxu1 %v9130_v26  ;;  %9202 = vmatpush.msra.mxu2 %v15460_v47  ;;  %v9147_v4 = vsub.f32 %v15460_v47, %v17587_v20  ;;  %v9142_v26 = vand.u32 4294901760, %v9141_v40  ;;  %v15484_v12 = vsub.f32 %v8947_v57, %v15473_v3  ;;  %v17954_v20 = vand.u32 4294901760, %v15263_v17 }
 0x4a3   : > { %v6714_v57 = vadd.f32 %v15184_v45, %v15175_v63  ;;  %v17955_v17 = vand.u32 4294901760, %v15279_v24  ;;  %v15518_v45 = vsub.f32 %v8943_v25, %v15496_v62  ;;  %v8939_v24 = vld [vmem:[#allocation5 + $0x1b0] sm:$0xff] }
 0x4a4   : > { %9137 = vmatpush.msra.mxu1 %v9136_v15  ;;  %9355 = vmatpush.msrb.mxu2 %v15473_v3  ;;  %17953 = vst [vmem:[#allocation53_spill] sm:$0xff] %v15484_v12  ;;  %v9148_v56 = vand.u32 4294901760, %v9147_v4  ;;  %v17589_v51 = vand.u32 4294901760, %v15484_v12  ;;  %v15499_v15 = vsub.f32 %v8945_v55, %v15478_v44  ;;  %v8941_v4 = vld [vmem:[#allocation5 + $0x1c0] sm:$0xff]  ;;  %v7345_v55 = vadd.f32 %v15270_v34, %v15248_v23 }
 0x4a5   : > { %v15488_v48 = vpop.f32.mrf.mxu3  ;;  %9255 = vmatpush.msrb.mxu0 %v17954_v20  ;;  %v15515_v63 = vand.u32 4294901760, %v8941_v4  ;;  %17956 = vst [vmem:[#allocation54_spill] sm:$0xff] %v15518_v45  ;;  %v6738_v23 = vadd.f32 %v15190_v54, %v6714_v57  ;;  %v17593_v25 = vand.u32 4294901760, %v15518_v45  ;;  %v8937_v34 = vld [vmem:[#allocation5 + $0x1a0] sm:$0xff] }
 0x4a6   : > { %v15486_v13 = vpop.f32.mrf.mxu1  ;;  %9143 = vmatpush.msra.mxu1 %v9142_v26  ;;  %9357 = vmatpush.msrb.mxu2 %v15478_v44  ;;  %v9398_v20 = vsub.f32 %v15484_v12, %v17589_v51  ;;  %v17592_v26 = vand.u32 4294901760, %v15499_v15  ;;  %v15525_v12 = vand.u32 4294901760, %v8939_v24  ;;  %v7369_v54 = vadd.f32 %v15288_v60, %v7345_v55 }
 0x4a7   : > { %v15492_v47 = vpop.f32.mrf.mxu0  ;;  %v15503_v40 = vpop.f32.mrf.mxu2  ;;  %9259 = vmatpush.msrb.mxu0 %v17955_v17  ;;  %v6762_v55 = vadd.f32 %v15186_v14, %v6738_v23  ;;  %v17965_v14 = vand.u32 4294901760, %v15331_v46  ;;  %v17966_v46 = vand.u32 4294901760, %v15350_v30  ;;  %v17967_v30 = vand.u32 4294901760, %v15362_v8 }
 0x4a8   : > { %9149 = vmatpush.msra.mxu1 %v9148_v56  ;;  %9359 = vmatpush.msrb.mxu2 %v15496_v62  ;;  %v17957_v56 = vand.u32 4294901760, %v15295_v31  ;;  %v9399_v17 = vand.u32 4294901760, %v9398_v20  ;;  %v9404_v51 = vsub.f32 %v15499_v15, %v17592_v26  ;;  %17958 = vst [vmem:[#allocation55_spill] sm:$0xff] %v15525_v12  ;;  %v15534_v20 = vand.u32 4294901760, %v8937_v34 }
 0x4a9   : > { %v17961_v26 = vand.u32 4294901760, %v15310_v33  ;;  %v8933_v33 = vld [vmem:[#allocation5 + $0x180] sm:$0xff] }
 0x4aa   : > { %9318 = vmatpush.msrb.mxu1 %v15252_v5  ;;  %9263 = vmatpush.msrb.mxu0 %v17957_v56  ;;  %v15532_v5 = vsub.f32 %v8941_v4, %v15515_v63  ;;  %v9405_v31 = vand.u32 4294901760, %v9404_v51  ;;  %17959 = vst [vmem:[#allocation56_spill] sm:$0xff] %v15534_v20  ;;  %v15537_v56 = vsub.f32 %v8939_v24, %v15525_v12  ;;  %v8935_v24 = vld [vmem:[#allocation5 + $0x190] sm:$0xff] }
 0x4ab   : > { %9361 = vmatpush.msrb.mxu2 %v15515_v63  ;;  %9400 = vmatpush.msrb.mxu3 %v9399_v17  ;;  %v9410_v51 = vsub.f32 %v15518_v45, %v17593_v25  ;;  %v15553_v60 = vand.u32 4294901760, %v8935_v24 }
 0x4ac   : > { %9320 = vmatpush.msrb.mxu1 %v15257_v39  ;;  %17960 = vst [vmem:[#allocation57_spill] sm:$0xff] %v15537_v56  ;;  %9267 = vmatpush.msrb.mxu0 %v17961_v26  ;;  %v15556_v26 = vsub.f32 %v8937_v34, %v15534_v20  ;;  %v17964_v34 = vand.u32 4294901760, %v15537_v56 }
 0x4ad   : > { %v15544_v57 = vpop.f32.mrf.mxu3  ;;  %9363 = vmatpush.msrb.mxu2 %v15525_v12  ;;  %9406 = vmatpush.msrb.mxu3 %v9405_v31  ;;  %v9411_v4 = vand.u32 4294901760, %v9410_v51  ;;  %v17963_v12 = vand.u32 4294901760, %v15532_v5  ;;  %v15579_v23 = vsub.f32 %v8935_v24, %v15553_v60  ;;  %v8931_v51 = vld [vmem:[#allocation5 + $0x170] sm:$0xff] }
 0x4ae   : > { %v15542_v39 = vpop.f32.mrf.mxu1  ;;  %9322 = vmatpush.msrb.mxu1 %v15266_v29  ;;  %v17962_v29 = vand.u32 4294901760, %v15318_v16  ;;  %v9422_v45 = vsub.f32 %v15537_v56, %v17964_v34  ;;  %v17611_v16 = vand.u32 4294901760, %v15556_v26  ;;  %v15585_v56 = vand.u32 4294901760, %v8931_v51 }
 0x4af   : > { %v7949_v17 = vpop.f32.mrf.mxu0  ;;  %v15561_v25 = vpop.f32.mrf.mxu2  ;;  %v9416_v31 = vsub.f32 %v15532_v5, %v17963_v12  ;;  %9365 = vmatpush.msrb.mxu2 %v15534_v20  ;;  %9412 = vmatpush.msrb.mxu3 %v9411_v4 }
 0x4b0   : > { %9271 = vmatpush.msrb.mxu0 %v17962_v29  ;;  %9324 = vmatpush.msrb.mxu1 %v15282_v18  ;;  %v15572_v29 = vand.u32 4294901760, %v8933_v33  ;;  %v7393_v18 = vadd.f32 %v15272_v58, %v7369_v54  ;;  %v9423_v20 = vand.u32 4294901760, %v9422_v45  ;;  %v9428_v34 = vsub.f32 %v15556_v26, %v17611_v16  ;;  %v8929_v54 = vld [vmem:[#allocation5 + $0x160] sm:$0xff] }
 0x4b1   : > { %v9417_v12 = vand.u32 4294901760, %v9416_v31  ;;  %9367 = vmatpush.msrb.mxu2 %v15553_v60  ;;  %v6786_v58 = vadd.f32 %v15188_v28, %v6762_v55  ;;  %v15596_v24 = vand.u32 4294901760, %v8929_v54  ;;  %v15599_v31 = vsub.f32 %v8931_v51, %v15585_v56 }
 0x4b2   : > { %9275 = vmatpush.msrb.mxu0 %v17965_v14  ;;  %9326 = vmatpush.msrb.mxu1 %v15299_v35  ;;  %v17602_v35 = vand.u32 4294901760, %v15579_v23  ;;  %v15593_v45 = vsub.f32 %v8933_v33, %v15572_v29  ;;  %v9429_v4 = vand.u32 4294901760, %v9428_v34  ;;  %v7417_v28 = vadd.f32 %v15285_v11, %v7393_v18 }
 0x4b3   : > { %9418 = vmatpush.msrb.mxu3 %v9417_v12  ;;  %9369 = vmatpush.msrb.mxu2 %v15572_v29  ;;  %v8927_v12 = vld [vmem:[#allocation5 + $0x150] sm:$0xff]  ;;  %v17603_v8 = vand.u32 4294901760, %v15599_v31  ;;  %v15614_v11 = vsub.f32 %v8929_v54, %v15596_v24 }
 0x4b4   : > { %9279 = vmatpush.msrb.mxu0 %v17966_v46  ;;  %9328 = vmatpush.msrb.mxu1 %v15307_v7  ;;  %v9434_v33 = vsub.f32 %v15579_v23, %v17602_v35  ;;  %v17610_v14 = vand.u32 4294901760, %v15593_v45  ;;  %v15611_v46 = vand.u32 4294901760, %v8927_v12 }
 0x4b5   : > { %v8023_v55 = vpop.f32.mrf.mxu3  ;;  %9424 = vmatpush.msrb.mxu3 %v9423_v20  ;;  %9371 = vmatpush.msrb.mxu2 %v15585_v56  ;;  %v6808_v20 = vadd.f32 %v15196_v27, %v6786_v58  ;;  %v17609_v54 = vand.u32 4294901760, %v15614_v11  ;;  %v7439_v58 = vadd.f32 %v15325_v53, %v7417_v28  ;;  %v17970_v53 = vand.u32 4294901760, %v15402_v32 }
 0x4b6   : > { %9283 = vmatpush.msrb.mxu0 %v17967_v30  ;;  %v7975_v7 = vpop.f32.mrf.mxu1  ;;  %9330 = vmatpush.msrb.mxu1 %v15320_v37  ;;  %v17968_v37 = vand.u32 4294901760, %v15377_v52  ;;  %v9440_v30 = vsub.f32 %v15593_v45, %v17610_v14  ;;  %v9446_v52 = vsub.f32 %v15599_v31, %v17603_v8 }
 0x4b7   : > { %v7976_v34 = vadd.f32 %v7975_v7, %v7949_v17  ;;  %v8047_v51 = vpop.f32.mrf.mxu0  ;;  %v7999_v18 = vpop.f32.mrf.mxu2  ;;  %9430 = vmatpush.msrb.mxu3 %v9429_v4  ;;  %v9435_v17 = vand.u32 4294901760, %v9434_v33  ;;  %v8925_v7 = vld [vmem:[#allocation5 + $0x140] sm:$0xff]  ;;  %9373 = vmatpush.msrb.mxu2 %v15596_v24  ;;  %v15635_v33 = vsub.f32 %v8927_v12, %v15611_v46  ;;  %v9452_v8 = vsub.f32 %v15614_v11, %v17609_v54  ;;  %v17991_v54 = vld [vmem:[#allocation27_spill] sm:$0xff] }
 0x4b8   : > { %9287 = vmatpush.msrb.mxu0 %v17968_v37  ;;  %9332 = vmatpush.msrb.mxu1 %v15333_v36  ;;  %v15628_v27 = vand.u32 4294901760, %v8925_v7  ;;  %v17969_v36 = vand.u32 4294901760, %v15388_v49  ;;  %v9441_v4 = vand.u32 4294901760, %v9440_v30 }
 0x4b9   : > { %v8000_v35 = vadd.f32 %v7999_v18, %v7976_v34  ;;  %9436 = vmatpush.msrb.mxu3 %v9435_v17  ;;  %v8923_v34 = vld [vmem:[#allocation5 + $0x130] sm:$0xff]  ;;  %v9447_v18 = vand.u32 4294901760, %v9446_v52  ;;  %9375 = vmatpush.msrb.mxu2 %v15611_v46  ;;  %v17608_v28 = vand.u32 4294901760, %v15635_v33  ;;  %v9453_v17 = vand.u32 4294901760, %v9452_v8 }
 0x4ba   : > { %9291 = vmatpush.msrb.mxu0 %v17969_v36  ;;  %9334 = vmatpush.msrb.mxu1 %v15352_v61  ;;  %v15641_v49 = vand.u32 4294901760, %v8923_v34  ;;  %v6958_v61 = vadd.f32 %v6808_v20, %v15095_v41  ;;  %v17971_v41 = vand.u32 4294901760, %v15417_v0  ;;  %v8919_v36 = vld [vmem:[#allocation5 + $0x110] sm:$0xff] }
 0x4bb   : > { %v8024_v37 = vadd.f32 %v8023_v55, %v8000_v35  ;;  %9442 = vmatpush.msrb.mxu3 %v9441_v4  ;;  %v15649_v35 = vsub.f32 %v8925_v7, %v15628_v27  ;;  %v8921_v55 = vld [vmem:[#allocation5 + $0x120] sm:$0xff]  ;;  %9377 = vmatpush.msrb.mxu2 %v15628_v27 }
 0x4bc   : > { %9295 = vmatpush.msrb.mxu0 %v17970_v53  ;;  %9336 = vmatpush.msrb.mxu1 %v15366_v38  ;;  %v15652_v30 = vand.u32 4294901760, %v8921_v55  ;;  %v15655_v32 = vsub.f32 %v8923_v34, %v15641_v49  ;;  %v6422_v38 = vadd.f32 %v15131_v6, %v15113_v19  ;;  %v7589_v20 = vadd.f32 %v7439_v58, %v6958_v61  ;;  %v8917_v53 = vld [vmem:[#allocation5 + $0x100] sm:$0xff] }
 0x4bd   : > { %v8048_v12 = vadd.f32 %v8047_v51, %v8024_v37  ;;  %v15661_v7 = vpop.f32.mrf.mxu3  ;;  %9448 = vmatpush.msrb.mxu3 %v9447_v18  ;;  %v9458_v51 = vsub.f32 %v15635_v33, %v17608_v28  ;;  %v17607_v8 = vand.u32 4294901760, %v15649_v35  ;;  %9379 = vmatpush.msrb.mxu2 %v15641_v49  ;;  %v15672_v6 = vand.u32 4294901760, %v8919_v36 }
 0x4be   : > { %9299 = vmatpush.msrb.mxu0 %v17971_v41  ;;  %v8069_v52 = vpop.f32.mrf.mxu1  ;;  %9338 = vmatpush.msrb.mxu1 %v15372_v1  ;;  %v17606_v19 = vand.u32 4294901760, %v15655_v32  ;;  %v15675_v58 = vsub.f32 %v8921_v55, %v15652_v30  ;;  %v17973_v1 = vand.u32 4294901760, %v15429_v21  ;;  %v7053_v61 = vadd.f32 %v15223_v59, %v15215_v2 }
 0x4bf   : > { %v8070_v4 = vadd.f32 %v8069_v52, %v8048_v12  ;;  %v15668_v0 = vpop.f32.mrf.mxu0  ;;  %v15679_v34 = vpop.f32.mrf.mxu2  ;;  %9454 = vmatpush.msrb.mxu3 %v9453_v17  ;;  %v9459_v37 = vand.u32 4294901760, %v9458_v51  ;;  %v9464_v18 = vsub.f32 %v15649_v35, %v17607_v8  ;;  %9381 = vmatpush.msrb.mxu2 %v15652_v30  ;;  %v17974_v55 = vand.u32 4294901760, %v15451_v9 }
 0x4c0   : > { %17972 = vst [vmem:[#allocation58_spill] sm:$0xff] %v15675_v58  ;;  %9303 = vmatpush.msrb.mxu0 %v17973_v1  ;;  %9340 = vmatpush.msrb.mxu1 %v15390_v50  ;;  %v9470_v21 = vsub.f32 %v15655_v32, %v17606_v19  ;;  %v17604_v50 = vand.u32 4294901760, %v15675_v58  ;;  %v6446_v17 = vadd.f32 %v15143_v42, %v6422_v38  ;;  %v15698_v2 = vand.u32 4294901760, %v8917_v53  ;;  %v17977_v42 = vld [vmem:[#allocation52_spill] sm:$0xff] }
 0x4c1   : > { %v15687_v12 = vadd.f32 %v8070_v4, %v7589_v20  ;;  %9460 = vmatpush.msrb.mxu3 %v9459_v37  ;;  %v9465_v41 = vand.u32 4294901760, %v9464_v18  ;;  %v15701_v59 = vsub.f32 %v8919_v36, %v15672_v6  ;;  %v7684_v20 = vadd.f32 %v15436_v10, %v15394_v22  ;;  %9383 = vmatpush.msrb.mxu2 %v15672_v6  ;;  %v17981_v4 = vld [vmem:[#allocation29_spill] sm:$0xff]  ;;  %v17982_v1 = vld [vmem:[#allocation32_spill] sm:$0xff] }
 0x4c2   : > { %9307 = vmatpush.msrb.mxu0 %v17974_v55  ;;  %9342 = vmatpush.msrb.mxu1 %v15404_v43  ;;  %17975 = vst [vmem:[#allocation59_spill] sm:$0xff] %v15698_v2  ;;  %v9471_v52 = vand.u32 4294901760, %v9470_v21  ;;  %v9476_v9 = vsub.f32 %v15675_v58, %v17604_v50  ;;  %v17978_v38 = vand.u32 4294901760, %v17977_v42  ;;  %v17979_v43 = vld [vmem:[#allocation46_spill] sm:$0xff]  ;;  %v15714_v36 = vsub.f32 %v8917_v53, %v15698_v2  ;;  %v17983_v55 = vld [vmem:[#allocation47_spill] sm:$0xff]  ;;  %v17988_v19 = vld [vmem:[#allocation48_spill] sm:$0xff] }
 0x4c3   : > { %17976 = vst [vmem:[#allocation60_spill] sm:$0xff] %v15701_v59  ;;  %9466 = vmatpush.msrb.mxu3 %v9465_v41  ;;  %v17605_v51 = vand.u32 4294901760, %v15701_v59  ;;  %v7077_v22 = vadd.f32 %v17981_v4, %v7053_v61  ;;  %9385 = vmatpush.msrb.mxu2 %v15698_v2  ;;  %v6470_v37 = vadd.f32 %v17982_v1, %v6446_v17  ;;  %v17984_v42 = vld [vmem:[#allocation51_spill] sm:$0xff] }
 0x4c4   : > { %9311 = vmatpush.msrb.mxu0 %v17978_v38  ;;  %9344 = vmatpush.msrb.mxu1 %v17979_v43  ;;  %17980 = vst [vmem:[#allocation52_spill] sm:$0xff] %v15714_v36  ;;  %v9477_v10 = vand.u32 4294901760, %v9476_v9  ;;  %v17614_v53 = vand.u32 4294901760, %v15714_v36  ;;  %v7708_v61 = vadd.f32 %v17984_v42, %v7684_v20  ;;  %v17985_v43 = vld [vmem:[#allocation49_spill] sm:$0xff]  ;;  %v17990_v42 = vld [vmem:[#allocation19_spill] sm:$0xff] }
 0x4c5   : > { %v15721_v21 = vpop.f32.mrf.mxu3  ;;  %9472 = vmatpush.msrb.mxu3 %v9471_v52  ;;  %v9482_v41 = vsub.f32 %v15701_v59, %v17605_v51  ;;  %v17986_v52 = vld [vmem:[#allocation28_spill] sm:$0xff]  ;;  %v17989_v20 = vld [vmem:[#allocation17_spill] sm:$0xff]  ;;  %v18000_v2 = vld [vmem:[#allocation35_spill] sm:$0xff] }
 0x4c6   : > { %v15719_v18 = vpop.f32.mrf.mxu1  ;;  %9346 = vmatpush.msrb.mxu1 %v17983_v55  ;;  %v9488_v4 = vsub.f32 %v15714_v36, %v17614_v53  ;;  %v7101_v1 = vadd.f32 %v17986_v52, %v7077_v22  ;;  %v17987_v55 = vld [vmem:[#allocation15_spill] sm:$0xff]  ;;  %v7732_v8 = vadd.f32 %v17988_v19, %v7708_v61  ;;  %v6568_v28 = vadd.f32 %v17990_v42, %v17989_v20  ;;  %v17993_v59 = vld [vmem:[#allocation36_spill] sm:$0xff]  ;;  %v17994_v53 = vld [vmem:[#allocation34_spill] sm:$0xff] }
 0x4c7   : > { %v8288_v9 = vpop.f32.mrf.mxu0  ;;  %v15729_v38 = vpop.f32.mrf.mxu2  ;;  %9478 = vmatpush.msrb.mxu3 %v9477_v10  ;;  %v9483_v17 = vand.u32 4294901760, %v9482_v41  ;;  %v6494_v50 = vadd.f32 %v17987_v55, %v6470_v37  ;;  %v17992_v10 = vld [vmem:[#allocation13_spill] sm:$0xff]  ;;  %v7199_v36 = vadd.f32 %v17994_v53, %v17993_v59  ;;  %v17995_v22 = vld [vmem:[#allocation50_spill] sm:$0xff]  ;;  %v17996_v55 = vld [vmem:[#allocation16_spill] sm:$0xff]  ;;  %v7830_v20 = vadd.f32 %v15488_v48, %v15503_v40 }
 0x4c8   : > { %9348 = vmatpush.msrb.mxu1 %v17985_v43  ;;  %v9489_v51 = vand.u32 4294901760, %v9488_v4  ;;  %v7125_v43 = vadd.f32 %v17991_v54, %v7101_v1  ;;  %v7756_v52 = vadd.f32 %v17995_v22, %v7732_v8  ;;  %v6592_v19 = vadd.f32 %v17996_v55, %v6568_v28  ;;  %v17998_v1 = vld [vmem:[#allocation31_spill] sm:$0xff]  ;;  %v17999_v42 = vld [vmem:[#allocation18_spill] sm:$0xff]  ;;  %v18001_v53 = vld [vmem:[#allocation37_spill] sm:$0xff] }
 0x4c9   : > { %9484 = vmatpush.msrb.mxu3 %v9483_v17  ;;  %v6516_v41 = vadd.f32 %v17992_v10, %v6494_v50  ;;  %v7223_v58 = vadd.f32 %v18000_v2, %v7199_v36  ;;  %v7854_v28 = vadd.f32 %v15492_v47, %v7830_v20  ;;  %v15757_v2 = vpop.permute.xlu2 %8856 }
 0x4ca   : > { %v6616_v10 = vadd.f32 %v17999_v42, %v6592_v19  ;;  %v7778_v59 = vadd.f32 %v15486_v13, %v7756_v52  ;;  %v18003_v13 = vld [vmem:[#allocation39_spill] sm:$0xff] }
 0x4cb   : > { %9490 = vmatpush.msrb.mxu3 %v9489_v51  ;;  %v17997_v51 = vld [vmem:[#allocation30_spill] sm:$0xff]  ;;  %v6956_v50 = vadd.f32 %v6516_v41, %v17998_v1  ;;  %v7878_v41 = vadd.f32 %v15542_v39, %v7854_v28 }
 0x4cc   : > { %v7147_v61 = vadd.f32 %v17997_v51, %v7125_v43  ;;  %v18002_v51 = vld [vmem:[#allocation12_spill] sm:$0xff] }
 0x4cd   : > { %v8362_v16 = vpop.f32.mrf.mxu3  ;;  %v6640_v48 = vadd.f32 %v18002_v51, %v6616_v10  ;;  %v7902_v47 = vadd.f32 %v15561_v25, %v7878_v41  ;;  %v18007_v10 = vld [vmem:[#allocation14_spill] sm:$0xff]  ;;  %v18012_v41 = vld [vmem:[#allocation24_spill] sm:$0xff] }
 0x4ce   : > { %v8314_v14 = vpop.f32.mrf.mxu1 }
 0x4cf   : > { %v8315_v37 = vadd.f32 %v8314_v14, %v8288_v9  ;;  %v8386_v17 = vpop.f32.mrf.mxu0  ;;  %v8338_v4 = vpop.f32.mrf.mxu2  ;;  %v7587_v14 = vadd.f32 %v7147_v61, %v6956_v50  ;;  %v7247_v9 = vadd.f32 %v18001_v53, %v7223_v58  ;;  %v18004_v58 = vld [vmem:[#allocation20_spill] sm:$0xff] }
 0x4d0   : > { %v6662_v61 = vadd.f32 %v18004_v58, %v6640_v48 }
 0x4d1   : > { %v8339_v54 = vadd.f32 %v8338_v4, %v8315_v37  ;;  %v8218_v40 = vadd.f32 %v7778_v59, %v7587_v14 }
 0x4d2   : > { %v6957_v59 = vadd.f32 %v6662_v61, %v18007_v10  ;;  %v18018_v61 = vld [vmem:[#allocation54_spill] sm:$0xff] }
 0x4d3   : > { %v8363_v8 = vadd.f32 %v8362_v16, %v8339_v54  ;;  %v7271_v16 = vadd.f32 %v18003_v13, %v7247_v9  ;;  %v18005_v54 = vld [vmem:[#allocation38_spill] sm:$0xff] }
 0x4d4   : > { %v18020_v10 = vld [vmem:[#allocation22_spill] sm:$0xff] }
 0x4d5   : > { %v8387_v22 = vadd.f32 %v8386_v17, %v8363_v8  ;;  %v8460_v55 = vpop.f32.mrf.mxu3  ;;  %v7293_v1 = vadd.f32 %v18005_v54, %v7271_v16  ;;  %v7924_v8 = vadd.f32 %v15544_v57, %v7902_v47  ;;  %v18010_v57 = vld [vmem:[#allocation53_spill] sm:$0xff]  ;;  %v18019_v47 = vand.u32 4294901760, %v18018_v61 }
 0x4d6   : > { %v8408_v43 = vpop.f32.mrf.mxu1 }
 0x4d7   : > { %v8409_v37 = vadd.f32 %v8408_v43, %v8387_v22  ;;  %v8484_v4 = vpop.f32.mrf.mxu0  ;;  %v8434_v19 = vpop.f32.mrf.mxu2  ;;  %v7588_v28 = vadd.f32 %v7293_v1, %v6957_v59 }
 0x4d8   : > { %v8461_v52 = vadd.f32 %v8460_v55, %v8434_v19  ;;  %v18011_v55 = vand.u32 4294901760, %v18010_v57  ;;  %v18014_v19 = vand.u32 4294901760, %v15499_v15 }
 0x4d9   : > { %v8849_v36 = vadd.f32 %v8409_v37, %v8218_v40  ;;  %v8219_v51 = vadd.f32 %v7924_v8, %v7588_v28  ;;  %v18013_v37 = vld [vmem:[#allocation21_spill] sm:$0xff]  ;;  %v8122_v8 = vadd.f32 %v15661_v7, %v15679_v34  ;;  %v18027_v34 = vld [vmem:[#allocation56_spill] sm:$0xff] }
 0x4da   : > { %v8485_v20 = vadd.f32 %v8484_v4, %v8461_v52  ;;  %v6860_v4 = vadd.f32 %v18013_v37, %v18012_v41  ;;  %v18017_v52 = vld [vmem:[#allocation40_spill] sm:$0xff] }
 0x4db   : > { %v8859_v17 = vadd.f32 %v15757_v2, %v8849_v36  ;;  %v18016_v36 = vld [vmem:[#allocation42_spill] sm:$0xff]  ;;  %v8979_v37 = vld [vmem:[#allocation5 + $0x2f0] sm:$0xff] }
 0x4dc   : > { %v7491_v58 = vadd.f32 %v18017_v52, %v18016_v36  ;;  %v6884_v59 = vadd.f32 %v18020_v10, %v6860_v4  ;;  %v18034_v10 = vld [vmem:[#allocation45_spill] sm:$0xff] }
 0x4dd   : > { %v15764_v50 = vand.u32 4294901760, %v8859_v17  ;;  %v8554_v42 = vpop.f32.mrf.mxu3  ;;  %v8863_v1 = vmul.f32 %v8859_v17, %v8859_v17 }
 0x4de   : > { %v8508_v39 = vpop.f32.mrf.mxu1 }
 0x4df   : > { %18006 = vst [vmem:[#allocation46_spill] sm:$0xff] %v15764_v50  ;;  %v15769_v14 = vsub.f32 %v8859_v17, %v15764_v50  ;;  %v8509_v53 = vadd.f32 %v8508_v39, %v8485_v20  ;;  %9151 = vmatmul.f32.vlgmr.msra.gmra.mxu1 %v15764_v50  ;;  %v8580_v25 = vpop.f32.mrf.mxu0  ;;  %v8532_v9 = vpop.f32.mrf.mxu2  ;;  %v18022_v17 = vld [vmem:[#allocation55_spill] sm:$0xff]  ;;  %v8867_v4 = vsel %vm3270_vm2, %v8863_v1, 0.0  ;;  %v15837_v1 = vand.u32 4294901760, %v8979_v37 }
 0x4e0   : > { %9551 = vmatpush.msra.mxu1 %v15473_v3 }
 0x4e1   : > { %18008 = vst [vmem:[#allocation29_spill] sm:$0xff] %v15769_v14  ;;  %v8533_v22 = vadd.f32 %v8532_v9, %v8509_v53  ;;  %9205 = vmatmul.f32.vlgmr.msra.gmra.mxu2 %v15769_v14  ;;  %v15775_v43 = vand.u32 4294901760, %v15769_v14 }
 0x4e2   : > { %9553 = vmatpush.msra.mxu1 %v15478_v44  ;;  %9592 = vmatpush.msra.mxu2 %v18011_v55 }
 0x4e3   : > { %18009 = vst [vmem:[#allocation32_spill] sm:$0xff] %v15775_v43  ;;  %v8555_v48 = vadd.f32 %v8554_v42, %v8533_v22  ;;  %9244 = vmatmul.f32.vlgmr.msra.gmra.mxu3 %v15775_v43  ;;  %v9048_v40 = vsub.f32 %v15769_v14, %v15775_v43  ;;  %v18024_v22 = vld [vmem:[#allocation23_spill] sm:$0xff] }
 0x4e4   : > { %9555 = vmatpush.msra.mxu1 %v15496_v62  ;;  %9596 = vmatpush.msra.mxu2 %v18014_v19  ;;  %v6908_v55 = vadd.f32 %v18024_v22, %v6884_v59  ;;  %v18035_v59 = vand.u32 4294901760, %v15579_v23  ;;  %v18037_v22 = vld [vmem:[#allocation25_spill] sm:$0xff] }
 0x4e5   : > { %v8850_v13 = vadd.f32 %v8555_v48, %v8219_v51  ;;  %9659 = vmatpush.msra.mxu3 %v15473_v3  ;;  %v15789_v16 = vand.u32 4294901760, %v9048_v40  ;;  %v8654_v54 = vpop.f32.mrf.mxu3  ;;  %v18025_v51 = vld [vmem:[#allocation41_spill] sm:$0xff] }
 0x4e6   : > { %9557 = vmatpush.msra.mxu1 %v15515_v63  ;;  %9600 = vmatpush.msra.mxu2 %v18019_v47  ;;  %v8606_v20 = vpop.f32.mrf.mxu1  ;;  %v7515_v48 = vadd.f32 %v18025_v51, %v7491_v58  ;;  %v18032_v47 = vld [vmem:[#allocation26_spill] sm:$0xff] }
 0x4e7   : > { %18015 = vst [vmem:[#allocation47_spill] sm:$0xff] %v15789_v16  ;;  %v8860_v39 = vadd.f32 %v15757_v2, %v8850_v13  ;;  %9661 = vmatpush.msra.mxu3 %v15478_v44  ;;  %v8607_v42 = vadd.f32 %v8606_v20, %v8580_v25  ;;  %9050 = vmatmul.f32.vlgmr.msra.gmra.mxu0 %v15789_v16  ;;  %v8678_v3 = vpop.f32.mrf.mxu0  ;;  %v8630_v53 = vpop.f32.mrf.mxu2  ;;  %v18023_v44 = vand.u32 4294901760, %v15532_v5  ;;  %v18030_v13 = vld [vmem:[#allocation43_spill] sm:$0xff] }
 0x4e8   : > { %9350 = vmatmul.f32.vlgmr.msrb.gmra.mxu1 %v15764_v50  ;;  %9498 = vmatpush.msra.mxu0 %v18010_v57  ;;  %v18028_v57 = vld [vmem:[#allocation57_spill] sm:$0xff]  ;;  %v7539_v36 = vadd.f32 %v18030_v13, %v7515_v48  ;;  %v6932_v20 = vadd.f32 %v18032_v47, %v6908_v55  ;;  %v18038_v48 = vand.u32 4294901760, %v15593_v45 }
 0x4e9   : > { %v15804_v9 = vand.u32 4294901760, %v8860_v39  ;;  %9559 = vmatpush.msra.mxu1 %v18022_v17  ;;  %9604 = vmatpush.msra.mxu2 %v18023_v44  ;;  %v8631_v25 = vadd.f32 %v8630_v53, %v8607_v42  ;;  %v8864_v28 = vmul.f32 %v8860_v39, %v8860_v39  ;;  %v18029_v40 = vand.u32 4294901760, %v18028_v57 }
 0x4ea   : > { %9663 = vmatpush.msra.mxu3 %v15496_v62  ;;  %9501 = vmatpush.msra.mxu0 %v15499_v15  ;;  %v8146_v62 = vadd.f32 %v15668_v0, %v8122_v8  ;;  %v18033_v0 = vand.u32 4294901760, %v15556_v26  ;;  %v6954_v55 = vadd.f32 %v18037_v22, %v6932_v20  ;;  %v18042_v20 = vand.u32 4294901760, %v15614_v11 }
 0x4eb   : > { %18021 = vst [vmem:[#allocation51_spill] sm:$0xff] %v15804_v9  ;;  %v15814_v7 = vsub.f32 %v8860_v39, %v15804_v9  ;;  %9561 = vmatpush.msra.mxu1 %v18027_v34  ;;  %9608 = vmatpush.msra.mxu2 %v18029_v40  ;;  %v8655_v41 = vadd.f32 %v8654_v54, %v8631_v25  ;;  %v8868_v19 = vsel %vm3270_vm2, %v8864_v28, 0.0  ;;  %v8977_v39 = vld [vmem:[#allocation5 + $0x2e0] sm:$0xff] }
 0x4ec   : > { %9665 = vmatpush.msra.mxu3 %v15515_v63  ;;  %9504 = vmatpush.msra.mxu0 %v18018_v61  ;;  %v15825_v15 = vadd.f32 %v8868_v19, %v8867_v4  ;;  %v8170_v54 = vadd.f32 %v15719_v18, %v8146_v62  ;;  %v7563_v18 = vadd.f32 %v18034_v10, %v7539_v36  ;;  %v15852_v28 = vand.u32 4294901760, %v8977_v39  ;;  %v18041_v62 = vld [vmem:[#allocation33_spill] sm:$0xff]  ;;  %v8967_v10 = vld [vmem:[#allocation5 + $0x290] sm:$0xff] }
 0x4ed   : > { %18026 = vst [vmem:[#allocation49_spill] sm:$0xff] %v15814_v7  ;;  %9492 = vmatmul.f32.vlgmr.msrb.gmra.mxu3 %v15804_v9  ;;  %9563 = vmatpush.msra.mxu1 %v15553_v60  ;;  %v8679_v52 = vadd.f32 %v8678_v3, %v8655_v41  ;;  %v15830_v58 = vand.u32 4294901760, %v15814_v7  ;;  %v8752_v61 = vpop.f32.mrf.mxu3 }
 0x4ee   : > { %9612 = vmatpush.msra.mxu2 %v18033_v0  ;;  %9667 = vmatpush.msra.mxu3 %v18022_v17  ;;  %v8700_v63 = vpop.f32.mrf.mxu1  ;;  %v8975_v17 = vld [vmem:[#allocation5 + $0x2d0] sm:$0xff]  ;;  %v8194_v51 = vadd.f32 %v15729_v38, %v8170_v54  ;;  %v15876_v13 = vsub.f32 %v8977_v39, %v15852_v28 }
 0x4ef   : > { %18031 = vst [vmem:[#allocation28_spill] sm:$0xff] %v15830_v58  ;;  %9507 = vmatpush.msra.mxu0 %v15532_v5  ;;  %9565 = vmatpush.msra.mxu1 %v15572_v29  ;;  %v8701_v42 = vadd.f32 %v8700_v63, %v8679_v52  ;;  %v9389_v3 = vsub.f32 %v15814_v7, %v15830_v58  ;;  %v8726_v8 = vpop.f32.mrf.mxu2  ;;  %v8776_v53 = vpop.f32.mrf.mxu0  ;;  %v15867_v4 = vand.u32 4294901760, %v8975_v17  ;;  %v18039_v38 = vld [vmem:[#allocation44_spill] sm:$0xff] }
 0x4f0   : > { %9616 = vmatpush.msra.mxu2 %v18035_v59  ;;  %9669 = vmatpush.msra.mxu3 %v18027_v34  ;;  %v8753_v5 = vadd.f32 %v8752_v61, %v8726_v8  ;;  %v8973_v34 = vld [vmem:[#allocation5 + $0x2c0] sm:$0xff]  ;;  %v7585_v19 = vadd.f32 %v18039_v38, %v7563_v18  ;;  %v6959_v52 = vadd.f32 %v6954_v55, %v18041_v62  ;;  %v17635_v59 = vand.u32 4294901760, %v15876_v13 }
 0x4f1   : > { %v8851_v44 = vadd.f32 %v8701_v42, %v15687_v12  ;;  %9313 = vmatmul.f32.vlgmr.msrb.gmra.mxu0 %v15764_v50  ;;  %9567 = vmatpush.msra.mxu1 %v15585_v56  ;;  %v15850_v25 = vand.u32 4294901760, %v9389_v3  ;;  %v15860_v12 = vsub.f32 %v8979_v37, %v15837_v1  ;;  %v8971_v37 = vld [vmem:[#allocation5 + $0x2b0] sm:$0xff]  ;;  %v15891_v0 = vsub.f32 %v8975_v17, %v15867_v4  ;;  %v8969_v61 = vld [vmem:[#allocation5 + $0x2a0] sm:$0xff] }
 0x4f2   : > { %9510 = vmatpush.msra.mxu0 %v18028_v57  ;;  %9620 = vmatpush.msra.mxu2 %v18038_v48  ;;  %v8777_v41 = vadd.f32 %v8776_v53, %v8753_v5  ;;  %v18040_v57 = vand.u32 4294901760, %v15599_v31  ;;  %v15893_v63 = vand.u32 4294901760, %v8971_v37  ;;  %v8965_v17 = vld [vmem:[#allocation5 + $0x280] sm:$0xff]  ;;  %v18045_v55 = vand.u32 4294901760, %v15655_v32 }
 0x4f3   : > { %18036 = vst [vmem:[#allocation15_spill] sm:$0xff] %v15850_v25  ;;  %v15863_v40 = vadd.f32 %v15757_v2, %v8851_v44  ;;  %9671 = vmatpush.msra.mxu3 %v15553_v60  ;;  %9569 = vmatpush.msra.mxu1 %v15596_v24  ;;  %v15878_v60 = vand.u32 4294901760, %v8973_v34  ;;  %v17634_v5 = vand.u32 4294901760, %v15891_v0  ;;  %v8961_v62 = vld [vmem:[#allocation5 + $0x260] sm:$0xff] }
 0x4f4   : > { %9513 = vmatpush.msra.mxu0 %v15556_v26  ;;  %9624 = vmatpush.msra.mxu2 %v18040_v57  ;;  %v8216_v26 = vadd.f32 %v15721_v21, %v8194_v51  ;;  %v15918_v22 = vsub.f32 %v8971_v37, %v15893_v63 }
 0x4f5   : > { %9673 = vmatpush.msra.mxu3 %v15572_v29  ;;  %9391 = vmatmul.f32.vlgmr.msrb.gmra.mxu2 %v15850_v25  ;;  %v8865_v36 = vmul.f32 %v15863_v40, %v15863_v40  ;;  %v17636_v29 = vand.u32 4294901760, %v15860_v12  ;;  %v8846_v42 = vpop.f32.mrf.mxu3  ;;  %v15904_v8 = vsub.f32 %v8973_v34, %v15878_v60  ;;  %v15931_v34 = vand.u32 4294901760, %v8965_v17 }
 0x4f6   : > { %9516 = vmatpush.msra.mxu0 %v15579_v23  ;;  %9571 = vmatpush.msra.mxu1 %v15611_v46  ;;  %v8800_v47 = vpop.f32.mrf.mxu1  ;;  %v7590_v23 = vadd.f32 %v7585_v19, %v6959_v52  ;;  %v18046_v19 = vld [vmem:[#allocation58_spill] sm:$0xff]  ;;  %v9751_v37 = vsub.f32 %v15891_v0, %v17634_v5  ;;  %v18048_v52 = vld [vmem:[#allocation59_spill] sm:$0xff] }
 0x4f7   : > { %9628 = vmatpush.msra.mxu2 %v18042_v20  ;;  %9675 = vmatpush.msra.mxu3 %v15585_v56  ;;  %v8801_v54 = vadd.f32 %v8800_v47, %v8777_v41  ;;  %v8870_v21 = vsel %vm3270_vm2, %v8865_v36, 0.0  ;;  %v8824_v39 = vpop.f32.mrf.mxu2  ;;  %v18043_v56 = vand.u32 4294901760, %v15635_v33  ;;  %v17633_v48 = vand.u32 4294901760, %v15904_v8  ;;  %v8963_v41 = vld [vmem:[#allocation5 + $0x270] sm:$0xff] }
 0x4f8   : > { %9519 = vmatpush.msra.mxu0 %v15593_v45  ;;  %9573 = vmatpush.msra.mxu1 %v15628_v27  ;;  %v8871_v3 = vadd.f32 %v8870_v21, %v15825_v15  ;;  %v8221_v53 = vadd.f32 %v8216_v26, %v7590_v23  ;;  %v9739_v45 = vsub.f32 %v15860_v12, %v17636_v29  ;;  %v15911_v15 = vand.u32 4294901760, %v8969_v61  ;;  %v18049_v26 = vld [vmem:[#allocation60_spill] sm:$0xff]  ;;  %v8997_v29 = vld [vmem:[#allocation5 + $0x380] sm:$0xff] }
 0x4f9   : > { %9632 = vmatpush.msra.mxu2 %v18043_v56  ;;  %9677 = vmatpush.msra.mxu3 %v15596_v24  ;;  %v8825_v18 = vadd.f32 %v8824_v39, %v8801_v54  ;;  %v18044_v24 = vand.u32 4294901760, %v15649_v35  ;;  %v18047_v57 = vand.u32 4294901760, %v18046_v19  ;;  %v18050_v47 = vand.u32 4294901760, %v18049_v26 }
 0x4fa   : > { %9522 = vmatpush.msra.mxu0 %v15599_v31  ;;  %9575 = vmatpush.msra.mxu1 %v15641_v49  ;;  %v15920_v31 = vand.u32 4294901760, %v8967_v10  ;;  %v15936_v38 = vsub.f32 %v8969_v61, %v15911_v15  ;;  %v9757_v20 = vsub.f32 %v15904_v8, %v17633_v48  ;;  %v15964_v21 = vsub.f32 %v8965_v17, %v15931_v34 }
 0x4fb   : > { %9636 = vmatpush.msra.mxu2 %v18044_v24  ;;  %9679 = vmatpush.msra.mxu3 %v15611_v46  ;;  %v8847_v44 = vadd.f32 %v8846_v42, %v8825_v18  ;;  %v9745_v46 = vsub.f32 %v15876_v13, %v17635_v59  ;;  %v15969_v23 = vand.u32 4294901760, %v8961_v62  ;;  %v9752_v42 = vand.u32 4294901760, %v9751_v37 }
 0x4fc   : > { %9525 = vmatpush.msra.mxu0 %v15614_v11  ;;  %9577 = vmatpush.msra.mxu1 %v15652_v30  ;;  %v9740_v11 = vand.u32 4294901760, %v9739_v45  ;;  %v15949_v36 = vsub.f32 %v8967_v10, %v15920_v31  ;;  %v17631_v61 = vand.u32 4294901760, %v15936_v38  ;;  %v9758_v24 = vand.u32 4294901760, %v9757_v20 }
 0x4fd   : > { %9640 = vmatpush.msra.mxu2 %v18045_v55  ;;  %9681 = vmatpush.msra.mxu3 %v15628_v27  ;;  %v8852_v51 = vadd.f32 %v8847_v44, %v8221_v53  ;;  %v8957_v53 = vld [vmem:[#allocation5 + $0x240] sm:$0xff]  ;;  %v17628_v44 = vand.u32 4294901760, %v15964_v21  ;;  %v8955_v55 = vld [vmem:[#allocation5 + $0x230] sm:$0xff] }
 0x4fe   : > { %9528 = vmatpush.msra.mxu0 %v15635_v33  ;;  %9579 = vmatpush.msra.mxu1 %v15672_v6  ;;  %v17632_v33 = vand.u32 4294901760, %v15918_v22  ;;  %v17630_v18 = vand.u32 4294901760, %v15949_v36  ;;  %v16007_v37 = vand.u32 4294901760, %v8955_v55 }
 0x4ff   : > { %v15939_v27 = vadd.f32 %v15757_v2, %v8852_v51  ;;  %9644 = vmatpush.msra.mxu2 %v18047_v57  ;;  %9683 = vmatpush.msra.mxu3 %v15641_v49  ;;  %v15953_v2 = vand.u32 4294901760, %v8963_v41  ;;  %v9746_v49 = vand.u32 4294901760, %v9745_v46  ;;  %v15995_v51 = vand.u32 4294901760, %v8957_v53 }
 0x500   : > { %9531 = vmatpush.msra.mxu0 %v15649_v35  ;;  %9581 = vmatpush.msra.mxu1 %v18048_v52  ;;  %v8959_v35 = vld [vmem:[#allocation5 + $0x250] sm:$0xff]  ;;  %v9763_v10 = vsub.f32 %v15918_v22, %v17632_v33  ;;  %v9001_v33 = vld [vmem:[#allocation5 + $0x3a0] sm:$0xff] }
 0x501   : > { %9648 = vmatpush.msra.mxu2 %v18050_v47  ;;  %9685 = vmatpush.msra.mxu3 %v15652_v30  ;;  %v8866_v54 = vmul.f32 %v15939_v27, %v15939_v27  ;;  %v18051_v30 = vld [vmem:[#allocation52_spill] sm:$0xff]  ;;  %v15981_v45 = vsub.f32 %v8963_v41, %v15953_v2  ;;  %v15983_v17 = vand.u32 4294901760, %v8959_v35  ;;  %v9775_v41 = vsub.f32 %v15949_v36, %v17630_v18 }
 0x502   : > { %9585 = vmatmul.f32.vlgmr.msra.gmra.mxu1 %v15830_v58  ;;  %9534 = vmatpush.msra.mxu0 %v15655_v32  ;;  %v18052_v39 = vand.u32 4294901760, %v18051_v30  ;;  %v9764_v46 = vand.u32 4294901760, %v9763_v10  ;;  %v16017_v20 = vsub.f32 %v8957_v53, %v15995_v51  ;;  %v16029_v10 = vsub.f32 %v8955_v55, %v16007_v37  ;;  %v9003_v18 = vld [vmem:[#allocation5 + $0x3b0] sm:$0xff] }
 0x503   : > { %9741 = vmatpush.msrb.mxu1 %v9740_v11  ;;  %v8872_v56 = vsel %vm3270_vm2, %v8866_v54, 0.0  ;;  %9687 = vmatpush.msra.mxu3 %v15672_v6  ;;  %v9769_v6 = vsub.f32 %v15936_v38, %v17631_v61  ;;  %v8953_v11 = vld [vmem:[#allocation5 + $0x220] sm:$0xff]  ;;  %v16005_v57 = vsub.f32 %v8959_v35, %v15983_v17  ;;  %v16129_v48 = vand.u32 4294901760, %v9001_v33  ;;  %v8995_v58 = vld [vmem:[#allocation5 + $0x370] sm:$0xff] }
 0x504   : > { %9652 = vmatpush.msra.mxu2 %v18052_v39  ;;  %v8873_v32 = vadd.f32 %v8872_v56, %v8871_v3  ;;  %9537 = vmatpush.msra.mxu0 %v18046_v19  ;;  %v15993_v3 = vsub.f32 %v8961_v62, %v15969_v23  ;;  %v17626_v19 = vand.u32 4294901760, %v15981_v45  ;;  %v9781_v62 = vsub.f32 %v15964_v21, %v17628_v44  ;;  %v8949_v35 = vld [vmem:[#allocation5 + $0x200] sm:$0xff] }
 0x505   : > { %9654 = vmatmul.f32.vlgmr.msra.gmra.mxu2 %v15804_v9  ;;  %9747 = vmatpush.msrb.mxu1 %v9746_v49  ;;  %v9770_v47 = vand.u32 4294901760, %v9769_v6  ;;  %v16019_v54 = vand.u32 4294901760, %v8953_v11  ;;  %v16042_v55 = vand.u32 4294901760, %v8949_v35  ;;  %v9005_v44 = vld [vmem:[#allocation5 + $0x3c0] sm:$0xff]  ;;  %v16177_v43 = vand.u32 4294901760, %v8995_v58 }
 0x506   : > { %9839 = vmatpush.msrb.mxu2 %v15860_v12  ;;  %9689 = vmatpush.msra.mxu3 %v18048_v52  ;;  %v8951_v52 = vld [vmem:[#allocation5 + $0x210] sm:$0xff]  ;;  %v17624_v49 = vand.u32 4294901760, %v15993_v3  ;;  %v9787_v39 = vsub.f32 %v15981_v45, %v17626_v19  ;;  %v16111_v61 = vand.u32 4294901760, %v9005_v44 }
 0x507   : > { %9691 = vmatmul.f32.vlgmr.msra.gmra.mxu3 %v15804_v9  ;;  %9753 = vmatpush.msrb.mxu1 %v9752_v42  ;;  %v17622_v42 = vand.u32 4294901760, %v16005_v57  ;;  %v16031_v56 = vand.u32 4294901760, %v8951_v52  ;;  %v16040_v6 = vsub.f32 %v8953_v11, %v16019_v54  ;;  %v8993_v9 = vld [vmem:[#allocation5 + $0x360] sm:$0xff]  ;;  %v16202_v50 = vsub.f32 %v8995_v58, %v16177_v43 }
 0x508   : > { %9842 = vmatpush.msrb.mxu2 %v15876_v13  ;;  %9892 = vmatpush.msrb.mxu3 %v15837_v1  ;;  %v9793_v53 = vsub.f32 %v15993_v3, %v17624_v49  ;;  %v16133_v5 = vsub.f32 %v9005_v44, %v16111_v61  ;;  %v16190_v14 = vand.u32 4294901760, %v8993_v9 }
 0x509   : > { %9540 = vmatpush.msra.mxu0 %v18049_v26  ;;  %9759 = vmatpush.msrb.mxu1 %v9758_v24  ;;  %v9776_v26 = vand.u32 4294901760, %v9775_v41  ;;  %v17621_v24 = vand.u32 4294901760, %v16017_v20  ;;  %v17623_v41 = vand.u32 4294901760, %v16029_v10 }
 0x50a   : > { %9845 = vmatpush.msrb.mxu2 %v15891_v0  ;;  %9894 = vmatpush.msrb.mxu3 %v15852_v28  ;;  %v9794_v11 = vand.u32 4294901760, %v9793_v53  ;;  %18055 = vst [vmem:[#allocation19_spill] sm:$0xff] %v16133_v5  ;;  %v16214_v58 = vsub.f32 %v8993_v9, %v16190_v14 }
 0x50b   : > { %9543 = vmatpush.msra.mxu0 %v18051_v30  ;;  %9765 = vmatpush.msrb.mxu1 %v9764_v46  ;;  %v9782_v30 = vand.u32 4294901760, %v9781_v62  ;;  %v9799_v46 = vsub.f32 %v16005_v57, %v17622_v42  ;;  %v16052_v62 = vsub.f32 %v8951_v52, %v16031_v56  ;;  %v9009_v42 = vld [vmem:[#allocation5 + $0x3e0] sm:$0xff] }
 0x50c   : > { %9546 = vmatmul.f32.vlgmr.msra.gmra.mxu0 %v15814_v7  ;;  %9848 = vmatpush.msrb.mxu2 %v15904_v8  ;;  %v16157_v7 = vsub.f32 %v9001_v33, %v16129_v48 }
 0x50d   : > { %9696 = vmatpush.msrb.mxu0 %v15837_v1  ;;  %9896 = vmatpush.msrb.mxu3 %v15867_v4  ;;  %v9800_v52 = vand.u32 4294901760, %v9799_v46  ;;  %v17627_v53 = vand.u32 4294901760, %v16052_v62 }
 0x50e   : > { %8874 = vadd.xlane.f32.xlu0 %v8873_v32  ;;  %9771 = vmatpush.msrb.mxu1 %v9770_v47  ;;  %v9788_v32 = vand.u32 4294901760, %v9787_v39  ;;  %v9805_v47 = vsub.f32 %v16017_v20, %v17621_v24  ;;  %v16062_v39 = vsub.f32 %v8949_v35, %v16042_v55  ;;  %v9011_v24 = vld [vmem:[#allocation5 + $0x3f0] sm:$0xff]  ;;  %18058 = vst [vmem:[#allocation36_spill] sm:$0xff] %v16157_v7 }
 0x50f   : > { %9698 = vmatpush.msrb.mxu0 %v15852_v28  ;;  %9851 = vmatpush.msrb.mxu2 %v15918_v22 }
 0x510   : > { %9898 = vmatpush.msrb.mxu3 %v15878_v60  ;;  %9777 = vmatpush.msrb.mxu1 %v9776_v26  ;;  %v17625_v26 = vand.u32 4294901760, %v16040_v6  ;;  %v9806_v35 = vand.u32 4294901760, %v9805_v47  ;;  %v17629_v46 = vand.u32 4294901760, %v16062_v39  ;;  %v16088_v47 = vand.u32 4294901760, %v9009_v42 }
 0x511   : > { %9700 = vmatpush.msrb.mxu0 %v15867_v4  ;;  %9854 = vmatpush.msrb.mxu2 %v15936_v38 }
 0x512   : > { %9900 = vmatpush.msrb.mxu3 %v15893_v63  ;;  %9783 = vmatpush.msrb.mxu1 %v9782_v30  ;;  %v9811_v30 = vsub.f32 %v16029_v10, %v17623_v41  ;;  %v16080_v41 = vand.u32 4294901760, %v9011_v24 }
 0x513   : > { %9702 = vmatpush.msrb.mxu0 %v15878_v60  ;;  %9857 = vmatpush.msrb.mxu2 %v15949_v36 }
 0x514   : > { %9902 = vmatpush.msrb.mxu3 %v15911_v15  ;;  %9789 = vmatpush.msrb.mxu1 %v9788_v32  ;;  %v9817_v32 = vsub.f32 %v16040_v6, %v17625_v26  ;;  %v9812_v49 = vand.u32 4294901760, %v9811_v30  ;;  %v9007_v26 = vld [vmem:[#allocation5 + $0x3d0] sm:$0xff]  ;;  %v16095_v30 = vand.u32 4294901760, %v15863_v40 }
 0x515   : > { %9704 = vmatpush.msrb.mxu0 %v15893_v63  ;;  %9860 = vmatpush.msrb.mxu2 %v15964_v21 }
 0x516   : > { %9904 = vmatpush.msrb.mxu3 %v15920_v31  ;;  %9795 = vmatpush.msrb.mxu1 %v9794_v11  ;;  %v9823_v11 = vsub.f32 %v16052_v62, %v17627_v53  ;;  %v9818_v19 = vand.u32 4294901760, %v9817_v32  ;;  %18053 = vst [vmem:[#allocation48_spill] sm:$0xff] %v16095_v30  ;;  %v16100_v53 = vsub.f32 %v9011_v24, %v16080_v41  ;;  %v16103_v32 = vand.u32 4294901760, %v9007_v26 }
 0x517   : > { %9706 = vmatpush.msrb.mxu0 %v15911_v15  ;;  %9863 = vmatpush.msrb.mxu2 %v15981_v45 }
 0x518   : > { %9906 = vmatpush.msrb.mxu3 %v15931_v34  ;;  %9801 = vmatpush.msrb.mxu1 %v9800_v52  ;;  %v9829_v52 = vsub.f32 %v16062_v39, %v17629_v46  ;;  %v16108_v46 = vsub.f32 %v9009_v42, %v16088_v47  ;;  %v16122_v42 = vsub.f32 %v9007_v26, %v16103_v32 }
 0x519   : > { %9708 = vmatpush.msrb.mxu0 %v15920_v31  ;;  %9866 = vmatpush.msrb.mxu2 %v15993_v3 }
 0x51a   : > { %9908 = vmatpush.msrb.mxu3 %v15953_v2  ;;  %9807 = vmatpush.msrb.mxu1 %v9806_v35  ;;  %v9824_v35 = vand.u32 4294901760, %v9823_v11  ;;  %v9830_v24 = vand.u32 4294901760, %v9829_v52  ;;  %v17637_v11 = vand.u32 4294901760, %v16100_v53  ;;  %v8999_v52 = vld [vmem:[#allocation5 + $0x390] sm:$0xff]  ;;  %v18059_v44 = vand.u32 4294901760, %v16122_v42 }
 0x51b   : > { %9710 = vmatpush.msrb.mxu0 %v15931_v34  ;;  %9869 = vmatpush.msrb.mxu2 %v16005_v57  ;;  %v16143_v59 = vand.u32 4294901760, %v8999_v52 }
 0x51c   : > { %9910 = vmatpush.msrb.mxu3 %v15969_v23  ;;  %9813 = vmatpush.msrb.mxu1 %v9812_v49  ;;  %v16115_v49 = vsub.f32 %v15863_v40, %v16095_v30  ;;  %v17640_v40 = vand.u32 4294901760, %v16108_v46  ;;  %v10092_v25 = vsub.f32 %v16122_v42, %v18059_v44 }
 0x51d   : > { %9712 = vmatpush.msrb.mxu0 %v15953_v2  ;;  %9872 = vmatpush.msrb.mxu2 %v16017_v20  ;;  %v16169_v33 = vsub.f32 %v8999_v52, %v16143_v59  ;;  %v8989_v52 = vld [vmem:[#allocation5 + $0x340] sm:$0xff] }
 0x51e   : > { %9912 = vmatpush.msrb.mxu3 %v15983_v17  ;;  %9819 = vmatpush.msrb.mxu1 %v9818_v19  ;;  %18054 = vst [vmem:[#allocation17_spill] sm:$0xff] %v16115_v49  ;;  %v16124_v19 = vand.u32 4294901760, %v9003_v18  ;;  %v16138_v26 = vand.u32 4294901760, %v16115_v49 }
 0x51f   : > { %9714 = vmatpush.msrb.mxu0 %v15969_v23  ;;  %9875 = vmatpush.msrb.mxu2 %v16029_v10 }
 0x520   : > { %9914 = vmatpush.msrb.mxu3 %v15995_v51  ;;  %9825 = vmatpush.msrb.mxu1 %v9824_v35  ;;  %18056 = vst [vmem:[#allocation27_spill] sm:$0xff] %v16138_v26  ;;  %v10080_v35 = vsub.f32 %v16100_v53, %v17637_v11  ;;  %v10086_v11 = vsub.f32 %v16108_v46, %v17640_v40 }
 0x521   : > { %9716 = vmatpush.msrb.mxu0 %v15983_v17  ;;  %9878 = vmatpush.msrb.mxu2 %v16040_v6  ;;  %v9730_v40 = vsub.f32 %v16115_v49, %v16138_v26 }
 0x522   : > { %9916 = vmatpush.msrb.mxu3 %v16007_v37  ;;  %9831 = vmatpush.msrb.mxu1 %v9830_v24  ;;  %v16149_v24 = vsub.f32 %v9003_v18, %v16124_v19  ;;  %v16162_v18 = vand.u32 4294901760, %v8997_v29 }
 0x523   : > { %9718 = vmatpush.msrb.mxu0 %v15995_v51  ;;  %9881 = vmatpush.msrb.mxu2 %v16052_v62 }
 0x524   : > { %9918 = vmatpush.msrb.mxu3 %v16019_v54  ;;  %9833 = vmatmul.f32.vlgmr.msrb.gmra.mxu1 %v16095_v30  ;;  %18057 = vst [vmem:[#allocation13_spill] sm:$0xff] %v16149_v24  ;;  %v16188_v16 = vsub.f32 %v8997_v29, %v16162_v18 }
 0x525   : > { %10000 = vmatpush.msra.mxu1 %v15837_v1  ;;  %9720 = vmatpush.msrb.mxu0 %v16007_v37  ;;  %v10081_v1 = vand.u32 4294901760, %v10080_v35  ;;  %v8991_v35 = vld [vmem:[#allocation5 + $0x350] sm:$0xff] }
 0x526   : > { %9884 = vmatpush.msrb.mxu2 %v16062_v39  ;;  %9920 = vmatpush.msrb.mxu3 %v16031_v56 }
 0x527   : > { %9887 = vmatmul.f32.vlgmr.msrb.gmra.mxu2 %v16115_v49  ;;  %10002 = vmatpush.msra.mxu1 %v15852_v28  ;;  %v10087_v28 = vand.u32 4294901760, %v10086_v11  ;;  %v18060_v49 = vand.u32 4294901760, %v16133_v5 }
 0x528   : > { %10037 = vmatpush.msra.mxu2 %v16080_v41  ;;  %9722 = vmatpush.msrb.mxu0 %v16019_v54 }
 0x529   : > { %9922 = vmatpush.msrb.mxu3 %v16042_v55  ;;  %10004 = vmatpush.msra.mxu1 %v15867_v4  ;;  %v10098_v44 = vsub.f32 %v16133_v5, %v18060_v49  ;;  %v16193_v4 = vand.u32 4294901760, %v9730_v40  ;;  %v18062_v49 = vand.u32 4294901760, %v16149_v24  ;;  %v18063_v40 = vand.u32 4294901760, %v16157_v7  ;;  %v8983_v5 = vld [vmem:[#allocation5 + $0x310] sm:$0xff] }
 0x52a   : > { %9926 = vmatmul.f32.vlgmr.msrb.gmra.mxu3 %v16138_v26  ;;  %10039 = vmatpush.msra.mxu2 %v16088_v47  ;;  %v10093_v26 = vand.u32 4294901760, %v10092_v25 }
 0x52b   : > { %10082 = vmatpush.msra.mxu3 %v10081_v1  ;;  %9724 = vmatpush.msrb.mxu0 %v16031_v56  ;;  %18061 = vst [vmem:[#allocation34_spill] sm:$0xff] %v16193_v4  ;;  %v10104_v29 = vsub.f32 %v16149_v24, %v18062_v49  ;;  %v16204_v1 = vand.u32 4294901760, %v8991_v35  ;;  %v10110_v11 = vsub.f32 %v16157_v7, %v18063_v40  ;;  %v10099_v25 = vand.u32 4294901760, %v10098_v44 }
 0x52c   : > { %10006 = vmatpush.msra.mxu1 %v15878_v60  ;;  %10041 = vmatpush.msra.mxu2 %v16103_v32  ;;  %v8987_v60 = vld [vmem:[#allocation5 + $0x330] sm:$0xff]  ;;  %v16216_v24 = vand.u32 4294901760, %v8989_v52  ;;  %v18065_v40 = vand.u32 4294901760, %v16169_v33  ;;  %v10127_v44 = vand.u32 4294901760, %v16202_v50 }
 0x52d   : > { %10088 = vmatpush.msra.mxu3 %v10087_v28  ;;  %9726 = vmatpush.msrb.mxu0 %v16042_v55  ;;  %v18064_v28 = vand.u32 4294901760, %v15860_v12  ;;  %v16227_v9 = vsub.f32 %v8991_v35, %v16204_v1  ;;  %v16229_v49 = vand.u32 4294901760, %v8987_v60  ;;  %v18066_v12 = vand.u32 4294901760, %v15876_v13 }
 0x52e   : > { %9732 = vmatmul.f32.vlgmr.msrb.gmra.mxu0 %v16193_v4  ;;  %10008 = vmatpush.msra.mxu1 %v15893_v63  ;;  %v10116_v7 = vsub.f32 %v16169_v33, %v18065_v40  ;;  %v8985_v4 = vld [vmem:[#allocation5 + $0x320] sm:$0xff]  ;;  %v10105_v63 = vand.u32 4294901760, %v10104_v29  ;;  %v10133_v29 = vand.u32 4294901760, %v16214_v58  ;;  %v16240_v35 = vsub.f32 %v8989_v52, %v16216_v24 }
 0x52f   : > { %9933 = vmatpush.msra.mxu0 %v18064_v28  ;;  %10043 = vmatpush.msra.mxu2 %v16111_v61  ;;  %v10111_v28 = vand.u32 4294901760, %v10110_v11  ;;  %v16242_v40 = vand.u32 4294901760, %v8985_v4  ;;  %v18068_v13 = vand.u32 4294901760, %v15891_v0  ;;  %v16253_v52 = vsub.f32 %v8987_v60, %v16229_v49 }
 0x530   : > { %10094 = vmatpush.msra.mxu3 %v10093_v26  ;;  %10010 = vmatpush.msra.mxu1 %v15911_v15  ;;  %v18067_v15 = vand.u32 4294901760, %v16188_v16  ;;  %v10117_v11 = vand.u32 4294901760, %v10116_v7  ;;  %v18069_v0 = vand.u32 4294901760, %v15904_v8  ;;  %v18071_v8 = vand.u32 4294901760, %v15918_v22 }
 0x531   : > { %9937 = vmatpush.msra.mxu0 %v18066_v12  ;;  %10045 = vmatpush.msra.mxu2 %v16124_v19  ;;  %v16255_v12 = vand.u32 4294901760, %v8983_v5  ;;  %v16266_v60 = vsub.f32 %v8985_v4, %v16242_v40  ;;  %v10151_v4 = vand.u32 4294901760, %v16253_v52  ;;  %v18072_v22 = vand.u32 4294901760, %v15936_v38 }
 0x532   : > { %10100 = vmatpush.msra.mxu3 %v10099_v25  ;;  %10012 = vmatpush.msra.mxu1 %v15920_v31  ;;  %v10122_v26 = vsub.f32 %v16188_v16, %v18067_v15  ;;  %v10128_v31 = vsub.f32 %v16202_v50, %v10127_v44  ;;  %v10139_v25 = vand.u32 4294901760, %v16227_v9  ;;  %v8981_v15 = vld [vmem:[#allocation5 + $0x300] sm:$0xff] }
 0x533   : > { %9941 = vmatpush.msra.mxu0 %v18068_v13  ;;  %10047 = vmatpush.msra.mxu2 %v16129_v48  ;;  %v16269_v13 = vand.u32 4294901760, %v15939_v27 }
 0x534   : > { %10106 = vmatpush.msra.mxu3 %v10105_v63  ;;  %10014 = vmatpush.msra.mxu1 %v15931_v34  ;;  %v10123_v7 = vand.u32 4294901760, %v10122_v26  ;;  %v10134_v34 = vsub.f32 %v16214_v58, %v10133_v29  ;;  %v10145_v63 = vand.u32 4294901760, %v16240_v35  ;;  %v10140_v26 = vsub.f32 %v16227_v9, %v10139_v25 }
 0x535   : > { %9945 = vmatpush.msra.mxu0 %v18069_v0  ;;  %10049 = vmatpush.msra.mxu2 %v16143_v59  ;;  %18070 = vst [vmem:[#allocation50_spill] sm:$0xff] %v16269_v13  ;;  %v16282_v0 = vsub.f32 %v8983_v5, %v16255_v12  ;;  %v18074_v5 = vand.u32 4294901760, %v15949_v36 }
 0x536   : > { %10112 = vmatpush.msra.mxu3 %v10111_v28  ;;  %10016 = vmatpush.msra.mxu1 %v15953_v2  ;;  %v16274_v28 = vand.u32 4294901760, %v8981_v15  ;;  %v10129_v2 = vand.u32 4294901760, %v10128_v31  ;;  %v10157_v31 = vand.u32 4294901760, %v16266_v60 }
 0x537   : > { %9949 = vmatpush.msra.mxu0 %v18071_v8  ;;  %10051 = vmatpush.msra.mxu2 %v16162_v18  ;;  %v16294_v8 = vsub.f32 %v15939_v27, %v16269_v13  ;;  %v18075_v27 = vand.u32 4294901760, %v15964_v21 }
 0x538   : > { %10118 = vmatpush.msra.mxu3 %v10117_v11  ;;  %10018 = vmatpush.msra.mxu1 %v15969_v23  ;;  %v10135_v11 = vand.u32 4294901760, %v10134_v34  ;;  %v10146_v23 = vsub.f32 %v16240_v35, %v10145_v63  ;;  %v16300_v38 = vsub.f32 %v8981_v15, %v16274_v28  ;;  %v10163_v34 = vand.u32 4294901760, %v16282_v0 }
 0x539   : > { %9953 = vmatpush.msra.mxu0 %v18072_v22  ;;  %10053 = vmatpush.msra.mxu2 %v16177_v43  ;;  %18073 = vst [vmem:[#allocation16_spill] sm:$0xff] %v16294_v8  ;;  %v18076_v15 = vand.u32 4294901760, %v15981_v45  ;;  %v18078_v22 = vand.u32 4294901760, %v15993_v3 }
 0x53a   : > { %10124 = vmatpush.msra.mxu3 %v10123_v7  ;;  %10020 = vmatpush.msra.mxu1 %v15983_v17  ;;  %v10141_v17 = vand.u32 4294901760, %v10140_v26  ;;  %v10152_v7 = vsub.f32 %v16253_v52, %v10151_v4  ;;  %v10147_v36 = vand.u32 4294901760, %v10146_v23  ;;  %v10169_v21 = vand.u32 4294901760, %v16300_v38 }
 0x53b   : > { %9957 = vmatpush.msra.mxu0 %v18074_v5  ;;  %10055 = vmatpush.msra.mxu2 %v16190_v14  ;;  %v18080_v5 = vand.u32 4294901760, %v16017_v20  ;;  %v18083_v20 = vand.u32 4294901760, %v16100_v53 }
 0x53c   : > { %10130 = vmatpush.msra.mxu3 %v10129_v2  ;;  %10022 = vmatpush.msra.mxu1 %v15995_v51  ;;  %v10158_v51 = vsub.f32 %v16266_v60, %v10157_v31  ;;  %v16318_v2 = vand.u32 4294901760, %v16294_v8  ;;  %v10153_v26 = vand.u32 4294901760, %v10152_v7  ;;  %v10170_v23 = vsub.f32 %v16300_v38, %v10169_v21 }
 0x53d   : > { %9961 = vmatpush.msra.mxu0 %v18075_v27  ;;  %10057 = vmatpush.msra.mxu2 %v16204_v1  ;;  %v18086_v7 = vand.u32 4294901760, %v16052_v62  ;;  %v18087_v27 = vand.u32 4294901760, %v16122_v42  ;;  %v8916_v62 = vld [vmem:[#allocation5 + $0xf8] sm:$0xff] }
 0x53e   : > { %10136 = vmatpush.msra.mxu3 %v10135_v11  ;;  %10024 = vmatpush.msra.mxu1 %v16007_v37  ;;  %18077 = vst [vmem:[#allocation30_spill] sm:$0xff] %v16318_v2  ;;  %v10164_v37 = vsub.f32 %v16282_v0, %v10163_v34  ;;  %v10159_v45 = vand.u32 4294901760, %v10158_v51  ;;  %v18079_v11 = vand.u32 4294901760, %v16005_v57  ;;  %v18081_v57 = vand.u32 4294901760, %v16029_v10 }
 0x53f   : > { %9965 = vmatpush.msra.mxu0 %v18076_v15  ;;  %10059 = vmatpush.msra.mxu2 %v16216_v24  ;;  %v18085_v10 = vand.u32 4294901760, %v16108_v46 }
 0x540   : > { %10142 = vmatpush.msra.mxu3 %v10141_v17  ;;  %10026 = vmatpush.msra.mxu1 %v16019_v54  ;;  %v10071_v54 = vsub.f32 %v16294_v8, %v16318_v2  ;;  %v10165_v3 = vand.u32 4294901760, %v10164_v37  ;;  %v10171_v17 = vand.u32 4294901760, %v10170_v23  ;;  %v8904_v23 = vld [vmem:[#allocation5 + $0x98] sm:$0xff] }
 0x541   : > { %9969 = vmatpush.msra.mxu0 %v18078_v22  ;;  %10061 = vmatpush.msra.mxu2 %v16229_v49  ;;  %v8910_v22 = vld [vmem:[#allocation5 + $0xc8] sm:$0xff] }
 0x542   : > { %10148 = vmatpush.msra.mxu3 %v10147_v36  ;;  %10028 = vmatpush.msra.mxu1 %v16031_v56  ;;  %v16345_v56 = vand.u32 4294901760, %v10071_v54 }
 0x543   : > { %9973 = vmatpush.msra.mxu0 %v18079_v11  ;;  %10063 = vmatpush.msra.mxu2 %v16242_v40  ;;  %v16411_v11 = vand.u32 4294901760, %v8910_v22 }
 0x544   : > { %10154 = vmatpush.msra.mxu3 %v10153_v26  ;;  %10030 = vmatpush.msra.mxu1 %v16042_v55  ;;  %18082 = vst [vmem:[#allocation31_spill] sm:$0xff] %v16345_v56  ;;  %v18084_v55 = vand.u32 4294901760, %v16040_v6  ;;  %v18088_v6 = vand.u32 4294901760, %v16062_v39  ;;  %v8914_v39 = vld [vmem:[#allocation5 + $0xe8] sm:$0xff]  ;;  %v16382_v26 = vand.u32 4294901760, %v8916_v62 }
 0x545   : > { %9977 = vmatpush.msra.mxu0 %v18080_v5  ;;  %10065 = vmatpush.msra.mxu2 %v16255_v12 }
 0x546   : > { %10160 = vmatpush.msra.mxu3 %v10159_v45  ;;  %10032 = vmatmul.f32.vlgmr.msra.gmra.mxu1 %v16095_v30  ;;  %v8908_v45 = vld [vmem:[#allocation5 + $0xb8] sm:$0xff] }
 0x547   : > { %10233 = vmatpush.msrb.mxu1 %v16080_v41  ;;  %9981 = vmatpush.msra.mxu0 %v18081_v57  ;;  %v8900_v57 = vld [vmem:[#allocation5 + $0x78] sm:$0xff] }
 0x548   : > { %10067 = vmatpush.msra.mxu2 %v16274_v28  ;;  %10166 = vmatpush.msra.mxu3 %v10165_v3  ;;  %v8902_v3 = vld [vmem:[#allocation5 + $0x88] sm:$0xff] }
 0x549   : > { %10073 = vmatmul.f32.vlgmr.msra.gmra.mxu2 %v16345_v56  ;;  %10235 = vmatpush.msrb.mxu1 %v16088_v47  ;;  %v18106_v56 = vld [vmem:[#allocation47_spill] sm:$0xff] }
 0x54a   : > { %10274 = vmatpush.msrb.mxu2 %v18083_v20  ;;  %9985 = vmatpush.msra.mxu0 %v18084_v55 }
 0x54b   : > { %10172 = vmatpush.msra.mxu3 %v10171_v17  ;;  %10237 = vmatpush.msrb.mxu1 %v16103_v32 }
 0x54c   : > { %10174 = vmatmul.f32.vlgmr.msra.gmra.mxu3 %v16269_v13  ;;  %10278 = vmatpush.msrb.mxu2 %v18085_v10  ;;  %v16475_v10 = vand.u32 4294901760, %v8900_v57 }
 0x54d   : > { %10341 = vmatpush.msrb.mxu3 %v16080_v41  ;;  %9989 = vmatpush.msra.mxu0 %v18086_v7  ;;  %v18089_v41 = vld [vmem:[#allocation19_spill] sm:$0xff]  ;;  %v8896_v7 = vld [vmem:[#allocation5 + $0x58] sm:$0xff] }
 0x54e   : > { %10239 = vmatpush.msrb.mxu1 %v16111_v61  ;;  %10282 = vmatpush.msrb.mxu2 %v18087_v27  ;;  %v18090_v36 = vand.u32 4294901760, %v18089_v41 }
 0x54f   : > { %10343 = vmatpush.msrb.mxu3 %v16088_v47  ;;  %9993 = vmatpush.msra.mxu0 %v18088_v6  ;;  %v18091_v47 = vld [vmem:[#allocation13_spill] sm:$0xff] }
 0x550   : > { %9995 = vmatmul.f32.vlgmr.msra.gmra.mxu0 %v16095_v30  ;;  %10241 = vmatpush.msrb.mxu1 %v16124_v19  ;;  %v18092_v51 = vand.u32 4294901760, %v18091_v47 }
 0x551   : > { %10180 = vmatpush.msrb.mxu0 %v16100_v53  ;;  %10286 = vmatpush.msrb.mxu2 %v18090_v36  ;;  %v18093_v53 = vld [vmem:[#allocation36_spill] sm:$0xff]  ;;  %v16500_v36 = vsub.f32 %v8900_v57, %v16475_v10 }
 0x552   : > { %10345 = vmatpush.msrb.mxu3 %v16103_v32  ;;  %10243 = vmatpush.msrb.mxu1 %v16129_v48  ;;  %v18094_v15 = vand.u32 4294901760, %v18093_v53  ;;  %v18095_v32 = vand.u32 4294901760, %v16169_v33 }
 0x553   : > { %10183 = vmatpush.msrb.mxu0 %v16108_v46  ;;  %10290 = vmatpush.msrb.mxu2 %v18092_v51  ;;  %v8912_v46 = vld [vmem:[#allocation5 + $0xd8] sm:$0xff] }
 0x554   : > { %10347 = vmatpush.msrb.mxu3 %v16111_v61  ;;  %10245 = vmatpush.msrb.mxu1 %v16143_v59  ;;  %v16389_v61 = vand.u32 4294901760, %v8914_v39  ;;  %v16399_v37 = vand.u32 4294901760, %v8912_v46 }
 0x555   : > { %10186 = vmatpush.msrb.mxu0 %v16122_v42  ;;  %10294 = vmatpush.msrb.mxu2 %v18094_v15  ;;  %v18096_v42 = vand.u32 4294901760, %v16188_v16  ;;  %v8890_v15 = vld [vmem:[#allocation5 + $0x28] sm:$0xff] }
 0x556   : > { %10349 = vmatpush.msrb.mxu3 %v16124_v19  ;;  %10247 = vmatpush.msrb.mxu1 %v16162_v18  ;;  %v16397_v19 = vsub.f32 %v8916_v62, %v16382_v26  ;;  %v16418_v54 = vsub.f32 %v8912_v46, %v16399_v37  ;;  %v16502_v62 = vand.u32 4294901760, %v8896_v7  ;;  %v17665_v46 = vand.u32 4294901760, %v16500_v36 }
 0x557   : > { %10189 = vmatpush.msrb.mxu0 %v18089_v41  ;;  %10298 = vmatpush.msrb.mxu2 %v18095_v32  ;;  %v8894_v41 = vld [vmem:[#allocation5 + $0x48] sm:$0xff] }
 0x558   : > { %10351 = vmatpush.msrb.mxu3 %v16129_v48  ;;  %10249 = vmatpush.msrb.mxu1 %v16177_v43  ;;  %v16407_v48 = vsub.f32 %v8914_v39, %v16389_v61  ;;  %v16514_v39 = vand.u32 4294901760, %v8894_v41  ;;  %v16524_v32 = vsub.f32 %v8896_v7, %v16502_v62 }
 0x559   : > { %10192 = vmatpush.msrb.mxu0 %v18091_v47  ;;  %10302 = vmatpush.msrb.mxu2 %v18096_v42  ;;  %v8892_v47 = vld [vmem:[#allocation5 + $0x38] sm:$0xff] }
 0x55a   : > { %10353 = vmatpush.msrb.mxu3 %v16143_v59  ;;  %10251 = vmatpush.msrb.mxu1 %v16190_v14  ;;  %v17674_v59 = vand.u32 4294901760, %v16397_v19  ;;  %v16526_v42 = vand.u32 4294901760, %v8892_v47  ;;  %v17663_v57 = vand.u32 4294901760, %v16524_v32 }
 0x55b   : > { %10195 = vmatpush.msrb.mxu0 %v18093_v53  ;;  %10306 = vmatpush.msrb.mxu2 %v10127_v44  ;;  %v8906_v44 = vld [vmem:[#allocation5 + $0xa8] sm:$0xff] }
 0x55c   : > { %10355 = vmatpush.msrb.mxu3 %v16162_v18  ;;  %10253 = vmatpush.msrb.mxu1 %v16204_v1  ;;  %v16422_v18 = vand.u32 4294901760, %v8908_v45 }
 0x55d   : > { %10198 = vmatpush.msrb.mxu0 %v16169_v33  ;;  %10310 = vmatpush.msrb.mxu2 %v10133_v29  ;;  %v17673_v33 = vand.u32 4294901760, %v16407_v48  ;;  %v16431_v29 = vsub.f32 %v8910_v22, %v16411_v11  ;;  %v8888_v22 = vld [vmem:[#allocation5 + $0x18] sm:$0xff] }
 0x55e   : > { %10357 = vmatpush.msrb.mxu3 %v16177_v43  ;;  %10255 = vmatpush.msrb.mxu1 %v16216_v24  ;;  %v16433_v43 = vand.u32 4294901760, %v8906_v44  ;;  %v16447_v5 = vsub.f32 %v8908_v45, %v16422_v18 }
 0x55f   : > { %10201 = vmatpush.msrb.mxu0 %v16188_v16  ;;  %10314 = vmatpush.msrb.mxu2 %v10139_v25  ;;  %v10421_v16 = vsub.f32 %v16397_v19, %v17674_v59  ;;  %v17671_v25 = vand.u32 4294901760, %v16418_v54  ;;  %v18100_v59 = vld [vmem:[#allocation29_spill] sm:$0xff] }
 0x560   : > { %10359 = vmatpush.msrb.mxu3 %v16190_v14  ;;  %10257 = vmatpush.msrb.mxu1 %v16229_v49  ;;  %v16442_v14 = vand.u32 4294901760, %v8904_v23  ;;  %v16461_v17 = vsub.f32 %v8906_v44, %v16433_v43  ;;  %v17669_v55 = vand.u32 4294901760, %v16447_v5 }
 0x561   : > { %10204 = vmatpush.msrb.mxu0 %v16202_v50  ;;  %10318 = vmatpush.msrb.mxu2 %v10145_v63  ;;  %v10427_v50 = vsub.f32 %v16407_v48, %v17673_v33  ;;  %v16455_v63 = vand.u32 4294901760, %v8902_v3 }
 0x562   : > { %10361 = vmatpush.msrb.mxu3 %v16204_v1  ;;  %10259 = vmatpush.msrb.mxu1 %v16242_v40  ;;  %v17670_v1 = vand.u32 4294901760, %v16431_v29  ;;  %v16470_v20 = vsub.f32 %v8904_v23, %v16442_v14  ;;  %v17668_v27 = vand.u32 4294901760, %v16461_v17  ;;  %v16536_v23 = vsub.f32 %v8894_v41, %v16514_v39 }
 0x563   : > { %10207 = vmatpush.msrb.mxu0 %v16214_v58  ;;  %10322 = vmatpush.msrb.mxu2 %v10151_v4  ;;  %v10422_v58 = vand.u32 4294901760, %v10421_v16  ;;  %v10433_v4 = vsub.f32 %v16418_v54, %v17671_v25  ;;  %v8886_v16 = vld [vmem:[#allocation5 + $0x8] sm:$0xff]  ;;  %v10481_v41 = vsub.f32 %v16524_v32, %v17663_v57 }
 0x564   : > { %10363 = vmatpush.msrb.mxu3 %v16216_v24  ;;  %10261 = vmatpush.msrb.mxu1 %v16255_v12  ;;  %v8898_v24 = vld [vmem:[#allocation5 + $0x68] sm:$0xff] }
 0x565   : > { %10210 = vmatpush.msrb.mxu0 %v16227_v9  ;;  %10326 = vmatpush.msrb.mxu2 %v10157_v31  ;;  %v10428_v9 = vand.u32 4294901760, %v10427_v50  ;;  %v16481_v31 = vsub.f32 %v8902_v3, %v16455_v63  ;;  %v16489_v6 = vand.u32 4294901760, %v8898_v24  ;;  %v16538_v3 = vand.u32 4294901760, %v8890_v15 }
 0x566   : > { %10365 = vmatpush.msrb.mxu3 %v16229_v49  ;;  %10263 = vmatpush.msrb.mxu1 %v16274_v28  ;;  %v10439_v49 = vsub.f32 %v16431_v29, %v17670_v1  ;;  %v10469_v50 = vsub.f32 %v16500_v36, %v17665_v46  ;;  %v18097_v1 = vld [vmem:[#allocation46_spill] sm:$0xff] }
 0x567   : > { %10213 = vmatpush.msrb.mxu0 %v16240_v35  ;;  %10330 = vmatpush.msrb.mxu2 %v10163_v34  ;;  %v10434_v35 = vand.u32 4294901760, %v10433_v4  ;;  %v17667_v34 = vand.u32 4294901760, %v16470_v20  ;;  %v16512_v51 = vsub.f32 %v8898_v24, %v16489_v6  ;;  %v16550_v4 = vand.u32 4294901760, %v8888_v22 }
 0x568   : > { %10367 = vmatpush.msrb.mxu3 %v16242_v40  ;;  %10267 = vmatmul.f32.vlgmr.msrb.gmra.mxu1 %v16318_v2  ;;  %v10445_v40 = vsub.f32 %v16447_v5, %v17669_v55  ;;  %v16560_v7 = vsub.f32 %v8890_v15, %v16538_v3  ;;  %v8934_v55 = vld [vmem:[#allocation5 + $0x188] sm:$0xff] }
 0x569   : > { %10423 = vmatpush.msra.mxu1 %v10422_v58  ;;  %10216 = vmatpush.msrb.mxu0 %v16253_v52  ;;  %v17666_v52 = vand.u32 4294901760, %v16481_v31  ;;  %v10457_v53 = vsub.f32 %v16470_v20, %v17667_v34  ;;  %v17664_v44 = vand.u32 4294901760, %v16512_v51  ;;  %v16548_v58 = vsub.f32 %v8892_v47, %v16526_v42 }
 0x56a   : > { %10334 = vmatpush.msrb.mxu2 %v10169_v21  ;;  %10369 = vmatpush.msrb.mxu3 %v16255_v12  ;;  %v10440_v12 = vand.u32 4294901760, %v10439_v49  ;;  %v10451_v21 = vsub.f32 %v16461_v17, %v17668_v27  ;;  %v16562_v49 = vand.u32 4294901760, %v8886_v16  ;;  %v16572_v47 = vsub.f32 %v8888_v22, %v16550_v4 }
 0x56b   : > { %10336 = vmatmul.f32.vlgmr.msrb.gmra.mxu2 %v16269_v13  ;;  %10429 = vmatpush.msra.mxu1 %v10428_v9  ;;  %v10475_v24 = vsub.f32 %v16512_v51, %v17664_v44  ;;  %v17661_v9 = vand.u32 4294901760, %v16536_v23  ;;  %v8940_v44 = vld [vmem:[#allocation5 + $0x1b8] sm:$0xff] }
 0x56c   : > { %10521 = vmatpush.msra.mxu2 %v16397_v19  ;;  %10219 = vmatpush.msrb.mxu0 %v16266_v60  ;;  %v10446_v60 = vand.u32 4294901760, %v10445_v40  ;;  %v10452_v45 = vand.u32 4294901760, %v10451_v21  ;;  %v17660_v40 = vand.u32 4294901760, %v16548_v58  ;;  %v16582_v15 = vsub.f32 %v8886_v16, %v16562_v49 }
 0x56d   : > { %10371 = vmatpush.msrb.mxu3 %v16274_v28  ;;  %10435 = vmatpush.msra.mxu1 %v10434_v35  ;;  %v10463_v28 = vsub.f32 %v16481_v31, %v17666_v52  ;;  %v10470_v35 = vand.u32 4294901760, %v10469_v50  ;;  %v10487_v21 = vsub.f32 %v16536_v23, %v17661_v9  ;;  %v17659_v22 = vand.u32 4294901760, %v16572_v47 }
 0x56e   : > { %10373 = vmatmul.f32.vlgmr.msrb.gmra.mxu3 %v16269_v13  ;;  %10524 = vmatpush.msra.mxu2 %v16407_v48  ;;  %v17662_v50 = vand.u32 4294901760, %v16582_v15  ;;  %v16638_v52 = vand.u32 4294901760, %v8940_v44 }
 0x56f   : > { %10574 = vmatpush.msra.mxu3 %v16382_v26  ;;  %10222 = vmatpush.msrb.mxu0 %v16282_v0  ;;  %v10458_v0 = vand.u32 4294901760, %v10457_v53  ;;  %v17658_v53 = vand.u32 4294901760, %v16560_v7 }
 0x570   : > { %10441 = vmatpush.msra.mxu1 %v10440_v12  ;;  %10527 = vmatpush.msra.mxu2 %v16418_v54  ;;  %v10476_v12 = vand.u32 4294901760, %v10475_v24 }
 0x571   : > { %10576 = vmatpush.msra.mxu3 %v16389_v61  ;;  %10225 = vmatpush.msrb.mxu0 %v16300_v38  ;;  %v10464_v38 = vand.u32 4294901760, %v10463_v28  ;;  %v10493_v28 = vsub.f32 %v16548_v58, %v17660_v40  ;;  %v10499_v16 = vsub.f32 %v16560_v7, %v17658_v53  ;;  %v8942_v40 = vld [vmem:[#allocation5 + $0x1c8] sm:$0xff] }
 0x572   : > { %10228 = vmatmul.f32.vlgmr.msrb.gmra.mxu0 %v16294_v8  ;;  %10447 = vmatpush.msra.mxu1 %v10446_v60  ;;  %v10482_v60 = vand.u32 4294901760, %v10481_v41  ;;  %v10505_v41 = vsub.f32 %v16572_v47, %v17659_v22  ;;  %v16629_v46 = vand.u32 4294901760, %v8942_v40 }
 0x573   : > { %10378 = vmatpush.msra.mxu0 %v16382_v26  ;;  %10530 = vmatpush.msra.mxu2 %v16431_v29  ;;  %v10500_v53 = vand.u32 4294901760, %v10499_v16 }
 0x574   : > { %10578 = vmatpush.msra.mxu3 %v16399_v37  ;;  %10453 = vmatpush.msra.mxu1 %v10452_v45  ;;  %v8948_v45 = vld [vmem:[#allocation5 + $0x1f8] sm:$0xff]  ;;  %v10506_v9 = vand.u32 4294901760, %v10505_v41 }
 0x575   : > { %10380 = vmatpush.msra.mxu0 %v16389_v61  ;;  %10533 = vmatpush.msra.mxu2 %v16447_v5  ;;  %v16600_v24 = vand.u32 4294901760, %v8948_v45 }
 0x576   : > { %10580 = vmatpush.msra.mxu3 %v16411_v11  ;;  %10459 = vmatpush.msra.mxu1 %v10458_v0  ;;  %v10488_v0 = vand.u32 4294901760, %v10487_v21  ;;  %v8944_v21 = vld [vmem:[#allocation5 + $0x1d8] sm:$0xff] }
 0x577   : > { %10382 = vmatpush.msra.mxu0 %v16399_v37  ;;  %10536 = vmatpush.msra.mxu2 %v16461_v17  ;;  %v16617_v22 = vsub.f32 %v8948_v45, %v16600_v24  ;;  %v16621_v16 = vand.u32 4294901760, %v8944_v21 }
 0x578   : > { %10582 = vmatpush.msra.mxu3 %v16422_v18  ;;  %10465 = vmatpush.msra.mxu1 %v10464_v38  ;;  %v8946_v38 = vld [vmem:[#allocation5 + $0x1e8] sm:$0xff] }
 0x579   : > { %10384 = vmatpush.msra.mxu0 %v16411_v11  ;;  %10539 = vmatpush.msra.mxu2 %v16470_v20 }
 0x57a   : > { %10584 = vmatpush.msra.mxu3 %v16433_v43  ;;  %10471 = vmatpush.msra.mxu1 %v10470_v35  ;;  %v10494_v35 = vand.u32 4294901760, %v10493_v28 }
 0x57b   : > { %10386 = vmatpush.msra.mxu0 %v16422_v18  ;;  %10542 = vmatpush.msra.mxu2 %v16481_v31 }
 0x57c   : > { %10586 = vmatpush.msra.mxu3 %v16442_v14  ;;  %10477 = vmatpush.msra.mxu1 %v10476_v12  ;;  %v16608_v12 = vand.u32 4294901760, %v8946_v38 }
 0x57d   : > { %10388 = vmatpush.msra.mxu0 %v16433_v43  ;;  %10545 = vmatpush.msra.mxu2 %v16500_v36 }
 0x57e   : > { %10588 = vmatpush.msra.mxu3 %v16455_v63  ;;  %10483 = vmatpush.msra.mxu1 %v10482_v60  ;;  %v10511_v60 = vsub.f32 %v16582_v15, %v17662_v50  ;;  %v16626_v57 = vsub.f32 %v8946_v38, %v16608_v12  ;;  %v16636_v38 = vsub.f32 %v8944_v21, %v16621_v16 }
 0x57f   : > { %10390 = vmatpush.msra.mxu0 %v16442_v14  ;;  %10548 = vmatpush.msra.mxu2 %v16512_v51 }
 0x580   : > { %10590 = vmatpush.msra.mxu3 %v16475_v10  ;;  %10489 = vmatpush.msra.mxu1 %v10488_v0  ;;  %v10512_v45 = vand.u32 4294901760, %v10511_v60  ;;  %v17675_v34 = vand.u32 4294901760, %v16626_v57  ;;  %v18101_v8 = vand.u32 4294901760, %v16636_v38 }
 0x581   : > { %10392 = vmatpush.msra.mxu0 %v16455_v63  ;;  %10551 = vmatpush.msra.mxu2 %v16524_v32  ;;  %v8875_v28 = vpop.xlane.xlu0 %8874 }
 0x582   : > { %10592 = vmatpush.msra.mxu3 %v16489_v6  ;;  %10495 = vmatpush.msra.mxu1 %v10494_v35  ;;  %v8876_v0 = vsel %vm3270_vm2, %v8875_v28, 0.0  ;;  %v8938_v35 = vld [vmem:[#allocation5 + $0x1a8] sm:$0xff]  ;;  %v17672_v28 = vand.u32 4294901760, %v16617_v22 }
 0x583   : > { %10394 = vmatpush.msra.mxu0 %v16475_v10  ;;  %10554 = vmatpush.msra.mxu2 %v16536_v23  ;;  %v8877_v50 = vrot.slane %v8876_v0, 4  ;;  %v16643_v27 = vand.u32 4294901760, %v8938_v35 }
 0x584   : > { %10594 = vmatpush.msra.mxu3 %v16502_v62  ;;  %10501 = vmatpush.msra.mxu1 %v10500_v53  ;;  %v8936_v53 = vld [vmem:[#allocation5 + $0x198] sm:$0xff]  ;;  %v10762_v21 = vsub.f32 %v16617_v22, %v17672_v28 }
 0x585   : > { %10396 = vmatpush.msra.mxu0 %v16489_v6  ;;  %10557 = vmatpush.msra.mxu2 %v16548_v58  ;;  %v8878_v41 = vadd.f32 %v8877_v50, %v8876_v0  ;;  %v16654_v0 = vand.u32 4294901760, %v8936_v53  ;;  %v8932_v28 = vld [vmem:[#allocation5 + $0x178] sm:$0xff] }
 0x586   : > { %10596 = vmatpush.msra.mxu3 %v16514_v39  ;;  %10507 = vmatpush.msra.mxu1 %v10506_v9  ;;  %v16647_v9 = vsub.f32 %v8942_v40, %v16629_v46  ;;  %v8930_v40 = vld [vmem:[#allocation5 + $0x168] sm:$0xff] }
 0x587   : > { %10398 = vmatpush.msra.mxu0 %v16502_v62  ;;  %10560 = vmatpush.msra.mxu2 %v16560_v7  ;;  %v8879_v60 = vrot.slane %v8878_v41, 2 }
 0x588   : > { %10598 = vmatpush.msra.mxu3 %v16526_v42  ;;  %10513 = vmatpush.msra.mxu1 %v10512_v45  ;;  %v16660_v45 = vsub.f32 %v8940_v44, %v16638_v52  ;;  %v16677_v44 = vand.u32 4294901760, %v8934_v55 }
 0x589   : > { %10400 = vmatpush.msra.mxu0 %v16514_v39  ;;  %10563 = vmatpush.msra.mxu2 %v16572_v47  ;;  %v8880_v50 = vadd.f32 %v8879_v60, %v8878_v41  ;;  %v10768_v41 = vsub.f32 %v16626_v57, %v17675_v34  ;;  %v16668_v60 = vsub.f32 %v8938_v35, %v16643_v27  ;;  %v10763_v35 = vand.u32 4294901760, %v10762_v21 }
 0x58a   : > { %10600 = vmatpush.msra.mxu3 %v16538_v3  ;;  %10515 = vmatmul.f32.vlgmr.msra.gmra.mxu1 %v18097_v1  ;;  %18098 = vst [vmem:[#allocation18_spill] sm:$0xff] %v16660_v45  ;;  %v16682_v34 = vsub.f32 %v8936_v53, %v16654_v0  ;;  %v8928_v53 = vld [vmem:[#allocation5 + $0x158] sm:$0xff]  ;;  %v16702_v2 = vsub.f32 %v8934_v55, %v16677_v44 }
 0x58b   : > { %v8881_v25 = vrot.slane %v8880_v50, 1  ;;  %10682 = vmatpush.msrb.mxu1 %v16382_v26  ;;  %10402 = vmatpush.msra.mxu0 %v16526_v42  ;;  %18099 = vst [vmem:[#allocation35_spill] sm:$0xff] %v16668_v60  ;;  %v10774_v26 = vsub.f32 %v16636_v38, %v18101_v8  ;;  %v18103_v8 = vand.u32 4294901760, %v16647_v9  ;;  %v16716_v13 = vand.u32 4294901760, %v8928_v53 }
 0x58c   : > { %10566 = vmatpush.msra.mxu2 %v16582_v15  ;;  %10602 = vmatpush.msra.mxu3 %v16550_v4 }
 0x58d   : > { %v8882_v33 = vadd.f32 %v8881_v25, %v8880_v50  ;;  %10569 = vmatmul.f32.vlgmr.msra.gmra.mxu2 %v18100_v59  ;;  %10684 = vmatpush.msrb.mxu1 %v16389_v61  ;;  %v16690_v25 = vand.u32 4294901760, %v8932_v28  ;;  %v10769_v61 = vand.u32 4294901760, %v10768_v41  ;;  %v18102_v50 = vld [vmem:[#allocation32_spill] sm:$0xff]  ;;  %v10780_v21 = vsub.f32 %v16647_v9, %v18103_v8  ;;  %v8926_v41 = vld [vmem:[#allocation5 + $0x148] sm:$0xff] }
 0x58e   : > { %10719 = vmatpush.msrb.mxu2 %v16600_v24  ;;  %10404 = vmatpush.msra.mxu0 %v16538_v3  ;;  %v18104_v59 = vand.u32 4294901760, %v16660_v45  ;;  %v16728_v30 = vand.u32 4294901760, %v8926_v41 }
 0x58f   : > { %8884 = vst.msk [vmem:[%s335_s19] sm:$0x1] %vm8883_vm10, %v8882_v33  ;;  %10604 = vmatpush.msra.mxu3 %v16562_v49  ;;  %10686 = vmatpush.msrb.mxu1 %v16399_v37  ;;  %v16704_v33 = vand.u32 4294901760, %v8930_v40  ;;  %v16714_v55 = vsub.f32 %v8932_v28, %v16690_v25 }
 0x590   : > { %10608 = vmatmul.f32.vlgmr.msra.gmra.mxu3 %v18102_v50  ;;  %10721 = vmatpush.msrb.mxu2 %v16608_v12  ;;  %v10775_v50 = vand.u32 4294901760, %v10774_v26  ;;  %v10786_v8 = vsub.f32 %v16660_v45, %v18104_v59  ;;  %v10781_v26 = vand.u32 4294901760, %v10780_v21  ;;  %v8920_v45 = vld [vmem:[#allocation5 + $0x118] sm:$0xff] }
 0x591   : > { %10764 = vmatpush.msrb.mxu3 %v10763_v35  ;;  %10406 = vmatpush.msra.mxu0 %v16550_v4  ;;  %v18105_v35 = vand.u32 4294901760, %v16668_v60  ;;  %v16726_v28 = vsub.f32 %v8930_v40, %v16704_v33  ;;  %v10809_v21 = vand.u32 4294901760, %v16714_v55  ;;  %v16739_v40 = vsub.f32 %v8928_v53, %v16716_v13 }
 0x592   : > { %10688 = vmatpush.msrb.mxu1 %v16411_v11  ;;  %10723 = vmatpush.msrb.mxu2 %v16621_v16  ;;  %v8924_v11 = vld [vmem:[#allocation5 + $0x138] sm:$0xff]  ;;  %v16752_v53 = vsub.f32 %v8926_v41, %v16728_v30 }
 0x593   : > { %10770 = vmatpush.msrb.mxu3 %v10769_v61  ;;  %10408 = vmatpush.msra.mxu0 %v16562_v49  ;;  %v10792_v37 = vsub.f32 %v16668_v60, %v18105_v35  ;;  %v18107_v61 = vand.u32 4294901760, %v16397_v19  ;;  %v18108_v35 = vand.u32 4294901760, %v16682_v34  ;;  %v16741_v59 = vand.u32 4294901760, %v8924_v11 }
 0x594   : > { %10414 = vmatmul.f32.vlgmr.msra.gmra.mxu0 %v18106_v56  ;;  %10690 = vmatpush.msrb.mxu1 %v16422_v18  ;;  %v8922_v56 = vld [vmem:[#allocation5 + $0x128] sm:$0xff]  ;;  %v10787_v18 = vand.u32 4294901760, %v10786_v8  ;;  %v18109_v19 = vand.u32 4294901760, %v16407_v48  ;;  %v10815_v8 = vand.u32 4294901760, %v16726_v28  ;;  %v18111_v48 = vand.u32 4294901760, %v16418_v54 }
 0x595   : > { %10615 = vmatpush.msrb.mxu0 %v18107_v61  ;;  %10725 = vmatpush.msrb.mxu2 %v16629_v46  ;;  %v10798_v60 = vsub.f32 %v16682_v34, %v18108_v35  ;;  %v10793_v61 = vand.u32 4294901760, %v10792_v37  ;;  %v16754_v35 = vand.u32 4294901760, %v8922_v56  ;;  %v16765_v41 = vsub.f32 %v8924_v11, %v16741_v59 }
 0x596   : > { %10776 = vmatpush.msrb.mxu3 %v10775_v50  ;;  %10692 = vmatpush.msrb.mxu1 %v16433_v43  ;;  %v18110_v43 = vand.u32 4294901760, %v16702_v2  ;;  %v18112_v54 = vand.u32 4294901760, %v16431_v29 }
 0x597   : > { %10619 = vmatpush.msrb.mxu0 %v18109_v19  ;;  %10727 = vmatpush.msrb.mxu2 %v16638_v52  ;;  %v10799_v37 = vand.u32 4294901760, %v10798_v60  ;;  %v16767_v19 = vand.u32 4294901760, %v8920_v45  ;;  %v10816_v60 = vsub.f32 %v16726_v28, %v10815_v8  ;;  %v16778_v11 = vsub.f32 %v8922_v56, %v16754_v35 }
 0x598   : > { %10782 = vmatpush.msrb.mxu3 %v10781_v26  ;;  %10694 = vmatpush.msrb.mxu1 %v16442_v14  ;;  %v10804_v50 = vsub.f32 %v16702_v2, %v18110_v43  ;;  %v10810_v14 = vsub.f32 %v16714_v55, %v10809_v21  ;;  %v10821_v26 = vand.u32 4294901760, %v16739_v40  ;;  %v8918_v43 = vld [vmem:[#allocation5 + $0x108] sm:$0xff] }
 0x599   : > { %10623 = vmatpush.msrb.mxu0 %v18111_v48  ;;  %10729 = vmatpush.msrb.mxu2 %v16643_v27  ;;  %v18113_v48 = vand.u32 4294901760, %v16447_v5  ;;  %v16783_v29 = vand.u32 4294901760, %v8918_v43  ;;  %v16791_v56 = vsub.f32 %v8920_v45, %v16767_v19  ;;  %v18114_v5 = vand.u32 4294901760, %v16461_v17 }
 0x59a   : > { %10788 = vmatpush.msrb.mxu3 %v10787_v18  ;;  %10696 = vmatpush.msrb.mxu1 %v16455_v63  ;;  %v10805_v63 = vand.u32 4294901760, %v10804_v50  ;;  %v10827_v18 = vand.u32 4294901760, %v16752_v53  ;;  %v10833_v50 = vand.u32 4294901760, %v16765_v41 }
 0x59b   : > { %10627 = vmatpush.msrb.mxu0 %v18112_v54  ;;  %10731 = vmatpush.msrb.mxu2 %v16654_v0  ;;  %v18115_v54 = vand.u32 4294901760, %v16470_v20  ;;  %v16805_v17 = vsub.f32 %v8918_v43, %v16783_v29  ;;  %v18117_v43 = vand.u32 4294901760, %v16500_v36 }
 0x59c   : > { %10794 = vmatpush.msrb.mxu3 %v10793_v61  ;;  %10698 = vmatpush.msrb.mxu1 %v16475_v10  ;;  %v10811_v10 = vand.u32 4294901760, %v10810_v14  ;;  %v10822_v61 = vsub.f32 %v16739_v40, %v10821_v26  ;;  %v10839_v14 = vand.u32 4294901760, %v16778_v11 }
 0x59d   : > { %10631 = vmatpush.msrb.mxu0 %v18113_v48  ;;  %10733 = vmatpush.msrb.mxu2 %v16677_v44  ;;  %v10851_v48 = vand.u32 4294901760, %v16805_v17 }
 0x59e   : > { %10800 = vmatpush.msrb.mxu3 %v10799_v37  ;;  %10700 = vmatpush.msrb.mxu1 %v16489_v6  ;;  %v10817_v37 = vand.u32 4294901760, %v10816_v60  ;;  %v10828_v6 = vsub.f32 %v16752_v53, %v10827_v18  ;;  %v10823_v45 = vand.u32 4294901760, %v10822_v61  ;;  %v18116_v60 = vand.u32 4294901760, %v16481_v31 }
 0x59f   : > { %10635 = vmatpush.msrb.mxu0 %v18114_v5  ;;  %10735 = vmatpush.msrb.mxu2 %v16690_v25  ;;  %v18119_v61 = vand.u32 4294901760, %v16524_v32  ;;  %v18120_v5 = vand.u32 4294901760, %v16536_v23  ;;  %v18121_v32 = vand.u32 4294901760, %v16548_v58  ;;  %v18123_v23 = vand.u32 4294901760, %v16617_v22 }
 0x5a0   : > { %10806 = vmatpush.msrb.mxu3 %v10805_v63  ;;  %10702 = vmatpush.msrb.mxu1 %v16502_v62  ;;  %v10834_v62 = vsub.f32 %v16765_v41, %v10833_v50  ;;  %v10845_v63 = vand.u32 4294901760, %v16791_v56  ;;  %v10829_v20 = vand.u32 4294901760, %v10828_v6  ;;  %v18125_v6 = vld [vmem:[#allocation51_spill] sm:$0xff]  ;;  %v18126_v58 = vand.u32 4294901760, %v16626_v57 }
 0x5a1   : > { %10639 = vmatpush.msrb.mxu0 %v18115_v54  ;;  %10737 = vmatpush.msrb.mxu2 %v16704_v33  ;;  %v18127_v54 = vand.u32 4294901760, %v16572_v47  ;;  %v8980_v47 = vld [vmem:[#allocation5 + $0x2f8] sm:$0xff] }
 0x5a2   : > { %10812 = vmatpush.msrb.mxu3 %v10811_v10  ;;  %10704 = vmatpush.msrb.mxu1 %v16514_v39  ;;  %v10840_v39 = vsub.f32 %v16778_v11, %v10839_v14  ;;  %v10835_v31 = vand.u32 4294901760, %v10834_v62  ;;  %v18118_v10 = vand.u32 4294901760, %v16512_v51 }
 0x5a3   : > { %10643 = vmatpush.msrb.mxu0 %v18116_v60  ;;  %10739 = vmatpush.msrb.mxu2 %v16716_v13  ;;  %v16880_v60 = vand.u32 4294901760, %v8980_v47 }
 0x5a4   : > { %10818 = vmatpush.msrb.mxu3 %v10817_v37  ;;  %10706 = vmatpush.msrb.mxu1 %v16526_v42  ;;  %v10846_v42 = vsub.f32 %v16791_v56, %v10845_v63  ;;  %v10841_v36 = vand.u32 4294901760, %v10840_v39  ;;  %v18122_v37 = vld [vmem:[#allocation15_spill] sm:$0xff]  ;;  %v8972_v39 = vld [vmem:[#allocation5 + $0x2b8] sm:$0xff] }
 0x5a5   : > { %10647 = vmatpush.msrb.mxu0 %v18117_v43  ;;  %10741 = vmatpush.msrb.mxu2 %v16728_v30 }
 0x5a6   : > { %10824 = vmatpush.msrb.mxu3 %v10823_v45  ;;  %10708 = vmatpush.msrb.mxu1 %v16538_v3  ;;  %v10852_v3 = vsub.f32 %v16805_v17, %v10851_v48  ;;  %v10847_v51 = vand.u32 4294901760, %v10846_v42  ;;  %v18128_v45 = vand.u32 4294901760, %v16636_v38  ;;  %v8968_v42 = vld [vmem:[#allocation5 + $0x298] sm:$0xff] }
 0x5a7   : > { %10651 = vmatpush.msrb.mxu0 %v18118_v10  ;;  %10743 = vmatpush.msrb.mxu2 %v16741_v59  ;;  %v8966_v10 = vld [vmem:[#allocation5 + $0x288] sm:$0xff] }
 0x5a8   : > { %10830 = vmatpush.msrb.mxu3 %v10829_v20  ;;  %10710 = vmatpush.msrb.mxu1 %v16550_v4  ;;  %v10853_v4 = vand.u32 4294901760, %v10852_v3 }
 0x5a9   : > { %10655 = vmatpush.msrb.mxu0 %v18119_v61  ;;  %10745 = vmatpush.msrb.mxu2 %v16754_v35  ;;  %v8964_v61 = vld [vmem:[#allocation5 + $0x278] sm:$0xff] }
 0x5aa   : > { %10836 = vmatpush.msrb.mxu3 %v10835_v31  ;;  %10712 = vmatpush.msrb.mxu1 %v16562_v49  ;;  %v18124_v49 = vand.u32 4294901760, %v16560_v7  ;;  %v18129_v7 = vand.u32 4294901760, %v16582_v15  ;;  %v18133_v15 = vld [vmem:[#allocation35_spill] sm:$0xff] }
 0x5ab   : > { %10659 = vmatpush.msrb.mxu0 %v18120_v5  ;;  %10747 = vmatpush.msrb.mxu2 %v16767_v19 }
 0x5ac   : > { %10842 = vmatpush.msrb.mxu3 %v10841_v36  ;;  %10714 = vmatmul.f32.vlgmr.msrb.gmra.mxu1 %v18097_v1 }
 0x5ad   : > { %10915 = vmatpush.msra.mxu1 %v16600_v24  ;;  %10663 = vmatpush.msrb.mxu0 %v18121_v32  ;;  %v16973_v32 = vand.u32 4294901760, %v8964_v61 }
 0x5ae   : > { %10749 = vmatpush.msrb.mxu2 %v16783_v29  ;;  %10848 = vmatpush.msrb.mxu3 %v10847_v51 }
 0x5af   : > { %10755 = vmatmul.f32.vlgmr.msrb.gmra.mxu2 %v18122_v37  ;;  %10917 = vmatpush.msra.mxu1 %v16608_v12  ;;  %v18137_v37 = vld [vmem:[#allocation28_spill] sm:$0xff] }
 0x5b0   : > { %10956 = vmatpush.msra.mxu2 %v18123_v23  ;;  %10667 = vmatpush.msrb.mxu0 %v18124_v49 }
 0x5b1   : > { %10854 = vmatpush.msrb.mxu3 %v10853_v4  ;;  %10919 = vmatpush.msra.mxu1 %v16621_v16  ;;  %v8960_v4 = vld [vmem:[#allocation5 + $0x258] sm:$0xff] }
 0x5b2   : > { %10856 = vmatmul.f32.vlgmr.msrb.gmra.mxu3 %v18125_v6  ;;  %10960 = vmatpush.msra.mxu2 %v18126_v58  ;;  %v8958_v58 = vld [vmem:[#allocation5 + $0x248] sm:$0xff] }
 0x5b3   : > { %11023 = vmatpush.msra.mxu3 %v16600_v24  ;;  %10671 = vmatpush.msrb.mxu0 %v18127_v54  ;;  %v18130_v24 = vand.u32 4294901760, %v16647_v9  ;;  %v16998_v54 = vsub.f32 %v8964_v61, %v16973_v32 }
 0x5b4   : > { %10921 = vmatpush.msra.mxu1 %v16629_v46  ;;  %10964 = vmatpush.msra.mxu2 %v18128_v45  ;;  %v17000_v45 = vand.u32 4294901760, %v8960_v4 }
 0x5b5   : > { %11025 = vmatpush.msra.mxu3 %v16608_v12  ;;  %10675 = vmatpush.msrb.mxu0 %v18129_v7  ;;  %v18131_v12 = vld [vmem:[#allocation18_spill] sm:$0xff]  ;;  %v8956_v7 = vld [vmem:[#allocation5 + $0x238] sm:$0xff] }
 0x5b6   : > { %10677 = vmatmul.f32.vlgmr.msrb.gmra.mxu0 %v18097_v1  ;;  %10923 = vmatpush.msra.mxu1 %v16638_v52  ;;  %v18132_v62 = vand.u32 4294901760, %v18131_v12  ;;  %v8978_v1 = vld [vmem:[#allocation5 + $0x2e8] sm:$0xff] }
 0x5b7   : > { %10862 = vmatpush.msra.mxu0 %v16617_v22  ;;  %10968 = vmatpush.msra.mxu2 %v18130_v24  ;;  %v18134_v22 = vand.u32 4294901760, %v18133_v15 }
 0x5b8   : > { %11027 = vmatpush.msra.mxu3 %v16621_v16  ;;  %10925 = vmatpush.msra.mxu1 %v16643_v27  ;;  %v18135_v16 = vand.u32 4294901760, %v16682_v34 }
 0x5b9   : > { %10865 = vmatpush.msra.mxu0 %v16626_v57  ;;  %10972 = vmatpush.msra.mxu2 %v18132_v62  ;;  %v8976_v57 = vld [vmem:[#allocation5 + $0x2d8] sm:$0xff]  ;;  %v8954_v62 = vld [vmem:[#allocation5 + $0x228] sm:$0xff] }
 0x5ba   : > { %11029 = vmatpush.msra.mxu3 %v16629_v46  ;;  %10927 = vmatpush.msra.mxu1 %v16654_v0  ;;  %v16887_v46 = vand.u32 4294901760, %v8978_v1  ;;  %v16897_v20 = vand.u32 4294901760, %v8976_v57 }
 0x5bb   : > { %10868 = vmatpush.msra.mxu0 %v16636_v38  ;;  %10976 = vmatpush.msra.mxu2 %v18134_v22  ;;  %v18136_v38 = vand.u32 4294901760, %v16702_v2  ;;  %v17024_v22 = vand.u32 4294901760, %v8956_v7 }
 0x5bc   : > { %11031 = vmatpush.msra.mxu3 %v16638_v52  ;;  %10929 = vmatpush.msra.mxu1 %v16677_v44  ;;  %v16895_v52 = vsub.f32 %v8980_v47, %v16880_v60  ;;  %v16916_v31 = vsub.f32 %v8976_v57, %v16897_v20  ;;  %v17012_v47 = vand.u32 4294901760, %v8958_v58  ;;  %v8952_v57 = vld [vmem:[#allocation5 + $0x218] sm:$0xff] }
 0x5bd   : > { %10871 = vmatpush.msra.mxu0 %v16647_v9  ;;  %10980 = vmatpush.msra.mxu2 %v18135_v16  ;;  %v8974_v9 = vld [vmem:[#allocation5 + $0x2c8] sm:$0xff] }
 0x5be   : > { %11033 = vmatpush.msra.mxu3 %v16643_v27  ;;  %10931 = vmatpush.msra.mxu1 %v16690_v25  ;;  %v16905_v27 = vsub.f32 %v8978_v1, %v16887_v46  ;;  %v16909_v43 = vand.u32 4294901760, %v8974_v9  ;;  %v17695_v1 = vand.u32 4294901760, %v16998_v54 }
 0x5bf   : > { %10874 = vmatpush.msra.mxu0 %v18131_v12  ;;  %10984 = vmatpush.msra.mxu2 %v18136_v38  ;;  %v17034_v38 = vsub.f32 %v8958_v58, %v17012_v47 }
 0x5c0   : > { %11035 = vmatpush.msra.mxu3 %v16654_v0  ;;  %10933 = vmatpush.msra.mxu1 %v16704_v33  ;;  %v17707_v0 = vand.u32 4294901760, %v16895_v52 }
 0x5c1   : > { %10877 = vmatpush.msra.mxu0 %v18133_v15  ;;  %10988 = vmatpush.msra.mxu2 %v10809_v21  ;;  %v8970_v21 = vld [vmem:[#allocation5 + $0x2a8] sm:$0xff]  ;;  %v17022_v15 = vsub.f32 %v8960_v4, %v17000_v45 }
 0x5c2   : > { %11037 = vmatpush.msra.mxu3 %v16677_v44  ;;  %10935 = vmatpush.msra.mxu1 %v16716_v13  ;;  %v16920_v44 = vand.u32 4294901760, %v8972_v39 }
 0x5c3   : > { %10880 = vmatpush.msra.mxu0 %v16682_v34  ;;  %10992 = vmatpush.msra.mxu2 %v10815_v8  ;;  %v17705_v34 = vand.u32 4294901760, %v16905_v27  ;;  %v16929_v8 = vsub.f32 %v8974_v9, %v16909_v43  ;;  %v17036_v9 = vand.u32 4294901760, %v8954_v62 }
 0x5c4   : > { %11039 = vmatpush.msra.mxu3 %v16690_v25  ;;  %10937 = vmatpush.msra.mxu1 %v16728_v30  ;;  %v16931_v25 = vand.u32 4294901760, %v8970_v21  ;;  %v16945_v36 = vsub.f32 %v8972_v39, %v16920_v44  ;;  %v8950_v39 = vld [vmem:[#allocation5 + $0x208] sm:$0xff] }
 0x5c5   : > { %10883 = vmatpush.msra.mxu0 %v16702_v2  ;;  %10996 = vmatpush.msra.mxu2 %v10821_v26  ;;  %v11103_v2 = vsub.f32 %v16895_v52, %v17707_v0  ;;  %v17703_v26 = vand.u32 4294901760, %v16916_v31 }
 0x5c6   : > { %11041 = vmatpush.msra.mxu3 %v16704_v33  ;;  %10939 = vmatpush.msra.mxu1 %v16741_v59  ;;  %v16940_v33 = vand.u32 4294901760, %v8968_v42  ;;  %v16959_v3 = vsub.f32 %v8970_v21, %v16931_v25  ;;  %v17700_v5 = vand.u32 4294901760, %v16945_v36  ;;  %v18138_v21 = vld [vmem:[#allocation49_spill] sm:$0xff] }
 0x5c7   : > { %10886 = vmatpush.msra.mxu0 %v16714_v55  ;;  %11000 = vmatpush.msra.mxu2 %v10827_v18  ;;  %v11109_v55 = vsub.f32 %v16905_v27, %v17705_v34  ;;  %v16953_v18 = vand.u32 4294901760, %v8966_v10 }
 0x5c8   : > { %11043 = vmatpush.msra.mxu3 %v16716_v13  ;;  %10941 = vmatpush.msra.mxu1 %v16754_v35  ;;  %v17702_v13 = vand.u32 4294901760, %v16929_v8  ;;  %v16968_v51 = vsub.f32 %v8968_v42, %v16940_v33  ;;  %v17699_v23 = vand.u32 4294901760, %v16959_v3  ;;  %v11151_v42 = vsub.f32 %v16998_v54, %v17695_v1 }
 0x5c9   : > { %10889 = vmatpush.msra.mxu0 %v16726_v28  ;;  %11004 = vmatpush.msra.mxu2 %v10833_v50  ;;  %v11104_v28 = vand.u32 4294901760, %v11103_v2  ;;  %v11115_v50 = vsub.f32 %v16916_v31, %v17703_v26  ;;  %v17046_v2 = vsub.f32 %v8956_v7, %v17024_v22 }
 0x5ca   : > { %11045 = vmatpush.msra.mxu3 %v16728_v30  ;;  %10943 = vmatpush.msra.mxu1 %v16767_v19  ;;  %v8962_v30 = vld [vmem:[#allocation5 + $0x268] sm:$0xff] }
 0x5cb   : > { %10892 = vmatpush.msra.mxu0 %v16739_v40  ;;  %11008 = vmatpush.msra.mxu2 %v10839_v14  ;;  %v11110_v40 = vand.u32 4294901760, %v11109_v55  ;;  %v16979_v14 = vsub.f32 %v8966_v10, %v16953_v18  ;;  %v16987_v49 = vand.u32 4294901760, %v8962_v30  ;;  %v17693_v10 = vand.u32 4294901760, %v17022_v15 }
 0x5cc   : > { %11047 = vmatpush.msra.mxu3 %v16741_v59  ;;  %10945 = vmatpush.msra.mxu1 %v16783_v29  ;;  %v11121_v59 = vsub.f32 %v16929_v8, %v17702_v13  ;;  %v17048_v55 = vand.u32 4294901760, %v8952_v57 }
 0x5cd   : > { %10895 = vmatpush.msra.mxu0 %v16752_v53  ;;  %11012 = vmatpush.msra.mxu2 %v10845_v63  ;;  %v11116_v53 = vand.u32 4294901760, %v11115_v50  ;;  %v17697_v63 = vand.u32 4294901760, %v16968_v51  ;;  %v17010_v24 = vsub.f32 %v8962_v30, %v16987_v49  ;;  %v17058_v50 = vsub.f32 %v8954_v62, %v17036_v9  ;;  %v9012_v62 = vld [vmem:[#allocation5 + $0x3f8] sm:$0xff] }
 0x5ce   : > { %11049 = vmatpush.msra.mxu3 %v16754_v35  ;;  %10949 = vmatmul.f32.vlgmr.msra.gmra.mxu1 %v18137_v37  ;;  %v11127_v35 = vsub.f32 %v16945_v36, %v17700_v5  ;;  %v17060_v30 = vand.u32 4294901760, %v8950_v39  ;;  %v11163_v4 = vsub.f32 %v17022_v15, %v17693_v10  ;;  %v17690_v37 = vand.u32 4294901760, %v17046_v2 }
 0x5cf   : > { %11105 = vmatpush.msrb.mxu1 %v11104_v28  ;;  %10898 = vmatpush.msra.mxu0 %v16765_v41  ;;  %v17696_v41 = vand.u32 4294901760, %v16979_v14  ;;  %v11139_v12 = vsub.f32 %v16968_v51, %v17697_v63  ;;  %v17694_v16 = vand.u32 4294901760, %v17010_v24  ;;  %v17691_v28 = vand.u32 4294901760, %v17034_v38 }
 0x5d0   : > { %11016 = vmatpush.msra.mxu2 %v10851_v48  ;;  %11051 = vmatpush.msra.mxu3 %v16767_v19  ;;  %v11122_v19 = vand.u32 4294901760, %v11121_v59  ;;  %v11133_v48 = vsub.f32 %v16959_v3, %v17699_v23  ;;  %v17070_v59 = vsub.f32 %v8952_v57, %v17048_v55  ;;  %v17080_v7 = vsub.f32 %v8950_v39, %v17060_v30 }
 0x5d1   : > { %11018 = vmatmul.f32.vlgmr.msra.gmra.mxu2 %v18125_v6  ;;  %11111 = vmatpush.msrb.mxu1 %v11110_v40  ;;  %v11157_v61 = vsub.f32 %v17010_v24, %v17694_v16  ;;  %v11152_v40 = vand.u32 4294901760, %v11151_v42  ;;  %v11169_v58 = vsub.f32 %v17034_v38, %v17691_v28  ;;  %v18139_v28 = vld [vmem:[#allocation48_spill] sm:$0xff]  ;;  %v8996_v16 = vld [vmem:[#allocation5 + $0x378] sm:$0xff] }
 0x5d2   : > { %11203 = vmatpush.msrb.mxu2 %v16895_v52  ;;  %10901 = vmatpush.msra.mxu0 %v16778_v11  ;;  %v11128_v11 = vand.u32 4294901760, %v11127_v35  ;;  %v17689_v35 = vand.u32 4294901760, %v17058_v50  ;;  %v17687_v57 = vand.u32 4294901760, %v17080_v7  ;;  %v17183_v5 = vand.u32 4294901760, %v8996_v16 }
 0x5d3   : > { %11053 = vmatpush.msra.mxu3 %v16783_v29  ;;  %11117 = vmatpush.msrb.mxu1 %v11116_v53  ;;  %v11145_v29 = vsub.f32 %v16979_v14, %v17696_v41  ;;  %v11158_v53 = vand.u32 4294901760, %v11157_v61  ;;  %v18142_v41 = vld [vmem:[#allocation17_spill] sm:$0xff] }
 0x5d4   : > { %11055 = vmatmul.f32.vlgmr.msra.gmra.mxu3 %v18125_v6  ;;  %11206 = vmatpush.msrb.mxu2 %v16905_v27  ;;  %v11134_v6 = vand.u32 4294901760, %v11133_v48  ;;  %v11175_v48 = vsub.f32 %v17046_v2, %v17690_v37  ;;  %v8998_v37 = vld [vmem:[#allocation5 + $0x388] sm:$0xff] }
 0x5d5   : > { %11256 = vmatpush.msrb.mxu3 %v16880_v60  ;;  %10904 = vmatpush.msra.mxu0 %v16791_v56  ;;  %v11140_v56 = vand.u32 4294901760, %v11139_v12  ;;  %v17688_v12 = vand.u32 4294901760, %v17070_v59 }
 0x5d6   : > { %11123 = vmatpush.msrb.mxu1 %v11122_v19  ;;  %11209 = vmatpush.msrb.mxu2 %v16916_v31  ;;  %v11164_v19 = vand.u32 4294901760, %v11163_v4  ;;  %v11176_v39 = vand.u32 4294901760, %v11175_v48 }
 0x5d7   : > { %11258 = vmatpush.msrb.mxu3 %v16887_v46  ;;  %10907 = vmatpush.msra.mxu0 %v16805_v17  ;;  %v11146_v17 = vand.u32 4294901760, %v11145_v29  ;;  %v11181_v29 = vsub.f32 %v17058_v50, %v17689_v35 }
 0x5d8   : > { %10910 = vmatmul.f32.vlgmr.msra.gmra.mxu0 %v18138_v21  ;;  %11129 = vmatpush.msrb.mxu1 %v11128_v11  ;;  %v11170_v11 = vand.u32 4294901760, %v11169_v58  ;;  %v11187_v21 = vsub.f32 %v17070_v59, %v17688_v12  ;;  %v9000_v12 = vld [vmem:[#allocation5 + $0x398] sm:$0xff] }
 0x5d9   : > { %11060 = vmatpush.msrb.mxu0 %v16880_v60  ;;  %11212 = vmatpush.msrb.mxu2 %v16929_v8  ;;  %v11182_v61 = vand.u32 4294901760, %v11181_v29 }
 0x5da   : > { %11260 = vmatpush.msrb.mxu3 %v16897_v20  ;;  %11135 = vmatpush.msrb.mxu1 %v11134_v6  ;;  %v9010_v6 = vld [vmem:[#allocation5 + $0x3e8] sm:$0xff]  ;;  %v11188_v58 = vand.u32 4294901760, %v11187_v21 }
 0x5db   : > { %11062 = vmatpush.msrb.mxu0 %v16887_v46  ;;  %11215 = vmatpush.msrb.mxu2 %v16945_v36  ;;  %v17106_v42 = vand.u32 4294901760, %v9010_v6 }
 0x5dc   : > { %11262 = vmatpush.msrb.mxu3 %v16909_v43  ;;  %11141 = vmatpush.msrb.mxu1 %v11140_v56  ;;  %v17098_v56 = vand.u32 4294901760, %v9012_v62 }
 0x5dd   : > { %11064 = vmatpush.msrb.mxu0 %v16897_v20  ;;  %11218 = vmatpush.msrb.mxu2 %v16959_v3  ;;  %v17123_v48 = vsub.f32 %v9010_v6, %v17106_v42 }
 0x5de   : > { %11264 = vmatpush.msrb.mxu3 %v16920_v44  ;;  %11147 = vmatpush.msrb.mxu1 %v11146_v17  ;;  %v9008_v17 = vld [vmem:[#allocation5 + $0x3d8] sm:$0xff]  ;;  %v17115_v4 = vsub.f32 %v9012_v62, %v17098_v56 }
 0x5df   : > { %11066 = vmatpush.msrb.mxu0 %v16909_v43  ;;  %11221 = vmatpush.msrb.mxu2 %v16968_v51 }
 0x5e0   : > { %11266 = vmatpush.msrb.mxu3 %v16931_v25  ;;  %11153 = vmatpush.msrb.mxu1 %v11152_v40  ;;  %v11193_v40 = vsub.f32 %v17080_v7, %v17687_v57  ;;  %v9002_v57 = vld [vmem:[#allocation5 + $0x3a8] sm:$0xff] }
 0x5e1   : > { %11068 = vmatpush.msrb.mxu0 %v16920_v44  ;;  %11224 = vmatpush.msrb.mxu2 %v16979_v14 }
 0x5e2   : > { %11268 = vmatpush.msrb.mxu3 %v16940_v33  ;;  %11159 = vmatpush.msrb.mxu1 %v11158_v53  ;;  %v9006_v53 = vld [vmem:[#allocation5 + $0x3c8] sm:$0xff]  ;;  %v11194_v62 = vand.u32 4294901760, %v11193_v40  ;;  %v17140_v40 = vand.u32 4294901760, %v9002_v57 }
 0x5e3   : > { %11070 = vmatpush.msrb.mxu0 %v16931_v25  ;;  %11227 = vmatpush.msrb.mxu2 %v16998_v54  ;;  %v17126_v29 = vand.u32 4294901760, %v9006_v53 }
 0x5e4   : > { %11270 = vmatpush.msrb.mxu3 %v16953_v18  ;;  %11165 = vmatpush.msrb.mxu1 %v11164_v19  ;;  %v17118_v19 = vand.u32 4294901760, %v9008_v17  ;;  %v17165_v10 = vsub.f32 %v9002_v57, %v17140_v40 }
 0x5e5   : > { %11072 = vmatpush.msrb.mxu0 %v16940_v33  ;;  %11230 = vmatpush.msrb.mxu2 %v17010_v24  ;;  %v17144_v35 = vsub.f32 %v9006_v53, %v17126_v29 }
 0x5e6   : > { %11272 = vmatpush.msrb.mxu3 %v16973_v32  ;;  %11171 = vmatpush.msrb.mxu1 %v11170_v11  ;;  %v9004_v11 = vld [vmem:[#allocation5 + $0x3b8] sm:$0xff]  ;;  %v17133_v6 = vsub.f32 %v9008_v17, %v17118_v19  ;;  %18141 = vst [vmem:[#allocation12_spill] sm:$0xff] %v17165_v10 }
 0x5e7   : > { %11074 = vmatpush.msrb.mxu0 %v16953_v18  ;;  %11233 = vmatpush.msrb.mxu2 %v17022_v15  ;;  %v17135_v21 = vand.u32 4294901760, %v9004_v11  ;;  %v17704_v1 = vand.u32 4294901760, %v17144_v35 }
 0x5e8   : > { %11274 = vmatpush.msrb.mxu3 %v16987_v49  ;;  %11177 = vmatpush.msrb.mxu1 %v11176_v39  ;;  %v17692_v39 = vand.u32 4294901760, %v17115_v4 }
 0x5e9   : > { %11076 = vmatpush.msrb.mxu0 %v16973_v32  ;;  %11236 = vmatpush.msrb.mxu2 %v17034_v38  ;;  %v17157_v53 = vsub.f32 %v9004_v11, %v17135_v21  ;;  %v17170_v11 = vand.u32 4294901760, %v8998_v37 }
 0x5ea   : > { %11276 = vmatpush.msrb.mxu3 %v17000_v45  ;;  %11183 = vmatpush.msrb.mxu1 %v11182_v61  ;;  %v17698_v61 = vand.u32 4294901760, %v17123_v48  ;;  %v11444_v17 = vsub.f32 %v17115_v4, %v17692_v39 }
 0x5eb   : > { %11078 = vmatpush.msrb.mxu0 %v16987_v49  ;;  %11239 = vmatpush.msrb.mxu2 %v17046_v2  ;;  %18140 = vst [vmem:[#allocation37_spill] sm:$0xff] %v17157_v53  ;;  %v17706_v23 = vand.u32 4294901760, %v17157_v53  ;;  %v17194_v13 = vsub.f32 %v8998_v37, %v17170_v11  ;;  %v17206_v37 = vsub.f32 %v8996_v16, %v17183_v5 }
 0x5ec   : > { %11278 = vmatpush.msrb.mxu3 %v17012_v47  ;;  %11189 = vmatpush.msrb.mxu1 %v11188_v58  ;;  %v17151_v58 = vand.u32 4294901760, %v9000_v12  ;;  %v11450_v39 = vsub.f32 %v17123_v48, %v17698_v61  ;;  %v8994_v61 = vld [vmem:[#allocation5 + $0x368] sm:$0xff] }
 0x5ed   : > { %11080 = vmatpush.msrb.mxu0 %v17000_v45  ;;  %11242 = vmatpush.msrb.mxu2 %v17058_v50  ;;  %v17196_v26 = vand.u32 4294901760, %v8994_v61 }
 0x5ee   : > { %11280 = vmatpush.msrb.mxu3 %v17024_v22  ;;  %11195 = vmatpush.msrb.mxu1 %v11194_v62  ;;  %v17701_v62 = vand.u32 4294901760, %v17133_v6  ;;  %v17175_v63 = vsub.f32 %v9000_v12, %v17151_v58  ;;  %v8992_v12 = vld [vmem:[#allocation5 + $0x358] sm:$0xff] }
 0x5ef   : > { %11082 = vmatpush.msrb.mxu0 %v17012_v47  ;;  %11245 = vmatpush.msrb.mxu2 %v17070_v59  ;;  %v17208_v34 = vand.u32 4294901760, %v8992_v12  ;;  %v17218_v16 = vsub.f32 %v8994_v61, %v17196_v26 }
 0x5f0   : > { %11282 = vmatpush.msrb.mxu3 %v17036_v9  ;;  %11197 = vmatmul.f32.vlgmr.msrb.gmra.mxu1 %v18139_v28  ;;  %v11456_v57 = vsub.f32 %v17133_v6, %v17701_v62  ;;  %v11462_v62 = vsub.f32 %v17144_v35, %v17704_v1  ;;  %v11468_v1 = vsub.f32 %v17157_v53, %v17706_v23  ;;  %v8984_v53 = vld [vmem:[#allocation5 + $0x318] sm:$0xff] }
 0x5f1   : > { %11364 = vmatpush.msra.mxu1 %v16880_v60  ;;  %11084 = vmatpush.msrb.mxu0 %v17024_v22  ;;  %v11445_v60 = vand.u32 4294901760, %v11444_v17  ;;  %v18143_v17 = vld [vmem:[#allocation27_spill] sm:$0xff]  ;;  %v17231_v61 = vsub.f32 %v8992_v12, %v17208_v34 }
 0x5f2   : > { %11248 = vmatpush.msrb.mxu2 %v17080_v7  ;;  %11284 = vmatpush.msrb.mxu3 %v17048_v55 }
 0x5f3   : > { %11251 = vmatmul.f32.vlgmr.msrb.gmra.mxu2 %v18142_v41  ;;  %11366 = vmatpush.msra.mxu1 %v16887_v46  ;;  %v11451_v46 = vand.u32 4294901760, %v11450_v39  ;;  %v17708_v41 = vand.u32 4294901760, %v17165_v10  ;;  %v8990_v39 = vld [vmem:[#allocation5 + $0x348] sm:$0xff] }
 0x5f4   : > { %11401 = vmatpush.msra.mxu2 %v17098_v56  ;;  %11086 = vmatpush.msrb.mxu0 %v17036_v9  ;;  %v17220_v0 = vand.u32 4294901760, %v8990_v39 }
 0x5f5   : > { %11286 = vmatpush.msrb.mxu3 %v17060_v30  ;;  %11368 = vmatpush.msra.mxu1 %v16897_v20  ;;  %v18144_v20 = vld [vmem:[#allocation34_spill] sm:$0xff] }
 0x5f6   : > { %11290 = vmatmul.f32.vlgmr.msrb.gmra.mxu3 %v18143_v17  ;;  %11403 = vmatpush.msra.mxu2 %v17106_v42  ;;  %v11457_v17 = vand.u32 4294901760, %v11456_v57  ;;  %v11463_v57 = vand.u32 4294901760, %v11462_v62  ;;  %v11491_v62 = vand.u32 4294901760, %v17206_v37  ;;  %v17244_v12 = vsub.f32 %v8990_v39, %v17220_v0 }
 0x5f7   : > { %11446 = vmatpush.msra.mxu3 %v11445_v60  ;;  %11088 = vmatpush.msrb.mxu0 %v17048_v55  ;;  %v11474_v60 = vsub.f32 %v17165_v10, %v17708_v41  ;;  %v18146_v41 = vand.u32 4294901760, %v17175_v63 }
 0x5f8   : > { %11370 = vmatpush.msra.mxu1 %v16909_v43  ;;  %11405 = vmatpush.msra.mxu2 %v17118_v19  ;;  %v8988_v43 = vld [vmem:[#allocation5 + $0x338] sm:$0xff] }
 0x5f9   : > { %11452 = vmatpush.msra.mxu3 %v11451_v46  ;;  %11090 = vmatpush.msrb.mxu0 %v17060_v30  ;;  %v18145_v46 = vand.u32 4294901760, %v16895_v52  ;;  %v11480_v10 = vsub.f32 %v17175_v63, %v18146_v41  ;;  %v17233_v23 = vand.u32 4294901760, %v8988_v43  ;;  %v18147_v52 = vand.u32 4294901760, %v16905_v27 }
 0x5fa   : > { %11096 = vmatmul.f32.vlgmr.msrb.gmra.mxu0 %v18144_v20  ;;  %11372 = vmatpush.msra.mxu1 %v16920_v44  ;;  %v8986_v20 = vld [vmem:[#allocation5 + $0x328] sm:$0xff]  ;;  %v11469_v44 = vand.u32 4294901760, %v11468_v1  ;;  %v11497_v41 = vand.u32 4294901760, %v17218_v16  ;;  %v18149_v27 = vand.u32 4294901760, %v16916_v31  ;;  %v18150_v31 = vand.u32 4294901760, %v16929_v8 }
 0x5fb   : > { %11297 = vmatpush.msra.mxu0 %v18145_v46  ;;  %11407 = vmatpush.msra.mxu2 %v17126_v29  ;;  %v11475_v46 = vand.u32 4294901760, %v11474_v60  ;;  %v11481_v60 = vand.u32 4294901760, %v11480_v10  ;;  %v17257_v39 = vsub.f32 %v8988_v43, %v17233_v23 }
 0x5fc   : > { %11458 = vmatpush.msra.mxu3 %v11457_v17  ;;  %11374 = vmatpush.msra.mxu1 %v16931_v25  ;;  %v18148_v25 = vand.u32 4294901760, %v17194_v13  ;;  %v17246_v17 = vand.u32 4294901760, %v8986_v20  ;;  %v11498_v10 = vsub.f32 %v17218_v16, %v11497_v41 }
 0x5fd   : > { %11301 = vmatpush.msra.mxu0 %v18147_v52  ;;  %11409 = vmatpush.msra.mxu2 %v17135_v21  ;;  %v17259_v52 = vand.u32 4294901760, %v8984_v53 }
 0x5fe   : > { %11464 = vmatpush.msra.mxu3 %v11463_v57  ;;  %11376 = vmatpush.msra.mxu1 %v16940_v33  ;;  %v11486_v1 = vsub.f32 %v17194_v13, %v18148_v25  ;;  %v11492_v33 = vsub.f32 %v17206_v37, %v11491_v62  ;;  %v11503_v57 = vand.u32 4294901760, %v17231_v61  ;;  %v8982_v25 = vld [vmem:[#allocation5 + $0x308] sm:$0xff]  ;;  %v17270_v43 = vsub.f32 %v8986_v20, %v17246_v17 }
 0x5ff   : > { %11305 = vmatpush.msra.mxu0 %v18149_v27  ;;  %11411 = vmatpush.msra.mxu2 %v17140_v40  ;;  %v18151_v27 = vand.u32 4294901760, %v16945_v36  ;;  %v17275_v8 = vand.u32 4294901760, %v8982_v25  ;;  %v17283_v20 = vsub.f32 %v8984_v53, %v17259_v52  ;;  %v18152_v36 = vand.u32 4294901760, %v16959_v3 }
 0x600   : > { %11470 = vmatpush.msra.mxu3 %v11469_v44  ;;  %11378 = vmatpush.msra.mxu1 %v16953_v18  ;;  %v11487_v18 = vand.u32 4294901760, %v11486_v1  ;;  %v11509_v44 = vand.u32 4294901760, %v17244_v12  ;;  %v11515_v1 = vand.u32 4294901760, %v17257_v39 }
 0x601   : > { %11309 = vmatpush.msra.mxu0 %v18150_v31  ;;  %11413 = vmatpush.msra.mxu2 %v17151_v58  ;;  %v18153_v31 = vand.u32 4294901760, %v16968_v51  ;;  %v17297_v3 = vsub.f32 %v8982_v25, %v17275_v8  ;;  %v18155_v25 = vand.u32 4294901760, %v16998_v54 }
 0x602   : > { %11476 = vmatpush.msra.mxu3 %v11475_v46  ;;  %11380 = vmatpush.msra.mxu1 %v16973_v32  ;;  %v11493_v32 = vand.u32 4294901760, %v11492_v33  ;;  %v11504_v46 = vsub.f32 %v17231_v61, %v11503_v57  ;;  %v11521_v33 = vand.u32 4294901760, %v17270_v43 }
 0x603   : > { %11313 = vmatpush.msra.mxu0 %v18151_v27  ;;  %11415 = vmatpush.msra.mxu2 %v17170_v11  ;;  %v11533_v27 = vand.u32 4294901760, %v17297_v3 }
 0x604   : > { %11482 = vmatpush.msra.mxu3 %v11481_v60  ;;  %11382 = vmatpush.msra.mxu1 %v16987_v49  ;;  %v11499_v60 = vand.u32 4294901760, %v11498_v10  ;;  %v11510_v49 = vsub.f32 %v17244_v12, %v11509_v44  ;;  %v11505_v53 = vand.u32 4294901760, %v11504_v46  ;;  %v18154_v10 = vand.u32 4294901760, %v16979_v14 }
 0x605   : > { %11317 = vmatpush.msra.mxu0 %v18152_v36  ;;  %11417 = vmatpush.msra.mxu2 %v17183_v5  ;;  %v18157_v46 = vand.u32 4294901760, %v17022_v15  ;;  %v18158_v36 = vand.u32 4294901760, %v17034_v38  ;;  %v18159_v15 = vand.u32 4294901760, %v17046_v2  ;;  %v18161_v38 = vand.u32 4294901760, %v17115_v4 }
 0x606   : > { %11488 = vmatpush.msra.mxu3 %v11487_v18  ;;  %11384 = vmatpush.msra.mxu1 %v17000_v45  ;;  %v11516_v45 = vsub.f32 %v17257_v39, %v11515_v1  ;;  %v11527_v18 = vand.u32 4294901760, %v17283_v20  ;;  %v11511_v51 = vand.u32 4294901760, %v11510_v49  ;;  %v18163_v49 = vld [vmem:[#allocation50_spill] sm:$0xff]  ;;  %v18164_v2 = vand.u32 4294901760, %v17123_v48 }
 0x607   : > { %11321 = vmatpush.msra.mxu0 %v18153_v31  ;;  %11419 = vmatpush.msra.mxu2 %v17196_v26  ;;  %v18165_v31 = vand.u32 4294901760, %v17070_v59  ;;  %v18169_v59 = vld [vmem:[#allocation37_spill] sm:$0xff] }
 0x608   : > { %11494 = vmatpush.msra.mxu3 %v11493_v32  ;;  %11386 = vmatpush.msra.mxu1 %v17012_v47  ;;  %v11522_v47 = vsub.f32 %v17270_v43, %v11521_v33  ;;  %v11517_v14 = vand.u32 4294901760, %v11516_v45  ;;  %v18156_v32 = vand.u32 4294901760, %v17010_v24 }
 0x609   : > { %11325 = vmatpush.msra.mxu0 %v18154_v10  ;;  %11421 = vmatpush.msra.mxu2 %v17208_v34 }
 0x60a   : > { %11500 = vmatpush.msra.mxu3 %v11499_v60  ;;  %11388 = vmatpush.msra.mxu1 %v17024_v22  ;;  %v11528_v22 = vsub.f32 %v17283_v20, %v11527_v18  ;;  %v11523_v54 = vand.u32 4294901760, %v11522_v47  ;;  %v18160_v60 = vld [vmem:[#allocation31_spill] sm:$0xff] }
 0x60b   : > { %11329 = vmatpush.msra.mxu0 %v18155_v25  ;;  %11423 = vmatpush.msra.mxu2 %v17220_v0 }
 0x60c   : > { %11506 = vmatpush.msra.mxu3 %v11505_v53  ;;  %11390 = vmatpush.msra.mxu1 %v17036_v9  ;;  %v11534_v9 = vsub.f32 %v17297_v3, %v11533_v27  ;;  %v11529_v24 = vand.u32 4294901760, %v11528_v22  ;;  %v18166_v53 = vand.u32 4294901760, %v17133_v6 }
 0x60d   : > { %11333 = vmatpush.msra.mxu0 %v18156_v32  ;;  %11425 = vmatpush.msra.mxu2 %v17233_v23 }
 0x60e   : > { %11512 = vmatpush.msra.mxu3 %v11511_v51  ;;  %11392 = vmatpush.msra.mxu1 %v17048_v55  ;;  %v11535_v55 = vand.u32 4294901760, %v11534_v9 }
 0x60f   : > { %11337 = vmatpush.msra.mxu0 %v18157_v46  ;;  %11427 = vmatpush.msra.mxu2 %v17246_v17 }
 0x610   : > { %11518 = vmatpush.msra.mxu3 %v11517_v14  ;;  %11394 = vmatpush.msra.mxu1 %v17060_v30  ;;  %v18162_v30 = vand.u32 4294901760, %v17058_v50  ;;  %v18167_v50 = vand.u32 4294901760, %v17080_v7 }
 0x611   : > { %11341 = vmatpush.msra.mxu0 %v18158_v36  ;;  %11429 = vmatpush.msra.mxu2 %v17259_v52 }
 0x612   : > { %11524 = vmatpush.msra.mxu3 %v11523_v54  ;;  %11396 = vmatmul.f32.vlgmr.msra.gmra.mxu1 %v18139_v28 }
 0x613   : > { %11597 = vmatpush.msrb.mxu1 %v17098_v56  ;;  %11345 = vmatpush.msra.mxu0 %v18159_v15 }
 0x614   : > { %11431 = vmatpush.msra.mxu2 %v17275_v8  ;;  %11530 = vmatpush.msra.mxu3 %v11529_v24 }
 0x615   : > { %11437 = vmatmul.f32.vlgmr.msra.gmra.mxu2 %v18160_v60  ;;  %11599 = vmatpush.msrb.mxu1 %v17106_v42 }
 0x616   : > { %11638 = vmatpush.msrb.mxu2 %v18161_v38  ;;  %11349 = vmatpush.msra.mxu0 %v18162_v30 }
 0x617   : > { %11536 = vmatpush.msra.mxu3 %v11535_v55  ;;  %11601 = vmatpush.msrb.mxu1 %v17118_v19 }
 0x618   : > { %11538 = vmatmul.f32.vlgmr.msra.gmra.mxu3 %v18163_v49  ;;  %11642 = vmatpush.msrb.mxu2 %v18164_v2 }
 0x619   : > { %11705 = vmatpush.msrb.mxu3 %v17098_v56  ;;  %11353 = vmatpush.msra.mxu0 %v18165_v31  ;;  %v18168_v56 = vand.u32 4294901760, %v17144_v35 }
 0x61a   : > { %11603 = vmatpush.msrb.mxu1 %v17126_v29  ;;  %11646 = vmatpush.msrb.mxu2 %v18166_v53 }
 0x61b   : > { %11707 = vmatpush.msrb.mxu3 %v17106_v42  ;;  %11357 = vmatpush.msra.mxu0 %v18167_v50  ;;  %v18170_v42 = vand.u32 4294901760, %v18169_v59 }
 0x61c   : > { %11359 = vmatmul.f32.vlgmr.msra.gmra.mxu0 %v18139_v28  ;;  %11605 = vmatpush.msrb.mxu1 %v17135_v21  ;;  %v18171_v28 = vld [vmem:[#allocation12_spill] sm:$0xff] }
 0x61d   : > { %11544 = vmatpush.msrb.mxu0 %v17115_v4  ;;  %11650 = vmatpush.msrb.mxu2 %v18168_v56  ;;  %v18172_v7 = vand.u32 4294901760, %v18171_v28  ;;  %v18173_v4 = vand.u32 4294901760, %v17175_v63 }
 0x61e   : > { %11709 = vmatpush.msrb.mxu3 %v17118_v19  ;;  %11607 = vmatpush.msrb.mxu1 %v17140_v40  ;;  %v18174_v19 = vand.u32 4294901760, %v17194_v13 }
 0x61f   : > { %11547 = vmatpush.msrb.mxu0 %v17123_v48  ;;  %11654 = vmatpush.msrb.mxu2 %v18170_v42 }
 0x620   : > { %11711 = vmatpush.msrb.mxu3 %v17126_v29  ;;  %11609 = vmatpush.msrb.mxu1 %v17151_v58 }
 0x621   : > { %11550 = vmatpush.msrb.mxu0 %v17133_v6  ;;  %11658 = vmatpush.msrb.mxu2 %v18172_v7 }
 0x622   : > { %11713 = vmatpush.msrb.mxu3 %v17135_v21  ;;  %11611 = vmatpush.msrb.mxu1 %v17170_v11 }
 0x623   : > { %11553 = vmatpush.msrb.mxu0 %v17144_v35  ;;  %11662 = vmatpush.msrb.mxu2 %v18173_v4 }
 0x624   : > { %11715 = vmatpush.msrb.mxu3 %v17140_v40  ;;  %11613 = vmatpush.msrb.mxu1 %v17183_v5 }
 0x625   : > { %11556 = vmatpush.msrb.mxu0 %v18169_v59  ;;  %11666 = vmatpush.msrb.mxu2 %v18174_v19 }
 0x626   : > { %11717 = vmatpush.msrb.mxu3 %v17151_v58  ;;  %11615 = vmatpush.msrb.mxu1 %v17196_v26 }
 0x627   : > { %11559 = vmatpush.msrb.mxu0 %v18171_v28  ;;  %11670 = vmatpush.msrb.mxu2 %v11491_v62 }
 0x628   : > { %11719 = vmatpush.msrb.mxu3 %v17170_v11  ;;  %11617 = vmatpush.msrb.mxu1 %v17208_v34 }
 0x629   : > { %11562 = vmatpush.msrb.mxu0 %v17175_v63  ;;  %11674 = vmatpush.msrb.mxu2 %v11497_v41 }
 0x62a   : > { %11721 = vmatpush.msrb.mxu3 %v17183_v5  ;;  %11619 = vmatpush.msrb.mxu1 %v17220_v0  ;;  %v9206_v5 = vpop.f32.mrf.mxu2 }
 0x62b   : > { %11565 = vmatpush.msrb.mxu0 %v17194_v13  ;;  %11678 = vmatpush.msrb.mxu2 %v11503_v57  ;;  %v9152_v13 = vpop.f32.mrf.mxu1 }
 0x62c   : > { %11723 = vmatpush.msrb.mxu3 %v17196_v26  ;;  %11621 = vmatpush.msrb.mxu1 %v17233_v23  ;;  %v9051_v26 = vpop.f32.mrf.mxu0 }
 0x62d   : > { %11568 = vmatpush.msrb.mxu0 %v17206_v37  ;;  %11682 = vmatpush.msrb.mxu2 %v11509_v44  ;;  %v9153_v44 = vadd.f32 %v9152_v13, %v9051_v26 }
 0x62e   : > { %11725 = vmatpush.msrb.mxu3 %v17208_v34  ;;  %11623 = vmatpush.msrb.mxu1 %v17246_v17  ;;  %v18175_v34 = vld [vmem:[#allocation30_spill] sm:$0xff] }
 0x62f   : > { %11571 = vmatpush.msrb.mxu0 %v17218_v16  ;;  %11686 = vmatpush.msrb.mxu2 %v11515_v1 }
 0x630   : > { %11727 = vmatpush.msrb.mxu3 %v17220_v0  ;;  %11625 = vmatpush.msrb.mxu1 %v17259_v52  ;;  %v18176_v0 = vld [vmem:[#allocation16_spill] sm:$0xff] }
 0x631   : > { %11574 = vmatpush.msrb.mxu0 %v17231_v61  ;;  %11690 = vmatpush.msrb.mxu2 %v11521_v33 }
 0x632   : > { %11729 = vmatpush.msrb.mxu3 %v17233_v23  ;;  %11627 = vmatpush.msrb.mxu1 %v17275_v8  ;;  %v9245_v23 = vpop.f32.mrf.mxu3  ;;  %v9392_v48 = vpop.f32.mrf.mxu2 }
 0x633   : > { %11577 = vmatpush.msrb.mxu0 %v17244_v12  ;;  %11694 = vmatpush.msrb.mxu2 %v11527_v18  ;;  %v9351_v35 = vpop.f32.mrf.mxu1 }
 0x634   : > { %11731 = vmatpush.msrb.mxu3 %v17246_v17  ;;  %11631 = vmatmul.f32.vlgmr.msrb.gmra.mxu1 %v18175_v34  ;;  %v9314_v63 = vpop.f32.mrf.mxu0 }
 0x635   : > { %11580 = vmatpush.msrb.mxu0 %v17257_v39  ;;  %11698 = vmatpush.msrb.mxu2 %v11533_v27 }
 0x636   : > { %11733 = vmatpush.msrb.mxu3 %v17259_v52  ;;  %11700 = vmatmul.f32.vlgmr.msrb.gmra.mxu2 %v18163_v49 }
 0x637   : > { %11583 = vmatpush.msrb.mxu0 %v17270_v43 }
 0x638   : > { %11735 = vmatpush.msrb.mxu3 %v17275_v8 }
 0x639   : > { %11737 = vmatmul.f32.vlgmr.msrb.gmra.mxu3 %v18163_v49  ;;  %11586 = vmatpush.msrb.mxu0 %v17283_v20  ;;  %v9207_v20 = vadd.f32 %v9206_v5, %v9153_v44 }
 0x63a   : > { %v9493_v6 = vpop.f32.mrf.mxu3  ;;  %v9655_v40 = vpop.f32.mrf.mxu2 }
 0x63b   : > { %11589 = vmatpush.msrb.mxu0 %v17297_v3  ;;  %v9586_v21 = vpop.f32.mrf.mxu1  ;;  %v9246_v45 = vadd.f32 %v9245_v23, %v9207_v20 }
 0x63c   : > { %11592 = vmatmul.f32.vlgmr.msrb.gmra.mxu0 %v18176_v0  ;;  %v9547_v29 = vpop.f32.mrf.mxu0 }
 0x63d   : > { %v9315_v10 = vadd.f32 %v9314_v63, %v9246_v45 }
 0x63f   : > { %v9352_v27 = vadd.f32 %v9351_v35, %v9315_v10 }
 0x641   : > { %v9393_v22 = vadd.f32 %v9392_v48, %v9352_v27 }
 0x642   : > { %v9692_v11 = vpop.f32.mrf.mxu3  ;;  %v9888_v16 = vpop.f32.mrf.mxu2 }
 0x643   : > { %v9834_v37 = vpop.f32.mrf.mxu1  ;;  %v9494_v46 = vadd.f32 %v9493_v6, %v9393_v22 }
 0x644   : > { %v9733_v58 = vpop.f32.mrf.mxu0 }
 0x645   : > { %v9548_v24 = vadd.f32 %v9547_v29, %v9494_v46 }
 0x647   : > { %v9587_v60 = vadd.f32 %v9586_v21, %v9548_v24 }
 0x649   : > { %v9656_v49 = vadd.f32 %v9655_v40, %v9587_v60 }
 0x64a   : > { %v9927_v61 = vpop.f32.mrf.mxu3  ;;  %v10074_v12 = vpop.f32.mrf.mxu2 }
 0x64b   : > { %v10033_v41 = vpop.f32.mrf.mxu1  ;;  %v9693_v53 = vadd.f32 %v9692_v11, %v9656_v49 }
 0x64c   : > { %v9996_v62 = vpop.f32.mrf.mxu0 }
 0x64d   : > { %v9734_v56 = vadd.f32 %v9733_v58, %v9693_v53 }
 0x64f   : > { %v9835_v7 = vadd.f32 %v9834_v37, %v9734_v56 }
 0x651   : > { %v9889_v34 = vadd.f32 %v9888_v16, %v9835_v7 }
 0x652   : > { %v10175_v57 = vpop.f32.mrf.mxu3  ;;  %v17430_v52 = vpop.f32.mrf.mxu2 }
 0x653   : > { %v10268_v39 = vpop.f32.mrf.mxu1  ;;  %v9928_v13 = vadd.f32 %v9927_v61, %v9889_v34 }
 0x654   : > { %v10229_v17 = vpop.f32.mrf.mxu0 }
 0x655   : > { %v9997_v23 = vadd.f32 %v9996_v62, %v9928_v13 }
 0x657   : > { %v10034_v29 = vadd.f32 %v10033_v41, %v9997_v23 }
 0x659   : > { %v10075_v40 = vadd.f32 %v10074_v12, %v10034_v29 }
 0x65a   : > { %v17432_v8 = vpop.f32.mrf.mxu3  ;;  %v10570_v3 = vpop.f32.mrf.mxu2 }
 0x65b   : > { %v10516_v1 = vpop.f32.mrf.mxu1  ;;  %v10176_v37 = vadd.f32 %v10175_v57, %v10075_v40 }
 0x65c   : > { %v10415_v43 = vpop.f32.mrf.mxu0 }
 0x65d   : > { %v10517_v33 = vadd.f32 %v10516_v1, %v10415_v43  ;;  %v10230_v43 = vadd.f32 %v10229_v17, %v10176_v37 }
 0x65f   : > { %v10571_v18 = vadd.f32 %v10570_v3, %v10517_v33  ;;  %v10269_v20 = vadd.f32 %v10268_v39, %v10230_v43 }
 0x661   : > { %v10338_v45 = vadd.f32 %v17430_v52, %v10269_v20 }
 0x662   : > { %v10609_v51 = vpop.f32.mrf.mxu3  ;;  %v10756_v9 = vpop.f32.mrf.mxu2 }
 0x663   : > { %v10610_v25 = vadd.f32 %v10609_v51, %v10571_v18  ;;  %v10715_v32 = vpop.f32.mrf.mxu1  ;;  %v10375_v17 = vadd.f32 %v17432_v8, %v10338_v45 }
 0x664   : > { %v10678_v47 = vpop.f32.mrf.mxu0 }
 0x665   : > { %v10679_v14 = vadd.f32 %v10678_v47, %v10610_v25  ;;  %v11741_v51 = vmul.f32 0.00390625, %v10375_v17 }
 0x667   : > { %v10716_v54 = vadd.f32 %v10715_v32, %v10679_v14 }
 0x669   : > { %v10757_v36 = vadd.f32 %v10756_v9, %v10716_v54 }
 0x66a   : > { %v10857_v15 = vpop.f32.mrf.mxu3  ;;  %v11019_v50 = vpop.f32.mrf.mxu2 }
 0x66b   : > { %v10858_v38 = vadd.f32 %v10857_v15, %v10757_v36  ;;  %v10950_v2 = vpop.f32.mrf.mxu1 }
 0x66c   : > { %v10911_v55 = vpop.f32.mrf.mxu0 }
 0x66d   : > { %v10912_v30 = vadd.f32 %v10911_v55, %v10858_v38 }
 0x66f   : > { %v10951_v31 = vadd.f32 %v10950_v2, %v10912_v30 }
 0x671   : > { %v11020_v59 = vadd.f32 %v11019_v50, %v10951_v31 }
 0x672   : > { %v11056_v42 = vpop.f32.mrf.mxu3 }
 0x673   : > { %v11057_v4 = vadd.f32 %v11056_v42, %v11020_v59  ;;  %v11198_v0 = vpop.f32.mrf.mxu1 }
 0x676   : > { %v11252_v5 = vpop.f32.mrf.mxu2 }
 0x677   : > { %v11097_v28 = vpop.f32.mrf.mxu0 }
 0x678   : > { %v11098_v19 = vadd.f32 %v11097_v28, %v11057_v4 }
 0x67a   : > { %v11199_v26 = vadd.f32 %v11198_v0, %v11098_v19  ;;  %v11291_v35 = vpop.f32.mrf.mxu3 }
 0x67c   : > { %v11253_v63 = vadd.f32 %v11252_v5, %v11199_v26 }
 0x67e   : > { %v11292_v6 = vadd.f32 %v11291_v35, %v11253_v63 }
 0x68f   : > { %v11397_v58 = vpop.f32.mrf.mxu1 }
 0x698   : > { %v11438_v44 = vpop.f32.mrf.mxu2 }
 0x699   : > { %v11360_v48 = vpop.f32.mrf.mxu0 }
 0x69a   : > { %v11361_v21 = vadd.f32 %v11360_v48, %v11292_v6 }
 0x69b   : > { %v11539_v1 = vpop.f32.mrf.mxu3 }
 0x69c   : > { %v11398_v11 = vadd.f32 %v11397_v58, %v11361_v21 }
 0x69e   : > { %v11439_v16 = vadd.f32 %v11438_v44, %v11398_v11 }
 0x6a0   : > { %v11540_v61 = vadd.f32 %v11539_v1, %v11439_v16 }
 0x6b1   : > { %v11632_v3 = vpop.f32.mrf.mxu1 }
 0x6b9   : > { %v11593_v33 = vpop.f32.mrf.mxu0  ;;  %v11701_v12 = vpop.f32.mrf.mxu2 }
 0x6ba   : > { %v11594_v62 = vadd.f32 %v11593_v33, %v11540_v61 }
 0x6bc   : > { %v11633_v41 = vadd.f32 %v11632_v3, %v11594_v62  ;;  %v11738_v10 = vpop.f32.mrf.mxu3 }
 0x6be   : > { %v11702_v18 = vadd.f32 %v11701_v12, %v11633_v41 }
 0x6c0   : > { %v11739_v57 = vadd.f32 %v11738_v10, %v11702_v18 }
 0x6c2   : > { %v11742_v39 = vmul.f32 0.00390625, %v11739_v57 }
 0x6c4   : > { %v11745_v52 = vrot.slane %v11742_v39, 4 }
 0x6c6   : > { %v11746_v47 = vsel %vm3270_vm2, %v11741_v51, %v11745_v52 }
 0x6c7   : > { %11748 = vst [vmem:[%s322_s14] sm:$0xff] %v11746_v47 }
 0x6c8   : > { %12119 = shalt.err (!%p12116_p8)
}
 0x6c9   : > { %11921 = dma.vmem_to_hbm [thread:$0]  (%p12258_p5), %s11767_s15, 128, %s11769_s17, %s11750_s28  }
 0x6ca PF: > { %p11943_p9 = scmp.ge.s32.totalorder %s12162_s27, 2  ;;  %s11783_s1 = sand.u32 1, %s12150_s24  }
 0x6cb   : > { %s11784_s22 = scalar_lea.sflag [#allocation4], %s11783_s1 }
 0x6cc   : > { %p11934_p10 = pnand %p11943_p9, %p12262_p6 }
 0x6ce   : > { %p11935_p11 = pneg %p11934_p10 }
 0x6d0   : > { %12145 = dma.done.wait (%p11935_p11), %s11784_s22, 128  }
 0x6d1   : > { %12147 = vsyncadd (%p11935_p11), %s11784_s22, 4294967168  ;;  %p20_p12 = scmp.ge.s32.totalorder %s12245_s30, 4   ;;  %s18177_s24 = smov %s12154_s25 }
 0x6d2   : > { %s18178_s25 = smov %s12158_s26  ;;  %s18179_s26 = smov %s12256_s10 }
 0x6d3   : > { %s18180_s27 = smov %s12245_s30  ;;  %22 = sbr.rel (!%p20_p12) target bundleno = 8 (0x8), region = 112 }
 0x6d8   :  { %11796 = vsyncpa [#allocation3], 1 }
 0x6d9   :  { %11798 = vsyncpa [#allocation3 + $0x1], 1 }
 0x6da   :  { %11799 = vsyncpa [#allocation6], 1 }
 0x6db   :  { %11800 = vsyncpa [#allocation4], 1 }
 0x6dc   :  { %11802 = vsyncpa [#allocation4 + $0x1], 1 }

</bundles_post_ra>
